<compile_context>
chip_gen: v5e
topology: v5e:2x2
jax: 0.10.0
libtpu: 0.0.40
codegen_flags: <defaults>
</compile_context>

<pallas_src>
import functools

import jax
import jax.numpy as jnp
from jax.experimental import pallas as pl
from jax.experimental.pallas import tpu as pltpu


def _round_up(x, m):
    return (x + m - 1) // m * m


# ------------------------------ Pallas kernel ------------------------------ #

def _fused_conv_kernel(x_hbm, m_hbm, w_ref, b_ref, sc_ref, sh_ref, *rest,
                       tm, rh, offsets, apply_bn, add_residual, with_stats):
    """Fused [BN+CELU] -> Conv3d(k=3,p=1) -> [dup-cat + residual] -> mask."""
    if with_stats:
        y_ref, ps_ref, pq_ref, xwin, mwin, sem = rest
    else:
        y_ref, xwin, mwin, sem = rest

    i = pl.program_id(0)
    width = tm + 2 * rh
    start = pl.multiple_of((i + 1) * tm - rh, 128)

    # Manual windowed DMA: output tile [lead + i*tm, +tm) plus a +-rh halo.
    cx = pltpu.make_async_copy(x_hbm.at[:, pl.ds(start, width)], xwin, sem.at[0])
    cm = pltpu.make_async_copy(m_hbm.at[:, pl.ds(start, width)], mwin, sem.at[1])
    cx.start()
    cm.start()
    cx.wait()
    cm.wait()

    raw = xwin[...]                        # (Cin, width), f32
    msk = mwin[...] > 0.0                  # (1, width), True on real voxels

    if apply_bn:
        act = raw * sc_ref[...] + sh_ref[...]                       # BN affine
        act = jnp.where(act > 0.0, act,
                        jnp.exp(jnp.minimum(act, 0.0)) - 1.0)       # CELU(a=1)
    else:
        act = raw
    # Conv must see exact zeros at padded / halo voxels.
    act = jnp.where(msk, act, 0.0)

    # Fold the 27 taps into one contraction: cols = (27*Cin, TM).
    cols = jnp.concatenate(
        [act[:, rh + off: rh + off + tm] for off in offsets], axis=0)
    out = jnp.dot(w_ref[...], cols,
                  preferred_element_type=jnp.float32) + b_ref[...]  # (Crows,TM)

    if add_residual:
        # torch.cat((y, y), dim=1) is already folded into the duplicated
        # weight rows; only the residual add remains.
        out = out + raw[:, rh: rh + tm]

    out = jnp.where(msk[:, rh: rh + tm], out, 0.0)   # keep padded voxels at 0
    y_ref[...] = out

    if with_stats:
        # Per-tile per-channel partials for the next block's BatchNorm.
        ps_ref[...] = jnp.broadcast_to(
            jnp.sum(out, axis=1, keepdims=True), ps_ref.shape)
        pq_ref[...] = jnp.broadcast_to(
            jnp.sum(out * out, axis=1, keepdims=True), pq_ref.shape)


# ------------------------------ kernel wrapper ------------------------------ #

def _fused_conv(x_buf, mask_buf, w2d, b2d, scale, shift, geo, *,
                apply_bn, add_residual, with_stats):
    cin = x_buf.shape[0]
    c_rows = w2d.shape[0]
    tm, rh, mtot, nt = geo["tm"], geo["rh"], geo["mtot"], geo["num_tiles"]
    width = tm + 2 * rh
    if add_residual:
        assert c_rows == cin

    kernel = functools.partial(
        _fused_conv_kernel, tm=tm, rh=rh, offsets=geo["offsets"],
        apply_bn=apply_bn, add_residual=add_residual, with_stats=with_stats)

    out_shape = [jax.ShapeDtypeStruct((c_rows, mtot), jnp.float32)]
    out_specs = [pl.BlockSpec((c_rows, tm), lambda i: (0, i + 1))]
    if with_stats:
        out_shape += [jax.ShapeDtypeStruct((nt * c_rows, 128), jnp.float32)] * 2
        out_specs += [pl.BlockSpec((c_rows, 128), lambda i: (i, 0))] * 2

    return pl.pallas_call(
        kernel,
        out_shape=tuple(out_shape),
        grid_spec=pltpu.PrefetchScalarGridSpec(
            num_scalar_prefetch=0,
            grid=(nt,),
            in_specs=[
                pl.BlockSpec(memory_space=pl.ANY),               # activations
                pl.BlockSpec(memory_space=pl.ANY),               # valid mask
                pl.BlockSpec((c_rows, w2d.shape[1]), lambda i: (0, 0)),
                pl.BlockSpec((c_rows, 1), lambda i: (0, 0)),
                pl.BlockSpec((cin, 1), lambda i: (0, 0)),
                pl.BlockSpec((cin, 1), lambda i: (0, 0)),
            ],
            out_specs=tuple(out_specs),
            scratch_shapes=[
                pltpu.VMEM((cin, width), jnp.float32),           # x window
                pltpu.VMEM((1, width), jnp.float32),             # mask window
                pltpu.SemaphoreType.DMA((2,)),
            ],
        ),
        compiler_params=pltpu.CompilerParams(
            dimension_semantics=("parallel",),
            vmem_limit_bytes=32 * 1024 * 1024),
    )(x_buf, mask_buf, w2d, b2d, scale, shift)


# -------------------------------- JAX glue ---------------------------------- #

def _geometry(N, D, H, W, tm_min=512):
    Dp, Hp, Wp = D + 2, H + 2, W + 2
    reach = Hp * Wp + Wp + 1                    # max |flat shift| of a tap
    rh = _round_up(reach, 128)                  # halo width (lane-aligned)
    tm = _round_up(max(tm_min, rh), 128)        # tile width (lanes)
    mp = N * Dp * Hp * Wp                       # flat padded volume
    mp_r = _round_up(mp, tm)
    num_tiles = mp_r // tm
    mtot = mp_r + 2 * tm                        # lead tile + core + trail tile
    offsets = [(kd - 1) * Hp * Wp + (kh - 1) * Wp + (kw - 1)
               for kd in range(3) for kh in range(3) for kw in range(3)]
    return dict(N=N, D=D, H=H, W=W, Dp=Dp, Hp=Hp, Wp=Wp, mp=mp, tm=tm, rh=rh,
                mtot=mtot, num_tiles=num_tiles, offsets=offsets)


def _pack_input(x_ncdhw, geo):
    xpad = jnp.pad(x_ncdhw[:, 0].astype(jnp.float32),
                   ((0, 0), (1, 1), (1, 1), (1, 1)))
    buf = jnp.zeros((1, geo["mtot"]), jnp.float32)
    return buf.at[0, geo["tm"]: geo["tm"] + geo["mp"]].set(xpad.reshape(-1))


def _make_mask(geo):
    m = jnp.zeros((geo["N"], geo["Dp"], geo["Hp"], geo["Wp"]), jnp.float32)
    m = m.at[:, 1:1 + geo["D"], 1:1 + geo["H"], 1:1 + geo["W"]].set(1.0)
    buf = jnp.zeros((1, geo["mtot"]), jnp.float32)
    return buf.at[0, geo["tm"]: geo["tm"] + geo["mp"]].set(m.reshape(-1))


def _unpack_output(y_row, geo):
    core = y_row[geo["tm"]: geo["tm"] + geo["mp"]]
    vol = core.reshape(geo["N"], geo["Dp"], geo["Hp"], geo["Wp"])
    return vol[:, 1:1 + geo["D"], 1:1 + geo["H"], 1:1 + geo["W"]][:, None]


def _bn_affine(psum, psq, gamma, beta, geo, c):
    nt = geo["num_tiles"]
    count = geo["N"] * geo["D"] * geo["H"] * geo["W"]
    s = psum.reshape(nt, c, 128)[:, :, 0].sum(axis=0)
    ss = psq.reshape(nt, c, 128)[:, :, 0].sum(axis=0)
    mean = s / count
    # TODO(synk): one-pass E[x^2]-E[x]^2 variance (PyTorch uses a numerically
    # safer two-pass reduction); negligible difference at these scales.
    var = jnp.maximum(ss / count - mean * mean, 0.0)
    invstd = jax.lax.rsqrt(var + 1e-5)
    scale = gamma * invstd
    shift = beta - mean * scale
    return scale.reshape(c, 1), shift.reshape(c, 1)


def dcsrn_forward(x_ncdhw, params):
    N, _, D, H, W = x_ncdhw.shape
    geo = _geometry(N, D, H, W)
    x_buf = _pack_input(x_ncdhw, geo)
    mask = _make_mask(geo)

    c2 = params["bn_gamma"].shape[0]             # 2 * n_chans
    ones1 = jnp.ones((1, 1), jnp.float32)
    zeros1 = jnp.zeros((1, 1), jnp.float32)
    ones2 = jnp.ones((c2, 1), jnp.float32)
    zeros2 = jnp.zeros((c2, 1), jnp.float32)

    # initial_block: Conv3d(1 -> 2n); emits batch stats for the first BN.
    x_in, ps, pq = _fused_conv(x_buf, mask, params["init_w"], params["init_b"],
                               ones1, zeros1, geo,
                               apply_bn=False, add_residual=False,
                               with_stats=True)

    # 4x shared DCSRNSubblock + channel-duplicate cat + residual (all fused).
    for _ in range(4):
        scale, shift = _bn_affine(ps, pq, params["bn_gamma"],
                                  params["bn_beta"], geo, c2)
        x_in, ps, pq = _fused_conv(x_in, mask, params["inter_w"],
                                   params["inter_b"], scale, shift, geo,
                                   apply_bn=True, add_residual=True,
                                   with_stats=True)

    # final_block: Conv3d(2n -> 1)  (weights zero-padded to 8 output rows).
    (y,) = _fused_conv(x_in, mask, params["final_w"], params["final_b"],
                       ones2, zeros2, geo,
                       apply_bn=False, add_residual=False, with_stats=False)
    return _unpack_output(y[0], geo)


# ------------------------------ parameter setup ----------------------------- #

def _flatten_conv(w, b, duplicate=False, pad_rows_to=None):
    """(Cout,Cin,3,3,3),(Cout,) -> (Crows, 27*Cin),(Crows,1), tap-major cols."""
    cout, cin = w.shape[:2]
    w2 = jnp.transpose(w, (0, 2, 3, 4, 1)).reshape(cout, 27 * cin)
    b2 = b.reshape(cout, 1)
    if duplicate:                       # folds torch.cat((y, y), dim=1)
        w2 = jnp.concatenate([w2, w2], axis=0)
        b2 = jnp.concatenate([b2, b2], axis=0)
    if pad_rows_to is not None and w2.shape[0] < pad_rows_to:
        padn = pad_rows_to - w2.shape[0]
        w2 = jnp.concatenate([w2, jnp.zeros((padn, w2.shape[1]), w2.dtype)], 0)
        b2 = jnp.concatenate([b2, jnp.zeros((padn, 1), b2.dtype)], 0)
    return w2, b2


def init_params(key, n_chans):
    assert (2 * n_chans) % 8 == 0, "stats tiling assumes 2*n_chans % 8 == 0"

    def conv_init(k, cout, cin):
        kw, kb = jax.random.split(k)
        bound = 1.0 / jnp.sqrt(float(cin * 27))
        w = jax.random.uniform(kw, (cout, cin, 3, 3, 3), jnp.float32,
                               -bound, bound)
        b = jax.random.uniform(kb, (cout,), jnp.float32, -bound, bound)
        return w, b

    k1, k2, k3 = jax.random.split(key, 3)
    w_i, b_i = conv_init(k1, 2 * n_chans, 1)
    w_m, b_m = conv_init(k2, n_chans, 2 * n_chans)
    w_f, b_f = conv_init(k3, 1, 2 * n_chans)

    iw, ib = _flatten_conv(w_i, b_i)                      # (2n, 27)
    mw, mb = _flatten_conv(w_m, b_m, duplicate=True)      # (2n, 27*2n)
    fw, fb = _flatten_conv(w_f, b_f, pad_rows_to=8)       # (8, 27*2n)

    return {
        "init_w": iw, "init_b": ib,
        "inter_w": mw, "inter_b": mb,
        "final_w": fw, "final_b": fb,
        "bn_gamma": jnp.ones((2 * n_chans,), jnp.float32),   # PyTorch defaults
        "bn_beta": jnp.zeros((2 * n_chans,), jnp.float32),
    }


# ----------------------------------- main ----------------------------------- #

if __name__ == "__main__":
    n_chans = 4
    N, D, H, W = 2, 8, 8, 8

    key = jax.random.PRNGKey(0)
    kx, kp = jax.random.split(key)
    x = jax.random.normal(kx, (N, 1, D, H, W), jnp.float32)   # NCDHW, 1 channel
    params = init_params(kp, n_chans)

    fwd = jax.jit(dcsrn_forward)
    out = jax.block_until_ready(fwd(x, params))

    assert out.shape == (N, 1, D, H, W), out.shape
    assert bool(jnp.all(jnp.isfinite(out)))
    print("KERNEL_OK")
</pallas_src>

<mosaic_0001>
module attributes {stable_mosaic.version = 11 : i64} {
  func.func @_fused_conv_kernel(%arg0: i32, %arg1: memref<1x3072xf32, #tpu.memory_space<any>>, %arg2: memref<1x3072xf32, #tpu.memory_space<any>>, %arg3: memref<8x27xf32, #tpu.memory_space<vmem>>, %arg4: memref<8x1xf32, #tpu.memory_space<vmem>>, %arg5: memref<1x1xf32, #tpu.memory_space<vmem>>, %arg6: memref<1x1xf32, #tpu.memory_space<vmem>>, %arg7: memref<8x512xf32, #tpu.memory_space<vmem>>, %arg8: memref<8x128xf32, #tpu.memory_space<vmem>>, %arg9: memref<8x128xf32, #tpu.memory_space<vmem>>, %arg10: memref<1x768xf32, #tpu.memory_space<vmem>>, %arg11: memref<1x768xf32, #tpu.memory_space<vmem>>, %arg12: memref<2x!tpu.dma_semaphore, #tpu.memory_space<semaphore_mem>>) attributes {dimension_semantics = [#tpu.dimension_semantics<parallel>], iteration_bounds = array<i64: 4>, scalar_prefetch = 0 : i64, scratch_operands = 3 : i64, tpu.core_type = #tpu.core_type<tc>, window_params = [{}, {}, {pipeline_mode = #tpu.pipeline_mode<synchronous>, transform_indices = @transform_2, window_bounds = array<i64: 8, 27>}, {pipeline_mode = #tpu.pipeline_mode<synchronous>, transform_indices = @transform_3, window_bounds = array<i64: 8, 1>}, {pipeline_mode = #tpu.pipeline_mode<synchronous>, transform_indices = @transform_4, window_bounds = array<i64: 1, 1>}, {pipeline_mode = #tpu.pipeline_mode<synchronous>, transform_indices = @transform_5, window_bounds = array<i64: 1, 1>}, {transform_indices = @transform_6, window_bounds = array<i64: 8, 512>}, {transform_indices = @transform_7, window_bounds = array<i64: 8, 128>}, {transform_indices = @transform_8, window_bounds = array<i64: 8, 128>}]} {
    %c1_i32 = arith.constant 1 : i32
    %0 = arith.addi %arg0, %c1_i32 : i32
    %c512_i32 = arith.constant 512 : i32
    %1 = arith.muli %0, %c512_i32 : i32
    %c128_i32 = arith.constant 128 : i32
    %2 = arith.subi %1, %c128_i32 : i32
    %3 = tpu.assume_multiple %2, 128 : i32
    %c0_i32 = arith.constant 0 : i32
    %c0_i32_0 = arith.constant 0 : i32
    %4 = tpu.memref_slice %arg1[%c0_i32_0, %3] : memref<1x3072xf32, #tpu.memory_space<any>> -> memref<1x768xf32, #tpu.memory_space<any>>
    %5 = tpu.memref_slice %arg12[%c0_i32] : memref<2x!tpu.dma_semaphore, #tpu.memory_space<semaphore_mem>> -> memref<1x!tpu.dma_semaphore, #tpu.memory_space<semaphore_mem>>
    %6 = tpu.memref_squeeze %5 : memref<1x!tpu.dma_semaphore, #tpu.memory_space<semaphore_mem>> -> memref<!tpu.dma_semaphore, #tpu.memory_space<semaphore_mem>>
    tpu.enqueue_dma source(%4 : memref<1x768xf32, #tpu.memory_space<any>>) target(%arg10 : memref<1x768xf32, #tpu.memory_space<vmem>>) target_semaphore(%6 : memref<!tpu.dma_semaphore, #tpu.memory_space<semaphore_mem>>)
    %c1_i32_1 = arith.constant 1 : i32
    %c0_i32_2 = arith.constant 0 : i32
    %7 = tpu.memref_slice %arg2[%c0_i32_2, %3] : memref<1x3072xf32, #tpu.memory_space<any>> -> memref<1x768xf32, #tpu.memory_space<any>>
    %8 = tpu.memref_slice %arg12[%c1_i32_1] : memref<2x!tpu.dma_semaphore, #tpu.memory_space<semaphore_mem>> -> memref<1x!tpu.dma_semaphore, #tpu.memory_space<semaphore_mem>>
    %9 = tpu.memref_squeeze %8 : memref<1x!tpu.dma_semaphore, #tpu.memory_space<semaphore_mem>> -> memref<!tpu.dma_semaphore, #tpu.memory_space<semaphore_mem>>
    tpu.enqueue_dma source(%7 : memref<1x768xf32, #tpu.memory_space<any>>) target(%arg11 : memref<1x768xf32, #tpu.memory_space<vmem>>) target_semaphore(%9 : memref<!tpu.dma_semaphore, #tpu.memory_space<semaphore_mem>>)
    %c0_i32_3 = arith.constant 0 : i32
    %c0_i32_4 = arith.constant 0 : i32
    %10 = tpu.memref_slice %arg1[%c0_i32_4, %3] : memref<1x3072xf32, #tpu.memory_space<any>> -> memref<1x768xf32, #tpu.memory_space<any>>
    %11 = tpu.memref_slice %arg12[%c0_i32_3] : memref<2x!tpu.dma_semaphore, #tpu.memory_space<semaphore_mem>> -> memref<1x!tpu.dma_semaphore, #tpu.memory_space<semaphore_mem>>
    %12 = tpu.memref_squeeze %11 : memref<1x!tpu.dma_semaphore, #tpu.memory_space<semaphore_mem>> -> memref<!tpu.dma_semaphore, #tpu.memory_space<semaphore_mem>>
    tpu.wait_dma2 semaphore(%12 : memref<!tpu.dma_semaphore, #tpu.memory_space<semaphore_mem>>) src(%10 : memref<1x768xf32, #tpu.memory_space<any>>) dst(%arg10 : memref<1x768xf32, #tpu.memory_space<vmem>>)
    %c1_i32_5 = arith.constant 1 : i32
    %c0_i32_6 = arith.constant 0 : i32
    %13 = tpu.memref_slice %arg2[%c0_i32_6, %3] : memref<1x3072xf32, #tpu.memory_space<any>> -> memref<1x768xf32, #tpu.memory_space<any>>
    %14 = tpu.memref_slice %arg12[%c1_i32_5] : memref<2x!tpu.dma_semaphore, #tpu.memory_space<semaphore_mem>> -> memref<1x!tpu.dma_semaphore, #tpu.memory_space<semaphore_mem>>
    %15 = tpu.memref_squeeze %14 : memref<1x!tpu.dma_semaphore, #tpu.memory_space<semaphore_mem>> -> memref<!tpu.dma_semaphore, #tpu.memory_space<semaphore_mem>>
    tpu.wait_dma2 semaphore(%15 : memref<!tpu.dma_semaphore, #tpu.memory_space<semaphore_mem>>) src(%13 : memref<1x768xf32, #tpu.memory_space<any>>) dst(%arg11 : memref<1x768xf32, #tpu.memory_space<vmem>>)
    %c0 = arith.constant 0 : index
    %c0_7 = arith.constant 0 : index
    %16 = vector.load %arg10[%c0, %c0_7] : memref<1x768xf32, #tpu.memory_space<vmem>>, vector<1x768xf32>
    %c0_8 = arith.constant 0 : index
    %c0_9 = arith.constant 0 : index
    %17 = vector.load %arg11[%c0_8, %c0_9] : memref<1x768xf32, #tpu.memory_space<vmem>>, vector<1x768xf32>
    %cst = arith.constant 0.000000e+00 : f32
    %18 = vector.broadcast %cst : f32 to vector<1x768xf32>
    %19 = arith.cmpf ogt, %17, %18 : vector<1x768xf32>
    %cst_10 = arith.constant 0.000000e+00 : f32
    %20 = vector.broadcast %cst_10 : f32 to vector<1x768xf32>
    %21 = arith.select %19, %16, %20 : vector<1x768xi1>, vector<1x768xf32>
    %22 = vector.extract_strided_slice %21 {offsets = [0, 17], sizes = [1, 512], strides = [1, 1]} : vector<1x768xf32> to vector<1x512xf32>
    %23 = vector.extract_strided_slice %21 {offsets = [0, 18], sizes = [1, 512], strides = [1, 1]} : vector<1x768xf32> to vector<1x512xf32>
    %24 = vector.extract_strided_slice %21 {offsets = [0, 19], sizes = [1, 512], strides = [1, 1]} : vector<1x768xf32> to vector<1x512xf32>
    %25 = vector.extract_strided_slice %21 {offsets = [0, 27], sizes = [1, 512], strides = [1, 1]} : vector<1x768xf32> to vector<1x512xf32>
    %26 = vector.extract_strided_slice %21 {offsets = [0, 28], sizes = [1, 512], strides = [1, 1]} : vector<1x768xf32> to vector<1x512xf32>
    %27 = vector.extract_strided_slice %21 {offsets = [0, 29], sizes = [1, 512], strides = [1, 1]} : vector<1x768xf32> to vector<1x512xf32>
    %28 = vector.extract_strided_slice %21 {offsets = [0, 37], sizes = [1, 512], strides = [1, 1]} : vector<1x768xf32> to vector<1x512xf32>
    %29 = vector.extract_strided_slice %21 {offsets = [0, 38], sizes = [1, 512], strides = [1, 1]} : vector<1x768xf32> to vector<1x512xf32>
    %30 = vector.extract_strided_slice %21 {offsets = [0, 39], sizes = [1, 512], strides = [1, 1]} : vector<1x768xf32> to vector<1x512xf32>
    %31 = vector.extract_strided_slice %21 {offsets = [0, 117], sizes = [1, 512], strides = [1, 1]} : vector<1x768xf32> to vector<1x512xf32>
    %32 = vector.extract_strided_slice %21 {offsets = [0, 118], sizes = [1, 512], strides = [1, 1]} : vector<1x768xf32> to vector<1x512xf32>
    %33 = vector.extract_strided_slice %21 {offsets = [0, 119], sizes = [1, 512], strides = [1, 1]} : vector<1x768xf32> to vector<1x512xf32>
    %34 = vector.extract_strided_slice %21 {offsets = [0, 127], sizes = [1, 512], strides = [1, 1]} : vector<1x768xf32> to vector<1x512xf32>
    %35 = vector.extract_strided_slice %21 {offsets = [0, 128], sizes = [1, 512], strides = [1, 1]} : vector<1x768xf32> to vector<1x512xf32>
    %36 = vector.extract_strided_slice %21 {offsets = [0, 129], sizes = [1, 512], strides = [1, 1]} : vector<1x768xf32> to vector<1x512xf32>
    %37 = vector.extract_strided_slice %21 {offsets = [0, 137], sizes = [1, 512], strides = [1, 1]} : vector<1x768xf32> to vector<1x512xf32>
    %38 = vector.extract_strided_slice %21 {offsets = [0, 138], sizes = [1, 512], strides = [1, 1]} : vector<1x768xf32> to vector<1x512xf32>
    %39 = vector.extract_strided_slice %21 {offsets = [0, 139], sizes = [1, 512], strides = [1, 1]} : vector<1x768xf32> to vector<1x512xf32>
    %40 = vector.extract_strided_slice %21 {offsets = [0, 217], sizes = [1, 512], strides = [1, 1]} : vector<1x768xf32> to vector<1x512xf32>
    %41 = vector.extract_strided_slice %21 {offsets = [0, 218], sizes = [1, 512], strides = [1, 1]} : vector<1x768xf32> to vector<1x512xf32>
    %42 = vector.extract_strided_slice %21 {offsets = [0, 219], sizes = [1, 512], strides = [1, 1]} : vector<1x768xf32> to vector<1x512xf32>
    %43 = vector.extract_strided_slice %21 {offsets = [0, 227], sizes = [1, 512], strides = [1, 1]} : vector<1x768xf32> to vector<1x512xf32>
    %44 = vector.extract_strided_slice %21 {offsets = [0, 228], sizes = [1, 512], strides = [1, 1]} : vector<1x768xf32> to vector<1x512xf32>
    %45 = vector.extract_strided_slice %21 {offsets = [0, 229], sizes = [1, 512], strides = [1, 1]} : vector<1x768xf32> to vector<1x512xf32>
    %46 = vector.extract_strided_slice %21 {offsets = [0, 237], sizes = [1, 512], strides = [1, 1]} : vector<1x768xf32> to vector<1x512xf32>
    %47 = vector.extract_strided_slice %21 {offsets = [0, 238], sizes = [1, 512], strides = [1, 1]} : vector<1x768xf32> to vector<1x512xf32>
    %48 = vector.extract_strided_slice %21 {offsets = [0, 239], sizes = [1, 512], strides = [1, 1]} : vector<1x768xf32> to vector<1x512xf32>
    %49 = tpu.concatenate %22, %23, %24, %25, %26, %27, %28, %29, %30, %31, %32, %33, %34, %35, %36, %37 in 0 : vector<1x512xf32>, vector<1x512xf32>, vector<1x512xf32>, vector<1x512xf32>, vector<1x512xf32>, vector<1x512xf32>, vector<1x512xf32>, vector<1x512xf32>, vector<1x512xf32>, vector<1x512xf32>, vector<1x512xf32>, vector<1x512xf32>, vector<1x512xf32>, vector<1x512xf32>, vector<1x512xf32>, vector<1x512xf32> -> vector<16x512xf32>
    %50 = tpu.concatenate %38, %39, %40, %41, %42, %43, %44, %45, %46, %47, %48 in 0 : vector<1x512xf32>, vector<1x512xf32>, vector<1x512xf32>, vector<1x512xf32>, vector<1x512xf32>, vector<1x512xf32>, vector<1x512xf32>, vector<1x512xf32>, vector<1x512xf32>, vector<1x512xf32>, vector<1x512xf32> -> vector<11x512xf32>
    %51 = tpu.concatenate %49, %50 in 0 : vector<16x512xf32>, vector<11x512xf32> -> vector<27x512xf32>
    %c0_11 = arith.constant 0 : index
    %c0_12 = arith.constant 0 : index
    %52 = vector.load %arg3[%c0_11, %c0_12] : memref<8x27xf32, #tpu.memory_space<vmem>>, vector<8x27xf32>
    %cst_13 = arith.constant dense<0.000000e+00> : vector<8x512xf32>
    %53 = tpu.matmul %52, %51, %cst_13 {dimension_numbers = #tpu.dot_dimension_numbers<[1], [0], [0], [1], [0, 0, 1, 1], [], []>} : vector<8x27xf32>, vector<27x512xf32>, vector<8x512xf32> -> vector<8x512xf32>
    %c0_14 = arith.constant 0 : index
    %c0_15 = arith.constant 0 : index
    %54 = vector.load %arg4[%c0_14, %c0_15] : memref<8x1xf32, #tpu.memory_space<vmem>>, vector<8x1xf32>
    %55 = vector.broadcast %54 : vector<8x1xf32> to vector<8x512xf32>
    %56 = arith.addf %53, %55 : vector<8x512xf32>
    %57 = vector.extract_strided_slice %19 {offsets = [0, 128], sizes = [1, 512], strides = [1, 1]} : vector<1x768xi1> to vector<1x512xi1>
    %cst_16 = arith.constant 0.000000e+00 : f32
    %58 = vector.shape_cast %57 : vector<1x512xi1> to vector<1x512xi1>
    %59 = vector.broadcast %58 : vector<1x512xi1> to vector<8x512xi1>
    %60 = vector.broadcast %cst_16 : f32 to vector<8x512xf32>
    %61 = arith.select %59, %56, %60 : vector<8x512xi1>, vector<8x512xf32>
    %c0_17 = arith.constant 0 : index
    %c0_18 = arith.constant 0 : index
    %62 = vector.load %arg7[%c0_17, %c0_18] : memref<8x512xf32, #tpu.memory_space<vmem>>, vector<8x512xf32>
    tpu.vector_store %arg7[%c0_17, %c0_18], %61 {strides = array<i32>} : memref<8x512xf32, #tpu.memory_space<vmem>>, vector<8x512xf32>,
    %cst_19 = arith.constant dense<0.000000e+00> : vector<8xf32>
    %63 = vector.multi_reduction <add>, %61, %cst_19 [1] : vector<8x512xf32> to vector<8xf32>
    %64 = vector.shape_cast %63 : vector<8xf32> to vector<8x1xf32>
    %65 = vector.shape_cast %64 : vector<8x1xf32> to vector<8x1xf32>
    %66 = vector.broadcast %65 : vector<8x1xf32> to vector<8x128xf32>
    %c0_20 = arith.constant 0 : index
    %c0_21 = arith.constant 0 : index
    %67 = vector.load %arg8[%c0_20, %c0_21] : memref<8x128xf32, #tpu.memory_space<vmem>>, vector<8x128xf32>
    tpu.vector_store %arg8[%c0_20, %c0_21], %66 {strides = array<i32>} : memref<8x128xf32, #tpu.memory_space<vmem>>, vector<8x128xf32>,
    %68 = arith.mulf %61, %61 : vector<8x512xf32>
    %cst_22 = arith.constant dense<0.000000e+00> : vector<8xf32>
    %69 = vector.multi_reduction <add>, %68, %cst_22 [1] : vector<8x512xf32> to vector<8xf32>
    %70 = vector.shape_cast %69 : vector<8xf32> to vector<8x1xf32>
    %71 = vector.shape_cast %70 : vector<8x1xf32> to vector<8x1xf32>
    %72 = vector.broadcast %71 : vector<8x1xf32> to vector<8x128xf32>
    %c0_23 = arith.constant 0 : index
    %c0_24 = arith.constant 0 : index
    %73 = vector.load %arg9[%c0_23, %c0_24] : memref<8x128xf32, #tpu.memory_space<vmem>>, vector<8x128xf32>
    tpu.vector_store %arg9[%c0_23, %c0_24], %72 {strides = array<i32>} : memref<8x128xf32, #tpu.memory_space<vmem>>, vector<8x128xf32>,
    return
  }
  func.func @transform_2(%arg0: i32) -> (i32, i32) {
    %c0_i32 = arith.constant 0 : i32
    %c0_i32_0 = arith.constant 0 : i32
    %c0_i32_1 = arith.constant 0 : i32
    return %c0_i32, %c0_i32_0 : i32, i32
  }
  func.func @transform_3(%arg0: i32) -> (i32, i32) {
    %c0_i32 = arith.constant 0 : i32
    %c0_i32_0 = arith.constant 0 : i32
    %c0_i32_1 = arith.constant 0 : i32
    return %c0_i32, %c0_i32_0 : i32, i32
  }
  func.func @transform_4(%arg0: i32) -> (i32, i32) {
    %c0_i32 = arith.constant 0 : i32
    %c0_i32_0 = arith.constant 0 : i32
    %c0_i32_1 = arith.constant 0 : i32
    return %c0_i32, %c0_i32_0 : i32, i32
  }
  func.func @transform_5(%arg0: i32) -> (i32, i32) {
    %c0_i32 = arith.constant 0 : i32
    %c0_i32_0 = arith.constant 0 : i32
    %c0_i32_1 = arith.constant 0 : i32
    return %c0_i32, %c0_i32_0 : i32, i32
  }
  func.func @transform_6(%arg0: i32) -> (i32, i32) {
    %c1_i32 = arith.constant 1 : i32
    %0 = arith.addi %arg0, %c1_i32 : i32
    %c0_i32 = arith.constant 0 : i32
    %c0_i32_0 = arith.constant 0 : i32
    return %c0_i32, %0 : i32, i32
  }
  func.func @transform_7(%arg0: i32) -> (i32, i32) {
    %c0_i32 = arith.constant 0 : i32
    %c0_i32_0 = arith.constant 0 : i32
    return %arg0, %c0_i32 : i32, i32
  }
  func.func @transform_8(%arg0: i32) -> (i32, i32) {
    %c0_i32 = arith.constant 0 : i32
    %c0_i32_0 = arith.constant 0 : i32
    return %arg0, %c0_i32 : i32, i32
  }
}

module attributes {stable_mosaic.version = 11 : i64} {
  func.func @_fused_conv_kernel(%arg0: i32, %arg1: memref<8x3072xf32, #tpu.memory_space<any>>, %arg2: memref<1x3072xf32, #tpu.memory_space<any>>, %arg3: memref<8x216xf32, #tpu.memory_space<vmem>>, %arg4: memref<8x1xf32, #tpu.memory_space<vmem>>, %arg5: memref<8x1xf32, #tpu.memory_space<vmem>>, %arg6: memref<8x1xf32, #tpu.memory_space<vmem>>, %arg7: memref<8x512xf32, #tpu.memory_space<vmem>>, %arg8: memref<8x128xf32, #tpu.memory_space<vmem>>, %arg9: memref<8x128xf32, #tpu.memory_space<vmem>>, %arg10: memref<8x768xf32, #tpu.memory_space<vmem>>, %arg11: memref<1x768xf32, #tpu.memory_space<vmem>>, %arg12: memref<2x!tpu.dma_semaphore, #tpu.memory_space<semaphore_mem>>) attributes {dimension_semantics = [#tpu.dimension_semantics<parallel>], iteration_bounds = array<i64: 4>, scalar_prefetch = 0 : i64, scratch_operands = 3 : i64, tpu.core_type = #tpu.core_type<tc>, window_params = [{}, {}, {pipeline_mode = #tpu.pipeline_mode<synchronous>, transform_indices = @transform_2, window_bounds = array<i64: 8, 216>}, {pipeline_mode = #tpu.pipeline_mode<synchronous>, transform_indices = @transform_3, window_bounds = array<i64: 8, 1>}, {pipeline_mode = #tpu.pipeline_mode<synchronous>, transform_indices = @transform_4, window_bounds = array<i64: 8, 1>}, {pipeline_mode = #tpu.pipeline_mode<synchronous>, transform_indices = @transform_5, window_bounds = array<i64: 8, 1>}, {transform_indices = @transform_6, window_bounds = array<i64: 8, 512>}, {transform_indices = @transform_7, window_bounds = array<i64: 8, 128>}, {transform_indices = @transform_8, window_bounds = array<i64: 8, 128>}]} {
    %c1_i32 = arith.constant 1 : i32
    %0 = arith.addi %arg0, %c1_i32 : i32
    %c512_i32 = arith.constant 512 : i32
    %1 = arith.muli %0, %c512_i32 : i32
    %c128_i32 = arith.constant 128 : i32
    %2 = arith.subi %1, %c128_i32 : i32
    %3 = tpu.assume_multiple %2, 128 : i32
    %c0_i32 = arith.constant 0 : i32
    %c0_i32_0 = arith.constant 0 : i32
    %4 = tpu.memref_slice %arg1[%c0_i32_0, %3] : memref<8x3072xf32, #tpu.memory_space<any>> -> memref<8x768xf32, #tpu.memory_space<any>>
    %5 = tpu.memref_slice %arg12[%c0_i32] : memref<2x!tpu.dma_semaphore, #tpu.memory_space<semaphore_mem>> -> memref<1x!tpu.dma_semaphore, #tpu.memory_space<semaphore_mem>>
    %6 = tpu.memref_squeeze %5 : memref<1x!tpu.dma_semaphore, #tpu.memory_space<semaphore_mem>> -> memref<!tpu.dma_semaphore, #tpu.memory_space<semaphore_mem>>
    tpu.enqueue_dma source(%4 : memref<8x768xf32, #tpu.memory_space<any>>) target(%arg10 : memref<8x768xf32, #tpu.memory_space<vmem>>) target_semaphore(%6 : memref<!tpu.dma_semaphore, #tpu.memory_space<semaphore_mem>>)
    %c1_i32_1 = arith.constant 1 : i32
    %c0_i32_2 = arith.constant 0 : i32
    %7 = tpu.memref_slice %arg2[%c0_i32_2, %3] : memref<1x3072xf32, #tpu.memory_space<any>> -> memref<1x768xf32, #tpu.memory_space<any>>
    %8 = tpu.memref_slice %arg12[%c1_i32_1] : memref<2x!tpu.dma_semaphore, #tpu.memory_space<semaphore_mem>> -> memref<1x!tpu.dma_semaphore, #tpu.memory_space<semaphore_mem>>
    %9 = tpu.memref_squeeze %8 : memref<1x!tpu.dma_semaphore, #tpu.memory_space<semaphore_mem>> -> memref<!tpu.dma_semaphore, #tpu.memory_space<semaphore_mem>>
    tpu.enqueue_dma source(%7 : memref<1x768xf32, #tpu.memory_space<any>>) target(%arg11 : memref<1x768xf32, #tpu.memory_space<vmem>>) target_semaphore(%9 : memref<!tpu.dma_semaphore, #tpu.memory_space<semaphore_mem>>)
    %c0_i32_3 = arith.constant 0 : i32
    %c0_i32_4 = arith.constant 0 : i32
    %10 = tpu.memref_slice %arg1[%c0_i32_4, %3] : memref<8x3072xf32, #tpu.memory_space<any>> -> memref<8x768xf32, #tpu.memory_space<any>>
    %11 = tpu.memref_slice %arg12[%c0_i32_3] : memref<2x!tpu.dma_semaphore, #tpu.memory_space<semaphore_mem>> -> memref<1x!tpu.dma_semaphore, #tpu.memory_space<semaphore_mem>>
    %12 = tpu.memref_squeeze %11 : memref<1x!tpu.dma_semaphore, #tpu.memory_space<semaphore_mem>> -> memref<!tpu.dma_semaphore, #tpu.memory_space<semaphore_mem>>
    tpu.wait_dma2 semaphore(%12 : memref<!tpu.dma_semaphore, #tpu.memory_space<semaphore_mem>>) src(%10 : memref<8x768xf32, #tpu.memory_space<any>>) dst(%arg10 : memref<8x768xf32, #tpu.memory_space<vmem>>)
    %c1_i32_5 = arith.constant 1 : i32
    %c0_i32_6 = arith.constant 0 : i32
    %13 = tpu.memref_slice %arg2[%c0_i32_6, %3] : memref<1x3072xf32, #tpu.memory_space<any>> -> memref<1x768xf32, #tpu.memory_space<any>>
    %14 = tpu.memref_slice %arg12[%c1_i32_5] : memref<2x!tpu.dma_semaphore, #tpu.memory_space<semaphore_mem>> -> memref<1x!tpu.dma_semaphore, #tpu.memory_space<semaphore_mem>>
    %15 = tpu.memref_squeeze %14 : memref<1x!tpu.dma_semaphore, #tpu.memory_space<semaphore_mem>> -> memref<!tpu.dma_semaphore, #tpu.memory_space<semaphore_mem>>
    tpu.wait_dma2 semaphore(%15 : memref<!tpu.dma_semaphore, #tpu.memory_space<semaphore_mem>>) src(%13 : memref<1x768xf32, #tpu.memory_space<any>>) dst(%arg11 : memref<1x768xf32, #tpu.memory_space<vmem>>)
    %c0 = arith.constant 0 : index
    %c0_7 = arith.constant 0 : index
    %16 = vector.load %arg10[%c0, %c0_7] : memref<8x768xf32, #tpu.memory_space<vmem>>, vector<8x768xf32>
    %c0_8 = arith.constant 0 : index
    %c0_9 = arith.constant 0 : index
    %17 = vector.load %arg11[%c0_8, %c0_9] : memref<1x768xf32, #tpu.memory_space<vmem>>, vector<1x768xf32>
    %cst = arith.constant 0.000000e+00 : f32
    %18 = vector.broadcast %cst : f32 to vector<1x768xf32>
    %19 = arith.cmpf ogt, %17, %18 : vector<1x768xf32>
    %c0_10 = arith.constant 0 : index
    %c0_11 = arith.constant 0 : index
    %20 = vector.load %arg5[%c0_10, %c0_11] : memref<8x1xf32, #tpu.memory_space<vmem>>, vector<8x1xf32>
    %21 = vector.broadcast %20 : vector<8x1xf32> to vector<8x768xf32>
    %22 = arith.mulf %16, %21 : vector<8x768xf32>
    %c0_12 = arith.constant 0 : index
    %c0_13 = arith.constant 0 : index
    %23 = vector.load %arg6[%c0_12, %c0_13] : memref<8x1xf32, #tpu.memory_space<vmem>>, vector<8x1xf32>
    %24 = vector.broadcast %23 : vector<8x1xf32> to vector<8x768xf32>
    %25 = arith.addf %22, %24 : vector<8x768xf32>
    %cst_14 = arith.constant 0.000000e+00 : f32
    %26 = vector.broadcast %cst_14 : f32 to vector<8x768xf32>
    %27 = arith.cmpf ogt, %25, %26 : vector<8x768xf32>
    %cst_15 = arith.constant 0.000000e+00 : f32
    %28 = vector.broadcast %cst_15 : f32 to vector<8x768xf32>
    %29 = arith.minimumf %25, %28 : vector<8x768xf32>
    %30 = math.exp %29 : vector<8x768xf32>
    %cst_16 = arith.constant 1.000000e+00 : f32
    %31 = vector.broadcast %cst_16 : f32 to vector<8x768xf32>
    %32 = arith.subf %30, %31 : vector<8x768xf32>
    %33 = arith.select %27, %25, %32 : vector<8x768xi1>, vector<8x768xf32>
    %cst_17 = arith.constant 0.000000e+00 : f32
    %34 = vector.shape_cast %19 : vector<1x768xi1> to vector<1x768xi1>
    %35 = vector.broadcast %34 : vector<1x768xi1> to vector<8x768xi1>
    %36 = vector.broadcast %cst_17 : f32 to vector<8x768xf32>
    %37 = arith.select %35, %33, %36 : vector<8x768xi1>, vector<8x768xf32>
    %38 = vector.extract_strided_slice %37 {offsets = [0, 17], sizes = [8, 512], strides = [1, 1]} : vector<8x768xf32> to vector<8x512xf32>
    %39 = vector.extract_strided_slice %37 {offsets = [0, 18], sizes = [8, 512], strides = [1, 1]} : vector<8x768xf32> to vector<8x512xf32>
    %40 = vector.extract_strided_slice %37 {offsets = [0, 19], sizes = [8, 512], strides = [1, 1]} : vector<8x768xf32> to vector<8x512xf32>
    %41 = vector.extract_strided_slice %37 {offsets = [0, 27], sizes = [8, 512], strides = [1, 1]} : vector<8x768xf32> to vector<8x512xf32>
    %42 = vector.extract_strided_slice %37 {offsets = [0, 28], sizes = [8, 512], strides = [1, 1]} : vector<8x768xf32> to vector<8x512xf32>
    %43 = vector.extract_strided_slice %37 {offsets = [0, 29], sizes = [8, 512], strides = [1, 1]} : vector<8x768xf32> to vector<8x512xf32>
    %44 = vector.extract_strided_slice %37 {offsets = [0, 37], sizes = [8, 512], strides = [1, 1]} : vector<8x768xf32> to vector<8x512xf32>
    %45 = vector.extract_strided_slice %37 {offsets = [0, 38], sizes = [8, 512], strides = [1, 1]} : vector<8x768xf32> to vector<8x512xf32>
    %46 = vector.extract_strided_slice %37 {offsets = [0, 39], sizes = [8, 512], strides = [1, 1]} : vector<8x768xf32> to vector<8x512xf32>
    %47 = vector.extract_strided_slice %37 {offsets = [0, 117], sizes = [8, 512], strides = [1, 1]} : vector<8x768xf32> to vector<8x512xf32>
    %48 = vector.extract_strided_slice %37 {offsets = [0, 118], sizes = [8, 512], strides = [1, 1]} : vector<8x768xf32> to vector<8x512xf32>
    %49 = vector.extract_strided_slice %37 {offsets = [0, 119], sizes = [8, 512], strides = [1, 1]} : vector<8x768xf32> to vector<8x512xf32>
    %50 = vector.extract_strided_slice %37 {offsets = [0, 127], sizes = [8, 512], strides = [1, 1]} : vector<8x768xf32> to vector<8x512xf32>
    %51 = vector.extract_strided_slice %37 {offsets = [0, 128], sizes = [8, 512], strides = [1, 1]} : vector<8x768xf32> to vector<8x512xf32>
    %52 = vector.extract_strided_slice %37 {offsets = [0, 129], sizes = [8, 512], strides = [1, 1]} : vector<8x768xf32> to vector<8x512xf32>
    %53 = vector.extract_strided_slice %37 {offsets = [0, 137], sizes = [8, 512], strides = [1, 1]} : vector<8x768xf32> to vector<8x512xf32>
    %54 = vector.extract_strided_slice %37 {offsets = [0, 138], sizes = [8, 512], strides = [1, 1]} : vector<8x768xf32> to vector<8x512xf32>
    %55 = vector.extract_strided_slice %37 {offsets = [0, 139], sizes = [8, 512], strides = [1, 1]} : vector<8x768xf32> to vector<8x512xf32>
    %56 = vector.extract_strided_slice %37 {offsets = [0, 217], sizes = [8, 512], strides = [1, 1]} : vector<8x768xf32> to vector<8x512xf32>
    %57 = vector.extract_strided_slice %37 {offsets = [0, 218], sizes = [8, 512], strides = [1, 1]} : vector<8x768xf32> to vector<8x512xf32>
    %58 = vector.extract_strided_slice %37 {offsets = [0, 219], sizes = [8, 512], strides = [1, 1]} : vector<8x768xf32> to vector<8x512xf32>
    %59 = vector.extract_strided_slice %37 {offsets = [0, 227], sizes = [8, 512], strides = [1, 1]} : vector<8x768xf32> to vector<8x512xf32>
    %60 = vector.extract_strided_slice %37 {offsets = [0, 228], sizes = [8, 512], strides = [1, 1]} : vector<8x768xf32> to vector<8x512xf32>
    %61 = vector.extract_strided_slice %37 {offsets = [0, 229], sizes = [8, 512], strides = [1, 1]} : vector<8x768xf32> to vector<8x512xf32>
    %62 = vector.extract_strided_slice %37 {offsets = [0, 237], sizes = [8, 512], strides = [1, 1]} : vector<8x768xf32> to vector<8x512xf32>
    %63 = vector.extract_strided_slice %37 {offsets = [0, 238], sizes = [8, 512], strides = [1, 1]} : vector<8x768xf32> to vector<8x512xf32>
    %64 = vector.extract_strided_slice %37 {offsets = [0, 239], sizes = [8, 512], strides = [1, 1]} : vector<8x768xf32> to vector<8x512xf32>
    %65 = tpu.concatenate %38, %39, %40, %41, %42, %43, %44, %45, %46, %47, %48, %49, %50, %51, %52, %53 in 0 : vector<8x512xf32>, vector<8x512xf32>, vector<8x512xf32>, vector<8x512xf32>, vector<8x512xf32>, vector<8x512xf32>, vector<8x512xf32>, vector<8x512xf32>, vector<8x512xf32>, vector<8x512xf32>, vector<8x512xf32>, vector<8x512xf32>, vector<8x512xf32>, vector<8x512xf32>, vector<8x512xf32>, vector<8x512xf32> -> vector<128x512xf32>
    %66 = tpu.concatenate %54, %55, %56, %57, %58, %59, %60, %61, %62, %63, %64 in 0 : vector<8x512xf32>, vector<8x512xf32>, vector<8x512xf32>, vector<8x512xf32>, vector<8x512xf32>, vector<8x512xf32>, vector<8x512xf32>, vector<8x512xf32>, vector<8x512xf32>, vector<8x512xf32>, vector<8x512xf32> -> vector<88x512xf32>
    %67 = tpu.concatenate %65, %66 in 0 : vector<128x512xf32>, vector<88x512xf32> -> vector<216x512xf32>
    %c0_18 = arith.constant 0 : index
    %c0_19 = arith.constant 0 : index
    %68 = vector.load %arg3[%c0_18, %c0_19] : memref<8x216xf32, #tpu.memory_space<vmem>>, vector<8x216xf32>
    %cst_20 = arith.constant dense<0.000000e+00> : vector<8x512xf32>
    %69 = tpu.matmul %68, %67, %cst_20 {dimension_numbers = #tpu.dot_dimension_numbers<[1], [0], [0], [1], [0, 0, 1, 1], [], []>} : vector<8x216xf32>, vector<216x512xf32>, vector<8x512xf32> -> vector<8x512xf32>
    %c0_21 = arith.constant 0 : index
    %c0_22 = arith.constant 0 : index
    %70 = vector.load %arg4[%c0_21, %c0_22] : memref<8x1xf32, #tpu.memory_space<vmem>>, vector<8x1xf32>
    %71 = vector.broadcast %70 : vector<8x1xf32> to vector<8x512xf32>
    %72 = arith.addf %69, %71 : vector<8x512xf32>
    %73 = vector.extract_strided_slice %16 {offsets = [0, 128], sizes = [8, 512], strides = [1, 1]} : vector<8x768xf32> to vector<8x512xf32>
    %74 = arith.addf %72, %73 : vector<8x512xf32>
    %75 = vector.extract_strided_slice %19 {offsets = [0, 128], sizes = [1, 512], strides = [1, 1]} : vector<1x768xi1> to vector<1x512xi1>
    %cst_23 = arith.constant 0.000000e+00 : f32
    %76 = vector.shape_cast %75 : vector<1x512xi1> to vector<1x512xi1>
    %77 = vector.broadcast %76 : vector<1x512xi1> to vector<8x512xi1>
    %78 = vector.broadcast %cst_23 : f32 to vector<8x512xf32>
    %79 = arith.select %77, %74, %78 : vector<8x512xi1>, vector<8x512xf32>
    %c0_24 = arith.constant 0 : index
    %c0_25 = arith.constant 0 : index
    %80 = vector.load %arg7[%c0_24, %c0_25] : memref<8x512xf32, #tpu.memory_space<vmem>>, vector<8x512xf32>
    tpu.vector_store %arg7[%c0_24, %c0_25], %79 {strides = array<i32>} : memref<8x512xf32, #tpu.memory_space<vmem>>, vector<8x512xf32>,
    %cst_26 = arith.constant dense<0.000000e+00> : vector<8xf32>
    %81 = vector.multi_reduction <add>, %79, %cst_26 [1] : vector<8x512xf32> to vector<8xf32>
    %82 = vector.shape_cast %81 : vector<8xf32> to vector<8x1xf32>
    %83 = vector.shape_cast %82 : vector<8x1xf32> to vector<8x1xf32>
    %84 = vector.broadcast %83 : vector<8x1xf32> to vector<8x128xf32>
    %c0_27 = arith.constant 0 : index
    %c0_28 = arith.constant 0 : index
    %85 = vector.load %arg8[%c0_27, %c0_28] : memref<8x128xf32, #tpu.memory_space<vmem>>, vector<8x128xf32>
    tpu.vector_store %arg8[%c0_27, %c0_28], %84 {strides = array<i32>} : memref<8x128xf32, #tpu.memory_space<vmem>>, vector<8x128xf32>,
    %86 = arith.mulf %79, %79 : vector<8x512xf32>
    %cst_29 = arith.constant dense<0.000000e+00> : vector<8xf32>
    %87 = vector.multi_reduction <add>, %86, %cst_29 [1] : vector<8x512xf32> to vector<8xf32>
    %88 = vector.shape_cast %87 : vector<8xf32> to vector<8x1xf32>
    %89 = vector.shape_cast %88 : vector<8x1xf32> to vector<8x1xf32>
    %90 = vector.broadcast %89 : vector<8x1xf32> to vector<8x128xf32>
    %c0_30 = arith.constant 0 : index
    %c0_31 = arith.constant 0 : index
    %91 = vector.load %arg9[%c0_30, %c0_31] : memref<8x128xf32, #tpu.memory_space<vmem>>, vector<8x128xf32>
    tpu.vector_store %arg9[%c0_30, %c0_31], %90 {strides = array<i32>} : memref<8x128xf32, #tpu.memory_space<vmem>>, vector<8x128xf32>,
    return
  }
  func.func @transform_2(%arg0: i32) -> (i32, i32) {
    %c0_i32 = arith.constant 0 : i32
    %c0_i32_0 = arith.constant 0 : i32
    %c0_i32_1 = arith.constant 0 : i32
    return %c0_i32, %c0_i32_0 : i32, i32
  }
  func.func @transform_3(%arg0: i32) -> (i32, i32) {
    %c0_i32 = arith.constant 0 : i32
    %c0_i32_0 = arith.constant 0 : i32
    %c0_i32_1 = arith.constant 0 : i32
    return %c0_i32, %c0_i32_0 : i32, i32
  }
  func.func @transform_4(%arg0: i32) -> (i32, i32) {
    %c0_i32 = arith.constant 0 : i32
    %c0_i32_0 = arith.constant 0 : i32
    %c0_i32_1 = arith.constant 0 : i32
    return %c0_i32, %c0_i32_0 : i32, i32
  }
  func.func @transform_5(%arg0: i32) -> (i32, i32) {
    %c0_i32 = arith.constant 0 : i32
    %c0_i32_0 = arith.constant 0 : i32
    %c0_i32_1 = arith.constant 0 : i32
    return %c0_i32, %c0_i32_0 : i32, i32
  }
  func.func @transform_6(%arg0: i32) -> (i32, i32) {
    %c1_i32 = arith.constant 1 : i32
    %0 = arith.addi %arg0, %c1_i32 : i32
    %c0_i32 = arith.constant 0 : i32
    %c0_i32_0 = arith.constant 0 : i32
    return %c0_i32, %0 : i32, i32
  }
  func.func @transform_7(%arg0: i32) -> (i32, i32) {
    %c0_i32 = arith.constant 0 : i32
    %c0_i32_0 = arith.constant 0 : i32
    return %arg0, %c0_i32 : i32, i32
  }
  func.func @transform_8(%arg0: i32) -> (i32, i32) {
    %c0_i32 = arith.constant 0 : i32
    %c0_i32_0 = arith.constant 0 : i32
    return %arg0, %c0_i32 : i32, i32
  }
}

module attributes {stable_mosaic.version = 11 : i64} {
  func.func @_fused_conv_kernel(%arg0: i32, %arg1: memref<8x3072xf32, #tpu.memory_space<any>>, %arg2: memref<1x3072xf32, #tpu.memory_space<any>>, %arg3: memref<8x216xf32, #tpu.memory_space<vmem>>, %arg4: memref<8x1xf32, #tpu.memory_space<vmem>>, %arg5: memref<8x1xf32, #tpu.memory_space<vmem>>, %arg6: memref<8x1xf32, #tpu.memory_space<vmem>>, %arg7: memref<8x512xf32, #tpu.memory_space<vmem>>, %arg8: memref<8x128xf32, #tpu.memory_space<vmem>>, %arg9: memref<8x128xf32, #tpu.memory_space<vmem>>, %arg10: memref<8x768xf32, #tpu.memory_space<vmem>>, %arg11: memref<1x768xf32, #tpu.memory_space<vmem>>, %arg12: memref<2x!tpu.dma_semaphore, #tpu.memory_space<semaphore_mem>>) attributes {dimension_semantics = [#tpu.dimension_semantics<parallel>], iteration_bounds = array<i64: 4>, scalar_prefetch = 0 : i64, scratch_operands = 3 : i64, tpu.core_type = #tpu.core_type<tc>, window_params = [{}, {}, {pipeline_mode = #tpu.pipeline_mode<synchronous>, transform_indices = @transform_2, window_bounds = array<i64: 8, 216>}, {pipeline_mode = #tpu.pipeline_mode<synchronous>, transform_indices = @transform_3, window_bounds = array<i64: 8, 1>}, {pipeline_mode = #tpu.pipeline_mode<synchronous>, transform_indices = @transform_4, window_bounds = array<i64: 8, 1>}, {pipeline_mode = #tpu.pipeline_mode<synchronous>, transform_indices = @transform_5, window_bounds = array<i64: 8, 1>}, {transform_indices = @transform_6, window_bounds = array<i64: 8, 512>}, {transform_indices = @transform_7, window_bounds = array<i64: 8, 128>}, {transform_indices = @transform_8, window_bounds = array<i64: 8, 128>}]} {
    %c1_i32 = arith.constant 1 : i32
    %0 = arith.addi %arg0, %c1_i32 : i32
    %c512_i32 = arith.constant 512 : i32
    %1 = arith.muli %0, %c512_i32 : i32
    %c128_i32 = arith.constant 128 : i32
    %2 = arith.subi %1, %c128_i32 : i32
    %3 = tpu.assume_multiple %2, 128 : i32
    %c0_i32 = arith.constant 0 : i32
    %c0_i32_0 = arith.constant 0 : i32
    %4 = tpu.memref_slice %arg1[%c0_i32_0, %3] : memref<8x3072xf32, #tpu.memory_space<any>> -> memref<8x768xf32, #tpu.memory_space<any>>
    %5 = tpu.memref_slice %arg12[%c0_i32] : memref<2x!tpu.dma_semaphore, #tpu.memory_space<semaphore_mem>> -> memref<1x!tpu.dma_semaphore, #tpu.memory_space<semaphore_mem>>
    %6 = tpu.memref_squeeze %5 : memref<1x!tpu.dma_semaphore, #tpu.memory_space<semaphore_mem>> -> memref<!tpu.dma_semaphore, #tpu.memory_space<semaphore_mem>>
    tpu.enqueue_dma source(%4 : memref<8x768xf32, #tpu.memory_space<any>>) target(%arg10 : memref<8x768xf32, #tpu.memory_space<vmem>>) target_semaphore(%6 : memref<!tpu.dma_semaphore, #tpu.memory_space<semaphore_mem>>)
    %c1_i32_1 = arith.constant 1 : i32
    %c0_i32_2 = arith.constant 0 : i32
    %7 = tpu.memref_slice %arg2[%c0_i32_2, %3] : memref<1x3072xf32, #tpu.memory_space<any>> -> memref<1x768xf32, #tpu.memory_space<any>>
    %8 = tpu.memref_slice %arg12[%c1_i32_1] : memref<2x!tpu.dma_semaphore, #tpu.memory_space<semaphore_mem>> -> memref<1x!tpu.dma_semaphore, #tpu.memory_space<semaphore_mem>>
    %9 = tpu.memref_squeeze %8 : memref<1x!tpu.dma_semaphore, #tpu.memory_space<semaphore_mem>> -> memref<!tpu.dma_semaphore, #tpu.memory_space<semaphore_mem>>
    tpu.enqueue_dma source(%7 : memref<1x768xf32, #tpu.memory_space<any>>) target(%arg11 : memref<1x768xf32, #tpu.memory_space<vmem>>) target_semaphore(%9 : memref<!tpu.dma_semaphore, #tpu.memory_space<semaphore_mem>>)
    %c0_i32_3 = arith.constant 0 : i32
    %c0_i32_4 = arith.constant 0 : i32
    %10 = tpu.memref_slice %arg1[%c0_i32_4, %3] : memref<8x3072xf32, #tpu.memory_space<any>> -> memref<8x768xf32, #tpu.memory_space<any>>
    %11 = tpu.memref_slice %arg12[%c0_i32_3] : memref<2x!tpu.dma_semaphore, #tpu.memory_space<semaphore_mem>> -> memref<1x!tpu.dma_semaphore, #tpu.memory_space<semaphore_mem>>
    %12 = tpu.memref_squeeze %11 : memref<1x!tpu.dma_semaphore, #tpu.memory_space<semaphore_mem>> -> memref<!tpu.dma_semaphore, #tpu.memory_space<semaphore_mem>>
    tpu.wait_dma2 semaphore(%12 : memref<!tpu.dma_semaphore, #tpu.memory_space<semaphore_mem>>) src(%10 : memref<8x768xf32, #tpu.memory_space<any>>) dst(%arg10 : memref<8x768xf32, #tpu.memory_space<vmem>>)
    %c1_i32_5 = arith.constant 1 : i32
    %c0_i32_6 = arith.constant 0 : i32
    %13 = tpu.memref_slice %arg2[%c0_i32_6, %3] : memref<1x3072xf32, #tpu.memory_space<any>> -> memref<1x768xf32, #tpu.memory_space<any>>
    %14 = tpu.memref_slice %arg12[%c1_i32_5] : memref<2x!tpu.dma_semaphore, #tpu.memory_space<semaphore_mem>> -> memref<1x!tpu.dma_semaphore, #tpu.memory_space<semaphore_mem>>
    %15 = tpu.memref_squeeze %14 : memref<1x!tpu.dma_semaphore, #tpu.memory_space<semaphore_mem>> -> memref<!tpu.dma_semaphore, #tpu.memory_space<semaphore_mem>>
    tpu.wait_dma2 semaphore(%15 : memref<!tpu.dma_semaphore, #tpu.memory_space<semaphore_mem>>) src(%13 : memref<1x768xf32, #tpu.memory_space<any>>) dst(%arg11 : memref<1x768xf32, #tpu.memory_space<vmem>>)
    %c0 = arith.constant 0 : index
    %c0_7 = arith.constant 0 : index
    %16 = vector.load %arg10[%c0, %c0_7] : memref<8x768xf32, #tpu.memory_space<vmem>>, vector<8x768xf32>
    %c0_8 = arith.constant 0 : index
    %c0_9 = arith.constant 0 : index
    %17 = vector.load %arg11[%c0_8, %c0_9] : memref<1x768xf32, #tpu.memory_space<vmem>>, vector<1x768xf32>
    %cst = arith.constant 0.000000e+00 : f32
    %18 = vector.broadcast %cst : f32 to vector<1x768xf32>
    %19 = arith.cmpf ogt, %17, %18 : vector<1x768xf32>
    %c0_10 = arith.constant 0 : index
    %c0_11 = arith.constant 0 : index
    %20 = vector.load %arg5[%c0_10, %c0_11] : memref<8x1xf32, #tpu.memory_space<vmem>>, vector<8x1xf32>
    %21 = vector.broadcast %20 : vector<8x1xf32> to vector<8x768xf32>
    %22 = arith.mulf %16, %21 : vector<8x768xf32>
    %c0_12 = arith.constant 0 : index
    %c0_13 = arith.constant 0 : index
    %23 = vector.load %arg6[%c0_12, %c0_13] : memref<8x1xf32, #tpu.memory_space<vmem>>, vector<8x1xf32>
    %24 = vector.broadcast %23 : vector<8x1xf32> to vector<8x768xf32>
    %25 = arith.addf %22, %24 : vector<8x768xf32>
    %cst_14 = arith.constant 0.000000e+00 : f32
    %26 = vector.broadcast %cst_14 : f32 to vector<8x768xf32>
    %27 = arith.cmpf ogt, %25, %26 : vector<8x768xf32>
    %cst_15 = arith.constant 0.000000e+00 : f32
    %28 = vector.broadcast %cst_15 : f32 to vector<8x768xf32>
    %29 = arith.minimumf %25, %28 : vector<8x768xf32>
    %30 = math.exp %29 : vector<8x768xf32>
    %cst_16 = arith.constant 1.000000e+00 : f32
    %31 = vector.broadcast %cst_16 : f32 to vector<8x768xf32>
    %32 = arith.subf %30, %31 : vector<8x768xf32>
    %33 = arith.select %27, %25, %32 : vector<8x768xi1>, vector<8x768xf32>
    %cst_17 = arith.constant 0.000000e+00 : f32
    %34 = vector.shape_cast %19 : vector<1x768xi1> to vector<1x768xi1>
    %35 = vector.broadcast %34 : vector<1x768xi1> to vector<8x768xi1>
    %36 = vector.broadcast %cst_17 : f32 to vector<8x768xf32>
    %37 = arith.select %35, %33, %36 : vector<8x768xi1>, vector<8x768xf32>
    %38 = vector.extract_strided_slice %37 {offsets = [0, 17], sizes = [8, 512], strides = [1, 1]} : vector<8x768xf32> to vector<8x512xf32>
    %39 = vector.extract_strided_slice %37 {offsets = [0, 18], sizes = [8, 512], strides = [1, 1]} : vector<8x768xf32> to vector<8x512xf32>
    %40 = vector.extract_strided_slice %37 {offsets = [0, 19], sizes = [8, 512], strides = [1, 1]} : vector<8x768xf32> to vector<8x512xf32>
    %41 = vector.extract_strided_slice %37 {offsets = [0, 27], sizes = [8, 512], strides = [1, 1]} : vector<8x768xf32> to vector<8x512xf32>
    %42 = vector.extract_strided_slice %37 {offsets = [0, 28], sizes = [8, 512], strides = [1, 1]} : vector<8x768xf32> to vector<8x512xf32>
    %43 = vector.extract_strided_slice %37 {offsets = [0, 29], sizes = [8, 512], strides = [1, 1]} : vector<8x768xf32> to vector<8x512xf32>
    %44 = vector.extract_strided_slice %37 {offsets = [0, 37], sizes = [8, 512], strides = [1, 1]} : vector<8x768xf32> to vector<8x512xf32>
    %45 = vector.extract_strided_slice %37 {offsets = [0, 38], sizes = [8, 512], strides = [1, 1]} : vector<8x768xf32> to vector<8x512xf32>
    %46 = vector.extract_strided_slice %37 {offsets = [0, 39], sizes = [8, 512], strides = [1, 1]} : vector<8x768xf32> to vector<8x512xf32>
    %47 = vector.extract_strided_slice %37 {offsets = [0, 117], sizes = [8, 512], strides = [1, 1]} : vector<8x768xf32> to vector<8x512xf32>
    %48 = vector.extract_strided_slice %37 {offsets = [0, 118], sizes = [8, 512], strides = [1, 1]} : vector<8x768xf32> to vector<8x512xf32>
    %49 = vector.extract_strided_slice %37 {offsets = [0, 119], sizes = [8, 512], strides = [1, 1]} : vector<8x768xf32> to vector<8x512xf32>
    %50 = vector.extract_strided_slice %37 {offsets = [0, 127], sizes = [8, 512], strides = [1, 1]} : vector<8x768xf32> to vector<8x512xf32>
    %51 = vector.extract_strided_slice %37 {offsets = [0, 128], sizes = [8, 512], strides = [1, 1]} : vector<8x768xf32> to vector<8x512xf32>
    %52 = vector.extract_strided_slice %37 {offsets = [0, 129], sizes = [8, 512], strides = [1, 1]} : vector<8x768xf32> to vector<8x512xf32>
    %53 = vector.extract_strided_slice %37 {offsets = [0, 137], sizes = [8, 512], strides = [1, 1]} : vector<8x768xf32> to vector<8x512xf32>
    %54 = vector.extract_strided_slice %37 {offsets = [0, 138], sizes = [8, 512], strides = [1, 1]} : vector<8x768xf32> to vector<8x512xf32>
    %55 = vector.extract_strided_slice %37 {offsets = [0, 139], sizes = [8, 512], strides = [1, 1]} : vector<8x768xf32> to vector<8x512xf32>
    %56 = vector.extract_strided_slice %37 {offsets = [0, 217], sizes = [8, 512], strides = [1, 1]} : vector<8x768xf32> to vector<8x512xf32>
    %57 = vector.extract_strided_slice %37 {offsets = [0, 218], sizes = [8, 512], strides = [1, 1]} : vector<8x768xf32> to vector<8x512xf32>
    %58 = vector.extract_strided_slice %37 {offsets = [0, 219], sizes = [8, 512], strides = [1, 1]} : vector<8x768xf32> to vector<8x512xf32>
    %59 = vector.extract_strided_slice %37 {offsets = [0, 227], sizes = [8, 512], strides = [1, 1]} : vector<8x768xf32> to vector<8x512xf32>
    %60 = vector.extract_strided_slice %37 {offsets = [0, 228], sizes = [8, 512], strides = [1, 1]} : vector<8x768xf32> to vector<8x512xf32>
    %61 = vector.extract_strided_slice %37 {offsets = [0, 229], sizes = [8, 512], strides = [1, 1]} : vector<8x768xf32> to vector<8x512xf32>
    %62 = vector.extract_strided_slice %37 {offsets = [0, 237], sizes = [8, 512], strides = [1, 1]} : vector<8x768xf32> to vector<8x512xf32>
    %63 = vector.extract_strided_slice %37 {offsets = [0, 238], sizes = [8, 512], strides = [1, 1]} : vector<8x768xf32> to vector<8x512xf32>
    %64 = vector.extract_strided_slice %37 {offsets = [0, 239], sizes = [8, 512], strides = [1, 1]} : vector<8x768xf32> to vector<8x512xf32>
    %65 = tpu.concatenate %38, %39, %40, %41, %42, %43, %44, %45, %46, %47, %48, %49, %50, %51, %52, %53 in 0 : vector<8x512xf32>, vector<8x512xf32>, vector<8x512xf32>, vector<8x512xf32>, vector<8x512xf32>, vector<8x512xf32>, vector<8x512xf32>, vector<8x512xf32>, vector<8x512xf32>, vector<8x512xf32>, vector<8x512xf32>, vector<8x512xf32>, vector<8x512xf32>, vector<8x512xf32>, vector<8x512xf32>, vector<8x512xf32> -> vector<128x512xf32>
    %66 = tpu.concatenate %54, %55, %56, %57, %58, %59, %60, %61, %62, %63, %64 in 0 : vector<8x512xf32>, vector<8x512xf32>, vector<8x512xf32>, vector<8x512xf32>, vector<8x512xf32>, vector<8x512xf32>, vector<8x512xf32>, vector<8x512xf32>, vector<8x512xf32>, vector<8x512xf32>, vector<8x512xf32> -> vector<88x512xf32>
    %67 = tpu.concatenate %65, %66 in 0 : vector<128x512xf32>, vector<88x512xf32> -> vector<216x512xf32>
    %c0_18 = arith.constant 0 : index
    %c0_19 = arith.constant 0 : index
    %68 = vector.load %arg3[%c0_18, %c0_19] : memref<8x216xf32, #tpu.memory_space<vmem>>, vector<8x216xf32>
    %cst_20 = arith.constant dense<0.000000e+00> : vector<8x512xf32>
    %69 = tpu.matmul %68, %67, %cst_20 {dimension_numbers = #tpu.dot_dimension_numbers<[1], [0], [0], [1], [0, 0, 1, 1], [], []>} : vector<8x216xf32>, vector<216x512xf32>, vector<8x512xf32> -> vector<8x512xf32>
    %c0_21 = arith.constant 0 : index
    %c0_22 = arith.constant 0 : index
    %70 = vector.load %arg4[%c0_21, %c0_22] : memref<8x1xf32, #tpu.memory_space<vmem>>, vector<8x1xf32>
    %71 = vector.broadcast %70 : vector<8x1xf32> to vector<8x512xf32>
    %72 = arith.addf %69, %71 : vector<8x512xf32>
    %73 = vector.extract_strided_slice %16 {offsets = [0, 128], sizes = [8, 512], strides = [1, 1]} : vector<8x768xf32> to vector<8x512xf32>
    %74 = arith.addf %72, %73 : vector<8x512xf32>
    %75 = vector.extract_strided_slice %19 {offsets = [0, 128], sizes = [1, 512], strides = [1, 1]} : vector<1x768xi1> to vector<1x512xi1>
    %cst_23 = arith.constant 0.000000e+00 : f32
    %76 = vector.shape_cast %75 : vector<1x512xi1> to vector<1x512xi1>
    %77 = vector.broadcast %76 : vector<1x512xi1> to vector<8x512xi1>
    %78 = vector.broadcast %cst_23 : f32 to vector<8x512xf32>
    %79 = arith.select %77, %74, %78 : vector<8x512xi1>, vector<8x512xf32>
    %c0_24 = arith.constant 0 : index
    %c0_25 = arith.constant 0 : index
    %80 = vector.load %arg7[%c0_24, %c0_25] : memref<8x512xf32, #tpu.memory_space<vmem>>, vector<8x512xf32>
    tpu.vector_store %arg7[%c0_24, %c0_25], %79 {strides = array<i32>} : memref<8x512xf32, #tpu.memory_space<vmem>>, vector<8x512xf32>,
    %cst_26 = arith.constant dense<0.000000e+00> : vector<8xf32>
    %81 = vector.multi_reduction <add>, %79, %cst_26 [1] : vector<8x512xf32> to vector<8xf32>
    %82 = vector.shape_cast %81 : vector<8xf32> to vector<8x1xf32>
    %83 = vector.shape_cast %82 : vector<8x1xf32> to vector<8x1xf32>
    %84 = vector.broadcast %83 : vector<8x1xf32> to vector<8x128xf32>
    %c0_27 = arith.constant 0 : index
    %c0_28 = arith.constant 0 : index
    %85 = vector.load %arg8[%c0_27, %c0_28] : memref<8x128xf32, #tpu.memory_space<vmem>>, vector<8x128xf32>
    tpu.vector_store %arg8[%c0_27, %c0_28], %84 {strides = array<i32>} : memref<8x128xf32, #tpu.memory_space<vmem>>, vector<8x128xf32>,
    %86 = arith.mulf %79, %79 : vector<8x512xf32>
    %cst_29 = arith.constant dense<0.000000e+00> : vector<8xf32>
    %87 = vector.multi_reduction <add>, %86, %cst_29 [1] : vector<8x512xf32> to vector<8xf32>
    %88 = vector.shape_cast %87 : vector<8xf32> to vector<8x1xf32>
    %89 = vector.shape_cast %88 : vector<8x1xf32> to vector<8x1xf32>
    %90 = vector.broadcast %89 : vector<8x1xf32> to vector<8x128xf32>
    %c0_30 = arith.constant 0 : index
    %c0_31 = arith.constant 0 : index
    %91 = vector.load %arg9[%c0_30, %c0_31] : memref<8x128xf32, #tpu.memory_space<vmem>>, vector<8x128xf32>
    tpu.vector_store %arg9[%c0_30, %c0_31], %90 {strides = array<i32>} : memref<8x128xf32, #tpu.memory_space<vmem>>, vector<8x128xf32>,
    return
  }
  func.func @transform_2(%arg0: i32) -> (i32, i32) {
    %c0_i32 = arith.constant 0 : i32
    %c0_i32_0 = arith.constant 0 : i32
    %c0_i32_1 = arith.constant 0 : i32
    return %c0_i32, %c0_i32_0 : i32, i32
  }
  func.func @transform_3(%arg0: i32) -> (i32, i32) {
    %c0_i32 = arith.constant 0 : i32
    %c0_i32_0 = arith.constant 0 : i32
    %c0_i32_1 = arith.constant 0 : i32
    return %c0_i32, %c0_i32_0 : i32, i32
  }
  func.func @transform_4(%arg0: i32) -> (i32, i32) {
    %c0_i32 = arith.constant 0 : i32
    %c0_i32_0 = arith.constant 0 : i32
    %c0_i32_1 = arith.constant 0 : i32
    return %c0_i32, %c0_i32_0 : i32, i32
  }
  func.func @transform_5(%arg0: i32) -> (i32, i32) {
    %c0_i32 = arith.constant 0 : i32
    %c0_i32_0 = arith.constant 0 : i32
    %c0_i32_1 = arith.constant 0 : i32
    return %c0_i32, %c0_i32_0 : i32, i32
  }
  func.func @transform_6(%arg0: i32) -> (i32, i32) {
    %c1_i32 = arith.constant 1 : i32
    %0 = arith.addi %arg0, %c1_i32 : i32
    %c0_i32 = arith.constant 0 : i32
    %c0_i32_0 = arith.constant 0 : i32
    return %c0_i32, %0 : i32, i32
  }
  func.func @transform_7(%arg0: i32) -> (i32, i32) {
    %c0_i32 = arith.constant 0 : i32
    %c0_i32_0 = arith.constant 0 : i32
    return %arg0, %c0_i32 : i32, i32
  }
  func.func @transform_8(%arg0: i32) -> (i32, i32) {
    %c0_i32 = arith.constant 0 : i32
    %c0_i32_0 = arith.constant 0 : i32
    return %arg0, %c0_i32 : i32, i32
  }
}

module attributes {stable_mosaic.version = 11 : i64} {
  func.func @_fused_conv_kernel(%arg0: i32, %arg1: memref<8x3072xf32, #tpu.memory_space<any>>, %arg2: memref<1x3072xf32, #tpu.memory_space<any>>, %arg3: memref<8x216xf32, #tpu.memory_space<vmem>>, %arg4: memref<8x1xf32, #tpu.memory_space<vmem>>, %arg5: memref<8x1xf32, #tpu.memory_space<vmem>>, %arg6: memref<8x1xf32, #tpu.memory_space<vmem>>, %arg7: memref<8x512xf32, #tpu.memory_space<vmem>>, %arg8: memref<8x768xf32, #tpu.memory_space<vmem>>, %arg9: memref<1x768xf32, #tpu.memory_space<vmem>>, %arg10: memref<2x!tpu.dma_semaphore, #tpu.memory_space<semaphore_mem>>) attributes {dimension_semantics = [#tpu.dimension_semantics<parallel>], iteration_bounds = array<i64: 4>, scalar_prefetch = 0 : i64, scratch_operands = 3 : i64, tpu.core_type = #tpu.core_type<tc>, window_params = [{}, {}, {pipeline_mode = #tpu.pipeline_mode<synchronous>, transform_indices = @transform_2, window_bounds = array<i64: 8, 216>}, {pipeline_mode = #tpu.pipeline_mode<synchronous>, transform_indices = @transform_3, window_bounds = array<i64: 8, 1>}, {pipeline_mode = #tpu.pipeline_mode<synchronous>, transform_indices = @transform_4, window_bounds = array<i64: 8, 1>}, {pipeline_mode = #tpu.pipeline_mode<synchronous>, transform_indices = @transform_5, window_bounds = array<i64: 8, 1>}, {transform_indices = @transform_6, window_bounds = array<i64: 8, 512>}]} {
    %c1_i32 = arith.constant 1 : i32
    %0 = arith.addi %arg0, %c1_i32 : i32
    %c512_i32 = arith.constant 512 : i32
    %1 = arith.muli %0, %c512_i32 : i32
    %c128_i32 = arith.constant 128 : i32
    %2 = arith.subi %1, %c128_i32 : i32
    %3 = tpu.assume_multiple %2, 128 : i32
    %c0_i32 = arith.constant 0 : i32
    %c0_i32_0 = arith.constant 0 : i32
    %4 = tpu.memref_slice %arg1[%c0_i32_0, %3] : memref<8x3072xf32, #tpu.memory_space<any>> -> memref<8x768xf32, #tpu.memory_space<any>>
    %5 = tpu.memref_slice %arg10[%c0_i32] : memref<2x!tpu.dma_semaphore, #tpu.memory_space<semaphore_mem>> -> memref<1x!tpu.dma_semaphore, #tpu.memory_space<semaphore_mem>>
    %6 = tpu.memref_squeeze %5 : memref<1x!tpu.dma_semaphore, #tpu.memory_space<semaphore_mem>> -> memref<!tpu.dma_semaphore, #tpu.memory_space<semaphore_mem>>
    tpu.enqueue_dma source(%4 : memref<8x768xf32, #tpu.memory_space<any>>) target(%arg8 : memref<8x768xf32, #tpu.memory_space<vmem>>) target_semaphore(%6 : memref<!tpu.dma_semaphore, #tpu.memory_space<semaphore_mem>>)
    %c1_i32_1 = arith.constant 1 : i32
    %c0_i32_2 = arith.constant 0 : i32
    %7 = tpu.memref_slice %arg2[%c0_i32_2, %3] : memref<1x3072xf32, #tpu.memory_space<any>> -> memref<1x768xf32, #tpu.memory_space<any>>
    %8 = tpu.memref_slice %arg10[%c1_i32_1] : memref<2x!tpu.dma_semaphore, #tpu.memory_space<semaphore_mem>> -> memref<1x!tpu.dma_semaphore, #tpu.memory_space<semaphore_mem>>
    %9 = tpu.memref_squeeze %8 : memref<1x!tpu.dma_semaphore, #tpu.memory_space<semaphore_mem>> -> memref<!tpu.dma_semaphore, #tpu.memory_space<semaphore_mem>>
    tpu.enqueue_dma source(%7 : memref<1x768xf32, #tpu.memory_space<any>>) target(%arg9 : memref<1x768xf32, #tpu.memory_space<vmem>>) target_semaphore(%9 : memref<!tpu.dma_semaphore, #tpu.memory_space<semaphore_mem>>)
    %c0_i32_3 = arith.constant 0 : i32
    %c0_i32_4 = arith.constant 0 : i32
    %10 = tpu.memref_slice %arg1[%c0_i32_4, %3] : memref<8x3072xf32, #tpu.memory_space<any>> -> memref<8x768xf32, #tpu.memory_space<any>>
    %11 = tpu.memref_slice %arg10[%c0_i32_3] : memref<2x!tpu.dma_semaphore, #tpu.memory_space<semaphore_mem>> -> memref<1x!tpu.dma_semaphore, #tpu.memory_space<semaphore_mem>>
    %12 = tpu.memref_squeeze %11 : memref<1x!tpu.dma_semaphore, #tpu.memory_space<semaphore_mem>> -> memref<!tpu.dma_semaphore, #tpu.memory_space<semaphore_mem>>
    tpu.wait_dma2 semaphore(%12 : memref<!tpu.dma_semaphore, #tpu.memory_space<semaphore_mem>>) src(%10 : memref<8x768xf32, #tpu.memory_space<any>>) dst(%arg8 : memref<8x768xf32, #tpu.memory_space<vmem>>)
    %c1_i32_5 = arith.constant 1 : i32
    %c0_i32_6 = arith.constant 0 : i32
    %13 = tpu.memref_slice %arg2[%c0_i32_6, %3] : memref<1x3072xf32, #tpu.memory_space<any>> -> memref<1x768xf32, #tpu.memory_space<any>>
    %14 = tpu.memref_slice %arg10[%c1_i32_5] : memref<2x!tpu.dma_semaphore, #tpu.memory_space<semaphore_mem>> -> memref<1x!tpu.dma_semaphore, #tpu.memory_space<semaphore_mem>>
    %15 = tpu.memref_squeeze %14 : memref<1x!tpu.dma_semaphore, #tpu.memory_space<semaphore_mem>> -> memref<!tpu.dma_semaphore, #tpu.memory_space<semaphore_mem>>
    tpu.wait_dma2 semaphore(%15 : memref<!tpu.dma_semaphore, #tpu.memory_space<semaphore_mem>>) src(%13 : memref<1x768xf32, #tpu.memory_space<any>>) dst(%arg9 : memref<1x768xf32, #tpu.memory_space<vmem>>)
    %c0 = arith.constant 0 : index
    %c0_7 = arith.constant 0 : index
    %16 = vector.load %arg8[%c0, %c0_7] : memref<8x768xf32, #tpu.memory_space<vmem>>, vector<8x768xf32>
    %c0_8 = arith.constant 0 : index
    %c0_9 = arith.constant 0 : index
    %17 = vector.load %arg9[%c0_8, %c0_9] : memref<1x768xf32, #tpu.memory_space<vmem>>, vector<1x768xf32>
    %cst = arith.constant 0.000000e+00 : f32
    %18 = vector.broadcast %cst : f32 to vector<1x768xf32>
    %19 = arith.cmpf ogt, %17, %18 : vector<1x768xf32>
    %cst_10 = arith.constant 0.000000e+00 : f32
    %20 = vector.shape_cast %19 : vector<1x768xi1> to vector<1x768xi1>
    %21 = vector.broadcast %20 : vector<1x768xi1> to vector<8x768xi1>
    %22 = vector.broadcast %cst_10 : f32 to vector<8x768xf32>
    %23 = arith.select %21, %16, %22 : vector<8x768xi1>, vector<8x768xf32>
    %24 = vector.extract_strided_slice %23 {offsets = [0, 17], sizes = [8, 512], strides = [1, 1]} : vector<8x768xf32> to vector<8x512xf32>
    %25 = vector.extract_strided_slice %23 {offsets = [0, 18], sizes = [8, 512], strides = [1, 1]} : vector<8x768xf32> to vector<8x512xf32>
    %26 = vector.extract_strided_slice %23 {offsets = [0, 19], sizes = [8, 512], strides = [1, 1]} : vector<8x768xf32> to vector<8x512xf32>
    %27 = vector.extract_strided_slice %23 {offsets = [0, 27], sizes = [8, 512], strides = [1, 1]} : vector<8x768xf32> to vector<8x512xf32>
    %28 = vector.extract_strided_slice %23 {offsets = [0, 28], sizes = [8, 512], strides = [1, 1]} : vector<8x768xf32> to vector<8x512xf32>
    %29 = vector.extract_strided_slice %23 {offsets = [0, 29], sizes = [8, 512], strides = [1, 1]} : vector<8x768xf32> to vector<8x512xf32>
    %30 = vector.extract_strided_slice %23 {offsets = [0, 37], sizes = [8, 512], strides = [1, 1]} : vector<8x768xf32> to vector<8x512xf32>
    %31 = vector.extract_strided_slice %23 {offsets = [0, 38], sizes = [8, 512], strides = [1, 1]} : vector<8x768xf32> to vector<8x512xf32>
    %32 = vector.extract_strided_slice %23 {offsets = [0, 39], sizes = [8, 512], strides = [1, 1]} : vector<8x768xf32> to vector<8x512xf32>
    %33 = vector.extract_strided_slice %23 {offsets = [0, 117], sizes = [8, 512], strides = [1, 1]} : vector<8x768xf32> to vector<8x512xf32>
    %34 = vector.extract_strided_slice %23 {offsets = [0, 118], sizes = [8, 512], strides = [1, 1]} : vector<8x768xf32> to vector<8x512xf32>
    %35 = vector.extract_strided_slice %23 {offsets = [0, 119], sizes = [8, 512], strides = [1, 1]} : vector<8x768xf32> to vector<8x512xf32>
    %36 = vector.extract_strided_slice %23 {offsets = [0, 127], sizes = [8, 512], strides = [1, 1]} : vector<8x768xf32> to vector<8x512xf32>
    %37 = vector.extract_strided_slice %23 {offsets = [0, 128], sizes = [8, 512], strides = [1, 1]} : vector<8x768xf32> to vector<8x512xf32>
    %38 = vector.extract_strided_slice %23 {offsets = [0, 129], sizes = [8, 512], strides = [1, 1]} : vector<8x768xf32> to vector<8x512xf32>
    %39 = vector.extract_strided_slice %23 {offsets = [0, 137], sizes = [8, 512], strides = [1, 1]} : vector<8x768xf32> to vector<8x512xf32>
    %40 = vector.extract_strided_slice %23 {offsets = [0, 138], sizes = [8, 512], strides = [1, 1]} : vector<8x768xf32> to vector<8x512xf32>
    %41 = vector.extract_strided_slice %23 {offsets = [0, 139], sizes = [8, 512], strides = [1, 1]} : vector<8x768xf32> to vector<8x512xf32>
    %42 = vector.extract_strided_slice %23 {offsets = [0, 217], sizes = [8, 512], strides = [1, 1]} : vector<8x768xf32> to vector<8x512xf32>
    %43 = vector.extract_strided_slice %23 {offsets = [0, 218], sizes = [8, 512], strides = [1, 1]} : vector<8x768xf32> to vector<8x512xf32>
    %44 = vector.extract_strided_slice %23 {offsets = [0, 219], sizes = [8, 512], strides = [1, 1]} : vector<8x768xf32> to vector<8x512xf32>
    %45 = vector.extract_strided_slice %23 {offsets = [0, 227], sizes = [8, 512], strides = [1, 1]} : vector<8x768xf32> to vector<8x512xf32>
    %46 = vector.extract_strided_slice %23 {offsets = [0, 228], sizes = [8, 512], strides = [1, 1]} : vector<8x768xf32> to vector<8x512xf32>
    %47 = vector.extract_strided_slice %23 {offsets = [0, 229], sizes = [8, 512], strides = [1, 1]} : vector<8x768xf32> to vector<8x512xf32>
    %48 = vector.extract_strided_slice %23 {offsets = [0, 237], sizes = [8, 512], strides = [1, 1]} : vector<8x768xf32> to vector<8x512xf32>
    %49 = vector.extract_strided_slice %23 {offsets = [0, 238], sizes = [8, 512], strides = [1, 1]} : vector<8x768xf32> to vector<8x512xf32>
    %50 = vector.extract_strided_slice %23 {offsets = [0, 239], sizes = [8, 512], strides = [1, 1]} : vector<8x768xf32> to vector<8x512xf32>
    %51 = tpu.concatenate %24, %25, %26, %27, %28, %29, %30, %31, %32, %33, %34, %35, %36, %37, %38, %39 in 0 : vector<8x512xf32>, vector<8x512xf32>, vector<8x512xf32>, vector<8x512xf32>, vector<8x512xf32>, vector<8x512xf32>, vector<8x512xf32>, vector<8x512xf32>, vector<8x512xf32>, vector<8x512xf32>, vector<8x512xf32>, vector<8x512xf32>, vector<8x512xf32>, vector<8x512xf32>, vector<8x512xf32>, vector<8x512xf32> -> vector<128x512xf32>
    %52 = tpu.concatenate %40, %41, %42, %43, %44, %45, %46, %47, %48, %49, %50 in 0 : vector<8x512xf32>, vector<8x512xf32>, vector<8x512xf32>, vector<8x512xf32>, vector<8x512xf32>, vector<8x512xf32>, vector<8x512xf32>, vector<8x512xf32>, vector<8x512xf32>, vector<8x512xf32>, vector<8x512xf32> -> vector<88x512xf32>
    %53 = tpu.concatenate %51, %52 in 0 : vector<128x512xf32>, vector<88x512xf32> -> vector<216x512xf32>
    %c0_11 = arith.constant 0 : index
    %c0_12 = arith.constant 0 : index
    %54 = vector.load %arg3[%c0_11, %c0_12] : memref<8x216xf32, #tpu.memory_space<vmem>>, vector<8x216xf32>
    %cst_13 = arith.constant dense<0.000000e+00> : vector<8x512xf32>
    %55 = tpu.matmul %54, %53, %cst_13 {dimension_numbers = #tpu.dot_dimension_numbers<[1], [0], [0], [1], [0, 0, 1, 1], [], []>} : vector<8x216xf32>, vector<216x512xf32>, vector<8x512xf32> -> vector<8x512xf32>
    %c0_14 = arith.constant 0 : index
    %c0_15 = arith.constant 0 : index
    %56 = vector.load %arg4[%c0_14, %c0_15] : memref<8x1xf32, #tpu.memory_space<vmem>>, vector<8x1xf32>
    %57 = vector.broadcast %56 : vector<8x1xf32> to vector<8x512xf32>
    %58 = arith.addf %55, %57 : vector<8x512xf32>
    %59 = vector.extract_strided_slice %19 {offsets = [0, 128], sizes = [1, 512], strides = [1, 1]} : vector<1x768xi1> to vector<1x512xi1>
    %cst_16 = arith.constant 0.000000e+00 : f32
    %60 = vector.shape_cast %59 : vector<1x512xi1> to vector<1x512xi1>
    %61 = vector.broadcast %60 : vector<1x512xi1> to vector<8x512xi1>
    %62 = vector.broadcast %cst_16 : f32 to vector<8x512xf32>
    %63 = arith.select %61, %58, %62 : vector<8x512xi1>, vector<8x512xf32>
    %c0_17 = arith.constant 0 : index
    %c0_18 = arith.constant 0 : index
    %64 = vector.load %arg7[%c0_17, %c0_18] : memref<8x512xf32, #tpu.memory_space<vmem>>, vector<8x512xf32>
    tpu.vector_store %arg7[%c0_17, %c0_18], %63 {strides = array<i32>} : memref<8x512xf32, #tpu.memory_space<vmem>>, vector<8x512xf32>,
    return
  }
  func.func @transform_2(%arg0: i32) -> (i32, i32) {
    %c0_i32 = arith.constant 0 : i32
    %c0_i32_0 = arith.constant 0 : i32
    %c0_i32_1 = arith.constant 0 : i32
    return %c0_i32, %c0_i32_0 : i32, i32
  }
  func.func @transform_3(%arg0: i32) -> (i32, i32) {
    %c0_i32 = arith.constant 0 : i32
    %c0_i32_0 = arith.constant 0 : i32
    %c0_i32_1 = arith.constant 0 : i32
    return %c0_i32, %c0_i32_0 : i32, i32
  }
  func.func @transform_4(%arg0: i32) -> (i32, i32) {
    %c0_i32 = arith.constant 0 : i32
    %c0_i32_0 = arith.constant 0 : i32
    %c0_i32_1 = arith.constant 0 : i32
    return %c0_i32, %c0_i32_0 : i32, i32
  }
  func.func @transform_5(%arg0: i32) -> (i32, i32) {
    %c0_i32 = arith.constant 0 : i32
    %c0_i32_0 = arith.constant 0 : i32
    %c0_i32_1 = arith.constant 0 : i32
    return %c0_i32, %c0_i32_0 : i32, i32
  }
  func.func @transform_6(%arg0: i32) -> (i32, i32) {
    %c1_i32 = arith.constant 1 : i32
    %0 = arith.addi %arg0, %c1_i32 : i32
    %c0_i32 = arith.constant 0 : i32
    %c0_i32_0 = arith.constant 0 : i32
    return %c0_i32, %0 : i32, i32
  }
}

</mosaic_0001>

<bundles_post_ra>
// kernel: dcsrn_forward.6
= control target key start
LH: loop header
LB: loop body
LE: loop exit
PB: predicated region body
PF: predicated region fallthrough
CT: control target
= control target key end

     0   :  { %s1638_s27 = smov 0   ;;  %s2286_s0 = inlined_call_operand.vmem [shape: f32[1,3072], index: 0, kind: input, shape index: {}]   ;;  %s2287_s1 = inlined_call_operand.vmem [shape: f32[1,3072], index: 1, kind: input, shape index: {}]   ;;  %s2288_s2 = inlined_call_operand.vmem [shape: f32[8,27], index: 2, kind: input, shape index: {}]   ;;  %s2289_s3 = inlined_call_operand.vmem [shape: f32[8,1], index: 3, kind: input, shape index: {}]   ;;  %s2290_s4 = inlined_call_operand.<no memory space> [shape: f32[1,1], index: 4, kind: input, shape index: {}]   ;;  %s2291_s6 = inlined_call_operand.vmem [shape: f32[8,3072], index: 6, kind: output, shape index: {0}]   ;;  %s2292_s7 = inlined_call_operand.vmem [shape: f32[32,128], index: 7, kind: output, shape index: {1}]   ;;  %s2293_s8 = inlined_call_operand.vmem [shape: f32[32,128], index: 8, kind: output, shape index: {2}]   ;;  %s2294_s5 = inlined_call_operand.<no memory space> [shape: f32[1,1], index: 5, kind: input, shape index: {}]  }
   0x1 LB: > { %s1266_s4 = sadd.s32 4294967295, %s1569_s27   ;;  %p1269_p0 = scmp.ge.s32.totalorder %s1569_s27, 1  ;;  %s1569_s27 = sphi %s1638_s27, %s23_s27  }
   0x2   : > { %p215_p1 = scmp.lt.s32.totalorder %s1569_s27, 5 }
   0x4   : > { %p216_p2 = pnand %p1269_p0, %p215_p1 }
   0x5   : > { %s1288_s28 = sshll.u32 (!%p216_p2), %s1266_s4, 2  ;;  %p257_p3 = scmp.lt.s32.totalorder (!%p216_p2), %s1266_s4, 3 }
   0x6   : > { %219 = sbr.rel (%p216_p2) target bundleno = 803 (0x323), region = 36  ;;  %s1289_s29 = sadd.s32 (!%p216_p2), 4, %s1288_s28 }
   0x7   : > { %s1290_s30 = sshll.u32 (!%p216_p2), %s1266_s4, 9  ;;  %p251_p4 = scmp.lt.s32.totalorder (!%p216_p2), %s1289_s29, 23 }
   0x8   : > { %s1291_s5 = sadd.s32 (!%p216_p2), 512, %s1290_s30 }
   0x9   : > { %s1275_s10 = sadd.s32 (!%p216_p2), 4294967168, %s1291_s5 }
   0xa   : > { %s268_s21 = sshra.s32 (!%p216_p2), %s1275_s10, 7 }
   0xb   : > { %s2308_s4 = smov (!%p257_p3, %s1266_s4), 3  ;;  %s2310_s29 = smov (!%p251_p4, %s1289_s29), 23 }
   0xc   : > { %s1272_s9 = sshll.u32 %s2308_s4, 3  ;;  %s1271_s11 = sshll.u32 %s2310_s29, 3 }
   0xd   : > { %s1649_s14 = scalar_lea.vmem %s2292_s7, %s1272_s9  ;;  %s1654_s17 = scalar_lea.vmem %s2291_s6, %s1271_s11 }
   0xe   : > { %s1659_s20 = scalar_lea.vmem %s2293_s8, %s1272_s9  ;;  %s270_s24 = scalar_lea.vmem %s2286_s0, %s268_s21 }
   0xf   : > { %v285_v0 = vld [vmem:[%s270_s24] sm:$0x3f] }
  0x10   : > { %286 = vst [vmem:[#allocation2] sm:$0x3f] %v285_v0 }
  0x11   : > { %304 = vsyncadd [#allocation4], 96  ;;  %s305_s4 = scalar_lea.vmem %s2287_s1, %s268_s21 }
  0x12   : > { %v321_v1 = vld [vmem:[%s305_s4] sm:$0x3f] }
  0x13   : > { %322 = vst [vmem:[#allocation3] sm:$0x3f] %v321_v1 }
  0x14   : > { %340 = vsyncadd [#allocation4 + $0x1], 96 }
  0x15   : > { %1563 = dma.done.wait [#allocation4], 96 }
  0x16   : > { %1564 = vsyncadd [#allocation4], 4294967200 }
  0x17   : > { %1565 = dma.done.wait [#allocation4 + $0x1], 96 }
  0x18   : > { %1566 = vsyncadd [#allocation4 + $0x1], 4294967200  ;;  %v346_v2 = vld [vmem:[#allocation2] sm:$0x3f]  ;;  %s1571_s28 = smov 127   ;;  %s1572_s29 = smov 126  }
  0x19   : > { %s1573_s30 = smov 118   ;;  %s1574_s5 = smov 117   ;;  %vm391_vm1 = vcmask 1031168   ;;  %vm659_vm2 = vcmask 1040384   ;;  %vm665_vm3 = vcmask 1041408   ;;  %vm671_vm4 = vcmask 1042432  }
  0x1a   : > { %v1667_v3 = vld [vmem:[#allocation3] sm:$0x3f]  ;;  %s1575_s9 = smov 116   ;;  %s1576_s10 = smov 108   ;;  %vm411_vm5 = vcmask 965632   ;;  %vm431_vm6 = vcmask 957440  }
  0x1b   : > { %vm2295_vm0 = vcmp.gt.f32.partialorder %v1667_v3, 0.0  ;;  %s1577_s11 = smov 107   ;;  %s1578_s12 = smov 39   ;;  %vm677_vm7 = vcmask 1043456   ;;  %vm371_vm8 = vcmask 1039360   ;;  %vm683_vm9 = vcmask 1044480  }
  0x1c   : > { %v349_v4 = vsel %vm2295_vm0, %v346_v2, 0.0  ;;  %s1579_s13 = smov 106   ;;  %s1580_s15 = smov 38   ;;  %vm689_vm10 = vcmask 1045504   ;;  %vm695_vm11 = vcmask 1046528   ;;  %vm451_vm12 = vcmask 949248  }
  0x1d   : > { %v1672_v5 = vperm.slane %v349_v4, 1  ;;  %v1674_v6 = vperm.slane %v349_v4, 2  ;;  %v1676_v7 = vperm.slane %v349_v4, 3  ;;  %v1678_v8 = vperm.slane %v349_v4, 4  ;;  %s1581_s16 = smov 18   ;;  %s1582_s18 = smov 37  }
  0x1e   : > { %v1680_v9 = vperm.slane %v349_v4, 0  ;;  %v618_v12 = vperm.slane %v349_v4, 5  ;;  %s1583_s19 = smov 19   ;;  %s1584_s21 = smov 17   ;;  %vm754_vm13 = vcmask 318464   ;;  %vm471_vm14 = vcmask 883712  }
  0x1f   : > { %369 = vrot.lane.b32.xlu1 %v1678_v8, %s1571_s28  ;;  %v1685_v10 = vpack.i.bf16 %v1676_v7, %v1674_v6  ;;  %s1585_s22 = smov 29   ;;  %s1586_s23 = smov 28   ;;  %vm491_vm15 = vcmask 875520   ;;  %vm811_vm0 = vcmask 236544  }
  0x20   : > { %v1322_v11 = vpack.i.bf16 %v1672_v5, %v1680_v9  ;;  %v1693_v13 = vpack.i.bf16 %v618_v12, %v1678_v8  ;;  %s1587_s24 = smov 27   ;;  %v1467_v4 = vpack.i.bf16 %v1680_v9, %v1672_v5  ;;  %s1588_s25 = smov 26  }
  0x21   : > { %1338 = vrot.lane.b32.xlu2 %v1685_v10, %s1572_s29  ;;  %s1589_s26 = smov 16   ;;  %s1590_s4 = smov 8  }
  0x22   : > { %1323 = vrot.lane.b32.xlu0 %v1322_v11, %s1571_s28 }
  0x27   : > { %1333 = vrot.lane.b32.xlu1 %v1322_v11, %s1572_s29 }
  0x29   : > { %389 = vrot.lane.b32.xlu2 %v1678_v8, %s1572_s29 }
  0x2a   : > { %1328 = vrot.lane.b32.xlu0 %v1685_v10, %s1571_s28  ;;  %s1591_s28 = smov 111  }
  0x2f   : > { %1348 = vrot.lane.b32.xlu1 %v1685_v10, %s1573_s30 }
  0x31   : > { %1353 = vrot.lane.b32.xlu2 %v1693_v13, %s1573_s30 }
  0x32   : > { %1343 = vrot.lane.b32.xlu0 %v1322_v11, %s1573_s30 }
  0x37   : > { %1363 = vrot.lane.b32.xlu1 %v1685_v10, %s1574_s5 }
  0x39   : > { %1368 = vrot.lane.b32.xlu2 %v1693_v13, %s1574_s5 }
  0x3a   : > { %1358 = vrot.lane.b32.xlu0 %v1322_v11, %s1574_s5 }
  0x3f   : > { %1378 = vrot.lane.b32.xlu1 %v1685_v10, %s1575_s9 }
  0x41   : > { %449 = vrot.lane.b32.xlu2 %v1678_v8, %s1575_s9 }
  0x42   : > { %1373 = vrot.lane.b32.xlu0 %v1322_v11, %s1575_s9 }
  0x47   : > { %1388 = vrot.lane.b32.xlu1 %v1685_v10, %s1576_s10 }
  0x49   : > { %469 = vrot.lane.b32.xlu2 %v1678_v8, %s1576_s10 }
  0x4a   : > { %1383 = vrot.lane.b32.xlu0 %v1322_v11, %s1576_s10 }
  0x4f   : > { %1398 = vrot.lane.b32.xlu1 %v1685_v10, %s1577_s11 }
  0x51   : > { %489 = vrot.lane.b32.xlu2 %v1678_v8, %s1577_s11 }
  0x52   : > { %1393 = vrot.lane.b32.xlu0 %v1322_v11, %s1577_s11 }
  0x57   : > { %1408 = vrot.lane.b32.xlu1 %v1685_v10, %s1578_s12 }
  0x59   : > { %1413 = vrot.lane.b32.xlu2 %v1693_v13, %s1578_s12 }
  0x5a   : > { %1403 = vrot.lane.b32.xlu0 %v1322_v11, %s1579_s13 }
  0x5f   : > { %1423 = vrot.lane.b32.xlu1 %v1693_v13, %s1580_s15 }
  0x61   : > { %585 = vrot.lane.b32.xlu2 %v1674_v6, %s1581_s16 }
  0x62   : > { %1418 = vrot.lane.b32.xlu0 %v1685_v10, %s1580_s15 }
  0x67   : > { %589 = vrot.lane.b32.xlu1 %v1678_v8, %s1581_s16 }
  0x69   : > { %1428 = vrot.lane.b32.xlu2 %v1685_v10, %s1582_s18 }
  0x6a   : > { %587 = vrot.lane.b32.xlu0 %v1676_v7, %s1581_s16 }
  0x6f   : > { %830 = vrot.lane.b32.xlu1 %v1674_v6, %s1583_s19 }
  0x71   : > { %832 = vrot.lane.b32.xlu2 %v1676_v7, %s1583_s19 }
  0x72   : > { %1433 = vrot.lane.b32.xlu0 %v1693_v13, %s1582_s18 }
  0x77   : > { %836 = vrot.lane.b32.xlu1 %v618_v12, %s1583_s19 }
  0x79   : > { %847 = vrot.lane.b32.xlu2 %v618_v12, %s1581_s16 }
  0x7a   : > { %834 = vrot.lane.b32.xlu0 %v1678_v8, %s1583_s19 }
  0x7b   : > { %v1732_v14 = vpop.permute.xlu2 %1338 }
  0x7c   : > { %v1341_v15 = vunpack.i.h.bf16 %v1732_v14  ;;  %v1340_v35 = vunpack.i.l.bf16 %v1732_v14 }
  0x7e   : > { %v394_v52 = vsel %vm391_vm1, %v1340_v35, %v1341_v15 }
  0x7f   : > { %605 = vrot.lane.b32.xlu1 %v1676_v7, %s1584_s21 }
  0x81   : > { %607 = vrot.lane.b32.xlu2 %v1678_v8, %s1584_s21 }
  0x82   : > { %603 = vrot.lane.b32.xlu0 %v1674_v6, %s1584_s21 }
  0x83   : > { %v390_v16 = vpop.permute.xlu2 %389 }
  0x84   : > { %v1742_v17 = vsel %vm391_vm1, %v1341_v15, %v390_v16 }
  0x87   : > { %1443 = vrot.lane.b32.xlu1 %v1693_v13, %s1585_s22 }
  0x89   : > { %851 = vrot.lane.b32.xlu2 %v618_v12, %s1584_s21 }
  0x8a   : > { %1438 = vrot.lane.b32.xlu0 %v1685_v10, %s1585_s22 }
  0x8b   : > { %v1354_v18 = vpop.permute.xlu2 %1353 }
  0x8c   : > { %v1356_v19 = vunpack.i.h.bf16 %v1354_v18  ;;  %v1355_v20 = vunpack.i.l.bf16 %v1354_v18 }
  0x8e   : > { %v738_v25 = vsel %vm411_vm5, %v1355_v20, %v1356_v19 }
  0x8f   : > { %1453 = vrot.lane.b32.xlu1 %v1693_v13, %s1586_s23 }
  0x91   : > { %v370_v21 = vpop.permute.xlu1 %369  ;;  %744 = vrot.lane.b32.xlu2 %v1672_v5, %s1578_s12 }
  0x92   : > { %v664_v22 = vsel %vm659_vm2, %v1678_v8, %v370_v21  ;;  %1448 = vrot.lane.b32.xlu0 %v1685_v10, %s1586_s23 }
  0x93   : > { %v670_v23 = vsel %vm665_vm3, %v664_v22, %v390_v16  ;;  %v1369_v24 = vpop.permute.xlu2 %1368 }
  0x94   : > { %v1371_v26 = vunpack.i.h.bf16 %v1369_v24  ;;  %v1759_v27 = vunpack.i.l.bf16 %v1369_v24  ;;  %v1324_v28 = vpop.permute.xlu0 %1323  ;;  %v676_v29 = vsel %vm671_vm4, %v670_v23, %v1355_v20 }
  0x95   : > { %v1326_v30 = vunpack.i.h.bf16 %v1324_v28  ;;  %v1325_v31 = vunpack.i.l.bf16 %v1324_v28 }
  0x96   : > { %v742_v32 = vsel %vm431_vm6, %v1759_v27, %v1371_v26  ;;  %v682_v33 = vsel %vm677_vm7, %v676_v29, %v1759_v27 }
  0x97   : > { %v1767_v34 = vsel %vm659_vm2, %v738_v25, %v742_v32  ;;  %1463 = vrot.lane.b32.xlu1 %v1693_v13, %s1587_s24  ;;  %v372_v36 = vsel %vm371_vm8, %v1325_v31, %v1326_v30 }
  0x98   : > { %v660_v41 = vsel %vm659_vm2, %v1680_v9, %v372_v36 }
  0x99   : > { %763 = vrot.lane.b32.xlu2 %v1672_v5, %s1580_s15  ;;  %v1334_v37 = vpop.permute.xlu1 %1333 }
  0x9a   : > { %v1336_v38 = vunpack.i.h.bf16 %v1334_v37  ;;  %v1335_v39 = vunpack.i.l.bf16 %v1334_v37  ;;  %1458 = vrot.lane.b32.xlu0 %v1685_v10, %s1587_s24 }
  0x9b   : > { %v1777_v40 = vpop.permute.xlu2 %449 }
  0x9c   : > { %v393_v42 = vsel %vm391_vm1, %v1336_v38, %v1340_v35  ;;  %v392_v43 = vsel %vm391_vm1, %v1335_v39, %v1336_v38  ;;  %v688_v44 = vsel %vm683_vm9, %v682_v33, %v1777_v40  ;;  %v1329_v45 = vpop.permute.xlu0 %1328  ;;  %vm773_vm1 = vcmask 310272  }
  0x9d   : > { %v666_v46 = vsel %vm665_vm3, %v660_v41, %v392_v43  ;;  %v1331_v47 = vunpack.i.h.bf16 %v1329_v45  ;;  %v1330_v48 = vunpack.i.l.bf16 %v1329_v45  ;;  %v1487_v43 = vpack.i.bf16 %v1680_v9, %v1678_v8 }
  0x9f   : > { %v375_v49 = vsel %vm371_vm8, %v1331_v47, %v370_v21  ;;  %v373_v50 = vsel %vm371_vm8, %v1326_v30, %v1330_v48  ;;  %v374_v51 = vsel %vm371_vm8, %v1330_v48, %v1331_v47  ;;  %782 = vrot.lane.b32.xlu1 %v1672_v5, %s1582_s18  ;;  %vm838_vm8 = vcmask 154624  }
  0xa0   : > { %v663_v53 = vsel %vm659_vm2, %v1676_v7, %v375_v49  ;;  %v661_v54 = vsel %vm659_vm2, %v1672_v5, %v373_v50  ;;  %v662_v55 = vsel %vm659_vm2, %v1674_v6, %v374_v51 }
  0xa1   : > { %828 = vrot.lane.b32.xlu2 %v1672_v5, %s1583_s19  ;;  %v1349_v56 = vpop.permute.xlu1 %1348  ;;  %v668_v57 = vsel %vm665_vm3, %v662_v55, %v394_v52  ;;  %v669_v58 = vsel %vm665_vm3, %v663_v53, %v1742_v17  ;;  %v667_v59 = vsel %vm665_vm3, %v661_v54, %v393_v42 }
  0xa2   : > { %v1351_v60 = vunpack.i.h.bf16 %v1349_v56  ;;  %v1350_v61 = vunpack.i.l.bf16 %v1349_v56  ;;  %583 = vrot.lane.b32.xlu0 %v1672_v5, %s1581_s16 }
  0xa3   : > { %v1806_v62 = vpop.permute.xlu2 %469 }
  0xa4   : > { %v415_v63 = vsel %vm411_vm5, %v1351_v60, %v1355_v20  ;;  %v414_v0 = vsel %vm411_vm5, %v1350_v61, %v1351_v60  ;;  %v694_v1 = vsel %vm689_vm10, %v688_v44, %v1806_v62  ;;  %v1344_v2 = vpop.permute.xlu0 %1343 }
  0xa5   : > { %v674_v6 = vsel %vm671_vm4, %v668_v57, %v414_v0  ;;  %v675_v7 = vsel %vm671_vm4, %v669_v58, %v415_v63  ;;  %v1346_v11 = vunpack.i.h.bf16 %v1344_v2  ;;  %v1345_v12 = vunpack.i.l.bf16 %v1344_v2 }
  0xa7   : > { %v413_v14 = vsel %vm411_vm5, %v1346_v11, %v1350_v61  ;;  %v412_v15 = vsel %vm411_vm5, %v1345_v12, %v1346_v11  ;;  %801 = vrot.lane.b32.xlu1 %v1672_v5, %s1585_s22  ;;  %vm609_vm5 = vcmask 138240  }
  0xa8   : > { %v672_v16 = vsel %vm671_vm4, %v666_v46, %v412_v15  ;;  %v673_v17 = vsel %vm671_vm4, %v667_v59, %v413_v14 }
  0xa9   : > { %1468 = vrot.lane.b32.xlu2 %v1467_v4, %s1586_s23  ;;  %v1364_v18 = vpop.permute.xlu1 %1363 }
  0xaa   : > { %v1366_v19 = vunpack.i.h.bf16 %v1364_v18  ;;  %v1365_v20 = vunpack.i.l.bf16 %v1364_v18  ;;  %601 = vrot.lane.b32.xlu0 %v1672_v5, %s1584_s21 }
  0xab   : > { %v1825_v21 = vpop.permute.xlu2 %489 }
  0xac   : > { %v435_v22 = vsel %vm431_vm6, %v1366_v19, %v1759_v27  ;;  %v434_v23 = vsel %vm431_vm6, %v1365_v20, %v1366_v19  ;;  %v1832_v24 = vsel %vm695_vm11, %v694_v1, %v1825_v21  ;;  %v1359_v25 = vpop.permute.xlu0 %1358 }
  0xad   : > { %v680_v26 = vsel %vm677_vm7, %v674_v6, %v434_v23  ;;  %v681_v28 = vsel %vm677_vm7, %v675_v7, %v435_v22  ;;  %v1837_v29 = vsel %vm659_vm2, %v414_v0, %v434_v23  ;;  %v1840_v30 = vsel %vm659_vm2, %v415_v63, %v435_v22 }
  0xae   : > { %v1361_v31 = vunpack.i.h.bf16 %v1359_v25  ;;  %v1360_v32 = vunpack.i.l.bf16 %v1359_v25 }
  0xaf   : > { %1478 = vrot.lane.b32.xlu1 %v1685_v10, %s1579_s13 }
  0xb0   : > { %v433_v27 = vsel %vm431_vm6, %v1361_v31, %v1365_v20  ;;  %v432_v33 = vsel %vm431_vm6, %v1360_v32, %v1361_v31  ;;  %vm591_vm6 = vcmask 146432  }
  0xb1   : > { %v678_v35 = vsel %vm677_vm7, %v672_v16, %v432_v33  ;;  %509 = vrot.lane.b32.xlu2 %v1678_v8, %s1579_s13  ;;  %v1379_v36 = vpop.permute.xlu1 %1378  ;;  %v1850_v37 = vsel %vm659_vm2, %v413_v14, %v433_v27  ;;  %v679_v38 = vsel %vm677_vm7, %v673_v17, %v433_v27 }
  0xb2   : > { %v1381_v39 = vunpack.i.h.bf16 %v1379_v36  ;;  %v1380_v41 = vunpack.i.l.bf16 %v1379_v36  ;;  %1473 = vrot.lane.b32.xlu0 %v1467_v4, %s1587_s24 }
  0xb3   : > { %v1414_v42 = vpop.permute.xlu2 %1413 }
  0xb4   : > { %v455_v44 = vsel %vm451_vm12, %v1381_v39, %v1777_v40  ;;  %v454_v45 = vsel %vm451_vm12, %v1380_v41, %v1381_v39  ;;  %v1416_v46 = vunpack.i.h.bf16 %v1414_v42  ;;  %v1415_v47 = vunpack.i.l.bf16 %v1414_v42  ;;  %v1374_v48 = vpop.permute.xlu0 %1373 }
  0xb5   : > { %v686_v49 = vsel %vm683_vm9, %v680_v26, %v454_v45  ;;  %v687_v50 = vsel %vm683_vm9, %v681_v28, %v455_v44  ;;  %v1376_v51 = vunpack.i.h.bf16 %v1374_v48  ;;  %v1375_v52 = vunpack.i.l.bf16 %v1374_v48 }
  0xb6   : > { %v758_v53 = vsel %vm754_vm13, %v1415_v47, %v1416_v46 }
  0xb7   : > { %v453_v54 = vsel %vm451_vm12, %v1376_v51, %v1380_v41  ;;  %v452_v8 = vsel %vm451_vm12, %v1375_v52, %v1376_v51  ;;  %1488 = vrot.lane.b32.xlu1 %v1487_v43, %s1588_s25  ;;  %v862_v40 = vsel %vm665_vm3, %v1767_v34, %v758_v53  ;;  %vm2296_vm12 = vcmask 867328  }
  0xb8   : > { %v684_v55 = vsel %vm683_vm9, %v678_v35, %v452_v8  ;;  %v685_v56 = vsel %vm683_vm9, %v679_v38, %v453_v54 }
  0xb9   : > { %v1389_v57 = vpop.permute.xlu1 %1388 }
  0xba   : > { %v1391_v58 = vunpack.i.h.bf16 %v1389_v57  ;;  %v1390_v59 = vunpack.i.l.bf16 %v1389_v57  ;;  %1483 = vrot.lane.b32.xlu0 %v1685_v10, %s1588_s25 }
  0xbb   : > { %v1871_v60 = vpop.permute.xlu2 %585 }
  0xbc   : > { %v475_v61 = vsel %vm471_vm14, %v1391_v58, %v1806_v62  ;;  %v474_v63 = vsel %vm471_vm14, %v1390_v59, %v1391_v58  ;;  %v1384_v0 = vpop.permute.xlu0 %1383 }
  0xbd   : > { %v1386_v1 = vunpack.i.h.bf16 %v1384_v0  ;;  %v1385_v2 = vunpack.i.l.bf16 %v1384_v0  ;;  %v692_v34 = vsel %vm689_vm10, %v686_v49, %v474_v63  ;;  %v693_v4 = vsel %vm689_vm10, %v687_v50, %v475_v61 }
  0xbf   : > { %v472_v6 = vsel %vm471_vm14, %v1385_v2, %v1386_v1  ;;  %v473_v7 = vsel %vm471_vm14, %v1386_v1, %v1390_v59  ;;  %vm792_vm14 = vcmask 302080  }
  0xc0   : > { %v690_v11 = vsel %vm689_vm10, %v684_v55, %v472_v6  ;;  %v691_v12 = vsel %vm689_vm10, %v685_v56, %v473_v7 }
  0xc1   : > { %v1399_v14 = vpop.permute.xlu1 %1398 }
  0xc2   : > { %v1401_v15 = vunpack.i.h.bf16 %v1399_v14  ;;  %v1400_v16 = vunpack.i.l.bf16 %v1399_v14 }
  0xc3   : > { %v1878_v17 = vpop.permute.xlu2 %1428 }
  0xc4   : > { %v495_v62 = vsel %vm491_vm15, %v1401_v15, %v1825_v21  ;;  %v494_v18 = vsel %vm491_vm15, %v1400_v16, %v1401_v15  ;;  %v1394_v19 = vpop.permute.xlu0 %1393 }
  0xc5   : > { %v1396_v20 = vunpack.i.h.bf16 %v1394_v19  ;;  %v1395_v22 = vunpack.i.l.bf16 %v1394_v19  ;;  %v1882_v23 = vsel %vm695_vm11, %v692_v34, %v494_v18  ;;  %v1885_v25 = vsel %vm695_vm11, %v693_v4, %v495_v62 }
  0xc7   : > { %v492_v26 = vsel %vm491_vm15, %v1395_v22, %v1396_v20  ;;  %v493_v28 = vsel %vm491_vm15, %v1396_v20, %v1400_v16  ;;  %vm531_vm15 = vcmask 228352  }
  0xc8   : > { %v1888_v31 = vsel %vm695_vm11, %v690_v11, %v492_v26  ;;  %v1891_v32 = vsel %vm695_vm11, %v691_v12, %v493_v28 }
  0xc9   : > { %v1893_v27 = vpop.permute.xlu1 %1408 }
  0xca   : > { %v1411_v21 = vunpack.i.h.bf16 %v1893_v27  ;;  %v1410_v62 = vunpack.i.l.bf16 %v1893_v27 }
  0xcb   : > { %v833_v33 = vpop.permute.xlu2 %832 }
  0xcc   : > { %v1896_v35 = vpop.permute.xlu0 %1403  ;;  %v757_v36 = vsel %vm754_vm13, %v1411_v21, %v1415_v47 }
  0xcd   : > { %v1903_v38 = vsel %vm665_vm3, %v1840_v30, %v757_v36  ;;  %v2297_v19 = vunpack.i.h.bf16 %v1896_v35  ;;  %v1405_v20 = vunpack.i.l.bf16 %v1896_v35 }
  0xd1   : > { %v1905_v39 = vpop.permute.xlu1 %1423 }
  0xd2   : > { %v1426_v41 = vunpack.i.h.bf16 %v1905_v39  ;;  %v1425_v42 = vunpack.i.l.bf16 %v1905_v39 }
  0xd3   : > { %v848_v43 = vpop.permute.xlu2 %847 }
  0xd4   : > { %v1909_v44 = vpop.permute.xlu0 %1418  ;;  %v777_v45 = vsel %vm773_vm1, %v1425_v42, %v1426_v41 }
  0xd5   : > { %v1915_v46 = vsel %vm671_vm4, %v862_v40, %v777_v45  ;;  %v1421_v22 = vunpack.i.h.bf16 %v1909_v44  ;;  %v1420_v26 = vunpack.i.l.bf16 %v1909_v44  ;;  %v1430_v45 = vunpack.i.l.bf16 %v1878_v17 }
  0xd9   : > { %v1917_v47 = vpop.permute.xlu1 %589 }
  0xda   : > { %v849_v40 = vsel %vm591_vm6, %v1917_v47, %v848_v43  ;;  %v1431_v43 = vunpack.i.h.bf16 %v1878_v17 }
  0xdb   : > { %v1919_v30 = vpop.permute.xlu2 %607 }
  0xdc   : > { %v588_v48 = vpop.permute.xlu0 %587 }
  0xdd   : > { %v1938_v59 = vsel %vm591_vm6, %v588_v48, %v1917_v47  ;;  %v1954_v4 = vsel %vm591_vm6, %v1871_v60, %v588_v48  ;;  %v756_v48 = vsel %vm754_vm13, %v1410_v62, %v1411_v21 }
  0xe1   : > { %v1921_v49 = vpop.permute.xlu1 %830 }
  0xe2   : > { %v840_v63 = vsel %vm838_vm8, %v1921_v49, %v833_v33 }
  0xe3   : > { %v852_v50 = vpop.permute.xlu2 %851  ;;  %v884_v11 = vsel %vm659_vm2, %v840_v63, %v1954_v4 }
  0xe4   : > { %v1923_v51 = vpop.permute.xlu0 %1433  ;;  %v853_v54 = vsel %vm609_vm5, %v1919_v30, %v852_v50  ;;  %v512_v50 = vsel %vm2296_vm12, %v1405_v20, %v2297_v19  ;;  %vm551_vm12 = vcmask 220160  }
  0xe9   : > { %v837_v52 = vpop.permute.xlu1 %836 }
  0xeb   : > { %v1925_v53 = vpop.permute.xlu2 %744 }
  0xec   : > { %v835_v8 = vpop.permute.xlu0 %834 }
  0xed   : > { %v842_v55 = vsel %vm838_vm8, %v835_v8, %v837_v52  ;;  %v841_v57 = vsel %vm838_vm8, %v833_v33, %v835_v8  ;;  %v1435_v52 = vunpack.i.l.bf16 %v1923_v51 }
  0xee   : > { %v886_v56 = vsel %vm659_vm2, %v842_v55, %v849_v40  ;;  %v885_v1 = vsel %vm659_vm2, %v841_v57, %v1938_v59  ;;  %v776_v57 = vsel %vm773_vm1, %v1421_v22, %v1425_v42 }
  0xef   : > { %v890_v58 = vsel %vm665_vm3, %v886_v56, %v853_v54  ;;  %v775_v54 = vsel %vm773_vm1, %v1420_v26, %v1421_v22  ;;  %v860_v56 = vsel %vm665_vm3, %v1837_v29, %v756_v48  ;;  %v795_v42 = vsel %vm792_vm14, %v1431_v43, %v1435_v52 }
  0xf0   : > { %913 = vrot.lane.b32.xlu1 %v890_v58, %s1584_s21  ;;  %v864_v63 = vsel %vm671_vm4, %v860_v56, %v775_v54 }
  0xf1   : > { %v606_v61 = vpop.permute.xlu1 %605 }
  0xf2   : > { %v1944_v0 = vsel %vm609_vm5, %v606_v61, %v1919_v30 }
  0xf3   : > { %v1948_v2 = vpop.permute.xlu2 %763  ;;  %v889_v34 = vsel %vm665_vm3, %v885_v1, %v1944_v0 }
  0xf4   : > { %v1956_v6 = vpop.permute.xlu0 %603  ;;  %911 = vrot.lane.b32.xlu0 %v889_v34, %s1584_s21 }
  0xf5   : > { %v1961_v7 = vsel %vm609_vm5, %v1956_v6, %v606_v61 }
  0xf6   : > { %v888_v12 = vsel %vm665_vm3, %v884_v11, %v1961_v7  ;;  %v794_v11 = vsel %vm792_vm14, %v1430_v45, %v1431_v43 }
  0xf7   : > { %909 = vrot.lane.b32.xlu2 %v888_v12, %s1584_s21  ;;  %v865_v12 = vsel %vm671_vm4, %v1903_v38, %v776_v57  ;;  %v868_v38 = vsel %vm677_vm7, %v864_v63, %v794_v11 }
  0xf8   : > { %v869_v56 = vsel %vm677_vm7, %v865_v12, %v795_v42 }
  0xf9   : > { %v1968_v14 = vpop.permute.xlu1 %1443 }
  0xfa   : > { %v1445_v1 = vunpack.i.l.bf16 %v1968_v14 }
  0xfb   : > { %v1970_v15 = vpop.permute.xlu2 %828 }
  0xfc   : > { %v1972_v16 = vpop.permute.xlu0 %1438  ;;  %1498 = vrot.lane.b32.xlu0 %v1693_v13, %s1589_s26 }
  0xfd   : > { %v1441_v40 = vunpack.i.h.bf16 %v1972_v16  ;;  %v1440_v55 = vunpack.i.l.bf16 %v1972_v16 }
  0xff   : > { %1493 = vrot.lane.b32.xlu2 %v1685_v10, %s1589_s26  ;;  %v814_v16 = vsel %vm811_vm0, %v1441_v40, %v1445_v1  ;;  %v813_v20 = vsel %vm811_vm0, %v1440_v55, %v1441_v40 }
 0x100   : > { %v872_v57 = vsel %vm683_vm9, %v868_v38, %v813_v20  ;;  %v1446_v38 = vunpack.i.h.bf16 %v1968_v14 }
 0x101   : > { %v1979_v18 = vpop.permute.xlu1 %1453 }
 0x102   : > { %v1455_v29 = vunpack.i.l.bf16 %v1979_v18 }
 0x103   : > { %v1985_v28 = vpop.permute.xlu2 %1468 }
 0x104   : > { %v1471_v33 = vunpack.i.h.bf16 %v1985_v28  ;;  %v2298_v36 = vunpack.i.l.bf16 %v1985_v28  ;;  %v1989_v41 = vpop.permute.xlu0 %1448  ;;  %563 = vrot.lane.b32.xlu0 %v1672_v5, %s1588_s25 }
 0x105   : > { %v1451_v58 = vunpack.i.h.bf16 %v1989_v41  ;;  %v2299_v61 = vunpack.i.l.bf16 %v1989_v41 }
 0x106   : > { %v532_v8 = vsel %vm531_vm15, %v1471_v33, %v2298_v36 }
 0x107   : > { %v2013_v21 = vsel %vm659_vm2, %v512_v50, %v532_v8  ;;  %v535_v33 = vsel %vm531_vm15, %v1451_v58, %v1455_v29  ;;  %v534_v48 = vsel %vm531_vm15, %v2299_v61, %v1451_v58  ;;  %v873_v58 = vsel %vm683_vm9, %v869_v56, %v814_v16 }
 0x108   : > { %v876_v63 = vsel %vm689_vm10, %v872_v57, %v534_v48  ;;  %v877_v11 = vsel %vm689_vm10, %v873_v58, %v535_v33  ;;  %v1436_v16 = vunpack.i.h.bf16 %v1923_v51  ;;  %v1456_v51 = vunpack.i.h.bf16 %v1979_v18 }
 0x109   : > { %v2024_v34 = vpop.permute.xlu1 %1463  ;;  %v2303_v58 = vunpack.i.h.bf16 %v1896_v35 }
 0x10a   : > { %v1465_v39 = vunpack.i.l.bf16 %v2024_v34  ;;  %v1466_v27 = vunpack.i.h.bf16 %v2024_v34 }
 0x10b   : > { %v510_v22 = vpop.permute.xlu2 %509 }
 0x10c   : > { %v705_v50 = vsel %vm659_vm2, %v510_v22, %v1455_v29  ;;  %v2041_v54 = vpop.permute.xlu0 %1458  ;;  %581 = vrot.lane.b32.xlu0 %v1680_v9, %s1581_s16  ;;  %v826_v56 = vsel %vm551_vm12, %v1465_v39, %v1466_v27 }
 0x10d   : > { %v2047_v43 = vsel %vm665_vm3, %v705_v50, %v1465_v39  ;;  %v1461_v8 = vunpack.i.h.bf16 %v2041_v54  ;;  %v1460_v40 = vunpack.i.l.bf16 %v2041_v54 }
 0x10f   : > { %v555_v19 = vsel %vm551_vm12, %v1461_v8, %v1465_v39  ;;  %v554_v9 = vsel %vm551_vm12, %v1460_v40, %v1461_v8  ;;  %v796_v8 = vsel %vm792_vm14, %v1435_v52, %v1436_v16 }
 0x110   : > { %v880_v50 = vsel %vm695_vm11, %v876_v63, %v554_v9  ;;  %v881_v36 = vsel %vm695_vm11, %v877_v11, %v555_v19 }
 0x111   : > { %v783_v54 = vpop.permute.xlu1 %782  ;;  %v1502_v61 = vpack.i.bf16 %v881_v36, %v880_v50  ;;  %v755_v36 = vsel %vm754_vm13, %v1925_v53, %v1410_v62 }
 0x112   : > { %v859_v53 = vsel %vm665_vm3, %v1850_v37, %v755_v36  ;;  %v815_v37 = vsel %vm811_vm0, %v1445_v1, %v1446_v38 }
 0x113   : > { %1503 = vrot.lane.b32.xlu1 %v1502_v61, %s1584_s21  ;;  %v774_v61 = vsel %vm773_vm1, %v1948_v2, %v1420_v26  ;;  %v839_v2 = vsel %vm838_vm8, %v1970_v15, %v1921_v49  ;;  %v870_v26 = vsel %vm677_vm7, %v1915_v46, %v796_v8  ;;  %v822_v49 = vsel %vm531_vm15, %v1455_v29, %v1456_v51 }
 0x114   : > { %v2061_v42 = vpop.permute.xlu0 %583  ;;  %639 = vrot.lane.b32.xlu0 %v1672_v5, %s1590_s4  ;;  %v863_v14 = vsel %vm671_vm4, %v859_v53, %v774_v61  ;;  %v2300_v15 = vunpack.i.l.bf16 %v1989_v41  ;;  %v874_v16 = vsel %vm683_vm9, %v870_v26, %v815_v37  ;;  %vm649_vm8 = vcmask 64512  }
 0x119   : > { %v802_v12 = vpop.permute.xlu1 %801 }
 0x11a   : > { %v812_v62 = vsel %vm811_vm0, %v802_v12, %v1440_v55  ;;  %vm2302_vm0 = vcmask 867328  }
 0x11b   : > { %1513 = vrot.lane.b32.xlu1 %v1685_v10, %s1590_s4  ;;  %v2083_v10 = vsel %vm591_vm6, %v2061_v42, %v1871_v60  ;;  %v793_v60 = vsel %vm792_vm14, %v783_v54, %v1430_v45  ;;  %v2301_v45 = vunpack.i.l.bf16 %v1985_v28  ;;  %vm2304_vm13 = vmmov %vm2302_vm0 }
 0x11c   : > { %v2068_v20 = vpop.permute.xlu0 %601  ;;  %v867_v57 = vsel %vm677_vm7, %v863_v14, %v793_v60  ;;  %vm2305_vm1 = vmmov %vm2302_vm0 }
 0x11d   : > { %v2090_v44 = vsel %vm609_vm5, %v2068_v20, %v1956_v6  ;;  %v883_v6 = vsel %vm659_vm2, %v839_v2, %v2083_v10  ;;  %v533_v55 = vsel %vm531_vm15, %v2301_v45, %v2300_v15  ;;  %v871_v46 = vsel %vm683_vm9, %v867_v57, %v812_v62 }
 0x11e   : > { %v887_v17 = vsel %vm665_vm3, %v883_v6, %v2090_v44  ;;  %v875_v35 = vsel %vm689_vm10, %v871_v46, %v533_v55 }
 0x121   : > { %v1479_v18 = vpop.permute.xlu1 %1478 }
 0x122   : > { %v1481_v52 = vunpack.i.h.bf16 %v1479_v18  ;;  %v1480_v34 = vunpack.i.l.bf16 %v1479_v18 }
 0x123   : > { %907 = vrot.lane.b32.xlu1 %v887_v17, %s1584_s21 }
 0x124   : > { %v515_v1 = vsel %vm2302_vm0, %v1481_v52, %v510_v22  ;;  %v513_v29 = vsel %vm2304_vm13, %v2303_v58, %v1480_v34  ;;  %v514_v41 = vsel %vm2305_vm1, %v1480_v34, %v1481_v52  ;;  %v1474_v63 = vpop.permute.xlu0 %1473 }
 0x125   : > { %v703_v28 = vsel %vm659_vm2, %v514_v41, %v534_v48  ;;  %v704_v11 = vsel %vm659_vm2, %v515_v1, %v535_v33  ;;  %v1476_v39 = vunpack.i.h.bf16 %v1474_v63  ;;  %v1475_v50 = vunpack.i.l.bf16 %v1474_v63 }
 0x126   : > { %v708_v54 = vsel %vm665_vm3, %v703_v28, %v554_v9  ;;  %v709_v12 = vsel %vm665_vm3, %v704_v11, %v555_v19  ;;  %v702_v22 = vsel %vm659_vm2, %v513_v29, %v533_v55  ;;  %v878_v48 = vsel %vm689_vm10, %v874_v16, %v822_v49 }
 0x127   : > { %v552_v36 = vsel %vm551_vm12, %v1476_v39, %v1475_v50  ;;  %v553_v61 = vsel %vm551_vm12, %v1475_v50, %v1460_v40  ;;  %v882_v38 = vsel %vm695_vm11, %v878_v48, %v826_v56  ;;  %vm571_vm2 = vcmask 211968  }
 0x128   : > { %v879_v33 = vsel %vm695_vm11, %v875_v35, %v553_v61  ;;  %v706_v9 = vsel %vm665_vm3, %v2013_v21, %v552_v36  ;;  %v707_v19 = vsel %vm665_vm3, %v702_v22, %v553_v61  ;;  %vm629_vm3 = vcmask 130048  }
 0x129   : > { %v1507_v8 = vpack.i.bf16 %v879_v33, %v882_v38  ;;  %v1489_v51 = vpop.permute.xlu1 %1488 }
 0x12a   : > { %v1490_v53 = vunpack.i.l.bf16 %v1489_v51  ;;  %v1491_v34 = vunpack.i.h.bf16 %v1489_v51 }
 0x12b   : > { %1508 = vrot.lane.b32.xlu2 %v1507_v8, %s1584_s21 }
 0x12c   : > { %v1484_v27 = vpop.permute.xlu0 %1483  ;;  %v715_v45 = vsel %vm671_vm4, %v2047_v43, %v1490_v53 }
 0x12d   : > { %v1486_v2 = vunpack.i.h.bf16 %v1484_v27  ;;  %v1485_v40 = vunpack.i.l.bf16 %v1484_v27  ;;  %v720_v1 = vsel %vm677_vm7, %v715_v45, %v1917_v47 }
 0x12e   : > { %v725_v43 = vsel %vm683_vm9, %v720_v1, %v1919_v30 }
 0x12f   : > { %v574_v60 = vsel %vm571_vm2, %v1485_v40, %v1486_v2  ;;  %v575_v14 = vsel %vm571_vm2, %v1486_v2, %v1490_v53 }
 0x130   : > { %v713_v62 = vsel %vm671_vm4, %v708_v54, %v574_v60  ;;  %v714_v18 = vsel %vm671_vm4, %v709_v12, %v575_v14 }
 0x131   : > { %v718_v21 = vsel %vm677_vm7, %v713_v62, %v1954_v4  ;;  %v719_v6 = vsel %vm677_vm7, %v714_v18, %v1938_v59 }
 0x132   : > { %v723_v26 = vsel %vm683_vm9, %v718_v21, %v1961_v7  ;;  %v724_v37 = vsel %vm683_vm9, %v719_v6, %v1944_v0 }
 0x133   : > { %1518 = vrot.lane.b32.xlu2 %v1693_v13, %s1590_s4 }
 0x13b   : > { %619 = vrot.lane.b32.xlu2 %v1672_v5, %s1589_s26 }
 0x151   : > { %v2162_v7 = vpop.permute.xlu2 %909 }
 0x159   : > { %v1494_v49 = vpop.permute.xlu2 %1493 }
 0x15a   : > { %v1496_v55 = vunpack.i.h.bf16 %v1494_v49  ;;  %v1495_v56 = vunpack.i.l.bf16 %v1494_v49 }
 0x15c   : > { %v631_v58 = vsel %vm629_vm3, %v1495_v56, %v1496_v55 }
 0x15d   : > { %v728_v22 = vsel %vm689_vm10, %v723_v26, %v631_v58 }
 0x162   : > { %v2156_v52 = vpop.permute.xlu1 %913 }
 0x163   : > { %976 = vrot.lane.b32.xlu1 %v2156_v52, %s1591_s28 }
 0x166   : > { %v2160_v4 = vpop.permute.xlu0 %911 }
 0x16e   : > { %v1499_v59 = vpop.permute.xlu0 %1498 }
 0x16f   : > { %v1501_v57 = vunpack.i.h.bf16 %v1499_v59  ;;  %v1500_v46 = vunpack.i.l.bf16 %v1499_v59 }
 0x171   : > { %v632_v29 = vsel %vm629_vm3, %v1496_v55, %v1500_v46  ;;  %v633_v41 = vsel %vm629_vm3, %v1500_v46, %v1501_v57  ;;  %v922_v55 = vld [vmem:[%s2289_s3] sm:$0xff]  ;;  %v1592_v57 = vmov 0  }
 0x172   : > { %v729_v35 = vsel %vm689_vm10, %v724_v37, %v632_v29  ;;  %v730_v36 = vsel %vm689_vm10, %v725_v43, %v633_v41  ;;  %1557 = vset.pattern.permute.xlu2 %v1592_v57  ;;  %1558 = vset.pattern.permute.xlu0 %v1592_v57 }
 0x176   : > { %v564_v17 = vpop.permute.xlu0 %563 }
 0x177   : > { %v572_v0 = vsel %vm571_vm2, %v1491_v34, %v564_v17  ;;  %v573_v28 = vsel %vm571_vm2, %v564_v17, %v1485_v40  ;;  %v920_v17 = vsel %vm609_vm5, %v2160_v4, %v2156_v52 }
 0x178   : > { %v711_v13 = vsel %vm671_vm4, %v706_v9, %v572_v0  ;;  %v712_v61 = vsel %vm671_vm4, %v707_v19, %v573_v28 }
 0x179   : > { %v717_v19 = vsel %vm677_vm7, %v712_v61, %v2083_v10 }
 0x17a   : > { %v722_v62 = vsel %vm683_vm9, %v717_v19, %v2090_v44 }
 0x17e   : > { %v582_v63 = vpop.permute.xlu0 %581 }
 0x17f   : > { %v592_v47 = vsel %vm591_vm6, %v582_v63, %v2061_v42 }
 0x180   : > { %v716_v8 = vsel %vm677_vm7, %v711_v13, %v592_v47  ;;  %vm978_vm7 = vcmask 908288  }
 0x181   : > { %v721_v40 = vsel %vm683_vm9, %v716_v8, %v2068_v20 }
 0x185   : > { %v2166_v15 = vpop.permute.xlu1 %1503  ;;  %v2168_v5 = vpop.permute.xlu2 %1508 }
 0x186   : > { %v640_v53 = vpop.permute.xlu0 %639  ;;  %v1510_v14 = vunpack.i.l.bf16 %v2168_v5  ;;  %v1506_v59 = vunpack.i.h.bf16 %v2166_v15  ;;  %v1505_v34 = vunpack.i.l.bf16 %v2166_v15 }
 0x188   : > { %v1537_v44 = vpack.i.bf16 %v1882_v23, %v1510_v14  ;;  %v916_v23 = vsel %vm609_vm5, %v1505_v34, %v1506_v59  ;;  %v917_v0 = vsel %vm609_vm5, %v1506_v59, %v1510_v14 }
 0x189   : > { %v1542_v49 = vpack.i.bf16 %v917_v0, %v916_v23 }
 0x18d   : > { %v1514_v11 = vpop.permute.xlu1 %1513  ;;  %v1519_v39 = vpop.permute.xlu2 %1518 }
 0x18e   : > { %v1516_v50 = vunpack.i.h.bf16 %v1514_v11  ;;  %v1515_v54 = vunpack.i.l.bf16 %v1514_v11  ;;  %v1521_v12 = vunpack.i.h.bf16 %v1519_v39  ;;  %v1520_v16 = vunpack.i.l.bf16 %v1519_v39 }
 0x190   : > { %v651_v48 = vsel %vm649_vm8, %v1515_v54, %v1516_v50  ;;  %v652_v33 = vsel %vm649_vm8, %v1516_v50, %v1520_v16  ;;  %v653_v30 = vsel %vm649_vm8, %v1520_v16, %v1521_v12  ;;  %v650_v10 = vsel %vm649_vm8, %v640_v53, %v1515_v54 }
 0x191   : > { %v733_v38 = vsel %vm695_vm11, %v728_v22, %v651_v48  ;;  %v734_v9 = vsel %vm695_vm11, %v729_v35, %v652_v33  ;;  %v735_v42 = vsel %vm695_vm11, %v730_v36, %v653_v30 }
 0x192   : > { %v1522_v51 = vpack.i.bf16 %v734_v9, %v733_v38  ;;  %v1527_v27 = vpack.i.bf16 %v735_v42, %v1885_v25 }
 0x194   : > { %1523 = vrot.lane.b32.xlu2 %v1522_v51, %s1591_s28  ;;  %1528 = vrot.lane.b32.xlu0 %v1527_v27, %s1591_s28  ;;  %v921_v51 = vld [vmem:[%s2288_s2] sm:$0xff] }
 0x195   : > { %v908_v2 = vpop.permute.xlu1 %907  ;;  %v620_v60 = vpop.permute.xlu2 %619 }
 0x196   : > { %v630_v25 = vsel %vm629_vm3, %v620_v60, %v1495_v56  ;;  %v726_v18 = vsel %vm689_vm10, %v721_v40, %v620_v60  ;;  %968 = vrot.lane.b32.xlu1 %v908_v2, %s1591_s28  ;;  %v918_v52 = vsel %vm609_vm5, %v908_v2, %v2162_v7 }
 0x197   : > { %v727_v21 = vsel %vm689_vm10, %v722_v62, %v630_v25  ;;  %v731_v6 = vsel %vm695_vm11, %v726_v18, %v640_v53 }
 0x198   : > { %v1532_v20 = vpack.i.bf16 %v731_v6, %v1832_v24  ;;  %v732_v26 = vsel %vm695_vm11, %v727_v21, %v650_v10  ;;  %v1511_v24 = vunpack.i.h.bf16 %v2168_v5 }
 0x199   : > { %v1547_v37 = vpack.i.bf16 %v1888_v31, %v732_v26  ;;  %v919_v31 = vsel %vm609_vm5, %v2162_v7, %v2160_v4 }
 0x19a   : > { %v915_v13 = vsel %vm609_vm5, %v1511_v24, %v1505_v34 }
 0x19b   : > { %v1552_v15 = vpack.i.bf16 %v915_v13, %v1511_v24 }
 0x19c   : > { %974 = vrot.lane.b32.xlu2 %v920_v17, %s1591_s28  ;;  %1538 = vrot.lane.b32.xlu0 %v1537_v44, %s1591_s28 }
 0x19e   : > { %972 = vrot.lane.b32.xlu1 %v919_v31, %s1591_s28 }
 0x1a4   : > { %970 = vrot.lane.b32.xlu2 %v918_v52, %s1591_s28  ;;  %1543 = vrot.lane.b32.xlu0 %v1542_v49, %s1591_s28 }
 0x1a6   : > { %1553 = vrot.lane.b32.xlu1 %v1552_v15, %s1591_s28 }
 0x1ac   : > { %1533 = vrot.lane.b32.xlu2 %v1532_v20, %s1591_s28  ;;  %1548 = vrot.lane.b32.xlu0 %v1547_v37, %s1591_s28 }
 0x1ae   : > { %940 = vrot.lane.b32.xlu1 %v1891_v32, %s1591_s28 }
 0x1b4   : > { %925 = vperm.xlu2 %1557, %v922_v55  }
 0x1d5   : > { %v977_v5 = vpop.permute.xlu1 %976 }
 0x1ee   : > { %v2237_v4 = vpop.permute.xlu2 %1523 }
 0x1ef   : > { %v1526_v54 = vunpack.i.h.bf16 %v2237_v4  ;;  %v1525_v12 = vunpack.i.l.bf16 %v2237_v4 }
 0x1f1   : > { %v985_v42 = vsel %vm978_vm7, %v1525_v12, %v1526_v54 }
 0x1f6   : > { %v975_v45 = vpop.permute.xlu2 %974 }
 0x1f7   : > { %v994_v7 = vsel %vm978_vm7, %v975_v45, %v977_v5 }
 0x1f8   : > { %1282 = vmatpush.msk.msra.mxu3 %vm671_vm4, %v994_v7 }
 0x1fe   : > { %v971_v32 = vpop.permute.xlu2 %970 }
 0x206   : > { %v1529_v56 = vpop.permute.xlu0 %1528  ;;  %v1534_v11 = vpop.permute.xlu2 %1533 }
 0x207   : > { %v1531_v16 = vunpack.i.h.bf16 %v1529_v56  ;;  %v1535_v48 = vunpack.i.l.bf16 %v1534_v11  ;;  %v1530_v33 = vunpack.i.l.bf16 %v1529_v56  ;;  %v1536_v2 = vunpack.i.h.bf16 %v1534_v11 }
 0x208   : > { %v969_v46 = vpop.permute.xlu1 %968 }
 0x209   : > { %v991_v1 = vsel %vm978_vm7, %v969_v46, %v971_v32  ;;  %v986_v8 = vsel %vm978_vm7, %v1526_v54, %v1531_v16  ;;  %v982_v19 = vsel %vm978_vm7, %v1530_v33, %v1535_v48 }
 0x20a   : > { %1276 = vmatpush.msk.msra.mxu0 %vm671_vm4, %v991_v1 }
 0x20e   : > { %v1539_v58 = vpop.permute.xlu0 %1538  ;;  %v926_v59 = vpop.permute.xlu2 %925 }
 0x20f   : > { %v1540_v39 = vunpack.i.l.bf16 %v1539_v58  ;;  %v1541_v30 = vunpack.i.h.bf16 %v1539_v58 }
 0x210   : > { %v973_v29 = vpop.permute.xlu1 %972 }
 0x211   : > { %v992_v41 = vsel %vm978_vm7, %v971_v32, %v973_v29  ;;  %v993_v63 = vsel %vm978_vm7, %v973_v29, %v975_v45  ;;  %v981_v27 = vsel %vm978_vm7, %v1541_v30, %v1530_v33 }
 0x212   : > { %1278 = vmatpush.msk.msra.mxu1 %vm671_vm4, %v992_v41  ;;  %1280 = vmatpush.msk.msra.mxu2 %vm671_vm4, %v993_v63  ;;  %vm2306_vm4 = vcmp.gt.f32.partialorder %v1667_v3, 0.0 }
 0x213   : > { %v1098_v21 = vsel %vm2306_vm4, 1, %v1592_v57 }
 0x214   : > { %v1099_v6 = vrot.slane %v1098_v21, 1 }
 0x216   : > { %v1544_v28 = vpop.permute.xlu0 %1543  ;;  %vm1100_vm9 = vcmp.ne.s32.totalorder %v1099_v6, 0 }
 0x217   : > { %v1546_v43 = vunpack.i.h.bf16 %v1544_v28  ;;  %v1545_v50 = vunpack.i.l.bf16 %v1544_v28  ;;  %v1101_v20 = vsel %vm1100_vm9, 1, %v1592_v57 }
 0x218   : > { %v1554_v47 = vpop.permute.xlu1 %1553  ;;  %v1102_v26 = vperm.slane %v1101_v20, 0  ;;  %v1103_v37 = vperm.slane %v1101_v20, 1  ;;  %v1104_v44 = vperm.slane %v1101_v20, 2  ;;  %v1105_v34 = vperm.slane %v1101_v20, 3 }
 0x219   : > { %v1556_v22 = vunpack.i.h.bf16 %v1554_v47  ;;  %v1555_v35 = vunpack.i.l.bf16 %v1554_v47  ;;  %v989_v36 = vsel %vm978_vm7, %v1545_v50, %v1546_v43  ;;  %v990_v61 = vsel %vm978_vm7, %v1546_v43, %v1540_v39 }
 0x21a   : > { %1071 = vmatpush.msra.mxu2 %v989_v36  ;;  %1091 = vmatpush.msra.mxu3 %v990_v61  ;;  %vm1106_vm10 = vcmp.eq.s32.totalorder %v1102_v26, 1  ;;  %vm1107_vm11 = vcmp.eq.s32.totalorder %v1103_v37, 1  ;;  %vm1108_vm5 = vcmp.eq.s32.totalorder %v1104_v44, 1  ;;  %vm1109_vm6 = vcmp.eq.s32.totalorder %v1105_v34, 1 }
 0x21b   : > { %v987_v38 = vsel %vm978_vm7, %v1555_v35, %v1556_v22  ;;  %v988_v9 = vsel %vm978_vm7, %v1556_v22, %v1545_v50 }
 0x21c   : > { %1031 = vmatpush.msra.mxu0 %v987_v38  ;;  %1051 = vmatpush.msra.mxu1 %v988_v9 }
 0x21d   : > { %1072 = vmatpush.msra.mxu2 %v985_v42  ;;  %1092 = vmatpush.msra.mxu3 %v986_v8 }
 0x21e   : > { %v1549_v53 = vpop.permute.xlu0 %1548 }
 0x21f   : > { %1073 = vmatpush.msra.mxu2 %v981_v27  ;;  %1093 = vmatpush.msra.mxu3 %v982_v19  ;;  %v1551_v40 = vunpack.i.h.bf16 %v1549_v53  ;;  %v1550_v60 = vunpack.i.l.bf16 %v1549_v53 }
 0x220   : > { %1281 = vmatmul.msk.f32.vlgmr.msra.gmra.mxu2 %vm551_vm12, %v921_v51  ;;  %1283 = vmatmul.msk.f32.vlgmr.msra.gmra.mxu3 %vm551_vm12, %v921_v51  ;;  %v941_v14 = vpop.permute.xlu1 %940 }
 0x221   : > { %v983_v62 = vsel %vm978_vm7, %v1536_v2, %v1550_v60  ;;  %v984_v25 = vsel %vm978_vm7, %v1550_v60, %v1525_v12  ;;  %v979_v18 = vsel %vm978_vm7, %v1551_v40, %v941_v14  ;;  %v980_v10 = vsel %vm978_vm7, %v941_v14, %v1541_v30 }
 0x222   : > { %1032 = vmatpush.msra.mxu0 %v983_v62  ;;  %1052 = vmatpush.msra.mxu1 %v984_v25 }
 0x224   : > { %1033 = vmatpush.msra.mxu0 %v979_v18  ;;  %1053 = vmatpush.msra.mxu1 %v980_v10 }
 0x225   : > { %1277 = vmatmul.msk.f32.vlgmr.msra.gmra.mxu0 %vm551_vm12, %v921_v51  ;;  %1279 = vmatmul.msk.f32.vlgmr.msra.gmra.mxu1 %vm551_vm12, %v921_v51 }
 0x2a2   : > { %v1035_v17 = vpop.f32.mrf.mxu0  ;;  %v1055_v24 = vpop.f32.mrf.mxu1 }
 0x2a3   : > { %v1036_v31 = vadd.f32 %v1035_v17, %v926_v59  ;;  %v1056_v23 = vadd.f32 %v1055_v24, %v926_v59  ;;  %v1075_v3 = vpop.f32.mrf.mxu2  ;;  %v1095_v0 = vpop.f32.mrf.mxu3 }
 0x2a4   : > { %v1076_v13 = vadd.f32 %v1075_v3, %v926_v59  ;;  %v1096_v49 = vadd.f32 %v1095_v0, %v926_v59 }
 0x2a5   : > { %v1110_v52 = vsel %vm1106_vm10, %v1036_v31, 0.0  ;;  %v1111_v15 = vsel %vm1107_vm11, %v1056_v23, 0.0 }
 0x2a6   : > { %1114 = vst [vmem:[%s1654_s17] sm:$0xff] %v1110_v52  ;;  %v1124_v4 = vmul.f32 %v1110_v52, %v1110_v52  ;;  %v1118_v5 = vadd.f32 %v1111_v15, %v1110_v52  ;;  %v1125_v45 = vmul.f32 %v1111_v15, %v1111_v15  ;;  %v1112_v7 = vsel %vm1108_vm5, %v1076_v13, 0.0 }
 0x2a7   : > { %1115 = vst [vmem:[%s1654_s17 + $0x8] sm:$0xff] %v1111_v15  ;;  %v1113_v55 = vsel %vm1109_vm6, %v1096_v49, 0.0  ;;  %v1126_v56 = vmul.f32 %v1112_v7, %v1112_v7 }
 0x2a8   : > { %1116 = vst [vmem:[%s1654_s17 + $0x10] sm:$0xff] %v1112_v7  ;;  %v1119_v57 = vadd.f32 %v1118_v5, %v1112_v7  ;;  %v1128_v32 = vadd.f32 %v1125_v45, %v1124_v4  ;;  %v1127_v1 = vmul.f32 %v1113_v55, %v1113_v55 }
 0x2a9   : > { %1117 = vst [vmem:[%s1654_s17 + $0x18] sm:$0xff] %v1113_v55 }
 0x2aa   : > { %v1120_v46 = vadd.f32 %v1119_v57, %v1113_v55  ;;  %v1129_v58 = vadd.f32 %v1128_v32, %v1126_v56 }
 0x2ac   : > { %1121 = vadd.xlane.f32.xlu0 %v1120_v46  ;;  %v1130_v29 = vadd.f32 %v1129_v58, %v1127_v1 }
 0x2ae   : > { %1131 = vadd.xlane.f32.xlu1 %v1130_v29 }
 0x31f   : > { %v1122_v41 = vpop.xlane.xlu0 %1121 }
 0x320   : > { %1123 = vst [vmem:[%s1649_s14] sm:$0xff] %v1122_v41 }
 0x321   : > { %v1132_v63 = vpop.xlane.xlu1 %1131 }
 0x322   : > { %1133 = vst [vmem:[%s1659_s20] sm:$0xff] %v1132_v63 }
 0x323 PF: > { %s23_s27 = sadd.s32 1, %s1569_s27  }
 0x324   : > { %p20_p5 = scmp.ge.s32.totalorder %s23_s27, 6  }
 0x326   :  { %22 = sbr.rel (!%p20_p5) target bundleno = 1 (0x1), region = 159 }
 0x32b   :  { %1187 = vsyncmov [#allocation4] }
 0x32e   :  { %s1188_s10 = vpop.sfrf %1187 }
 0x32f   :  { %p1286_p6 = scmp.ne.s32.totalorder %s1188_s10, 0 }
 0x331   :  { %1192 = shalt.err (%p1286_p6)  }
 0x332   :  { %1194 = vsyncmov [#allocation4 + $0x1] }
 0x335   :  { %s1195_s17 = vpop.sfrf %1194 }
 0x336   :  { %p1287_p7 = scmp.ne.s32.totalorder %s1195_s17, 0 }
 0x338   :  { %1199 = shalt.err (%p1287_p7)  }

// kernel: dcsrn_forward.10
= control target key start
LH: loop header
LB: loop body
LE: loop exit
PB: predicated region body
PF: predicated region fallthrough
CT: control target
= control target key end

     0   :  { %14 = vsyncpa [#allocation6], 0  ;;  %s4468_s0 = inlined_call_operand.vmem [shape: f32[8,3072], index: 0, kind: input, shape index: {}]   ;;  %s4469_s1 = inlined_call_operand.vmem [shape: f32[1,3072], index: 1, kind: input, shape index: {}]   ;;  %s4470_s2 = inlined_call_operand.vmem [shape: f32[8,216], index: 2, kind: input, shape index: {}]   ;;  %s4471_s3 = inlined_call_operand.vmem [shape: f32[8,1], index: 3, kind: input, shape index: {}]   ;;  %s4472_s4 = inlined_call_operand.vmem [shape: f32[8,1], index: 4, kind: input, shape index: {}]   ;;  %s4473_s5 = inlined_call_operand.vmem [shape: f32[8,1], index: 5, kind: input, shape index: {}]   ;;  %s4474_s6 = inlined_call_operand.vmem [shape: f32[8,3072], index: 6, kind: output, shape index: {0}]   ;;  %s4475_s7 = inlined_call_operand.hbm [shape: f32[32,128], index: 7, kind: output, shape index: {1}]   ;;  %s4476_s8 = inlined_call_operand.hbm [shape: f32[32,128], index: 8, kind: output, shape index: {2}]  }
   0x1   :  { %16 = vsyncpa [#allocation6 + $0x1], 0 }
   0x2   :  { %17 = vsyncpa [#allocation8], 0 }
   0x3   :  { %19 = vsyncpa [#allocation8 + $0x1], 0  ;;  %s2787_s27 = smov 0   ;;  %s2789_s28 = smov 0  }
   0x4   :  { %s2791_s29 = smov 0   ;;  %s2793_s30 = smov 0  }
   0x5 LB: > { %4560 = sst [smem:[#allocation15_spill]] %s2707_s28  ;;  %s2808_s9 = sadd.s32 4294967295, %s2715_s30   ;;  %s2715_s30 = sphi %s2793_s30, %s4741_s30   ;;  %s2711_s29 = sphi %s2791_s29, %s4740_s29   ;;  %s2707_s28 = sphi %s2789_s28, %s4739_s28   ;;  %s2703_s27 = sphi %s2787_s27, %s4738_s27  }
   0x6   : > { %4561 = sst [smem:[#allocation16_spill]] %s2711_s29  ;;  %s1797_s10 = sadd.s32 4294967294, %s2715_s30  }
   0x7   : > { %s2812_s11 = sadd.s32 1, %s2715_s30   ;;  %s144_s12 = sadd.s32 1, %s2711_s29 }
   0x8   : > { %s141_s13 = ssub.s32 %s2715_s30, %s2812_s11  ;;  %p154_p0 = scmp.ne.s32.totalorder %s2711_s29, %s2707_s28 }
   0x9   : > { %p142_p1 = scmp.eq.s32.totalorder %s141_s13, 0  ;;  %p155_p2 = scmp.eq.s32.totalorder %s2808_s9, 3 }
   0xa   : > { %p160_p3 = scmp.ne.s32.totalorder %s2707_s28, %s2703_s27  ;;  %p161_p4 = scmp.eq.s32.totalorder %s1797_s10, 3 }
   0xb   : > { %s2823_s14 = scalar_select %p142_p1, %s2711_s29, %s144_s12  }
   0xc   : > { %p2825_p5 = por %p155_p2, %p154_p0  ;;  %p2829_p6 = por %p161_p4, %p160_p3 }
   0xd   : > { %4562 = sst [smem:[#allocation17_spill]] %s2823_s14  ;;  %p1799_p7 = scmp.ge.s32.totalorder %s2715_s30, 1 }
   0xe   : > { %p217_p8 = scmp.lt.s32.totalorder %s2715_s30, 5 }
  0x10   : > { %p218_p9 = pnand %p1799_p7, %p217_p8 }
  0x12   : > { %221 = sbr.rel (%p218_p9) target bundleno = 1096 (0x448), region = 36 }
  0x17   : > { %s2836_s17 = sand.u32 1, %s2707_s28   ;;  %s1825_s18 = sshll.u32 %s2808_s9, 2 }
  0x18   : > { %s1800_s19 = sshll.u32 %s2836_s17, 3  ;;  %s1826_s20 = sadd.s32 4, %s1825_s18 }
  0x19   : > { %p255_p10 = scmp.lt.s32.totalorder %s1826_s20, 23  ;;  %s1827_s21 = sshll.u32 %s2808_s9, 9 }
  0x1a   : > { %s1828_s22 = sadd.s32 512, %s1827_s21  ;;  %s2857_s18 = scalar_lea.vmem [#allocation5], %s1800_s19 }
  0x1b   : > { %s4743_s20 = smov (!%p255_p10, %s1826_s20), 23  ;;  %s1805_s23 = sadd.s32 4294967168, %s1828_s22 }
  0x1c   : > { %s1803_s24 = sshll.u32 %s4743_s20, 3  ;;  %s264_s25 = sshra.s32 %s1805_s23, 7 }
  0x1d   : > { %s2844_s12 = scalar_lea.vmem %s4474_s6, %s1803_s24  ;;  %s1806_s13 = sshll.u32 %s264_s25, 3 }
  0x1e   : > { %s267_s28 = scalar_lea.vmem %s4468_s0, %s1806_s13  ;;  %s2859_s20 = scalar_lea.vmem [#allocation7], %s1800_s19 }
  0x1f   : > { %v278_v0 = vld [vmem:[%s267_s28] sm:$0xff]  ;;  %v2849_v1 = vld [vmem:[%s267_s28 + $0x8] sm:$0xff]  ;;  %v2851_v2 = vld [vmem:[%s267_s28 + $0x10] sm:$0xff] }
  0x20   : > { %4565 = vst [vmem:[#allocation18_spill] sm:$0xff] %v2849_v1  ;;  %v2853_v3 = vld [vmem:[%s267_s28 + $0x18] sm:$0xff]  ;;  %v2855_v4 = vld [vmem:[%s267_s28 + $0x20] sm:$0xff]  ;;  %v288_v5 = vld [vmem:[%s267_s28 + $0x28] sm:$0xff] }
  0x21   : > { %4566 = vst [vmem:[#allocation19_spill] sm:$0xff] %v2851_v2 }
  0x22   : > { %4567 = vst [vmem:[#allocation20_spill] sm:$0xff] %v2853_v3 }
  0x23   : > { %4568 = vst [vmem:[#allocation21_spill] sm:$0xff] %v2855_v4 }
  0x24   : > { %295 = vsyncadd [#allocation4], 768  ;;  %s296_s29 = scalar_lea.vmem %s4469_s1, %s264_s25 }
  0x25   : > { %v312_v6 = vld [vmem:[%s296_s29] sm:$0x3f] }
  0x26   : > { %313 = vst [vmem:[#allocation3] sm:$0x3f] %v312_v6 }
  0x27   : > { %331 = vsyncadd [#allocation4 + $0x1], 96 }
  0x28   : > { %2689 = dma.done.wait [#allocation4], 768 }
  0x29   : > { %2690 = vsyncadd [#allocation4], 4294966528 }
  0x2a   : > { %2691 = dma.done.wait [#allocation4 + $0x1], 96 }
  0x2b   : > { %2692 = vsyncadd [#allocation4 + $0x1], 4294967200  ;;  %v2717_v7 = vmov 0   ;;  %v347_v9 = vld [vmem:[%s4472_s4] sm:$0xff]  ;;  %s2718_s24 = smov 127   ;;  %s2719_s25 = smov 126  }
  0x2c   : > { %1898 = vset.pattern.permute.xlu0 %v2717_v7  ;;  %2144 = vset.pattern.permute.xlu2 %v2717_v7  ;;  %v359_v12 = vld [vmem:[%s4473_s5] sm:$0xff]  ;;  %s2720_s26 = smov 118   ;;  %s2721_s10 = smov 117   ;;  %vm441_vm14 = vcmask 1039360   ;;  %vm531_vm15 = vcmask 875520  }
  0x2d   : > { %v345_v8 = vld [vmem:[#allocation3] sm:$0x3f]  ;;  %350 = vperm.xlu0 %1898, %v347_v9   ;;  %s2722_s13 = smov 116   ;;  %s2723_s21 = smov 108  }
  0x2e   : > { %vm346_vm0 = vcmp.gt.f32.partialorder %v345_v8, 0.0  ;;  %s2724_s22 = smov 107   ;;  %s2725_s29 = smov 106  }
  0x2f   : > { %v407_v10 = vsel %vm346_vm0, 1, %v2717_v7  ;;  %s2726_s28 = smov 28   ;;  %s2727_s14 = smov 27   ;;  %vm561_vm0 = vcmask 228352  }
  0x30   : > { %v1586_v11 = vrot.slane %v407_v10, 1  ;;  %v408_v40 = vperm.slane %v407_v10, 0  ;;  %v409_v41 = vperm.slane %v407_v10, 1  ;;  %v410_v42 = vperm.slane %v407_v10, 2  ;;  %s2728_s19 = smov 26   ;;  %s2729_s23 = smov 18  }
  0x31   : > { %v411_v43 = vperm.slane %v407_v10, 3  ;;  %v412_v44 = vperm.slane %v407_v10, 4  ;;  %v413_v45 = vperm.slane %v407_v10, 5 }
  0x32   : > { %vm1587_vm1 = vcmp.ne.s32.totalorder %v1586_v11, 0  ;;  %vm2876_vm2 = vcmp.eq.s32.totalorder %v408_v40, 1  ;;  %vm2880_vm3 = vcmp.eq.s32.totalorder %v409_v41, 1  ;;  %vm2884_vm4 = vcmp.eq.s32.totalorder %v410_v42, 1 }
  0x33   : > { %v2870_v13 = vsel %vm1587_vm1, 1, %v2717_v7  ;;  %vm2888_vm5 = vcmp.eq.s32.totalorder %v411_v43, 1  ;;  %vm2892_vm6 = vcmp.eq.s32.totalorder %v412_v44, 1  ;;  %vm2896_vm7 = vcmp.eq.s32.totalorder %v413_v45, 1 }
  0x34   : > { %4569 = vst [vmem:[#allocation22_spill] sm:$0xff] %v2870_v13  ;;  %vm546_vm1 = vcmask 867328  }
  0x35   : > { %362 = vperm.xlu0 %1898, %v359_v12  }
  0x9f   : > { %v351_v14 = vpop.permute.xlu0 %350 }
  0xa0   : > { %v353_v15 = vmul.f32 %v351_v14, %v278_v0  ;;  %v354_v16 = vmul.f32 %v351_v14, %v2849_v1  ;;  %v355_v17 = vmul.f32 %v351_v14, %v2851_v2  ;;  %v356_v18 = vmul.f32 %v351_v14, %v2853_v3 }
  0xa1   : > { %v357_v19 = vmul.f32 %v351_v14, %v2855_v4  ;;  %v358_v20 = vmul.f32 %v351_v14, %v288_v5 }
  0xa7   : > { %v363_v21 = vpop.permute.xlu0 %362 }
  0xa8   : > { %v365_v22 = vadd.f32 %v363_v21, %v353_v15  ;;  %v366_v23 = vadd.f32 %v363_v21, %v354_v16  ;;  %v367_v24 = vadd.f32 %v363_v21, %v355_v17  ;;  %v368_v25 = vadd.f32 %v363_v21, %v356_v18 }
  0xa9   : > { %v369_v26 = vadd.f32 %v363_v21, %v357_v19  ;;  %v370_v27 = vadd.f32 %v363_v21, %v358_v20 }
  0xaa   : > { %v377_v28 = vmin.f32 %v365_v22, 0.0  ;;  %v378_v29 = vmin.f32 %v366_v23, 0.0  ;;  %v379_v30 = vmin.f32 %v367_v24, 0.0  ;;  %v380_v31 = vmin.f32 %v368_v25, 0.0 }
  0xab   : > { %v381_v32 = vmin.f32 %v369_v26, 0.0  ;;  %v382_v33 = vmin.f32 %v370_v27, 0.0  ;;  %vm371_vm8 = vcmp.gt.f32.partialorder %v365_v22, 0.0  ;;  %vm372_vm9 = vcmp.gt.f32.partialorder %v366_v23, 0.0 }
  0xac   : > { %v383_v34 = vmul.f32 1.442695, %v377_v28  ;;  %v385_v35 = vmul.f32 1.442695, %v378_v29  ;;  %v387_v36 = vmul.f32 1.442695, %v379_v30 }
  0xad   : > { %v389_v37 = vmul.f32 1.442695, %v380_v31  ;;  %v391_v38 = vmul.f32 1.442695, %v381_v32  ;;  %v393_v39 = vmul.f32 1.442695, %v382_v33 }
  0xae   : > { %2605 = vpow2.f32 %v383_v34  ;;  %vm373_vm10 = vcmp.gt.f32.partialorder %v367_v24, 0.0  ;;  %vm374_vm11 = vcmp.gt.f32.partialorder %v368_v25, 0.0  ;;  %vm375_vm12 = vcmp.gt.f32.partialorder %v369_v26, 0.0 }
  0xaf   : > { %2607 = vpow2.f32 %v385_v35  ;;  %vm376_vm13 = vcmp.gt.f32.partialorder %v370_v27, 0.0 }
  0xb0   : > { %2609 = vpow2.f32 %v387_v36 }
  0xb1   : > { %2611 = vpow2.f32 %v389_v37 }
  0xb2   : > { %2613 = vpow2.f32 %v391_v38 }
  0xb3   : > { %2615 = vpow2.f32 %v393_v39 }
  0xb4   : > { %v2606_v46 = vpop.eup %2605 }
  0xb5   : > { %v2608_v48 = vpop.eup %2607  ;;  %v1807_v52 = vadd.f32 -1.0, %v2606_v46 }
  0xb6   : > { %v2610_v53 = vpop.eup %2609  ;;  %v1808_v56 = vadd.f32 -1.0, %v2608_v48 }
  0xb7   : > { %v2612_v57 = vpop.eup %2611  ;;  %v1809_v58 = vadd.f32 -1.0, %v2610_v53  ;;  %v401_v59 = vsel %vm371_vm8, %v365_v22, %v1807_v52  ;;  %vm667_vm8 = vcmask 400384  }
  0xb8   : > { %v2614_v60 = vpop.eup %2613  ;;  %v1810_v61 = vadd.f32 -1.0, %v2612_v57  ;;  %v402_v62 = vsel %vm372_vm9, %v366_v23, %v1808_v56  ;;  %v420_v63 = vsel %vm2876_vm2, %v401_v59, 0.0  ;;  %vm576_vm2 = vcmask 220160  }
  0xb9   : > { %v2616_v0 = vpop.eup %2615  ;;  %v1811_v5 = vadd.f32 -1.0, %v2614_v60  ;;  %v403_v6 = vsel %vm373_vm10, %v367_v24, %v1809_v58  ;;  %v421_v7 = vsel %vm2880_vm3, %v402_v62, 0.0  ;;  %vm591_vm3 = vcmask 211968  }
  0xba   : > { %v1812_v8 = vadd.f32 -1.0, %v2616_v0  ;;  %v404_v9 = vsel %vm374_vm11, %v368_v25, %v1810_v61  ;;  %v422_v10 = vsel %vm2884_vm4, %v403_v6, 0.0  ;;  %v2906_v11 = vpack.i.bf16 %v421_v7, %v420_v63 }
  0xbb   : > { %v405_v12 = vsel %vm375_vm12, %v369_v26, %v1811_v5  ;;  %v423_v14 = vsel %vm2888_vm5, %v404_v9, 0.0  ;;  %v2924_v20 = vpack.i.bf16 %v422_v10, %v421_v7  ;;  %vm606_vm4 = vcmask 146432  }
  0xbc   : > { %v406_v15 = vsel %vm376_vm13, %v370_v27, %v1812_v8  ;;  %v2912_v16 = vsel %vm2892_vm6, %v405_v12, 0.0  ;;  %v2914_v17 = vpack.i.bf16 %v423_v14, %v422_v10  ;;  %1900 = vrot.lane.b32.xlu1 %v2906_v11, %s2718_s24  ;;  %vm619_vm5 = vcmask 138240  }
  0xbd   : > { %v2919_v18 = vsel %vm2896_vm7, %v406_v15, 0.0  ;;  %v2955_v21 = vpack.i.bf16 %v2912_v16, %v423_v14  ;;  %vm634_vm6 = vcmask 130048   ;;  %vm649_vm7 = vcmask 64512  }
  0xbe   : > { %v1909_v19 = vpack.i.bf16 %v2919_v18, %v2912_v16  ;;  %1920 = vrot.lane.b32.xlu0 %v2914_v17, %s2719_s25  ;;  %vm682_vm9 = vcmask 392192   ;;  %vm697_vm10 = vcmask 384000   ;;  %vm712_vm11 = vcmask 318464  }
  0xbf   : > { %vm727_vm12 = vcmask 310272   ;;  %vm742_vm13 = vcmask 302080  }
  0xc0   : > { %1910 = vrot.lane.b32.xlu2 %v1909_v19, %s2718_s24 }
  0xc4   : > { %1905 = vrot.lane.b32.xlu1 %v2914_v17, %s2718_s24  ;;  %s2730_s24 = smov 17  }
  0xc6   : > { %1930 = vrot.lane.b32.xlu0 %v2914_v17, %s2720_s26 }
  0xc8   : > { %1915 = vrot.lane.b32.xlu2 %v2906_v11, %s2719_s25 }
  0xcc   : > { %454 = vrot.lane.b32.xlu1 %v2912_v16, %s2719_s25  ;;  %s2731_s25 = smov 16  }
  0xce   : > { %1940 = vrot.lane.b32.xlu0 %v2914_v17, %s2721_s10 }
  0xd0   : > { %1925 = vrot.lane.b32.xlu2 %v2906_v11, %s2720_s26 }
  0xd4   : > { %469 = vrot.lane.b32.xlu1 %v2912_v16, %s2720_s26  ;;  %s2732_s26 = smov 8  }
  0xd6   : > { %1950 = vrot.lane.b32.xlu0 %v2914_v17, %s2722_s13 }
  0xd8   : > { %1935 = vrot.lane.b32.xlu2 %v2906_v11, %s2721_s10 }
  0xdc   : > { %484 = vrot.lane.b32.xlu1 %v2912_v16, %s2721_s10  ;;  %s2733_s10 = smov 49  }
  0xde   : > { %1960 = vrot.lane.b32.xlu0 %v2914_v17, %s2723_s21 }
  0xe0   : > { %1945 = vrot.lane.b32.xlu2 %v2906_v11, %s2722_s13 }
  0xe4   : > { %499 = vrot.lane.b32.xlu1 %v2912_v16, %s2722_s13  ;;  %s2734_s13 = smov 48  }
  0xe6   : > { %1970 = vrot.lane.b32.xlu0 %v2914_v17, %s2724_s22 }
  0xe8   : > { %1955 = vrot.lane.b32.xlu2 %v2906_v11, %s2723_s21 }
  0xec   : > { %514 = vrot.lane.b32.xlu1 %v2912_v16, %s2723_s21  ;;  %s2735_s21 = smov 47  }
  0xee   : > { %1980 = vrot.lane.b32.xlu0 %v2914_v17, %s2725_s29 }
  0xf0   : > { %1965 = vrot.lane.b32.xlu2 %v2906_v11, %s2724_s22 }
  0xf4   : > { %529 = vrot.lane.b32.xlu1 %v2912_v16, %s2724_s22  ;;  %s2736_s22 = smov 39  }
  0xf6   : > { %1990 = vrot.lane.b32.xlu0 %v2914_v17, %s2726_s28 }
  0xf8   : > { %1975 = vrot.lane.b32.xlu2 %v2906_v11, %s2725_s29 }
  0xfc   : > { %544 = vrot.lane.b32.xlu1 %v2912_v16, %s2725_s29  ;;  %s2737_s29 = smov 38  }
  0xfe   : > { %2005 = vrot.lane.b32.xlu0 %v2914_v17, %s2727_s14 }
 0x100   : > { %1985 = vrot.lane.b32.xlu2 %v2906_v11, %s2726_s28 }
 0x104   : > { %1995 = vrot.lane.b32.xlu1 %v1909_v19, %s2726_s28  ;;  %s2738_s28 = smov 37  }
 0x106   : > { %2020 = vrot.lane.b32.xlu0 %v2914_v17, %s2728_s19 }
 0x108   : > { %2000 = vrot.lane.b32.xlu2 %v2906_v11, %s2727_s14 }
 0x10c   : > { %2010 = vrot.lane.b32.xlu1 %v1909_v19, %s2727_s14  ;;  %s2739_s14 = smov 29  }
 0x10e   : > { %2030 = vrot.lane.b32.xlu0 %v2914_v17, %s2729_s23 }
 0x110   : > { %2015 = vrot.lane.b32.xlu2 %v2906_v11, %s2728_s19 }
 0x114   : > { %589 = vrot.lane.b32.xlu1 %v2912_v16, %s2728_s19  ;;  %s2740_s19 = smov 111  }
 0x116   : > { %2040 = vrot.lane.b32.xlu0 %v2955_v21, %s2730_s24 }
 0x118   : > { %2025 = vrot.lane.b32.xlu2 %v2906_v11, %s2729_s23 }
 0x11a   : > { %v2960_v22 = vpop.permute.xlu2 %1910 }
 0x11b   : > { %v2985_v34 = vunpack.i.l.bf16 %v2960_v22 }
 0x11c   : > { %604 = vrot.lane.b32.xlu1 %v2912_v16, %s2729_s23  ;;  %s2741_s23 = smov 7  }
 0x11e   : > { %632 = vrot.lane.b32.xlu0 %v2919_v18, %s2731_s25 }
 0x120   : > { %2035 = vrot.lane.b32.xlu2 %v2924_v20, %s2730_s24 }
 0x122   : > { %v2965_v23 = vpop.permute.xlu2 %1915 }
 0x124   : > { %2045 = vrot.lane.b32.xlu1 %v2924_v20, %s2731_s25 }
 0x126   : > { %647 = vrot.lane.b32.xlu0 %v2919_v18, %s2732_s26 }
 0x128   : > { %2050 = vrot.lane.b32.xlu2 %v2955_v21, %s2731_s25 }
 0x12a   : > { %v2970_v24 = vpop.permute.xlu2 %1925 }
 0x12c   : > { %2055 = vrot.lane.b32.xlu1 %v2924_v20, %s2732_s26 }
 0x12e   : > { %665 = vrot.lane.b32.xlu0 %v2919_v18, %s2733_s10  ;;  %v1901_v25 = vpop.permute.xlu1 %1900 }
 0x12f   : > { %v1903_v26 = vunpack.i.h.bf16 %v1901_v25  ;;  %v1902_v27 = vunpack.i.l.bf16 %v1901_v25 }
 0x130   : > { %2060 = vrot.lane.b32.xlu2 %v2955_v21, %s2732_s26  ;;  %v2975_v28 = vpop.permute.xlu0 %1920  ;;  %s1664_s26 = sshll.u32 %s2859_s20, 4  ;;  %s4421_s26 = int_to_ptr.vmem [resolvable:$true] %s1664_s26 }
 0x131   : > { %v2978_v29 = vsel %vm441_vm14, %v1902_v27, %v1903_v26 }
 0x132   : > { %v2980_v30 = vpop.permute.xlu2 %1935 }
 0x134   : > { %2065 = vrot.lane.b32.xlu1 %v2924_v20, %s2733_s10 }
 0x136   : > { %680 = vrot.lane.b32.xlu0 %v2919_v18, %s2734_s13  ;;  %v1906_v31 = vpop.permute.xlu1 %1905 }
 0x137   : > { %v1908_v32 = vunpack.i.h.bf16 %v1906_v31  ;;  %v1907_v33 = vunpack.i.l.bf16 %v1906_v31 }
 0x138   : > { %2070 = vrot.lane.b32.xlu2 %v2955_v21, %s2733_s10  ;;  %v2988_v35 = vpop.permute.xlu0 %1930 }
 0x139   : > { %v2991_v36 = vsel %vm441_vm14, %v1903_v26, %v1907_v33  ;;  %v2994_v37 = vsel %vm441_vm14, %v1907_v33, %v1908_v32  ;;  %v3000_v39 = vsel %vm441_vm14, %v1908_v32, %v2985_v34 }
 0x13a   : > { %v2996_v38 = vpop.permute.xlu2 %1945 }
 0x13c   : > { %2075 = vrot.lane.b32.xlu1 %v2924_v20, %s2734_s13 }
 0x13e   : > { %695 = vrot.lane.b32.xlu0 %v2919_v18, %s2735_s21  ;;  %v3008_v42 = vpop.permute.xlu1 %454 }
 0x140   : > { %2080 = vrot.lane.b32.xlu2 %v2955_v21, %s2734_s13  ;;  %v3011_v43 = vpop.permute.xlu0 %1940 }
 0x142   : > { %v3013_v44 = vpop.permute.xlu2 %1955 }
 0x144   : > { %2085 = vrot.lane.b32.xlu1 %v2924_v20, %s2735_s21 }
 0x146   : > { %710 = vrot.lane.b32.xlu0 %v2919_v18, %s2736_s22  ;;  %v3017_v45 = vpop.permute.xlu1 %469 }
 0x148   : > { %2090 = vrot.lane.b32.xlu2 %v2955_v21, %s2735_s21  ;;  %v3020_v46 = vpop.permute.xlu0 %1950 }
 0x14a   : > { %v1966_v47 = vpop.permute.xlu2 %1965 }
 0x14b   : > { %v1968_v53 = vunpack.i.h.bf16 %v1966_v47  ;;  %v1967_v56 = vunpack.i.l.bf16 %v1966_v47 }
 0x14c   : > { %2095 = vrot.lane.b32.xlu1 %v2924_v20, %s2736_s22 }
 0x14d   : > { %v3048_v0 = vsel %vm531_vm15, %v1967_v56, %v1968_v53 }
 0x14e   : > { %725 = vrot.lane.b32.xlu0 %v2919_v18, %s2737_s29  ;;  %v3024_v48 = vpop.permute.xlu1 %484 }
 0x150   : > { %2100 = vrot.lane.b32.xlu2 %v2955_v21, %s2736_s22  ;;  %v3027_v49 = vpop.permute.xlu0 %1960  ;;  %s1819_s22 = sshll.u32 %s2808_s9, 3  ;;  %s1628_s9 = scalar_lea.sflag [#allocation6], %s2836_s17 }
 0x151   : > { %s1662_s24 = scalar_lea.hbm %s4476_s8, %s1819_s22 }
 0x152   : > { %v1976_v50 = vpop.permute.xlu2 %1975  ;;  %s1666_s10 = sshll.u32 %s1662_s24, 4  ;;  %s4423_s10 = int_to_ptr.hbm [resolvable:$true] %s1666_s10 }
 0x153   : > { %v1978_v6 = vunpack.i.h.bf16 %v1976_v50  ;;  %v1977_v7 = vunpack.i.l.bf16 %v1976_v50 }
 0x154   : > { %2105 = vrot.lane.b32.xlu1 %v2924_v20, %s2737_s29 }
 0x155   : > { %v3056_v19 = vsel %vm546_vm1, %v1977_v7, %v1978_v6 }
 0x156   : > { %740 = vrot.lane.b32.xlu0 %v2919_v18, %s2738_s28  ;;  %v3031_v51 = vpop.permute.xlu1 %499 }
 0x158   : > { %2110 = vrot.lane.b32.xlu2 %v2955_v21, %s2737_s29  ;;  %v1971_v52 = vpop.permute.xlu0 %1970 }
 0x159   : > { %v1973_v54 = vunpack.i.h.bf16 %v1971_v52  ;;  %v1972_v55 = vunpack.i.l.bf16 %v1971_v52 }
 0x15a   : > { %v1986_v57 = vpop.permute.xlu2 %1985 }
 0x15b   : > { %v1988_v58 = vunpack.i.h.bf16 %v1986_v57  ;;  %v1987_v59 = vunpack.i.l.bf16 %v1986_v57  ;;  %v3035_v60 = vsel %vm531_vm15, %v1968_v53, %v1972_v55  ;;  %v3038_v61 = vsel %vm531_vm15, %v1972_v55, %v1973_v54 }
 0x15c   : > { %2115 = vrot.lane.b32.xlu1 %v2924_v20, %s2738_s28 }
 0x15d   : > { %v3044_v63 = vsel %vm561_vm0, %v1987_v59, %v1988_v58 }
 0x15e   : > { %755 = vrot.lane.b32.xlu0 %v2919_v18, %s2739_s14  ;;  %v3050_v5 = vpop.permute.xlu1 %514 }
 0x160   : > { %2120 = vrot.lane.b32.xlu2 %v2955_v21, %s2738_s28  ;;  %v1981_v9 = vpop.permute.xlu0 %1980  ;;  %s2637_s28 = scalar_lea.hbm %s4475_s7, 32 }
 0x161   : > { %v1982_v10 = vunpack.i.l.bf16 %v1981_v9  ;;  %v1983_v53 = vunpack.i.h.bf16 %v1981_v9 }
 0x162   : > { %v2001_v12 = vpop.permute.xlu2 %2000 }
 0x163   : > { %v2003_v14 = vunpack.i.h.bf16 %v2001_v12  ;;  %v2002_v15 = vunpack.i.l.bf16 %v2001_v12  ;;  %v3059_v25 = vsel %vm546_vm1, %v1978_v6, %v1982_v10  ;;  %v3091_v56 = vsel %vm546_vm1, %v1982_v10, %v1983_v53 }
 0x164   : > { %2125 = vrot.lane.b32.xlu1 %v2924_v20, %s2739_s14  ;;  %4583 = vst [vmem:[#allocation24_spill] sm:$0xff] %v3091_v56 }
 0x165   : > { %v3065_v27 = vsel %vm576_vm2, %v2002_v15, %v2003_v14  ;;  %v925_v15 = vld [vmem:[%s4471_s3] sm:$0xff] }
 0x166   : > { %2146 = vrot.lane.b32.xlu0 %v2906_v11, %s2740_s19  ;;  %v3069_v31 = vpop.permute.xlu1 %529  ;;  %v2155_v11 = vpack.i.bf16 %v2991_v36, %v2919_v18 }
 0x167   : > { %v3073_v32 = vsel %vm531_vm15, %v1973_v54, %v3069_v31  ;;  %vm878_vm15 = vcmask 56320  }
 0x168   : > { %2130 = vrot.lane.b32.xlu2 %v2955_v21, %s2739_s14  ;;  %v1991_v33 = vpop.permute.xlu0 %1990  ;;  %s1648_s14 = scalar_lea.hbm %s4475_s7, %s1819_s22 }
 0x169   : > { %v1992_v50 = vunpack.i.l.bf16 %v1991_v33  ;;  %v1993_v12 = vunpack.i.h.bf16 %v1991_v33  ;;  %s1652_s25 = sshll.u32 %s1648_s14, 4  ;;  %s1653_s25 = int_to_ptr.hbm [resolvable:$true] %s1652_s25 }
 0x16a   : > { %v3078_v52 = vpop.permute.xlu2 %2015  ;;  %s2631_s13 = sshra.s32 %s1653_s25, 4  ;;  %s2632_s13 = int_to_ptr.hbm [resolvable:$true] %s2631_s13 }
 0x16b   : > { %4582 = vst [vmem:[#allocation23_spill] sm:$0xff] %v3078_v52  ;;  %v3085_v54 = vsel %vm561_vm0, %v1988_v58, %v1992_v50  ;;  %s2633_s21 = scalar_lea.hbm %s2632_s13, 8  ;;  %p2638_p0 = scmp.lt.s32.totalorder %s2632_s13, %s4475_s7 }
 0x16c   : > { %2135 = vrot.lane.b32.xlu1 %v2924_v20, %s2741_s23  ;;  %p2634_p11 = scmp.ne.s32.totalorder %s2632_s13, %s2633_s21  ;;  %p2639_p1 = scmp.lt.s32.totalorder %s2637_s28, %s2633_s21 }
 0x16e   : > { %2156 = vrot.lane.b32.xlu0 %v2155_v11, %s2741_s23  ;;  %v3088_v55 = vpop.permute.xlu1 %544  ;;  %p2635_p12 = pnand %p2634_p11, %p2825_p5  ;;  %p2640_p2 = por %p2639_p1, %p2638_p0 }
 0x16f   : > { %v3095_v57 = vsel %vm546_vm1, %v1983_v53, %v3088_v55  ;;  %vm456_vm1 = vcmask 1031168  }
 0x170   : > { %4584 = vst [vmem:[#allocation25_spill] sm:$0xff] %v3095_v57  ;;  %2140 = vrot.lane.b32.xlu2 %v2955_v21, %s2741_s23  ;;  %v2006_v18 = vpop.permute.xlu0 %2005  ;;  %v3128_v21 = vsel %vm561_vm0, %v1992_v50, %v1993_v12  ;;  %p2636_p13 = pneg %p2635_p12 }
 0x171   : > { %v2008_v59 = vunpack.i.h.bf16 %v2006_v18  ;;  %v2007_v6 = vunpack.i.l.bf16 %v2006_v18  ;;  %v4479_v18 = vunpack.i.h.bf16 %v3078_v52 }
 0x172   : > { %v3103_v7 = vpop.permute.xlu2 %2025  ;;  %p2641_p3 = pnand %p2640_p2, %p2636_p13 }
 0x173   : > { %4585 = vst [vmem:[#allocation26_spill] sm:$0xff] %v3103_v7  ;;  %v3106_v9 = vsel %vm576_vm2, %v2003_v14, %v2007_v6  ;;  %v3111_v10 = vsel %vm576_vm2, %v2007_v6, %v2008_v59  ;;  %v1913_v14 = vunpack.i.h.bf16 %v2960_v22  ;;  %v4482_v22 = vunpack.i.h.bf16 %v3103_v7 }
 0x174   : > { %2151 = vrot.lane.b32.xlu1 %v2914_v17, %s2740_s19 }
 0x176   : > { %v3120_v11 = vpop.permute.xlu1 %1995 }
 0x177   : > { %v3124_v17 = vunpack.i.l.bf16 %v3120_v11 }
 0x178   : > { %928 = vperm.xlu2 %2144, %v925_v15   ;;  %v2021_v6 = vpop.permute.xlu0 %2020  ;;  %v656_v15 = vsel %vm441_vm14, %v2985_v34, %v1913_v14  ;;  %vm757_vm14 = vcmask 236544  }
 0x179   : > { %v2023_v58 = vunpack.i.h.bf16 %v2021_v6  ;;  %v2022_v33 = vunpack.i.l.bf16 %v2021_v6  ;;  %v3132_v62 = vsel %vm561_vm0, %v1993_v12, %v3124_v17  ;;  %v2165_v8 = vpack.i.bf16 %v1913_v14, %v656_v15 }
 0x17a   : > { %v3134_v26 = vpop.permute.xlu2 %2035 }
 0x17b   : > { %4586 = vst [vmem:[#allocation27_spill] sm:$0xff] %v3134_v26  ;;  %v3145_v50 = vsel %vm591_vm3, %v4479_v18, %v2022_v33  ;;  %v3148_v12 = vsel %vm591_vm3, %v2022_v33, %v2023_v58  ;;  %v4491_v3 = vunpack.i.l.bf16 %v3134_v26 }
 0x17c   : > { %4587 = vst [vmem:[#allocation28_spill] sm:$0xff] %v3145_v50 }
 0x17d   : > { %4588 = vst [vmem:[#allocation29_spill] sm:$0xff] %v3148_v12 }
 0x17e   : > { %v2011_v47 = vpop.permute.xlu1 %2010 }
 0x17f   : > { %v2013_v40 = vunpack.i.h.bf16 %v2011_v47  ;;  %v3152_v41 = vunpack.i.l.bf16 %v2011_v47 }
 0x180   : > { %2166 = vrot.lane.b32.xlu2 %v2165_v8, %s2741_s23  ;;  %v2031_v20 = vpop.permute.xlu0 %2030 }
 0x181   : > { %4589 = vst [vmem:[#allocation30_spill] sm:$0xff] %v3152_v41  ;;  %v2032_v53 = vunpack.i.l.bf16 %v2031_v20  ;;  %876 = vrot.lane.b32.xlu1 %v2013_v40, %s2741_s23  ;;  %v3159_v33 = vsel %vm576_vm2, %v2008_v59, %v3152_v41  ;;  %v3163_v18 = vsel %vm576_vm2, %v3152_v41, %v2013_v40  ;;  %v2038_v59 = vunpack.i.h.bf16 %v3134_v26 }
 0x182   : > { %v2051_v14 = vpop.permute.xlu2 %2050  ;;  %v2160_v40 = vpack.i.bf16 %v3000_v39, %v2994_v37  ;;  %v2033_v13 = vunpack.i.h.bf16 %v2031_v20  ;;  %vm471_vm2 = vcmask 965632  }
 0x183   : > { %v608_v15 = vsel %vm606_vm4, %v4482_v22, %v2032_v53  ;;  %v3187_v22 = vsel %vm619_vm5, %v4491_v3, %v2038_v59  ;;  %v2053_v52 = vunpack.i.h.bf16 %v2051_v14 }
 0x184   : > { %4593 = vst [vmem:[#allocation34_spill] sm:$0xff] %v3187_v22 }
 0x186   : > { %v3172_v6 = vpop.permute.xlu1 %589 }
 0x187   : > { %4590 = vst [vmem:[#allocation31_spill] sm:$0xff] %v3172_v6 }
 0x188   : > { %v3178_v4 = vpop.permute.xlu0 %2040 }
 0x189   : > { %4591 = vst [vmem:[#allocation32_spill] sm:$0xff] %v3178_v4  ;;  %v4492_v47 = vunpack.i.l.bf16 %v3178_v4  ;;  %2161 = vrot.lane.b32.xlu1 %v2160_v40, %s2741_s23  ;;  %v4500_v41 = vunpack.i.h.bf16 %v3178_v4  ;;  %v3199_v40 = vsel %vm591_vm3, %v2023_v58, %v3172_v6  ;;  %v2052_v6 = vunpack.i.l.bf16 %v2051_v14 }
 0x18a   : > { %v3182_v8 = vpop.permute.xlu2 %2060  ;;  %4595 = vst [vmem:[#allocation36_spill] sm:$0xff] %v3199_v40  ;;  %v609_v40 = vsel %vm606_vm4, %v2032_v53, %v2033_v13 }
 0x18b   : > { %4592 = vst [vmem:[#allocation33_spill] sm:$0xff] %v3182_v8  ;;  %v3192_v1 = vsel %vm619_vm5, %v2038_v59, %v4492_v47  ;;  %v4501_v50 = vunpack.i.h.bf16 %v3182_v8  ;;  %v3216_v59 = vsel %vm634_vm6, %v2052_v6, %v2053_v52 }
 0x18c   : > { %4594 = vst [vmem:[#allocation35_spill] sm:$0xff] %v3192_v1 }
 0x18d   : > { %4599 = vst [vmem:[#allocation40_spill] sm:$0xff] %v3216_v59 }
 0x18e   : > { %v3201_v7 = vpop.permute.xlu1 %604 }
 0x18f   : > { %4596 = vst [vmem:[#allocation37_spill] sm:$0xff] %v3201_v7  ;;  %v610_v3 = vsel %vm606_vm4, %v2033_v13, %v3201_v7 }
 0x190   : > { %v633_v47 = vpop.permute.xlu0 %632  ;;  %v3209_v20 = vpack.i.bf16 %v4500_v41, %v610_v3 }
 0x191   : > { %v3212_v2 = vsel %vm634_vm6, %v2053_v52, %v633_v47 }
 0x192   : > { %4597 = vst [vmem:[#allocation38_spill] sm:$0xff] %v3209_v20  ;;  %v2071_v58 = vpop.permute.xlu2 %2070 }
 0x193   : > { %4598 = vst [vmem:[#allocation39_spill] sm:$0xff] %v3212_v2  ;;  %v2073_v53 = vunpack.i.h.bf16 %v2071_v58  ;;  %v2072_v2 = vunpack.i.l.bf16 %v2071_v58 }
 0x195   : > { %v670_v4 = vsel %vm667_vm8, %v2072_v2, %v2073_v53 }
 0x196   : > { %v2046_v26 = vpop.permute.xlu1 %2045 }
 0x197   : > { %v2048_v12 = vunpack.i.h.bf16 %v2046_v26  ;;  %v2047_v22 = vunpack.i.l.bf16 %v2046_v26 }
 0x198   : > { %v648_v1 = vpop.permute.xlu0 %647 }
 0x199   : > { %v3222_v3 = vsel %vm649_vm7, %v4501_v50, %v648_v1  ;;  %v3224_v47 = vpack.i.bf16 %v2047_v22, %v609_v40  ;;  %v3227_v14 = vsel %vm634_vm6, %v2047_v22, %v2048_v12  ;;  %v3230_v41 = vsel %vm634_vm6, %v2048_v12, %v2052_v6 }
 0x19a   : > { %4600 = vst [vmem:[#allocation41_spill] sm:$0xff] %v3222_v3  ;;  %v2081_v52 = vpop.permute.xlu2 %2080  ;;  %v4509_v40 = vunpack.i.l.bf16 %v3182_v8  ;;  %vm486_vm6 = vcmask 957440  }
 0x19b   : > { %4601 = vst [vmem:[#allocation42_spill] sm:$0xff] %v3224_v47  ;;  %v2083_v3 = vunpack.i.h.bf16 %v2081_v52 }
 0x19c   : > { %4602 = vst [vmem:[#allocation43_spill] sm:$0xff] %v3227_v14 }
 0x19d   : > { %4603 = vst [vmem:[#allocation44_spill] sm:$0xff] %v3230_v41 }
 0x19e   : > { %v2056_v1 = vpop.permute.xlu1 %2055 }
 0x19f   : > { %v2058_v50 = vunpack.i.h.bf16 %v2056_v1  ;;  %v2057_v7 = vunpack.i.l.bf16 %v2056_v1 }
 0x1a0   : > { %v666_v22 = vpop.permute.xlu0 %665 }
 0x1a1   : > { %v671_v12 = vsel %vm667_vm8, %v2073_v53, %v666_v22  ;;  %v3239_v6 = vpack.i.bf16 %v608_v15, %v2057_v7  ;;  %v3242_v26 = vsel %vm649_vm7, %v2057_v7, %v2058_v50  ;;  %v3247_v58 = vsel %vm649_vm7, %v2058_v50, %v4509_v40 }
 0x1a2   : > { %4605 = vst [vmem:[#allocation46_spill] sm:$0xff] %v3242_v26  ;;  %v2175_v13 = vpack.i.bf16 %v671_v12, %v670_v4  ;;  %v2091_v20 = vpop.permute.xlu2 %2090 }
 0x1a3   : > { %4604 = vst [vmem:[#allocation45_spill] sm:$0xff] %v3239_v6 }
 0x1a4   : > { %4606 = vst [vmem:[#allocation47_spill] sm:$0xff] %v3247_v58  ;;  %2176 = vrot.lane.b32.xlu1 %v2175_v13, %s2741_s23  ;;  %v2082_v13 = vunpack.i.l.bf16 %v2081_v52 }
 0x1a6   : > { %v2066_v59 = vpop.permute.xlu1 %2065 }
 0x1a7   : > { %v2068_v53 = vunpack.i.h.bf16 %v2066_v59  ;;  %v2067_v15 = vunpack.i.l.bf16 %v2066_v59 }
 0x1a8   : > { %v681_v6 = vpop.permute.xlu0 %680 }
 0x1a9   : > { %v686_v7 = vsel %vm682_vm9, %v2083_v3, %v681_v6  ;;  %v668_v8 = vsel %vm667_vm8, %v2067_v15, %v2068_v53  ;;  %v669_v50 = vsel %vm667_vm8, %v2068_v53, %v2072_v2  ;;  %v685_v15 = vsel %vm682_vm9, %v2082_v13, %v2083_v3 }
 0x1aa   : > { %v2190_v40 = vpack.i.bf16 %v681_v6, %v686_v7  ;;  %v2101_v4 = vpop.permute.xlu2 %2100  ;;  %v2170_v12 = vpack.i.bf16 %v669_v50, %v668_v8  ;;  %v2093_v8 = vunpack.i.h.bf16 %v2091_v20  ;;  %vm501_vm8 = vcmask 949248  }
 0x1ac   : > { %2191 = vrot.lane.b32.xlu1 %v2190_v40, %s2741_s23  ;;  %2171 = vrot.lane.b32.xlu0 %v2170_v12, %s2741_s23  ;;  %v2092_v40 = vunpack.i.l.bf16 %v2091_v20 }
 0x1ae   : > { %v2076_v1 = vpop.permute.xlu1 %2075 }
 0x1af   : > { %v2078_v26 = vunpack.i.h.bf16 %v2076_v1  ;;  %v2077_v58 = vunpack.i.l.bf16 %v2076_v1 }
 0x1b0   : > { %v696_v59 = vpop.permute.xlu0 %695 }
 0x1b1   : > { %v683_v47 = vsel %vm682_vm9, %v2077_v58, %v2078_v26  ;;  %v684_v14 = vsel %vm682_vm9, %v2078_v26, %v2082_v13  ;;  %v701_v53 = vsel %vm697_vm10, %v2093_v8, %v696_v59  ;;  %v700_v58 = vsel %vm697_vm10, %v2092_v40, %v2093_v8 }
 0x1b2   : > { %v2111_v41 = vpop.permute.xlu2 %2110  ;;  %v2180_v2 = vpack.i.bf16 %v683_v47, %v666_v22  ;;  %v2185_v6 = vpack.i.bf16 %v685_v15, %v684_v14  ;;  %v2200_v56 = vpack.i.bf16 %v701_v53, %v700_v58  ;;  %v2103_v47 = vunpack.i.h.bf16 %v2101_v4 }
 0x1b3   : > { %v2102_v14 = vunpack.i.l.bf16 %v2101_v4  ;;  %v2112_v58 = vunpack.i.l.bf16 %v2111_v41  ;;  %vm516_vm9 = vcmask 883712  }
 0x1b4   : > { %2181 = vrot.lane.b32.xlu2 %v2180_v2, %s2741_s23  ;;  %2186 = vrot.lane.b32.xlu0 %v2185_v6, %s2741_s23 }
 0x1b5   : > { %v715_v57 = vsel %vm712_vm11, %v2102_v14, %v2103_v47 }
 0x1b6   : > { %v2086_v52 = vpop.permute.xlu1 %2085 }
 0x1b7   : > { %v2088_v1 = vunpack.i.h.bf16 %v2086_v52  ;;  %v2087_v7 = vunpack.i.l.bf16 %v2086_v52 }
 0x1b8   : > { %v711_v50 = vpop.permute.xlu0 %710 }
 0x1b9   : > { %v698_v12 = vsel %vm697_vm10, %v2087_v7, %v2088_v1  ;;  %v699_v26 = vsel %vm697_vm10, %v2088_v1, %v2092_v40  ;;  %v716_v2 = vsel %vm712_vm11, %v2103_v47, %v711_v50 }
 0x1ba   : > { %v2121_v3 = vpop.permute.xlu2 %2120  ;;  %v2195_v13 = vpack.i.bf16 %v699_v26, %v698_v12  ;;  %v2215_v1 = vpack.i.bf16 %v711_v50, %v716_v2 }
 0x1bc   : > { %2196 = vrot.lane.b32.xlu2 %v2195_v13, %s2741_s23  ;;  %2201 = vrot.lane.b32.xlu0 %v2200_v56, %s2741_s23  ;;  %v2113_v56 = vunpack.i.h.bf16 %v2111_v41  ;;  %v2122_v41 = vunpack.i.l.bf16 %v2121_v3 }
 0x1be   : > { %v2096_v20 = vpop.permute.xlu1 %2095  ;;  %v730_v47 = vsel %vm727_vm12, %v2112_v58, %v2113_v56 }
 0x1bf   : > { %v2098_v22 = vunpack.i.h.bf16 %v2096_v20  ;;  %v2097_v15 = vunpack.i.l.bf16 %v2096_v20 }
 0x1c0   : > { %v726_v6 = vpop.permute.xlu0 %725 }
 0x1c1   : > { %v714_v52 = vsel %vm712_vm11, %v2098_v22, %v2102_v14  ;;  %v713_v8 = vsel %vm712_vm11, %v2097_v15, %v2098_v22  ;;  %v731_v12 = vsel %vm727_vm12, %v2113_v56, %v726_v6  ;;  %v2123_v15 = vunpack.i.h.bf16 %v2121_v3 }
 0x1c2   : > { %v2131_v7 = vpop.permute.xlu2 %2130  ;;  %v2210_v40 = vpack.i.bf16 %v715_v57, %v714_v52  ;;  %v2205_v53 = vpack.i.bf16 %v713_v8, %v696_v59  ;;  %v2225_v57 = vpack.i.bf16 %v731_v12, %v730_v47 }
 0x1c3   : > { %v2133_v47 = vunpack.i.h.bf16 %v2131_v7 }
 0x1c4   : > { %2211 = vrot.lane.b32.xlu2 %v2210_v40, %s2741_s23  ;;  %2206 = vrot.lane.b32.xlu1 %v2205_v53, %s2741_s23 }
 0x1c5   : > { %2216 = vrot.lane.b32.xlu0 %v2215_v1, %s2741_s23 }
 0x1c6   : > { %v2106_v4 = vpop.permute.xlu1 %2105 }
 0x1c7   : > { %v2108_v26 = vunpack.i.h.bf16 %v2106_v4  ;;  %v2107_v13 = vunpack.i.l.bf16 %v2106_v4  ;;  %v745_v4 = vsel %vm742_vm13, %v2122_v41, %v2123_v15 }
 0x1c8   : > { %v741_v20 = vpop.permute.xlu0 %740 }
 0x1c9   : > { %v728_v14 = vsel %vm727_vm12, %v2107_v13, %v2108_v26  ;;  %v729_v22 = vsel %vm727_vm12, %v2108_v26, %v2112_v58  ;;  %v746_v52 = vsel %vm742_vm13, %v2123_v15, %v741_v20 }
 0x1ca   : > { %v2141_v59 = vpop.permute.xlu2 %2140  ;;  %v2220_v50 = vpack.i.bf16 %v729_v22, %v728_v14  ;;  %v2240_v13 = vpack.i.bf16 %v741_v20, %v746_v52  ;;  %v2132_v14 = vunpack.i.l.bf16 %v2131_v7 }
 0x1cb   : > { %v2143_v20 = vunpack.i.h.bf16 %v2141_v59 }
 0x1cc   : > { %2226 = vrot.lane.b32.xlu2 %v2225_v57, %s2741_s23  ;;  %2221 = vrot.lane.b32.xlu1 %v2220_v50, %s2741_s23  ;;  %v760_v15 = vsel %vm757_vm14, %v2132_v14, %v2133_v47 }
 0x1ce   : > { %v2116_v2 = vpop.permute.xlu1 %2115 }
 0x1cf   : > { %v2118_v8 = vunpack.i.h.bf16 %v2116_v2  ;;  %v2117_v40 = vunpack.i.l.bf16 %v2116_v2  ;;  %v2142_v2 = vunpack.i.l.bf16 %v2141_v59 }
 0x1d0   : > { %v756_v53 = vpop.permute.xlu0 %755 }
 0x1d1   : > { %v744_v1 = vsel %vm742_vm13, %v2118_v8, %v2122_v41  ;;  %v743_v56 = vsel %vm742_vm13, %v2117_v40, %v2118_v8  ;;  %v761_v22 = vsel %vm757_vm14, %v2133_v47, %v756_v53  ;;  %v2255_v8 = vpack.i.bf16 %v3085_v54, %v756_v53 }
 0x1d2   : > { %v3269_v58 = vpop.permute.xlu2 %928  ;;  %v2235_v12 = vpack.i.bf16 %v745_v4, %v744_v1  ;;  %v2230_v26 = vpack.i.bf16 %v743_v56, %v726_v6  ;;  %v2250_v7 = vpack.i.bf16 %v761_v22, %v760_v15  ;;  %v1998_v4 = vunpack.i.h.bf16 %v3120_v11 }
 0x1d3   : > { %4607 = vst [vmem:[#allocation48_spill] sm:$0xff] %v3269_v58  ;;  %v3285_v59 = vsel %vm878_vm15, %v2142_v2, %v2143_v20  ;;  %v4609_v15 = vpack.i.bf16 %v3111_v10, %v3106_v9 }
 0x1d4   : > { %2241 = vrot.lane.b32.xlu2 %v2240_v13, %s2741_s23  ;;  %2236 = vrot.lane.b32.xlu1 %v2235_v12, %s2741_s23 }
 0x1d5   : > { %2231 = vrot.lane.b32.xlu0 %v2230_v26, %s2741_s23  ;;  %v764_v26 = vsel %vm561_vm0, %v3124_v17, %v1998_v4  ;;  %vm1201_vm0 = vcmask 908288  }
 0x1d6   : > { %v2126_v3 = vpop.permute.xlu1 %2125 }
 0x1d7   : > { %v2128_v57 = vunpack.i.h.bf16 %v2126_v3  ;;  %v2127_v50 = vunpack.i.l.bf16 %v2126_v3 }
 0x1d8   : > { %v3274_v41 = vpop.permute.xlu0 %2146 }
 0x1d9   : > { %4608 = vst [vmem:[#allocation49_spill] sm:$0xff] %v3274_v41  ;;  %v758_v52 = vsel %vm757_vm14, %v2127_v50, %v2128_v57  ;;  %v759_v6 = vsel %vm757_vm14, %v2128_v57, %v2132_v14  ;;  %v2265_v57 = vpack.i.bf16 %v1998_v4, %v764_v26  ;;  %v2280_v4 = vpack.i.bf16 %v2978_v29, %v2912_v16 }
 0x1da   : > { %v3277_v40 = vpop.permute.xlu2 %2166  ;;  %v2245_v1 = vpack.i.bf16 %v759_v6, %v758_v52  ;;  %v4610_v52 = vpack.i.bf16 %v3132_v62, %v3128_v21  ;;  %v4613_v26 = vpack.i.bf16 %v2985_v34, %v3000_v39  ;;  %v4614_v16 = vpack.i.bf16 %v3163_v18, %v3159_v33 }
 0x1db   : > { %v2169_v56 = vunpack.i.h.bf16 %v3277_v40  ;;  %v2168_v13 = vunpack.i.l.bf16 %v3277_v40  ;;  %v1938_v18 = vunpack.i.h.bf16 %v2980_v30 }
 0x1dc   : > { %2256 = vrot.lane.b32.xlu2 %v2255_v8, %s2741_s23  ;;  %2251 = vrot.lane.b32.xlu1 %v2250_v7, %s2741_s23 }
 0x1dd   : > { %v3290_v53 = vsel %vm878_vm15, %v2168_v13, %v2169_v56  ;;  %2246 = vrot.lane.b32.xlu0 %v2245_v1, %s2741_s23  ;;  %v1922_v56 = vunpack.i.l.bf16 %v2975_v28 }
 0x1de   : > { %v3295_v12 = vpop.permute.xlu1 %2135 }
 0x1df   : > { %v4517_v47 = vunpack.i.h.bf16 %v3295_v12 }
 0x1e0   : > { %v3300_v14 = vpop.permute.xlu0 %2156 }
 0x1e1   : > { %v2158_v3 = vunpack.i.l.bf16 %v3300_v14  ;;  %v3306_v22 = vsel %vm878_vm15, %v4517_v47, %v2142_v2  ;;  %v4516_v2 = vunpack.i.h.bf16 %v3274_v41  ;;  %v2159_v11 = vunpack.i.h.bf16 %v3300_v14 }
 0x1e2   : > { %v4629_v14 = vpack.i.bf16 %v3124_v17, %v3132_v62 }
 0x1e3   : > { %v3309_v50 = vsel %vm878_vm15, %v2143_v20, %v2158_v3  ;;  %v1918_v3 = vunpack.i.h.bf16 %v2965_v23 }
 0x1e4   : > { %2271 = vrot.lane.b32.xlu2 %v4609_v15, %s2741_s23  ;;  %2266 = vrot.lane.b32.xlu1 %v2265_v57, %s2741_s23  ;;  %v1917_v57 = vunpack.i.l.bf16 %v2965_v23  ;;  %v1928_v15 = vunpack.i.h.bf16 %v2970_v24 }
 0x1e5   : > { %2261 = vrot.lane.b32.xlu0 %v4610_v52, %s2741_s23  ;;  %v1927_v52 = vunpack.i.l.bf16 %v2970_v24  ;;  %v458_v29 = vsel %vm456_vm1, %v1918_v3, %v1922_v56  ;;  %v1932_v24 = vunpack.i.l.bf16 %v2988_v35 }
 0x1e6   : > { %v3320_v6 = vpop.permute.xlu1 %2151  ;;  %v457_v39 = vsel %vm456_vm1, %v1917_v57, %v1918_v3  ;;  %v4615_v3 = vpack.i.bf16 %v2994_v37, %v2991_v36  ;;  %v1923_v57 = vunpack.i.h.bf16 %v2975_v28  ;;  %v1953_v36 = vunpack.i.h.bf16 %v3020_v46 }
 0x1e7   : > { %v2154_v7 = vunpack.i.h.bf16 %v3320_v6  ;;  %v2153_v20 = vunpack.i.l.bf16 %v3320_v6  ;;  %v472_v34 = vsel %vm471_vm2, %v1927_v52, %v1928_v15  ;;  %v2295_v23 = vpack.i.bf16 %v458_v29, %v457_v39 }
 0x1e8   : > { %v1937_v52 = vunpack.i.l.bf16 %v2980_v30  ;;  %v1952_v28 = vunpack.i.l.bf16 %v3020_v46 }
 0x1e9   : > { %v3328_v8 = vsel %vm1201_vm0, %v4516_v2, %v2153_v20  ;;  %v3333_v1 = vsel %vm1201_vm0, %v2153_v20, %v2154_v7  ;;  %v2305_v20 = vpack.i.bf16 %v472_v34, %v3008_v42  ;;  %v460_v34 = vsel %vm456_vm1, %v1923_v57, %v3008_v42 }
 0x1ea   : > { %4611 = vst [vmem:[#allocation50_spill] sm:$0xff] %v3328_v8  ;;  %v487_v39 = vsel %vm486_vm6, %v1937_v52, %v1938_v18  ;;  %v1948_v42 = vunpack.i.h.bf16 %v2996_v38  ;;  %v504_v40 = vsel %vm501_vm8, %v1952_v28, %v1953_v36 }
 0x1eb   : > { %4612 = vst [vmem:[#allocation51_spill] sm:$0xff] %v3333_v1 }
 0x1ec   : > { %2291 = vrot.lane.b32.xlu1 %v4613_v26, %s2740_s19  ;;  %2281 = vrot.lane.b32.xlu2 %v2280_v4, %s2740_s19  ;;  %v1933_v4 = vunpack.i.h.bf16 %v2988_v35  ;;  %v1942_v26 = vunpack.i.l.bf16 %v3011_v43 }
 0x1ed   : > { %2276 = vrot.lane.b32.xlu0 %v4614_v16, %s2741_s23  ;;  %v473_v16 = vsel %vm471_vm2, %v1928_v15, %v1932_v24 }
 0x1ee   : > { %v488_v35 = vsel %vm486_vm6, %v1938_v18, %v1942_v26  ;;  %v474_v29 = vsel %vm471_vm2, %v1932_v24, %v1933_v4  ;;  %v1943_v24 = vunpack.i.h.bf16 %v3011_v43 }
 0x1ef   : > { %v2320_v30 = vpack.i.bf16 %v488_v35, %v487_v39  ;;  %v1962_v39 = vunpack.i.l.bf16 %v3027_v49 }
 0x1f0   : > { %v490_v52 = vsel %vm486_vm6, %v1943_v24, %v3024_v48  ;;  %v489_v35 = vsel %vm486_vm6, %v1942_v26, %v1943_v24 }
 0x1f3   : > { %v3358_v2 = vpop.permute.xlu1 %876 }
 0x1f4   : > { %2306 = vrot.lane.b32.xlu1 %v2305_v20, %s2740_s19  ;;  %2296 = vrot.lane.b32.xlu2 %v2295_v23, %s2740_s19  ;;  %v459_v20 = vsel %vm456_vm1, %v1922_v56, %v1923_v57  ;;  %v2310_v23 = vpack.i.bf16 %v474_v29, %v473_v16  ;;  %v503_v57 = vsel %vm501_vm8, %v1948_v42, %v1952_v28 }
 0x1f5   : > { %2286 = vrot.lane.b32.xlu0 %v4615_v3, %s2740_s19  ;;  %v2300_v3 = vpack.i.bf16 %v460_v34, %v459_v20  ;;  %v2335_v16 = vpack.i.bf16 %v504_v40, %v503_v57  ;;  %v2325_v29 = vpack.i.bf16 %v490_v52, %v489_v35  ;;  %v1963_v34 = vunpack.i.h.bf16 %v3027_v49 }
 0x1f6   : > { %v1957_v49 = vunpack.i.l.bf16 %v3013_v44 }
 0x1f7   : > { %v520_v26 = vsel %vm516_vm9, %v1963_v34, %v3050_v5  ;;  %v519_v20 = vsel %vm516_vm9, %v1962_v39, %v1963_v34 }
 0x1f8   : > { %v2350_v28 = vpack.i.bf16 %v520_v26, %v519_v20  ;;  %v4621_v20 = vpack.i.bf16 %v3106_v9, %v3065_v27 }
 0x1fb   : > { %v2162_v37 = vpop.permute.xlu1 %2161 }
 0x1fc   : > { %v2164_v15 = vunpack.i.h.bf16 %v2162_v37  ;;  %v2163_v47 = vunpack.i.l.bf16 %v2162_v37  ;;  %2321 = vrot.lane.b32.xlu1 %v2320_v30, %s2740_s19  ;;  %2311 = vrot.lane.b32.xlu2 %v2310_v23, %s2740_s19  ;;  %v1947_v30 = vunpack.i.l.bf16 %v2996_v38  ;;  %v1958_v38 = vunpack.i.h.bf16 %v3013_v44 }
 0x1fd   : > { %2301 = vrot.lane.b32.xlu0 %v2300_v3, %s2740_s19 }
 0x1fe   : > { %v3387_v46 = vsel %vm878_vm15, %v2164_v15, %v2168_v13  ;;  %v3392_v56 = vsel %vm878_vm15, %v2159_v11, %v2163_v47  ;;  %v3395_v18 = vsel %vm878_vm15, %v2163_v47, %v2164_v15  ;;  %v475_v13 = vsel %vm471_vm2, %v1933_v4, %v3017_v45 }
 0x1ff   : > { %v2315_v47 = vpack.i.bf16 %v3017_v45, %v475_v13  ;;  %v505_v4 = vsel %vm501_vm8, %v1953_v36, %v3031_v51  ;;  %v502_v45 = vsel %vm501_vm8, %v1947_v30, %v1948_v42  ;;  %v518_v3 = vsel %vm516_vm9, %v1958_v38, %v1962_v39 }
 0x200   : > { %v2340_v23 = vpack.i.bf16 %v3031_v51, %v505_v4  ;;  %v2330_v37 = vpack.i.bf16 %v502_v45, %v3024_v48  ;;  %v517_v15 = vsel %vm516_vm9, %v1957_v49, %v1958_v38  ;;  %v4616_v51 = vpack.i.bf16 %v3069_v31, %v3073_v32 }
 0x201   : > { %v2345_v42 = vpack.i.bf16 %v518_v3, %v517_v15  ;;  %v4617_v48 = vpack.i.bf16 %v3048_v0, %v3050_v5  ;;  %v4618_v31 = vpack.i.bf16 %v3044_v63, %v3088_v55  ;;  %v4619_v0 = vpack.i.bf16 %v3059_v25, %v3056_v19 }
 0x202   : > { %v4620_v32 = vpack.i.bf16 %v3038_v61, %v3035_v60  ;;  %v2385_v60 = vpack.i.bf16 %v3128_v21, %v3085_v54  ;;  %v4622_v54 = vld [vmem:[#allocation25_spill] sm:$0xff]  ;;  %v4623_v21 = vld [vmem:[#allocation24_spill] sm:$0xff] }
 0x203   : > { %v4624_v45 = vpack.i.bf16 %v4622_v54, %v4623_v21  ;;  %v4635_v54 = vld [vmem:[#allocation46_spill] sm:$0xff] }
 0x204   : > { %2336 = vrot.lane.b32.xlu1 %v2335_v16, %s2740_s19  ;;  %2326 = vrot.lane.b32.xlu2 %v2325_v29, %s2740_s19 }
 0x205   : > { %2316 = vrot.lane.b32.xlu0 %v2315_v47, %s2740_s19 }
 0x20c   : > { %2351 = vrot.lane.b32.xlu1 %v2350_v28, %s2740_s19  ;;  %2341 = vrot.lane.b32.xlu2 %v2340_v23, %s2740_s19 }
 0x20d   : > { %2331 = vrot.lane.b32.xlu0 %v2330_v37, %s2740_s19 }
 0x20e   : > { %v3424_v36 = vpop.permute.xlu2 %2181 }
 0x20f   : > { %v2183_v44 = vunpack.i.l.bf16 %v3424_v36 }
 0x214   : > { %2366 = vrot.lane.b32.xlu1 %v4616_v51, %s2740_s19  ;;  %2356 = vrot.lane.b32.xlu2 %v4617_v48, %s2740_s19  ;;  %v4628_v48 = vpack.i.bf16 %v3159_v33, %v3111_v10 }
 0x215   : > { %2346 = vrot.lane.b32.xlu0 %v2345_v42, %s2740_s19  ;;  %v4625_v42 = vld [vmem:[#allocation44_spill] sm:$0xff] }
 0x216   : > { %v2177_v24 = vpop.permute.xlu1 %2176  ;;  %v2197_v52 = vpop.permute.xlu2 %2196 }
 0x217   : > { %v2179_v57 = vunpack.i.h.bf16 %v2177_v24  ;;  %v2178_v5 = vunpack.i.l.bf16 %v2177_v24  ;;  %v2198_v25 = vunpack.i.l.bf16 %v2197_v52 }
 0x219   : > { %v3437_v40 = vsel %vm878_vm15, %v2179_v57, %v2183_v44  ;;  %v3460_v19 = vsel %vm878_vm15, %v2178_v5, %v2179_v57 }
 0x21c   : > { %2381 = vrot.lane.b32.xlu1 %v4618_v31, %s2740_s19  ;;  %2371 = vrot.lane.b32.xlu2 %v4619_v0, %s2740_s19 }
 0x21d   : > { %2361 = vrot.lane.b32.xlu0 %v4620_v32, %s2740_s19 }
 0x21e   : > { %v2192_v35 = vpop.permute.xlu1 %2191  ;;  %v3453_v16 = vpop.permute.xlu2 %2211 }
 0x21f   : > { %v2194_v29 = vunpack.i.h.bf16 %v2192_v35  ;;  %v2193_v47 = vunpack.i.l.bf16 %v2192_v35  ;;  %v3455_v34 = vpop.permute.xlu0 %2171 }
 0x220   : > { %v4521_v63 = vunpack.i.h.bf16 %v3455_v34  ;;  %v4520_v55 = vunpack.i.l.bf16 %v3455_v34 }
 0x221   : > { %v3463_v39 = vsel %vm878_vm15, %v2193_v47, %v2194_v29  ;;  %v4630_v29 = vld [vmem:[#allocation42_spill] sm:$0xff] }
 0x222   : > { %v888_v30 = vsel %vm878_vm15, %v4521_v63, %v2178_v5  ;;  %v3475_v4 = vpack.i.bf16 %v4520_v55, %v3306_v22  ;;  %v2184_v22 = vunpack.i.h.bf16 %v3424_v36  ;;  %v4626_v36 = vld [vmem:[#allocation43_spill] sm:$0xff] }
 0x223   : > { %v3477_v26 = vpack.i.bf16 %v2198_v25, %v888_v30  ;;  %v4627_v51 = vpack.i.bf16 %v4625_v42, %v4626_v36  ;;  %v4519_v42 = vunpack.i.h.bf16 %v3453_v16 }
 0x224   : > { %2396 = vrot.lane.b32.xlu1 %v4621_v20, %s2740_s19  ;;  %2386 = vrot.lane.b32.xlu2 %v2385_v60, %s2740_s19  ;;  %v4632_v60 = vld [vmem:[#allocation34_spill] sm:$0xff]  ;;  %v4634_v20 = vld [vmem:[#allocation47_spill] sm:$0xff] }
 0x225   : > { %2376 = vrot.lane.b32.xlu0 %v4624_v45, %s2740_s19  ;;  %v4636_v21 = vpack.i.bf16 %v4634_v20, %v4635_v54  ;;  %v4641_v54 = vld [vmem:[#allocation28_spill] sm:$0xff] }
 0x226   : > { %v3488_v23 = vpop.permute.xlu2 %2226 }
 0x227   : > { %v2187_v28 = vpop.permute.xlu0 %2186  ;;  %v2229_v24 = vunpack.i.h.bf16 %v3488_v23  ;;  %v4523_v44 = vunpack.i.l.bf16 %v3488_v23 }
 0x228   : > { %v2189_v37 = vunpack.i.h.bf16 %v2187_v28  ;;  %v2188_v38 = vunpack.i.l.bf16 %v2187_v28 }
 0x229   : > { %v3525_v10 = vsel %vm878_vm15, %v4523_v44, %v2229_v24 }
 0x22a   : > { %v893_v49 = vsel %vm878_vm15, %v2189_v37, %v2193_v47  ;;  %v3493_v3 = vsel %vm878_vm15, %v2184_v22, %v2188_v38  ;;  %v3496_v27 = vsel %vm878_vm15, %v2188_v38, %v2189_v37  ;;  %v4631_v47 = vld [vmem:[#allocation35_spill] sm:$0xff] }
 0x22b   : > { %v3502_v15 = vpack.i.bf16 %v893_v49, %v2159_v11  ;;  %v2199_v11 = vunpack.i.h.bf16 %v2197_v52  ;;  %v4633_v30 = vpack.i.bf16 %v4631_v47, %v4632_v60  ;;  %v2137_v49 = vunpack.i.l.bf16 %v3295_v12  ;;  %v4637_v60 = vld [vmem:[#allocation41_spill] sm:$0xff] }
 0x22c   : > { %2411 = vrot.lane.b32.xlu1 %v4627_v51, %s2740_s19  ;;  %2401 = vrot.lane.b32.xlu2 %v4628_v48, %s2740_s19 }
 0x22d   : > { %2391 = vrot.lane.b32.xlu0 %v4629_v14, %s2740_s19  ;;  %v3535_v17 = vsel %vm878_vm15, %v2198_v25, %v2199_v11 }
 0x22e   : > { %v3518_v57 = vpop.permute.xlu2 %2241 }
 0x22f   : > { %v2244_v31 = vunpack.i.h.bf16 %v3518_v57  ;;  %v4518_v0 = vunpack.i.l.bf16 %v3518_v57  ;;  %v2202_v5 = vpop.permute.xlu0 %2201 }
 0x230   : > { %v2203_v32 = vunpack.i.l.bf16 %v2202_v5  ;;  %v2204_v25 = vunpack.i.h.bf16 %v2202_v5 }
 0x231   : > { %v3530_v33 = vsel %vm878_vm15, %v4518_v0, %v2244_v31 }
 0x232   : > { %v3538_v52 = vsel %vm878_vm15, %v2199_v11, %v2203_v32  ;;  %v3561_v14 = vsel %vm878_vm15, %v2203_v32, %v2204_v25  ;;  %v4640_v32 = vld [vmem:[#allocation29_spill] sm:$0xff] }
 0x234   : > { %2426 = vrot.lane.b32.xlu1 %v4630_v29, %s2740_s19  ;;  %2416 = vrot.lane.b32.xlu2 %v4633_v30, %s2740_s19  ;;  %v4638_v30 = vld [vmem:[#allocation40_spill] sm:$0xff] }
 0x235   : > { %2406 = vrot.lane.b32.xlu0 %v4636_v21, %s2740_s19  ;;  %v4639_v20 = vpack.i.bf16 %v4637_v60, %v4638_v30  ;;  %v4642_v21 = vpack.i.bf16 %v4640_v32, %v4641_v54  ;;  %v4646_v32 = vunpack.i.h.bf16 %v3295_v12 }
 0x236   : > { %v3552_v45 = vpop.permute.xlu2 %2256  ;;  %v3554_v28 = vpop.permute.xlu1 %2206 }
 0x237   : > { %v2208_v37 = vunpack.i.l.bf16 %v3554_v28  ;;  %v2217_v38 = vpop.permute.xlu0 %2216  ;;  %v3605_v54 = vsel %vm878_vm15, %v2137_v49, %v4646_v32  ;;  %v2259_v6 = vunpack.i.h.bf16 %v3552_v45 }
 0x238   : > { %v2219_v36 = vunpack.i.h.bf16 %v2217_v38  ;;  %v2218_v51 = vunpack.i.l.bf16 %v2217_v38 }
 0x239   : > { %v898_v48 = vsel %vm878_vm15, %v2204_v25, %v2208_v37  ;;  %v4643_v25 = vld [vmem:[#allocation45_spill] sm:$0xff] }
 0x23a   : > { %v3563_v11 = vpack.i.bf16 %v2137_v49, %v898_v48  ;;  %v901_v31 = vsel %vm878_vm15, %v4519_v42, %v2218_v51  ;;  %v3569_v5 = vsel %vm878_vm15, %v2218_v51, %v2219_v36 }
 0x23b   : > { %v3571_v29 = vpack.i.bf16 %v901_v31, %v2184_v22  ;;  %v4644_v22 = vld [vmem:[#allocation38_spill] sm:$0xff] }
 0x23c   : > { %2436 = vrot.lane.b32.xlu1 %v4639_v20, %s2740_s19  ;;  %2431 = vrot.lane.b32.xlu2 %v4642_v21, %s2740_s19  ;;  %v4647_v21 = vld [vmem:[#allocation32_spill] sm:$0xff] }
 0x23d   : > { %2421 = vrot.lane.b32.xlu0 %v4643_v25, %s2740_s19  ;;  %v4648_v25 = vunpack.i.h.bf16 %v4647_v21 }
 0x23e   : > { %v2272_v37 = vpop.permute.xlu2 %2271  ;;  %v3585_v38 = vpop.permute.xlu1 %2221 }
 0x23f   : > { %v2273_v48 = vunpack.i.l.bf16 %v2272_v37 }
 0x245   : > { %2441 = vrot.lane.b32.xlu0 %v4644_v22, %s2740_s19  ;;  %v4649_v22 = vunpack.i.l.bf16 %v4647_v21  ;;  %v4650_v21 = vld [vmem:[#allocation27_spill] sm:$0xff] }
 0x246   : > { %v3589_v36 = vpop.permute.xlu1 %2236  ;;  %v3591_v51 = vpop.permute.xlu2 %2281 }
 0x247   : > { %v3593_v31 = vpop.permute.xlu0 %2231  ;;  %v2283_v60 = vunpack.i.l.bf16 %v3591_v51  ;;  %v622_v13 = vsel %vm619_vm5, %v4649_v22, %v4648_v25  ;;  %v4651_v25 = vunpack.i.l.bf16 %v4650_v21  ;;  %v2238_v1 = vunpack.i.l.bf16 %v3589_v36 }
 0x248   : > { %v2233_v30 = vunpack.i.l.bf16 %v3593_v31  ;;  %v2445_v47 = vpack.i.bf16 %v622_v13, %v2273_v48  ;;  %v4652_v13 = vld [vmem:[#allocation23_spill] sm:$0xff] }
 0x249   : > { %v3600_v20 = vsel %vm1201_vm0, %v2154_v7, %v2283_v60  ;;  %v2274_v7 = vunpack.i.h.bf16 %v2272_v37 }
 0x24a   : > { %4645 = vst [vmem:[#allocation25_spill] sm:$0xff] %v3600_v20  ;;  %v3613_v61 = vsel %vm878_vm15, %v2229_v24, %v2233_v30  ;;  %v2017_v24 = vunpack.i.l.bf16 %v4652_v13  ;;  %v4531_v20 = vunpack.i.h.bf16 %v3593_v31 }
 0x24b   : > { %v919_v32 = vsel %vm878_vm15, %v2273_v48, %v2274_v7  ;;  %v4653_v48 = vunpack.i.h.bf16 %v4652_v13 }
 0x24c   : > { %v2450_v22 = vpack.i.bf16 %v919_v32, %v4651_v25  ;;  %v4654_v25 = vld [vmem:[#allocation33_spill] sm:$0xff] }
 0x24d   : > { %2446 = vrot.lane.b32.xlu0 %v2445_v47, %s2740_s19  ;;  %v592_v32 = vsel %vm591_vm3, %v2017_v24, %v4653_v48  ;;  %v4656_v0 = vunpack.i.l.bf16 %v4654_v25  ;;  %v4657_v48 = vld [vmem:[#allocation26_spill] sm:$0xff]  ;;  %vm1418_vm3 = vcmask 719872  }
 0x24e   : > { %v3618_v12 = vpop.permute.xlu1 %2251  ;;  %v3620_v49 = vpop.permute.xlu2 %2296 }
 0x24f   : > { %v3622_v60 = vpop.permute.xlu0 %2246  ;;  %v4529_v63 = vunpack.i.l.bf16 %v3618_v12 }
 0x250   : > { %v2249_v13 = vunpack.i.h.bf16 %v3622_v60  ;;  %v4525_v24 = vunpack.i.l.bf16 %v3622_v60 }
 0x255   : > { %2451 = vrot.lane.b32.xlu0 %v2450_v22, %s2740_s19  ;;  %v4655_v22 = vunpack.i.h.bf16 %v4654_v25 }
 0x256   : > { %v3629_v30 = vpop.permute.xlu1 %2266  ;;  %v3631_v37 = vpop.permute.xlu2 %2311 }
 0x257   : > { %v3633_v47 = vpop.permute.xlu0 %2261  ;;  %v652_v43 = vsel %vm649_vm7, %v4656_v0, %v4655_v22 }
 0x258   : > { %v4522_v62 = vunpack.i.h.bf16 %v3633_v47  ;;  %v2263_v9 = vunpack.i.l.bf16 %v3633_v47 }
 0x25a   : > { %v916_v21 = vsel %vm878_vm15, %v2263_v9, %v4522_v62  ;;  %v915_v35 = vsel %vm878_vm15, %v2259_v6, %v2263_v9  ;;  %v2027_v62 = vunpack.i.l.bf16 %v4657_v48 }
 0x25b   : > { %v2465_v42 = vpack.i.bf16 %v592_v32, %v916_v21  ;;  %v2460_v55 = vpack.i.bf16 %v915_v35, %v652_v43  ;;  %v911_v32 = vsel %vm878_vm15, %v4525_v24, %v2249_v13  ;;  %v4660_v21 = vunpack.i.h.bf16 %v4657_v48 }
 0x25c   : > { %v2284_v48 = vunpack.i.h.bf16 %v3591_v51 }
 0x25d   : > { %2466 = vrot.lane.b32.xlu0 %v2465_v42, %s2740_s19  ;;  %2461 = vrot.lane.b32.xlu2 %v2460_v55, %s2740_s19  ;;  %v912_v55 = vsel %vm878_vm15, %v2249_v13, %v4529_v63  ;;  %v607_v22 = vsel %vm606_vm4, %v2027_v62, %v4660_v21  ;;  %v4530_v13 = vunpack.i.h.bf16 %v3589_v36  ;;  %v4662_v63 = vld [vmem:[#allocation36_spill] sm:$0xff] }
 0x25e   : > { %v3656_v44 = vpop.permute.xlu1 %2291  ;;  %v3658_v25 = vpop.permute.xlu2 %2326  ;;  %v2475_v8 = vpack.i.bf16 %v912_v55, %v911_v32 }
 0x25f   : > { %4658 = vst [vmem:[#allocation24_spill] sm:$0xff] %v3656_v44  ;;  %v2277_v0 = vpop.permute.xlu0 %2276  ;;  %v4528_v9 = vunpack.i.h.bf16 %v3658_v25  ;;  %v2328_v43 = vunpack.i.l.bf16 %v3658_v25  ;;  %v4534_v55 = vunpack.i.l.bf16 %v3656_v44  ;;  %v908_v51 = vsel %vm878_vm15, %v2238_v1, %v4530_v13  ;;  %v4666_v13 = vld [vmem:[#allocation31_spill] sm:$0xff] }
 0x260   : > { %v2278_v35 = vunpack.i.l.bf16 %v2277_v0  ;;  %v2279_v41 = vunpack.i.h.bf16 %v2277_v0  ;;  %v4670_v44 = vunpack.i.h.bf16 %v3620_v49 }
 0x261   : > { %v3671_v42 = vsel %vm1201_vm0, %v2328_v43, %v4528_v9  ;;  %v4661_v9 = vld [vmem:[#allocation37_spill] sm:$0xff] }
 0x262   : > { %4659 = vst [vmem:[#allocation44_spill] sm:$0xff] %v3671_v42  ;;  %v920_v58 = vsel %vm878_vm15, %v2274_v7, %v2278_v35  ;;  %v4663_v42 = vpack.i.bf16 %v4661_v9, %v4662_v63  ;;  %v922_v9 = vsel %vm878_vm15, %v2279_v41, %v3358_v2 }
 0x263   : > { %v2455_v24 = vpack.i.bf16 %v607_v22, %v920_v58  ;;  %v4532_v58 = vunpack.i.l.bf16 %v3631_v37  ;;  %v2224_v22 = vunpack.i.h.bf16 %v3585_v38 }
 0x265   : > { %2456 = vrot.lane.b32.xlu1 %v2455_v24, %s2740_s19  ;;  %2471 = vrot.lane.b32.xlu0 %v4663_v42, %s2740_s19  ;;  %v907_v24 = vsel %vm878_vm15, %v4531_v20, %v2238_v1  ;;  %v2510_v20 = vpack.i.bf16 %v4666_v13, %v922_v9  ;;  %v4668_v9 = vunpack.i.l.bf16 %v3585_v38 }
 0x266   : > { %2476 = vrot.lane.b32.xlu2 %v2475_v8, %s2740_s19  ;;  %v2307_v62 = vpop.permute.xlu1 %2306  ;;  %v3686_v7 = vpop.permute.xlu2 %2341 }
 0x267   : > { %v2309_v0 = vunpack.i.h.bf16 %v2307_v62  ;;  %v3690_v32 = vpop.permute.xlu0 %2286 }
 0x268   : > { %v4535_v63 = vunpack.i.h.bf16 %v3690_v32  ;;  %v4533_v8 = vunpack.i.l.bf16 %v3690_v32 }
 0x269   : > { %v3706_v42 = vsel %vm1201_vm0, %v2309_v0, %v4532_v58  ;;  %v4667_v0 = vld [vmem:[#allocation39_spill] sm:$0xff] }
 0x26a   : > { %4664 = vst [vmem:[#allocation43_spill] sm:$0xff] %v3706_v42  ;;  %v3711_v21 = vsel %vm1201_vm0, %v2284_v48, %v4533_v8  ;;  %v3718_v2 = vsel %vm1201_vm0, %v4535_v63, %v4534_v55  ;;  %v2480_v58 = vpack.i.bf16 %v907_v24, %v4667_v0  ;;  %v2269_v42 = vunpack.i.h.bf16 %v3629_v30 }
 0x26b   : > { %4665 = vst [vmem:[#allocation42_spill] sm:$0xff] %v3718_v2  ;;  %v2268_v48 = vunpack.i.l.bf16 %v3629_v30  ;;  %v2485_v8 = vpack.i.bf16 %v2259_v6, %v908_v51  ;;  %v903_v30 = vsel %vm878_vm15, %v4668_v9, %v2224_v22  ;;  %v4669_v6 = vunpack.i.l.bf16 %v3488_v23 }
 0x26c   : > { %v921_v2 = vsel %vm878_vm15, %v2278_v35, %v2279_v41  ;;  %v2209_v41 = vunpack.i.h.bf16 %v3554_v28  ;;  %v2254_v35 = vunpack.i.h.bf16 %v3618_v12  ;;  %v4539_v28 = vunpack.i.l.bf16 %v3686_v7 }
 0x26d   : > { %2511 = vrot.lane.b32.xlu0 %v2510_v20, %s2740_s19  ;;  %2481 = vrot.lane.b32.xlu1 %v2480_v58, %s2740_s19  ;;  %v904_v20 = vsel %vm878_vm15, %v2224_v22, %v4669_v6  ;;  %v918_v58 = vsel %vm878_vm15, %v2268_v48, %v2269_v42 }
 0x26e   : > { %2486 = vrot.lane.b32.xlu2 %v2485_v8, %s2740_s19  ;;  %v3729_v55 = vpop.permute.xlu1 %2321  ;;  %v3731_v63 = vpop.permute.xlu2 %2356  ;;  %v2308_v8 = vunpack.i.l.bf16 %v2307_v62  ;;  %v4672_v62 = vld [vmem:[#allocation30_spill] sm:$0xff] }
 0x26f   : > { %v4538_v13 = vunpack.i.h.bf16 %v3729_v55  ;;  %v2302_v24 = vpop.permute.xlu0 %2301  ;;  %v2525_v22 = vpack.i.bf16 %v4672_v62, %v918_v58  ;;  %v4674_v62 = vunpack.i.h.bf16 %v3633_v47  ;;  %v4678_v47 = vunpack.i.h.bf16 %v3631_v37 }
 0x270   : > { %v2304_v51 = vunpack.i.h.bf16 %v2302_v24  ;;  %v2303_v0 = vunpack.i.l.bf16 %v2302_v24  ;;  %v2490_v24 = vpack.i.bf16 %v904_v20, %v903_v30 }
 0x271   : > { %v3746_v1 = vsel %vm1201_vm0, %v4538_v13, %v2328_v43  ;;  %v4673_v43 = vunpack.i.l.bf16 %v3622_v60  ;;  %v4677_v13 = vunpack.i.h.bf16 %v3453_v16 }
 0x272   : > { %v3751_v9 = vsel %vm1201_vm0, %v4670_v44, %v2303_v0  ;;  %v3754_v23 = vsel %vm1201_vm0, %v2304_v51, %v2308_v8  ;;  %v3757_v42 = vsel %vm1201_vm0, %v2303_v0, %v2304_v51  ;;  %v2213_v44 = vunpack.i.l.bf16 %v3453_v16 }
 0x273   : > { %4671 = vst [vmem:[#allocation35_spill] sm:$0xff] %v3757_v42  ;;  %v2495_v6 = vpack.i.bf16 %v921_v2, %v4673_v43  ;;  %v2258_v8 = vunpack.i.l.bf16 %v3552_v45  ;;  %v4675_v43 = vunpack.i.h.bf16 %v3455_v34 }
 0x274   : > { %v899_v45 = vsel %vm878_vm15, %v2209_v41, %v2213_v44  ;;  %v900_v58 = vsel %vm878_vm15, %v2213_v44, %v4677_v13  ;;  %v2358_v13 = vunpack.i.l.bf16 %v3731_v63 }
 0x275   : > { %2526 = vrot.lane.b32.xlu0 %v2525_v22, %s2740_s19  ;;  %2491 = vrot.lane.b32.xlu1 %v2490_v24, %s2740_s19  ;;  %v914_v2 = vsel %vm878_vm15, %v2254_v35, %v2258_v8  ;;  %v917_v22 = vsel %vm878_vm15, %v4674_v62, %v2268_v48 }
 0x276   : > { %2496 = vrot.lane.b32.xlu2 %v2495_v6, %s2740_s19  ;;  %v3769_v51 = vpop.permute.xlu1 %2336  ;;  %v3771_v30 = vpop.permute.xlu2 %2371  ;;  %v4676_v6 = vunpack.i.l.bf16 %v3455_v34 }
 0x277   : > { %v4540_v20 = vunpack.i.h.bf16 %v3769_v51  ;;  %v3775_v60 = vpop.permute.xlu0 %2316 }
 0x278   : > { %v4545_v0 = vunpack.i.l.bf16 %v3775_v60  ;;  %v887_v8 = vsel %vm878_vm15, %v4676_v6, %v4675_v43  ;;  %v4682_v6 = vunpack.i.l.bf16 %v3585_v38 }
 0x279   : > { %v3789_v24 = vsel %vm1201_vm0, %v4540_v20, %v4539_v28  ;;  %v2540_v62 = vpack.i.bf16 %v887_v8, %v914_v2  ;;  %v2500_v28 = vpack.i.bf16 %v900_v58, %v899_v45  ;;  %v4679_v20 = vunpack.i.h.bf16 %v3593_v31 }
 0x27a   : > { %v3804_v48 = vsel %vm1201_vm0, %v4678_v47, %v4545_v0 }
 0x27b   : > { %v2505_v42 = vpack.i.bf16 %v917_v22, %v4679_v20  ;;  %v4681_v22 = vunpack.i.h.bf16 %v3658_v25 }
 0x27d   : > { %2501 = vrot.lane.b32.xlu1 %v2500_v28, %s2740_s19  ;;  %2541 = vrot.lane.b32.xlu0 %v2540_v62, %s2740_s19  ;;  %v4680_v28 = vunpack.i.l.bf16 %v3618_v12  ;;  %v4683_v12 = vpack.i.bf16 %v3538_v52, %v3535_v17  ;;  %v4685_v17 = vunpack.i.l.bf16 %v3518_v57  ;;  %v4686_v52 = vunpack.i.h.bf16 %v3589_v36 }
 0x27e   : > { %2506 = vrot.lane.b32.xlu2 %v2505_v42, %s2740_s19  ;;  %v3811_v16 = vpop.permute.xlu1 %2351  ;;  %v3813_v34 = vpop.permute.xlu2 %2386 }
 0x27f   : > { %v2354_v44 = vunpack.i.h.bf16 %v3811_v16  ;;  %v2353_v2 = vunpack.i.l.bf16 %v3811_v16  ;;  %v3818_v58 = vpop.permute.xlu0 %2331  ;;  %v913_v20 = vsel %vm878_vm15, %v4680_v28, %v2254_v35  ;;  %v4684_v35 = vpack.i.bf16 %v3395_v18, %v3392_v56 }
 0x280   : > { %v2333_v31 = vunpack.i.l.bf16 %v3818_v58  ;;  %v2520_v8 = vpack.i.bf16 %v913_v20, %v4682_v6  ;;  %v4696_v16 = vunpack.i.l.bf16 %v3631_v37 }
 0x281   : > { %v3825_v42 = vsel %vm1201_vm0, %v2354_v44, %v2358_v13  ;;  %v3830_v45 = vsel %vm1201_vm0, %v2353_v2, %v2354_v44  ;;  %v909_v44 = vsel %vm878_vm15, %v4686_v52, %v4685_v17 }
 0x282   : > { %v3835_v43 = vsel %vm1201_vm0, %v4681_v22, %v2333_v31  ;;  %v2535_v18 = vpack.i.bf16 %v909_v44, %v2209_v41  ;;  %v4687_v31 = vpack.i.bf16 %v3496_v27, %v3493_v3 }
 0x285   : > { %2516 = vrot.lane.b32.xlu1 %v4683_v12, %s2740_s19  ;;  %2556 = vrot.lane.b32.xlu0 %v4684_v35, %s2740_s19  ;;  %v2389_v35 = vunpack.i.h.bf16 %v3813_v34 }
 0x286   : > { %2521 = vrot.lane.b32.xlu2 %v2520_v8, %s2740_s19  ;;  %v3848_v47 = vpop.permute.xlu1 %2366  ;;  %v3850_v25 = vpop.permute.xlu2 %2401 }
 0x287   : > { %v3852_v62 = vpop.permute.xlu0 %2346  ;;  %v4548_v38 = vunpack.i.h.bf16 %v3850_v25  ;;  %v2403_v13 = vunpack.i.l.bf16 %v3850_v25  ;;  %v4546_v28 = vunpack.i.l.bf16 %v3848_v47 }
 0x289   : > { %v3866_v56 = vsel %vm1201_vm0, %v2403_v13, %v4548_v38 }
 0x28d   : > { %2531 = vrot.lane.b32.xlu1 %v4687_v31, %s2740_s19  ;;  %2571 = vrot.lane.b32.xlu0 %v3475_v4, %s2740_s19  ;;  %v4688_v4 = vpack.i.bf16 %v3530_v33, %v3525_v10  ;;  %v4689_v10 = vpack.i.bf16 %v3290_v53, %v3285_v59  ;;  %v4690_v33 = vpack.i.bf16 %v3605_v54, %v3613_v61 }
 0x28e   : > { %2536 = vrot.lane.b32.xlu2 %v2535_v18, %s2740_s19  ;;  %v3875_v57 = vpop.permute.xlu1 %2381  ;;  %v3930_v59 = vpop.permute.xlu2 %2416  ;;  %v4691_v53 = vpack.i.bf16 %v3569_v5, %v3561_v14 }
 0x28f   : > { %v3877_v36 = vpop.permute.xlu0 %2361  ;;  %v2383_v41 = vunpack.i.l.bf16 %v3875_v57 }
 0x290   : > { %v2364_v20 = vunpack.i.h.bf16 %v3877_v36 }
 0x292   : > { %v3886_v3 = vsel %vm1201_vm0, %v2364_v20, %v4546_v28 }
 0x295   : > { %2546 = vrot.lane.b32.xlu1 %v3477_v26, %s2740_s19  ;;  %2586 = vrot.lane.b32.xlu0 %v3563_v11, %s2740_s19 }
 0x296   : > { %2551 = vrot.lane.b32.xlu2 %v4688_v4, %s2740_s19  ;;  %v3901_v8 = vpop.permute.xlu1 %2396  ;;  %v4541_v4 = vunpack.i.h.bf16 %v3930_v59 }
 0x297   : > { %v3896_v27 = vpop.permute.xlu0 %2376 }
 0x298   : > { %v2379_v22 = vunpack.i.h.bf16 %v3896_v27  ;;  %v2378_v6 = vunpack.i.l.bf16 %v3896_v27  ;;  %v2418_v27 = vunpack.i.l.bf16 %v3930_v59 }
 0x29a   : > { %v3904_v26 = vsel %vm1201_vm0, %v2379_v22, %v2383_v41  ;;  %v3907_v11 = vsel %vm1201_vm0, %v2378_v6, %v2379_v22  ;;  %v4692_v41 = vpack.i.bf16 %v3463_v39, %v3460_v19  ;;  %v3956_v22 = vpop.permute.xlu2 %2431 }
 0x29d   : > { %2561 = vrot.lane.b32.xlu1 %v3571_v29, %s2740_s19  ;;  %2601 = vrot.lane.b32.xlu0 %v4689_v10, %s2740_s19  ;;  %v4693_v10 = vpack.i.bf16 %v3437_v40, %v3387_v46  ;;  %v2433_v46 = vunpack.i.l.bf16 %v3956_v22 }
 0x29e   : > { %2566 = vrot.lane.b32.xlu2 %v4690_v33, %s2740_s19  ;;  %v3928_v52 = vpop.permute.xlu1 %2411  ;;  %v1255_v33 = vsel %vm1201_vm0, %v2418_v27, %v4541_v4  ;;  %v2399_v4 = vunpack.i.h.bf16 %v3901_v8 }
 0x29f   : > { %v3919_v12 = vpop.permute.xlu0 %2391  ;;  %v4542_v54 = vunpack.i.h.bf16 %v3928_v52  ;;  %v2413_v44 = vunpack.i.l.bf16 %v3928_v52 }
 0x2a0   : > { %v4547_v17 = vunpack.i.l.bf16 %v3919_v12 }
 0x2a2   : > { %v3926_v29 = vsel %vm1201_vm0, %v2389_v35, %v4547_v17 }
 0x2a5   : > { %2576 = vrot.lane.b32.xlu1 %v4691_v53, %s2740_s19 }
 0x2a6   : > { %2581 = vrot.lane.b32.xlu2 %v3502_v15, %s2740_s19  ;;  %v1259_v15 = vsel %vm1201_vm0, %v2413_v44, %v4542_v54  ;;  %v2427_v5 = vpop.permute.xlu1 %2426 }
 0x2a7   : > { %v3938_v61 = vpop.permute.xlu0 %2406 }
 0x2a8   : > { %v4544_v18 = vunpack.i.h.bf16 %v3938_v61  ;;  %v2408_v31 = vunpack.i.l.bf16 %v3938_v61 }
 0x2aa   : > { %v1263_v14 = vsel %vm1201_vm0, %v2408_v31, %v4544_v18 }
 0x2ab   : > { %1462 = vmatpush.msra.mxu2 %v1263_v14  ;;  %v2429_v14 = vunpack.i.h.bf16 %v2427_v5 }
 0x2ad   : > { %1463 = vmatpush.msra.mxu2 %v1259_v15  ;;  %2591 = vrot.lane.b32.xlu1 %v4692_v41, %s2740_s19  ;;  %v2428_v15 = vunpack.i.l.bf16 %v2427_v5  ;;  %v4543_v41 = vunpack.i.h.bf16 %v3956_v22  ;;  %v1258_v5 = vsel %vm1201_vm0, %v2429_v14, %v2413_v44  ;;  %v1243_v44 = vsel %vm1201_vm0, %v2399_v4, %v2403_v13 }
 0x2ae   : > { %2596 = vrot.lane.b32.xlu2 %v4693_v10, %s2740_s19 }
 0x2af   : > { %v3967_v53 = vpop.permute.xlu0 %2421  ;;  %1464 = vmatpush.msra.mxu2 %v1255_v33  ;;  %v2388_v33 = vunpack.i.l.bf16 %v3813_v34  ;;  %v2348_v34 = vunpack.i.l.bf16 %v3852_v62 }
 0x2b0   : > { %v2424_v19 = vunpack.i.h.bf16 %v3967_v53  ;;  %v2423_v39 = vunpack.i.l.bf16 %v3967_v53  ;;  %v2373_v53 = vunpack.i.l.bf16 %v3771_v30 }
 0x2b2   : > { %v1262_v40 = vsel %vm1201_vm0, %v2423_v39, %v2408_v31  ;;  %v1251_v10 = vsel %vm1201_vm0, %v2424_v19, %v2428_v15  ;;  %v1247_v31 = vsel %vm1201_vm0, %v2433_v46, %v4543_v41 }
 0x2b3   : > { %1422 = vmatpush.msra.mxu0 %v1262_v40  ;;  %1465 = vmatpush.msra.mxu2 %v1251_v10  ;;  %v4552_v40 = vunpack.i.l.bf16 %v3877_v36  ;;  %v1239_v10 = vsel %vm1201_vm0, %v2388_v33, %v2389_v35 }
 0x2b5   : > { %1423 = vmatpush.msra.mxu0 %v1258_v5  ;;  %1099 = vrot.lane.b32.xlu1 %v3309_v50, %s2740_s19  ;;  %v4553_v50 = vunpack.i.h.bf16 %v3771_v30  ;;  %v1231_v35 = vsel %vm1201_vm0, %v4552_v40, %v2364_v20  ;;  %v4695_v20 = vunpack.i.h.bf16 %v3631_v37 }
 0x2b6   : > { %1466 = vmatpush.msra.mxu2 %v1247_v31  ;;  %v4551_v31 = vunpack.i.h.bf16 %v3852_v62 }
 0x2b7   : > { %v3987_v39 = vpop.permute.xlu0 %2441  ;;  %v3989_v54 = vpop.permute.xlu2 %2461  ;;  %v1235_v13 = vsel %vm1201_vm0, %v4553_v50, %v2378_v6  ;;  %v4694_v6 = vunpack.i.h.bf16 %v3769_v51 }
 0x2b8   : > { %v4549_v14 = vunpack.i.l.bf16 %v3987_v39  ;;  %1467 = vmatpush.msra.mxu2 %v1243_v44  ;;  %v4550_v44 = vunpack.i.l.bf16 %v3769_v51 }
 0x2ba   : > { %1468 = vmatpush.msra.mxu2 %v1239_v10  ;;  %v4005_v5 = vsel %vm1201_vm0, %v2428_v15, %v4549_v14  ;;  %v1227_v15 = vsel %vm1201_vm0, %v4551_v31, %v2353_v2  ;;  %v2398_v14 = vunpack.i.l.bf16 %v3901_v8  ;;  %v2384_v31 = vunpack.i.h.bf16 %v3875_v57 }
 0x2bc   : > { %1469 = vmatpush.msra.mxu2 %v1235_v13  ;;  %v1223_v13 = vsel %vm1201_vm0, %v4550_v44, %v4694_v6 }
 0x2be   : > { %1470 = vmatpush.msra.mxu2 %v1231_v35  ;;  %v1215_v35 = vsel %vm1201_vm0, %v4696_v16, %v4695_v20  ;;  %v2464_v20 = vunpack.i.h.bf16 %v3989_v54 }
 0x2bf   : > { %v4017_v10 = vpop.permute.xlu0 %2446 }
 0x2c0   : > { %v4024_v41 = vpop.permute.xlu2 %2476  ;;  %1471 = vmatpush.msra.mxu2 %v1227_v15  ;;  %v2448_v18 = vunpack.i.l.bf16 %v4017_v10 }
 0x2c1   : > { %v2479_v44 = vunpack.i.h.bf16 %v4024_v41 }
 0x2c2   : > { %1472 = vmatpush.msra.mxu2 %v1223_v13  ;;  %v4698_v13 = vunpack.i.l.bf16 %v3690_v32 }
 0x2c4   : > { %1473 = vmatpush.msra.mxu2 %v3746_v1  ;;  %v4697_v1 = vunpack.i.h.bf16 %v3690_v32 }
 0x2c6   : > { %1474 = vmatpush.msra.mxu2 %v1215_v35  ;;  %v1207_v37 = vsel %vm1201_vm0, %v4698_v13, %v4697_v1  ;;  %v4060_v1 = vpop.permute.xlu1 %2436 }
 0x2c7   : > { %v2452_v2 = vpop.permute.xlu0 %2451 }
 0x2c8   : > { %v2454_v15 = vunpack.i.h.bf16 %v2452_v2  ;;  %v2453_v0 = vunpack.i.l.bf16 %v2452_v2  ;;  %v4038_v28 = vpop.permute.xlu2 %2486  ;;  %1475 = vmatpush.msra.mxu2 %v3751_v9  ;;  %v4055_v9 = vld [vmem:[%s4470_s2] sm:$0xff] }
 0x2c9   : > { %v2489_v6 = vunpack.i.h.bf16 %v4038_v28  ;;  %v4699_v2 = vld [vmem:[#allocation50_spill] sm:$0xff] }
 0x2ca   : > { %1476 = vmatpush.msra.mxu2 %v1207_v37  ;;  %v1254_v16 = vsel %vm1201_vm0, %v2453_v0, %v2418_v27  ;;  %v1306_v35 = vsel %vm1201_vm0, %v2448_v18, %v2454_v15  ;;  %v2478_v18 = vunpack.i.l.bf16 %v4024_v41 }
 0x2cb   : > { %1424 = vmatpush.msra.mxu0 %v1254_v16  ;;  %1447 = vmatpush.msra.mxu1 %v1306_v35  ;;  %v1302_v32 = vsel %vm1201_vm0, %v2489_v6, %v2464_v20 }
 0x2cc   : > { %1477 = vmatpush.msra.mxu2 %v4699_v2  ;;  %v1299_v57 = vsel %vm1201_vm0, %v2478_v18, %v2479_v44 }
 0x2cd   : > { %1478 = vmatmul.f32.vlgmr.msra.gmra.mxu2 %v4055_v9  ;;  %1448 = vmatpush.msra.mxu1 %v1302_v32 }
 0x2cf   : > { %v4062_v13 = vpop.permute.xlu0 %2466 }
 0x2d0   : > { %v4064_v0 = vpop.permute.xlu2 %2496  ;;  %v2469_v6 = vunpack.i.h.bf16 %v4062_v13  ;;  %v2468_v2 = vunpack.i.l.bf16 %v4062_v13 }
 0x2d1   : > { %v2498_v27 = vunpack.i.l.bf16 %v4064_v0  ;;  %v2499_v8 = vunpack.i.h.bf16 %v4064_v0 }
 0x2d2   : > { %v1246_v40 = vsel %vm1201_vm0, %v2469_v6, %v2433_v46  ;;  %v1303_v50 = vsel %vm1201_vm0, %v2464_v20, %v2468_v2  ;;  %v4700_v6 = vunpack.i.h.bf16 %v3771_v30 }
 0x2d3   : > { %v1298_v37 = vsel %vm1201_vm0, %v2498_v27, %v2478_v18  ;;  %v2359_v18 = vunpack.i.h.bf16 %v3731_v63  ;;  %v4701_v63 = vunpack.i.l.bf16 %v3877_v36 }
 0x2d4   : > { %1449 = vmatpush.msra.mxu1 %v1298_v37 }
 0x2d5   : > { %v1230_v30 = vsel %vm1201_vm0, %v2359_v18, %v4701_v63 }
 0x2d7   : > { %v4069_v16 = vpop.permute.xlu1 %2456  ;;  %v4071_v35 = vpop.permute.xlu0 %2471 }
 0x2d8   : > { %v2459_v32 = vunpack.i.h.bf16 %v4069_v16  ;;  %v2458_v17 = vunpack.i.l.bf16 %v4069_v16  ;;  %v4077_v38 = vpop.permute.xlu2 %2506 }
 0x2da   : > { %v1250_v27 = vsel %vm1201_vm0, %v2459_v32, %v2424_v19  ;;  %v1307_v37 = vsel %vm1201_vm0, %v2454_v15, %v2458_v17  ;;  %v1242_v19 = vsel %vm1201_vm0, %v2398_v14, %v2399_v4  ;;  %v4555_v15 = vunpack.i.l.bf16 %v4038_v28 }
 0x2db   : > { %1425 = vmatpush.msra.mxu0 %v1250_v27  ;;  %1487 = vmatpush.msra.mxu3 %v1307_v37  ;;  %v2508_v4 = vunpack.i.l.bf16 %v4077_v38  ;;  %v1234_v27 = vsel %vm1201_vm0, %v2373_v53, %v4700_v6  ;;  %v2323_v53 = vunpack.i.l.bf16 %v3729_v55 }
 0x2dd   : > { %1426 = vmatpush.msra.mxu0 %v1246_v40  ;;  %1488 = vmatpush.msra.mxu3 %v1303_v50  ;;  %v1238_v50 = vsel %vm1201_vm0, %v2384_v31, %v2388_v33 }
 0x2df   : > { %v4102_v32 = vpop.permute.xlu0 %2511  ;;  %v4104_v46 = vpop.permute.xlu1 %2481  ;;  %1427 = vmatpush.msra.mxu0 %v1242_v19  ;;  %1489 = vmatpush.msra.mxu3 %v1299_v57  ;;  %v2334_v19 = vunpack.i.h.bf16 %v3818_v58  ;;  %v4702_v57 = vunpack.i.h.bf16 %v3852_v62 }
 0x2e0   : > { %v2513_v14 = vunpack.i.l.bf16 %v4102_v32  ;;  %v2484_v40 = vunpack.i.h.bf16 %v4104_v46  ;;  %v4113_v20 = vpop.permute.xlu2 %2521 }
 0x2e1   : > { %1428 = vmatpush.msra.mxu0 %v1238_v50  ;;  %v1226_v50 = vsel %vm1201_vm0, %v2348_v34, %v4702_v57  ;;  %v2523_v18 = vunpack.i.l.bf16 %v4113_v20  ;;  %v4706_v57 = vld [vmem:[#allocation49_spill] sm:$0xff] }
 0x2e2   : > { %v1294_v33 = vsel %vm1201_vm0, %v2508_v4, %v2484_v40  ;;  %v1295_v31 = vsel %vm1201_vm0, %v2484_v40, %v4555_v15  ;;  %v1309_v37 = vsel %vm1201_vm0, %v2499_v8, %v2513_v14  ;;  %v2509_v4 = vunpack.i.h.bf16 %v4077_v38 }
 0x2e3   : > { %1429 = vmatpush.msra.mxu0 %v1234_v27  ;;  %1450 = vmatpush.msra.mxu1 %v1294_v33  ;;  %v4703_v40 = vunpack.i.l.bf16 %v3769_v51  ;;  %v2298_v33 = vunpack.i.l.bf16 %v3620_v49  ;;  %v2483_v15 = vunpack.i.l.bf16 %v4104_v46 }
 0x2e4   : > { %1490 = vmatpush.msra.mxu3 %v1295_v31  ;;  %1567 = vmatpush.msrb.mxu2 %v1309_v37  ;;  %v4704_v31 = vunpack.i.h.bf16 %v3729_v55  ;;  %v2148_v55 = vunpack.i.l.bf16 %v4706_v57 }
 0x2e5   : > { %1430 = vmatpush.msra.mxu0 %v1230_v30  ;;  %v1222_v36 = vsel %vm1201_vm0, %v2334_v19, %v4703_v40  ;;  %v4705_v30 = vld [vmem:[#allocation43_spill] sm:$0xff]  ;;  %v2524_v40 = vunpack.i.h.bf16 %v4113_v20 }
 0x2e6   : > { %v1218_v37 = vsel %vm1201_vm0, %v2323_v53, %v4704_v31  ;;  %v4707_v53 = vunpack.i.h.bf16 %v3620_v49  ;;  %v4557_v49 = vunpack.i.l.bf16 %v3989_v54 }
 0x2e7   : > { %v4136_v14 = vpop.permute.xlu0 %2526  ;;  %v4138_v58 = vpop.permute.xlu1 %2491  ;;  %1431 = vmatpush.msra.mxu0 %v1226_v50 }
 0x2e8   : > { %v2528_v6 = vunpack.i.l.bf16 %v4136_v14  ;;  %v4554_v27 = vunpack.i.h.bf16 %v4138_v58  ;;  %v2493_v62 = vunpack.i.l.bf16 %v4138_v58  ;;  %v4147_v34 = vpop.permute.xlu2 %2536  ;;  %v1210_v50 = vsel %vm1201_vm0, %v2298_v33, %v4707_v53 }
 0x2e9   : > { %1432 = vmatpush.msra.mxu0 %v1222_v36 }
 0x2ea   : > { %v1290_v51 = vsel %vm1201_vm0, %v2523_v18, %v2493_v62  ;;  %v1291_v19 = vsel %vm1201_vm0, %v2493_v62, %v4554_v27  ;;  %v1305_v63 = vsel %vm1201_vm0, %v2509_v4, %v2528_v6  ;;  %v2538_v6 = vunpack.i.l.bf16 %v4147_v34 }
 0x2eb   : > { %1433 = vmatpush.msra.mxu0 %v1218_v37  ;;  %1451 = vmatpush.msra.mxu1 %v1290_v51  ;;  %v2439_v27 = vunpack.i.h.bf16 %v4060_v1 }
 0x2ec   : > { %1491 = vmatpush.msra.mxu3 %v1291_v19  ;;  %1568 = vmatpush.msrb.mxu2 %v1305_v63  ;;  %v4708_v19 = vunpack.i.h.bf16 %v4706_v57  ;;  %v4556_v57 = vunpack.i.l.bf16 %v4060_v1 }
 0x2ed   : > { %1434 = vmatpush.msra.mxu0 %v4705_v30 }
 0x2ee   : > { %v1202_v63 = vsel %vm1201_vm0, %v2148_v55, %v4708_v19  ;;  %v4559_v55 = vunpack.i.h.bf16 %v4017_v10  ;;  %v1261_v19 = vsel %vm1201_vm0, %v4556_v57, %v2483_v15  ;;  %v2529_v57 = vunpack.i.h.bf16 %v4136_v14 }
 0x2ef   : > { %v4166_v36 = vpop.permute.xlu1 %2501  ;;  %v4168_v18 = vpop.permute.xlu0 %2541  ;;  %1435 = vmatpush.msra.mxu0 %v1210_v50 }
 0x2f0   : > { %v4558_v62 = vunpack.i.h.bf16 %v4166_v36  ;;  %v2503_v31 = vunpack.i.l.bf16 %v4166_v36  ;;  %v2543_v37 = vunpack.i.l.bf16 %v4168_v18  ;;  %v4174_v51 = vpop.permute.xlu2 %2551 }
 0x2f1   : > { %v2554_v33 = vunpack.i.h.bf16 %v4174_v51  ;;  %1436 = vmatpush.msra.mxu0 %v3711_v21  ;;  %v2539_v21 = vunpack.i.h.bf16 %v4147_v34 }
 0x2f2   : > { %v1286_v30 = vsel %vm1201_vm0, %v2538_v6, %v2503_v31  ;;  %v1287_v53 = vsel %vm1201_vm0, %v2503_v31, %v4558_v62  ;;  %v1301_v50 = vsel %vm1201_vm0, %v2524_v40, %v2543_v37  ;;  %v1265_v6 = vsel %vm1201_vm0, %v4557_v49, %v2439_v27 }
 0x2f3   : > { %1437 = vmatpush.msra.mxu0 %v1202_v63  ;;  %1452 = vmatpush.msra.mxu1 %v1286_v30  ;;  %v1297_v46 = vsel %vm1201_vm0, %v2539_v21, %v2554_v33  ;;  %v2444_v31 = vunpack.i.h.bf16 %v3987_v39  ;;  %v2474_v37 = vunpack.i.h.bf16 %v4071_v35  ;;  %v2514_v33 = vunpack.i.h.bf16 %v4102_v32 }
 0x2f4   : > { %1492 = vmatpush.msra.mxu3 %v1287_v53  ;;  %1569 = vmatpush.msrb.mxu2 %v1301_v50  ;;  %v2553_v50 = vunpack.i.l.bf16 %v4174_v51  ;;  %v4709_v49 = vunpack.i.l.bf16 %v3987_v39  ;;  %v4710_v39 = vunpack.i.h.bf16 %v3850_v25 }
 0x2f5   : > { %1438 = vmatmul.f32.vlgmr.msra.gmra.mxu0 %v4055_v9 }
 0x2f6   : > { %1542 = vmatpush.msrb.mxu0 %v1265_v6  ;;  %1570 = vmatpush.msrb.mxu2 %v1297_v46  ;;  %v1257_v46 = vsel %vm1201_vm0, %v4559_v55, %v2444_v31  ;;  %v1253_v32 = vsel %vm1201_vm0, %v4709_v49, %v2474_v37  ;;  %v2394_v31 = vunpack.i.h.bf16 %v3919_v12  ;;  %v1245_v14 = vsel %vm1201_vm0, %v4710_v39, %v2529_v57 }
 0x2f7   : > { %v4206_v63 = vpop.permute.xlu1 %2516  ;;  %v2344_v57 = vunpack.i.h.bf16 %v3686_v7  ;;  %v2544_v39 = vunpack.i.h.bf16 %v4168_v18 }
 0x2f8   : > { %1543 = vmatpush.msrb.mxu0 %v1261_v19  ;;  %v2519_v30 = vunpack.i.h.bf16 %v4206_v63  ;;  %v2518_v27 = vunpack.i.l.bf16 %v4206_v63  ;;  %v4210_v53 = vpop.permute.xlu2 %2566  ;;  %v2473_v19 = vunpack.i.l.bf16 %v4071_v35  ;;  %v4724_v63 = vunpack.i.h.bf16 %v3928_v52 }
 0x2f9   : > { %v2568_v6 = vunpack.i.l.bf16 %v4210_v53 }
 0x2fa   : > { %1544 = vmatpush.msrb.mxu0 %v1257_v46  ;;  %v1283_v15 = vsel %vm1201_vm0, %v2518_v27, %v2519_v30  ;;  %v4230_v46 = vpop.permute.xlu0 %2556  ;;  %v1249_v55 = vsel %vm1201_vm0, %v2473_v19, %v2514_v33 }
 0x2fb   : > { %1493 = vmatpush.msra.mxu3 %v1283_v15  ;;  %v1293_v62 = vsel %vm1201_vm0, %v2553_v50, %v2568_v6  ;;  %v2369_v6 = vunpack.i.h.bf16 %v3848_v47  ;;  %v4711_v15 = vunpack.i.l.bf16 %v3919_v12 }
 0x2fc   : > { %1545 = vmatpush.msrb.mxu0 %v1253_v32  ;;  %1571 = vmatpush.msrb.mxu2 %v1293_v62 }
 0x2fd   : > { %v1241_v32 = vsel %vm1201_vm0, %v4711_v15, %v2394_v31  ;;  %v2558_v15 = vunpack.i.l.bf16 %v4230_v46 }
 0x2fe   : > { %1546 = vmatpush.msrb.mxu0 %v1249_v55  ;;  %v4712_v55 = vunpack.i.l.bf16 %v3848_v47  ;;  %v2319_v47 = vunpack.i.h.bf16 %v3775_v60 }
 0x2ff   : > { %v4238_v49 = vpop.permute.xlu1 %2531 }
 0x300   : > { %1547 = vmatpush.msrb.mxu0 %v1245_v14  ;;  %v2534_v37 = vunpack.i.h.bf16 %v4238_v49  ;;  %v2533_v62 = vunpack.i.l.bf16 %v4238_v49  ;;  %v1233_v33 = vsel %vm1201_vm0, %v4712_v55, %v2369_v6  ;;  %v2559_v14 = vunpack.i.h.bf16 %v4230_v46 }
 0x301   : > { %v4713_v6 = vunpack.i.l.bf16 %v3686_v7 }
 0x302   : > { %1548 = vmatpush.msrb.mxu0 %v1241_v32  ;;  %v1279_v25 = vsel %vm1201_vm0, %v2533_v62, %v2534_v37  ;;  %v4255_v12 = vpop.permute.xlu0 %2571  ;;  %v1271_v7 = vsel %vm1201_vm0, %v2558_v15, %v2559_v14 }
 0x303   : > { %1494 = vmatpush.msra.mxu3 %v1279_v25  ;;  %v1225_v18 = vsel %vm1201_vm0, %v4713_v6, %v2344_v57  ;;  %v2573_v25 = vunpack.i.l.bf16 %v4255_v12  ;;  %v4714_v57 = vld [vmem:[#allocation24_spill] sm:$0xff] }
 0x304   : > { %1549 = vmatpush.msrb.mxu0 %v3904_v26  ;;  %v2294_v6 = vunpack.i.h.bf16 %v4714_v57 }
 0x306   : > { %1550 = vmatpush.msrb.mxu0 %v1233_v33 }
 0x307   : > { %v4257_v31 = vpop.permute.xlu1 %2546 }
 0x308   : > { %1551 = vmatpush.msrb.mxu0 %v3825_v42  ;;  %v2549_v26 = vunpack.i.h.bf16 %v4257_v31  ;;  %v2548_v32 = vunpack.i.l.bf16 %v4257_v31  ;;  %v2569_v42 = vunpack.i.h.bf16 %v4210_v53  ;;  %v4731_v31 = vld [vmem:[#allocation51_spill] sm:$0xff] }
 0x30a   : > { %1552 = vmatpush.msrb.mxu0 %v1225_v18  ;;  %v1282_v55 = vsel %vm1201_vm0, %v2549_v26, %v2518_v27  ;;  %v1275_v33 = vsel %vm1201_vm0, %v2544_v39, %v2548_v32  ;;  %v4715_v18 = vunpack.i.l.bf16 %v3775_v60  ;;  %v4285_v26 = vld [vmem:[%s4470_s2 + $0x8] sm:$0xff] }
 0x30b   : > { %1453 = vmatpush.msra.mxu1 %v1282_v55  ;;  %1495 = vmatpush.msra.mxu3 %v1275_v33  ;;  %v4290_v55 = vpop.permute.xlu2 %2581  ;;  %v2574_v33 = vunpack.i.h.bf16 %v4255_v12  ;;  %v4730_v12 = vld [vmem:[#allocation42_spill] sm:$0xff] }
 0x30c   : > { %1553 = vmatpush.msrb.mxu0 %v3835_v43  ;;  %v1217_v27 = vsel %vm1201_vm0, %v4715_v18, %v2319_v47  ;;  %v1267_v43 = vsel %vm1201_vm0, %v2569_v42, %v2573_v25  ;;  %v1308_v47 = vsel %vm1201_vm0, %v2458_v17, %v2499_v8  ;;  %v2583_v16 = vunpack.i.l.bf16 %v4290_v55  ;;  %v4717_v17 = vld [vmem:[#allocation25_spill] sm:$0xff] }
 0x30d   : > { %1496 = vmatpush.msra.mxu3 %v1271_v7  ;;  %v4716_v7 = vunpack.i.l.bf16 %v4714_v57  ;;  %v1300_v8 = vsel %vm1201_vm0, %v2479_v44, %v2524_v40  ;;  %v1274_v38 = vsel %vm1201_vm0, %v2574_v33, %v2544_v39  ;;  %v4719_v40 = vunpack.i.h.bf16 %v4138_v58 }
 0x30e   : > { %1554 = vmatpush.msrb.mxu0 %v1217_v27  ;;  %v2587_v27 = vpop.permute.xlu0 %2586  ;;  %v1270_v41 = vsel %vm1201_vm0, %v2583_v16, %v2558_v15  ;;  %v4721_v58 = vunpack.i.l.bf16 %v3989_v54 }
 0x30f   : > { %v2562_v53 = vpop.permute.xlu1 %2561  ;;  %1497 = vmatpush.msra.mxu3 %v1267_v43  ;;  %v1209_v18 = vsel %vm1201_vm0, %v4716_v7, %v2294_v6  ;;  %v2589_v57 = vunpack.i.h.bf16 %v2587_v27  ;;  %v1292_v39 = vsel %vm1201_vm0, %v4719_v40, %v2553_v50  ;;  %v2588_v43 = vunpack.i.l.bf16 %v2587_v27 }
 0x310   : > { %1555 = vmatpush.msrb.mxu0 %v3754_v23  ;;  %v2563_v60 = vunpack.i.l.bf16 %v2562_v53  ;;  %1814 = vmatmul.msk.f32.vlgmr.msra.gmra.mxu3 %vm1418_vm3, %v4285_v26  ;;  %v1304_v23 = vsel %vm1201_vm0, %v2468_v2, %v2509_v4  ;;  %v2564_v13 = vunpack.i.h.bf16 %v2562_v53  ;;  %v4718_v2 = vunpack.i.l.bf16 %v4038_v28 }
 0x311   : > { %1527 = vmatpush.msrb.mxu3 %v1308_v47  ;;  %v1266_v34 = vsel %vm1201_vm0, %v2589_v57, %v2569_v42  ;;  %v2584_v28 = vunpack.i.h.bf16 %v4290_v55  ;;  %v4722_v50 = vunpack.i.h.bf16 %v3938_v61  ;;  %v4723_v53 = vunpack.i.l.bf16 %v4060_v1 }
 0x312   : > { %1556 = vmatpush.msrb.mxu0 %v1209_v18  ;;  %v1278_v0 = vsel %vm1201_vm0, %v2563_v60, %v2533_v62  ;;  %v1296_v4 = vsel %vm1201_vm0, %v4718_v2, %v2539_v21  ;;  %v4720_v21 = vunpack.i.h.bf16 %v4166_v36  ;;  %v4725_v60 = vunpack.i.h.bf16 %v4017_v10  ;;  %v4735_v2 = vld [vmem:[#allocation18_spill] sm:$0xff] }
 0x313   : > { %1528 = vmatpush.msrb.mxu3 %v1304_v23  ;;  %1454 = vmatpush.msra.mxu1 %v1278_v0  ;;  %v1264_v42 = vsel %vm1201_vm0, %v4722_v50, %v4721_v58  ;;  %v2597_v36 = vpop.permute.xlu2 %2596  ;;  %v1280_v61 = vsel %vm1201_vm0, %v2534_v37, %v2584_v28  ;;  %v4726_v47 = vunpack.i.h.bf16 %v3930_v59  ;;  %v4727_v59 = vunpack.i.h.bf16 %v3956_v22 }
 0x314   : > { %1557 = vmatpush.msrb.mxu0 %v4717_v17  ;;  %v1288_v6 = vsel %vm1201_vm0, %v4720_v21, %v2564_v13  ;;  %v2598_v33 = vunpack.i.l.bf16 %v2597_v36  ;;  %v2599_v27 = vunpack.i.h.bf16 %v2597_v36 }
 0x315   : > { %1558 = vmatmul.f32.vlgmr.msrb.gmra.mxu0 %v4055_v9  ;;  %1529 = vmatpush.msrb.mxu3 %v1300_v8  ;;  %v1256_v1 = vsel %vm1201_vm0, %v4726_v47, %v4725_v60  ;;  %v1248_v37 = vsel %vm1201_vm0, %v4727_v59, %v2473_v19 }
 0x316   : > { %1455 = vmatpush.msra.mxu1 %v1274_v38  ;;  %v2602_v54 = vpop.permute.xlu0 %2601  ;;  %v1272_v16 = vsel %vm1201_vm0, %v2559_v14, %v2598_v33  ;;  %v4732_v14 = vld [vmem:[#allocation22_spill] sm:$0xff] }
 0x317   : > { %1530 = vmatpush.msrb.mxu3 %v1296_v4  ;;  %v2577_v20 = vpop.permute.xlu1 %2576  ;;  %v2604_v23 = vunpack.i.h.bf16 %v2602_v54  ;;  %v2603_v0 = vunpack.i.l.bf16 %v2602_v54  ;;  %v1589_v8 = vperm.slane %v4732_v14, 0 }
 0x318   : > { %v2579_v62 = vunpack.i.h.bf16 %v2577_v20  ;;  %v2578_v44 = vunpack.i.l.bf16 %v2577_v20  ;;  %1456 = vmatpush.msra.mxu1 %v1270_v41 }
 0x319   : > { %1531 = vmatpush.msrb.mxu3 %v1292_v39  ;;  %v1268_v35 = vsel %vm1201_vm0, %v2573_v25, %v2603_v0  ;;  %v1273_v22 = vsel %vm1201_vm0, %v2598_v33, %v2604_v23  ;;  %vm1593_vm5 = vcmp.eq.s32.totalorder %v1589_v8, 1 }
 0x31a   : > { %1457 = vmatpush.msra.mxu1 %v1266_v34  ;;  %v1289_v15 = vsel %vm1201_vm0, %v2564_v13, %v2579_v62  ;;  %v1284_v51 = vsel %vm1201_vm0, %v2519_v30, %v2578_v44  ;;  %v1260_v30 = vsel %vm1201_vm0, %v4724_v63, %v4723_v53  ;;  %v1285_v55 = vsel %vm1201_vm0, %v2578_v44, %v2588_v43  ;;  %v4736_v34 = vld [vmem:[#allocation21_spill] sm:$0xff] }
 0x31b   : > { %1813 = vmatmul.msk.f32.vlgmr.msra.gmra.mxu1 %vm1418_vm3, %v4285_v26  ;;  %1532 = vmatpush.msrb.mxu3 %v1288_v6  ;;  %v1592_v62 = vperm.slane %v4732_v14, 3 }
 0x31c   : > { %1502 = vmatpush.msrb.mxu1 %v1264_v42  ;;  %1572 = vmatpush.msrb.mxu2 %v1289_v15  ;;  %v4737_v42 = vld [vmem:[#allocation20_spill] sm:$0xff] }
 0x31d   : > { %1533 = vmatpush.msrb.mxu3 %v1284_v51  ;;  %vm1596_vm7 = vcmp.eq.s32.totalorder %v1592_v62, 1  ;;  %v1591_v51 = vperm.slane %v4732_v14, 2 }
 0x31e   : > { %1503 = vmatpush.msrb.mxu1 %v1260_v30  ;;  %1573 = vmatpush.msrb.mxu2 %v1285_v55 }
 0x31f   : > { %1534 = vmatpush.msrb.mxu3 %v1280_v61  ;;  %v2592_v52 = vpop.permute.xlu1 %2591  ;;  %vm1595_vm10 = vcmp.eq.s32.totalorder %v1591_v51, 1 }
 0x320   : > { %1504 = vmatpush.msrb.mxu1 %v1256_v1  ;;  %v2594_v7 = vunpack.i.h.bf16 %v2592_v52  ;;  %v2593_v18 = vunpack.i.l.bf16 %v2592_v52 }
 0x322   : > { %1505 = vmatpush.msrb.mxu1 %v4005_v5  ;;  %v1276_v49 = vsel %vm1201_vm0, %v2548_v32, %v2593_v18  ;;  %v1281_v10 = vsel %vm1201_vm0, %v2584_v28, %v2594_v7  ;;  %v1277_v5 = vsel %vm1201_vm0, %v2593_v18, %v2599_v27  ;;  %v4733_v32 = vld [vmem:[#allocation48_spill] sm:$0xff] }
 0x323   : > { %1535 = vmatpush.msrb.mxu3 %v1276_v49  ;;  %1574 = vmatpush.msrb.mxu2 %v1281_v10 }
 0x324   : > { %1506 = vmatpush.msrb.mxu1 %v1248_v37 }
 0x325   : > { %1536 = vmatpush.msrb.mxu3 %v1272_v16  ;;  %1575 = vmatpush.msrb.mxu2 %v1277_v5 }
 0x326   : > { %1507 = vmatpush.msrb.mxu1 %v3866_v56  ;;  %v4728_v56 = vld [vmem:[#allocation44_spill] sm:$0xff] }
 0x327   : > { %v1100_v19 = vpop.permute.xlu1 %1099  ;;  %1537 = vmatpush.msrb.mxu3 %v1268_v35  ;;  %1576 = vmatpush.msrb.mxu2 %v1273_v22 }
 0x328   : > { %1508 = vmatpush.msrb.mxu1 %v3926_v29  ;;  %v1269_v46 = vsel %vm1201_vm0, %v2603_v0, %v1100_v19  ;;  %1815 = vmatmul.msk.f32.vlgmr.msrb.gmra.mxu3 %vm1418_vm3, %v4285_v26  ;;  %v4729_v29 = vld [vmem:[#allocation35_spill] sm:$0xff] }
 0x329   : > { %1577 = vmatpush.msrb.mxu2 %v1269_v46 }
 0x32a   : > { %1509 = vmatpush.msrb.mxu1 %v3907_v11  ;;  %1816 = vmatmul.msk.f32.vlgmr.msrb.gmra.mxu2 %vm1418_vm3, %v4285_v26 }
 0x32c   : > { %1510 = vmatpush.msrb.mxu1 %v3886_v3  ;;  %v1590_v3 = vperm.slane %v4732_v14, 1 }
 0x32e   : > { %1511 = vmatpush.msrb.mxu1 %v3830_v45  ;;  %vm1594_vm4 = vcmp.eq.s32.totalorder %v1590_v3, 1 }
 0x330   : > { %1512 = vmatpush.msrb.mxu1 %v3789_v24 }
 0x332   : > { %1513 = vmatpush.msrb.mxu1 %v4728_v56 }
 0x334   : > { %1514 = vmatpush.msrb.mxu1 %v3804_v48  ;;  %v4734_v48 = vld [vmem:[#allocation19_spill] sm:$0xff] }
 0x336   : > { %1515 = vmatpush.msrb.mxu1 %v4729_v29 }
 0x338   : > { %1516 = vmatpush.msrb.mxu1 %v4730_v12 }
 0x33a   : > { %1517 = vmatpush.msrb.mxu1 %v4731_v31 }
 0x33b   : > { %1518 = vmatmul.f32.vlgmr.msrb.gmra.mxu1 %v4055_v9 }
 0x350   : > { %v1479_v11 = vpop.f32.mrf.mxu2 }
 0x351   : > { %v1480_v45 = vadd.f32 %v1479_v11, %v4733_v32 }
 0x372   : > { %v1439_v25 = vpop.f32.mrf.mxu0 }
 0x373   : > { %v1440_v57 = vadd.f32 %v1439_v25, %v4733_v32 }
 0x392   : > { %v1559_v41 = vpop.f32.mrf.mxu0 }
 0x393   : > { %v1499_v24 = vpop.f32.mrf.mxu3  ;;  %v1560_v44 = vadd.f32 %v1559_v41, %v4733_v32 }
 0x394   : > { %v1500_v26 = vadd.f32 %v1499_v24, %v1480_v45 }
 0x396   : > { %v1583_v17 = vadd.f32 %v1500_v26, %v4734_v48 }
 0x398   : > { %v1598_v38 = vsel %vm1594_vm4, %v1583_v17, 0.0  ;;  %v1459_v13 = vpop.f32.mrf.mxu1 }
 0x399   : > { %1602 = vst [vmem:[%s2844_s12 + $0x8] sm:$0xff] %v1598_v38  ;;  %v1460_v9 = vadd.f32 %v1459_v13, %v1440_v57  ;;  %v1612_v53 = vmul.f32 %v1598_v38, %v1598_v38 }
 0x39b   : > { %v1582_v4 = vadd.f32 %v1460_v9, %v4735_v2 }
 0x39d   : > { %v1597_v20 = vsel %vm1593_vm5, %v1582_v4, 0.0 }
 0x39e   : > { %1601 = vst [vmem:[%s2844_s12] sm:$0xff] %v1597_v20  ;;  %v1611_v50 = vmul.f32 %v1597_v20, %v1597_v20  ;;  %v1605_v63 = vadd.f32 %v1598_v38, %v1597_v20 }
 0x3a0   : > { %v1615_v55 = vadd.f32 %v1612_v53, %v1611_v50 }
 0x3ab   : > { %v1539_v15 = vpop.f32.mrf.mxu3 }
 0x3ad   : > { %v1579_v40 = vpop.f32.mrf.mxu2 }
 0x3ae   : > { %v1580_v39 = vadd.f32 %v1579_v40, %v1560_v44 }
 0x3b0   : > { %v1585_v28 = vadd.f32 %v1580_v39, %v4736_v34 }
 0x3b2   : > { %v1600_v21 = vsel %vm1596_vm7, %v1585_v28, 0.0 }
 0x3b3   : > { %1604 = vst [vmem:[%s2844_s12 + $0x18] sm:$0xff] %v1600_v21  ;;  %v1614_v60 = vmul.f32 %v1600_v21, %v1600_v21 }
 0x3b8   : > { %v1519_v6 = vpop.f32.mrf.mxu1 }
 0x3b9   : > { %v1520_v43 = vadd.f32 %v1519_v6, %v4733_v32 }
 0x3bb   : > { %v1540_v58 = vadd.f32 %v1539_v15, %v1520_v43 }
 0x3bd   : > { %v1584_v36 = vadd.f32 %v1540_v58, %v4737_v42 }
 0x3bf   : > { %v1599_v30 = vsel %vm1595_vm10, %v1584_v36, 0.0 }
 0x3c0   : > { %1603 = vst [vmem:[%s2844_s12 + $0x10] sm:$0xff] %v1599_v30  ;;  %v1606_v61 = vadd.f32 %v1605_v63, %v1599_v30  ;;  %v1613_v54 = vmul.f32 %v1599_v30, %v1599_v30  ;;  %s1650_s12 = sshll.u32 %s2857_s18, 4  ;;  %s1651_s12 = int_to_ptr.vmem [resolvable:$true] %s1650_s12 }
 0x3c2   : > { %v1607_v47 = vadd.f32 %v1606_v61, %v1600_v21  ;;  %v1616_v1 = vadd.f32 %v1615_v55, %v1613_v54 }
 0x3c4   : > { %1608 = vadd.xlane.f32.xlu2 %v1607_v47  ;;  %v1617_v52 = vadd.f32 %v1616_v1, %v1614_v60 }
 0x3c6   : > { %1618 = vadd.xlane.f32.xlu0 %v1617_v52 }
 0x437   : > { %v1609_v33 = vpop.xlane.xlu2 %1608 }
 0x438   : > { %1610 = vst [vmem:[%s2857_s18] sm:$0xff] %v1609_v33 }
 0x439   : > { %v1619_v7 = vpop.xlane.xlu0 %1618 }
 0x43a   : > { %2644 = shalt.err (!%p2641_p3)
}
 0x43b   : > { %1829 = dma.vmem_to_hbm [thread:$0]  (%p2825_p5), %s1651_s12, 128, %s1653_s25, %s1628_s9   ;;  %1620 = vst [vmem:[%s2859_s20] sm:$0xff] %v1619_v7 }
 0x43c   : > { %s1633_s18 = scalar_lea.sflag [#allocation8], %s2836_s17  ;;  %s2659_s23 = sshra.s32 %s4423_s10, 4  ;;  %s2660_s23 = int_to_ptr.hbm [resolvable:$true] %s2659_s23 }
 0x43d   : > { %s2661_s24 = scalar_lea.hbm %s2660_s23, 8  ;;  %s2665_s22 = scalar_lea.hbm %s4476_s8, 32 }
 0x43e   : > { %p2662_p4 = scmp.ne.s32.totalorder %s2660_s23, %s2661_s24  ;;  %p2666_p9 = scmp.lt.s32.totalorder %s2660_s23, %s4476_s8 }
 0x43f   : > { %p2667_p10 = scmp.lt.s32.totalorder %s2665_s22, %s2661_s24 }
 0x440   : > { %p2663_p7 = pnand %p2662_p4, %p2825_p5 }
 0x441   : > { %p2668_p11 = por %p2667_p10, %p2666_p9 }
 0x442   : > { %p2664_p8 = pneg %p2663_p7 }
 0x444   : > { %p2669_p12 = pnand %p2668_p11, %p2664_p8 }
 0x446   : > { %2672 = shalt.err (!%p2669_p12)
}
 0x447   : > { %1830 = dma.vmem_to_hbm [thread:$0]  (%p2825_p5), %s4421_s26, 128, %s4423_s10, %s1633_s18  }
 0x448 PF: > { %p1840_p13 = scmp.ge.s32.totalorder %s2715_s30, 2  ;;  %s1687_s17 = sand.u32 1, %s2703_s27  }
 0x449   : > { %s1688_s20 = scalar_lea.sflag [#allocation6], %s1687_s17 }
 0x44a   : > { %p1834_p0 = pnand %p1840_p13, %p2829_p6 }
 0x44c   : > { %p1835_p1 = pneg %p1834_p0 }
 0x44e   : > { %2694 = dma.done.wait (%p1835_p1), %s1688_s20, 128  }
 0x44f   : > { %2696 = vsyncadd (%p1835_p1), %s1688_s20, 4294967168  ;;  %s1698_s12 = scalar_lea.sflag [#allocation8], %s1687_s17 }
 0x450   : > { %2698 = dma.done.wait (%p1835_p1), %s1698_s12, 128  }
 0x451   : > { %2700 = vsyncadd (%p1835_p1), %s1698_s12, 4294967168  ;;  %s4738_s27 = sld [smem:[#allocation15_spill]]  ;;  %p22_p5 = scmp.ge.s32.totalorder %s2812_s11, 6  }
 0x452   : > { %s4739_s28 = sld [smem:[#allocation16_spill]]  ;;  %s4741_s30 = smov %s2812_s11 }
 0x453   : > { %s4740_s29 = sld [smem:[#allocation17_spill]]  ;;  %24 = sbr.rel (!%p22_p5) target bundleno = 5 (0x5), region = 158 }
 0x458   :  { %1704 = vsyncpa [#allocation6], 1 }
 0x459   :  { %1706 = vsyncpa [#allocation6 + $0x1], 1 }
 0x45a   :  { %1707 = vsyncpa [#allocation8], 1 }
 0x45b   :  { %1709 = vsyncpa [#allocation8 + $0x1], 1 }
 0x45c   :  { %1710 = vsyncmov [#allocation4] }
 0x45f   :  { %s1711_s30 = vpop.sfrf %1710 }
 0x460   :  { %p1823_p6 = scmp.ne.s32.totalorder %s1711_s30, 0 }
 0x462   :  { %1715 = shalt.err (%p1823_p6)  }
 0x463   :  { %1717 = vsyncmov [#allocation4 + $0x1] }
 0x466   :  { %s1718_s15 = vpop.sfrf %1717 }
 0x467   :  { %p1824_p2 = scmp.ne.s32.totalorder %s1718_s15, 0 }
 0x469   :  { %1722 = shalt.err (%p1824_p2)  }

// kernel: dcsrn_forward.7
= control target key start
LH: loop header
LB: loop body
LE: loop exit
PB: predicated region body
PF: predicated region fallthrough
CT: control target
= control target key end

     0   :  { %s2617_s27 = smov 0   ;;  %s4206_s0 = inlined_call_operand.vmem [shape: f32[8,3072], index: 0, kind: input, shape index: {}]   ;;  %s4207_s1 = inlined_call_operand.vmem [shape: f32[1,3072], index: 1, kind: input, shape index: {}]   ;;  %s4208_s2 = inlined_call_operand.vmem [shape: f32[8,216], index: 2, kind: input, shape index: {}]   ;;  %s4209_s3 = inlined_call_operand.vmem [shape: f32[8,1], index: 3, kind: input, shape index: {}]   ;;  %s4210_s4 = inlined_call_operand.vmem [shape: f32[8,1], index: 4, kind: input, shape index: {}]   ;;  %s4211_s5 = inlined_call_operand.vmem [shape: f32[8,1], index: 5, kind: input, shape index: {}]   ;;  %s4212_s6 = inlined_call_operand.vmem [shape: f32[8,3072], index: 6, kind: output, shape index: {0}]   ;;  %s4213_s7 = inlined_call_operand.vmem [shape: f32[32,128], index: 7, kind: output, shape index: {1}]   ;;  %s4214_s8 = inlined_call_operand.vmem [shape: f32[32,128], index: 8, kind: output, shape index: {2}]  }
   0x1 LB: > { %s1754_s28 = sadd.s32 4294967295, %s2545_s27   ;;  %p1757_p0 = scmp.ge.s32.totalorder %s2545_s27, 1  ;;  %s2545_s27 = sphi %s2617_s27, %s19_s27  }
   0x2   : > { %p211_p1 = scmp.lt.s32.totalorder %s2545_s27, 5 }
   0x4   : > { %p212_p2 = pnand %p1757_p0, %p211_p1 }
   0x6   : > { %215 = sbr.rel (%p212_p2) target bundleno = 1073 (0x431), region = 36 }
   0xb   : > { %s1779_s29 = sshll.u32 %s1754_s28, 2  ;;  %p253_p3 = scmp.lt.s32.totalorder %s1754_s28, 3 }
   0xc   : > { %s1780_s30 = sadd.s32 4, %s1779_s29  ;;  %s1781_s9 = sshll.u32 %s1754_s28, 9 }
   0xd   : > { %p247_p4 = scmp.lt.s32.totalorder %s1780_s30, 23  ;;  %s1782_s10 = sadd.s32 512, %s1781_s9 }
   0xe   : > { %s4470_s28 = smov (!%p253_p3, %s1754_s28), 3  ;;  %s1763_s12 = sadd.s32 4294967168, %s1782_s10 }
   0xf   : > { %s4472_s30 = smov (!%p247_p4, %s1780_s30), 23  ;;  %s1760_s11 = sshll.u32 %s4470_s28, 3 }
  0x10   : > { %s1759_s13 = sshll.u32 %s4472_s30, 3  ;;  %s2628_s16 = scalar_lea.vmem %s4213_s7, %s1760_s11 }
  0x11   : > { %s2633_s19 = scalar_lea.vmem %s4212_s6, %s1759_s13  ;;  %s2638_s22 = scalar_lea.vmem %s4214_s8, %s1760_s11 }
  0x12   : > { %s264_s23 = sshra.s32 %s1763_s12, 7 }
  0x13   : > { %s1764_s24 = sshll.u32 %s264_s23, 3 }
  0x14   : > { %s267_s28 = scalar_lea.vmem %s4206_s0, %s1764_s24 }
  0x15   : > { %v278_v0 = vld [vmem:[%s267_s28] sm:$0xff]  ;;  %v2643_v1 = vld [vmem:[%s267_s28 + $0x8] sm:$0xff]  ;;  %v2645_v2 = vld [vmem:[%s267_s28 + $0x10] sm:$0xff] }
  0x16   : > { %4296 = vst [vmem:[#allocation9_spill] sm:$0xff] %v2643_v1  ;;  %v2647_v3 = vld [vmem:[%s267_s28 + $0x18] sm:$0xff]  ;;  %v2649_v4 = vld [vmem:[%s267_s28 + $0x20] sm:$0xff]  ;;  %v288_v5 = vld [vmem:[%s267_s28 + $0x28] sm:$0xff] }
  0x17   : > { %4297 = vst [vmem:[#allocation10_spill] sm:$0xff] %v2645_v2 }
  0x18   : > { %4298 = vst [vmem:[#allocation11_spill] sm:$0xff] %v2647_v3 }
  0x19   : > { %4299 = vst [vmem:[#allocation12_spill] sm:$0xff] %v2649_v4 }
  0x1a   : > { %295 = vsyncadd [#allocation4], 768  ;;  %s296_s9 = scalar_lea.vmem %s4207_s1, %s264_s23 }
  0x1b   : > { %v312_v6 = vld [vmem:[%s296_s9] sm:$0x3f] }
  0x1c   : > { %313 = vst [vmem:[#allocation3] sm:$0x3f] %v312_v6 }
  0x1d   : > { %331 = vsyncadd [#allocation4 + $0x1], 96 }
  0x1e   : > { %2539 = dma.done.wait [#allocation4], 768 }
  0x1f   : > { %2540 = vsyncadd [#allocation4], 4294966528 }
  0x20   : > { %2541 = dma.done.wait [#allocation4 + $0x1], 96 }
  0x21   : > { %2542 = vsyncadd [#allocation4 + $0x1], 4294967200  ;;  %v2547_v7 = vmov 0   ;;  %v347_v9 = vld [vmem:[%s4210_s4] sm:$0xff]  ;;  %s2548_s14 = smov 127   ;;  %s2549_s15 = smov 126  }
  0x22   : > { %1816 = vset.pattern.permute.xlu0 %v2547_v7  ;;  %2062 = vset.pattern.permute.xlu2 %v2547_v7  ;;  %v359_v12 = vld [vmem:[%s4211_s5] sm:$0xff]  ;;  %s2550_s17 = smov 118   ;;  %s2551_s18 = smov 117   ;;  %vm441_vm14 = vcmask 1039360   ;;  %vm531_vm15 = vcmask 875520  }
  0x23   : > { %v345_v8 = vld [vmem:[#allocation3] sm:$0x3f]  ;;  %350 = vperm.xlu0 %1816, %v347_v9   ;;  %s2552_s20 = smov 116   ;;  %s2553_s21 = smov 108  }
  0x24   : > { %vm346_vm0 = vcmp.gt.f32.partialorder %v345_v8, 0.0  ;;  %s2554_s23 = smov 107   ;;  %s2555_s24 = smov 106  }
  0x25   : > { %v407_v10 = vsel %vm346_vm0, 1, %v2547_v7  ;;  %s2556_s25 = smov 28   ;;  %s2557_s26 = smov 27   ;;  %vm561_vm0 = vcmask 228352  }
  0x26   : > { %v1586_v11 = vrot.slane %v407_v10, 1  ;;  %v408_v40 = vperm.slane %v407_v10, 0  ;;  %v409_v41 = vperm.slane %v407_v10, 1  ;;  %v410_v42 = vperm.slane %v407_v10, 2  ;;  %s2558_s28 = smov 26   ;;  %s2559_s29 = smov 18  }
  0x27   : > { %v411_v43 = vperm.slane %v407_v10, 3  ;;  %v412_v44 = vperm.slane %v407_v10, 4  ;;  %v413_v45 = vperm.slane %v407_v10, 5  ;;  %s2560_s30 = smov 17   ;;  %s2561_s9 = smov 16  }
  0x28   : > { %vm1587_vm1 = vcmp.ne.s32.totalorder %v1586_v11, 0  ;;  %vm2666_vm2 = vcmp.eq.s32.totalorder %v408_v40, 1  ;;  %vm2670_vm3 = vcmp.eq.s32.totalorder %v409_v41, 1  ;;  %vm2674_vm4 = vcmp.eq.s32.totalorder %v410_v42, 1  ;;  %s2562_s10 = smov 8   ;;  %s2563_s11 = smov 49  }
  0x29   : > { %v2660_v13 = vsel %vm1587_vm1, 1, %v2547_v7  ;;  %vm2678_vm5 = vcmp.eq.s32.totalorder %v411_v43, 1  ;;  %vm2682_vm6 = vcmp.eq.s32.totalorder %v412_v44, 1  ;;  %vm2686_vm7 = vcmp.eq.s32.totalorder %v413_v45, 1  ;;  %s2564_s12 = smov 48   ;;  %s2565_s13 = smov 47  }
  0x2a   : > { %4300 = vst [vmem:[#allocation13_spill] sm:$0xff] %v2660_v13  ;;  %vm546_vm1 = vcmask 867328  }
  0x2b   : > { %362 = vperm.xlu0 %1816, %v359_v12  }
  0x95   : > { %v351_v14 = vpop.permute.xlu0 %350 }
  0x96   : > { %v353_v15 = vmul.f32 %v351_v14, %v278_v0  ;;  %v354_v16 = vmul.f32 %v351_v14, %v2643_v1  ;;  %v355_v17 = vmul.f32 %v351_v14, %v2645_v2  ;;  %v356_v18 = vmul.f32 %v351_v14, %v2647_v3 }
  0x97   : > { %v357_v19 = vmul.f32 %v351_v14, %v2649_v4  ;;  %v358_v20 = vmul.f32 %v351_v14, %v288_v5 }
  0x9d   : > { %v363_v21 = vpop.permute.xlu0 %362 }
  0x9e   : > { %v365_v22 = vadd.f32 %v363_v21, %v353_v15  ;;  %v366_v23 = vadd.f32 %v363_v21, %v354_v16  ;;  %v367_v24 = vadd.f32 %v363_v21, %v355_v17  ;;  %v368_v25 = vadd.f32 %v363_v21, %v356_v18 }
  0x9f   : > { %v369_v26 = vadd.f32 %v363_v21, %v357_v19  ;;  %v370_v27 = vadd.f32 %v363_v21, %v358_v20 }
  0xa0   : > { %v377_v28 = vmin.f32 %v365_v22, 0.0  ;;  %v378_v29 = vmin.f32 %v366_v23, 0.0  ;;  %v379_v30 = vmin.f32 %v367_v24, 0.0  ;;  %v380_v31 = vmin.f32 %v368_v25, 0.0 }
  0xa1   : > { %v381_v32 = vmin.f32 %v369_v26, 0.0  ;;  %v382_v33 = vmin.f32 %v370_v27, 0.0  ;;  %vm371_vm8 = vcmp.gt.f32.partialorder %v365_v22, 0.0  ;;  %vm372_vm9 = vcmp.gt.f32.partialorder %v366_v23, 0.0 }
  0xa2   : > { %v383_v34 = vmul.f32 1.442695, %v377_v28  ;;  %v385_v35 = vmul.f32 1.442695, %v378_v29  ;;  %v387_v36 = vmul.f32 1.442695, %v379_v30 }
  0xa3   : > { %v389_v37 = vmul.f32 1.442695, %v380_v31  ;;  %v391_v38 = vmul.f32 1.442695, %v381_v32  ;;  %v393_v39 = vmul.f32 1.442695, %v382_v33 }
  0xa4   : > { %2523 = vpow2.f32 %v383_v34  ;;  %vm373_vm10 = vcmp.gt.f32.partialorder %v367_v24, 0.0  ;;  %vm374_vm11 = vcmp.gt.f32.partialorder %v368_v25, 0.0  ;;  %vm375_vm12 = vcmp.gt.f32.partialorder %v369_v26, 0.0 }
  0xa5   : > { %2525 = vpow2.f32 %v385_v35  ;;  %vm376_vm13 = vcmp.gt.f32.partialorder %v370_v27, 0.0 }
  0xa6   : > { %2527 = vpow2.f32 %v387_v36 }
  0xa7   : > { %2529 = vpow2.f32 %v389_v37 }
  0xa8   : > { %2531 = vpow2.f32 %v391_v38 }
  0xa9   : > { %2533 = vpow2.f32 %v393_v39 }
  0xaa   : > { %v2524_v46 = vpop.eup %2523 }
  0xab   : > { %v2526_v48 = vpop.eup %2525  ;;  %v1765_v52 = vadd.f32 -1.0, %v2524_v46 }
  0xac   : > { %v2528_v53 = vpop.eup %2527  ;;  %v1766_v56 = vadd.f32 -1.0, %v2526_v48 }
  0xad   : > { %v2530_v57 = vpop.eup %2529  ;;  %v1767_v58 = vadd.f32 -1.0, %v2528_v53  ;;  %v401_v59 = vsel %vm371_vm8, %v365_v22, %v1765_v52  ;;  %vm667_vm8 = vcmask 400384  }
  0xae   : > { %v2532_v60 = vpop.eup %2531  ;;  %v1768_v61 = vadd.f32 -1.0, %v2530_v57  ;;  %v402_v62 = vsel %vm372_vm9, %v366_v23, %v1766_v56  ;;  %v420_v63 = vsel %vm2666_vm2, %v401_v59, 0.0  ;;  %vm576_vm2 = vcmask 220160  }
  0xaf   : > { %v2534_v0 = vpop.eup %2533  ;;  %v1769_v5 = vadd.f32 -1.0, %v2532_v60  ;;  %v403_v6 = vsel %vm373_vm10, %v367_v24, %v1767_v58  ;;  %v421_v7 = vsel %vm2670_vm3, %v402_v62, 0.0  ;;  %vm591_vm3 = vcmask 211968  }
  0xb0   : > { %v1770_v8 = vadd.f32 -1.0, %v2534_v0  ;;  %v404_v9 = vsel %vm374_vm11, %v368_v25, %v1768_v61  ;;  %v422_v10 = vsel %vm2674_vm4, %v403_v6, 0.0  ;;  %v2696_v11 = vpack.i.bf16 %v421_v7, %v420_v63 }
  0xb1   : > { %v405_v12 = vsel %vm375_vm12, %v369_v26, %v1769_v5  ;;  %v423_v14 = vsel %vm2678_vm5, %v404_v9, 0.0  ;;  %v2714_v20 = vpack.i.bf16 %v422_v10, %v421_v7  ;;  %vm606_vm4 = vcmask 146432  }
  0xb2   : > { %v406_v15 = vsel %vm376_vm13, %v370_v27, %v1770_v8  ;;  %v2702_v16 = vsel %vm2682_vm6, %v405_v12, 0.0  ;;  %v2704_v17 = vpack.i.bf16 %v423_v14, %v422_v10  ;;  %1818 = vrot.lane.b32.xlu1 %v2696_v11, %s2548_s14  ;;  %vm619_vm5 = vcmask 138240  }
  0xb3   : > { %v2709_v18 = vsel %vm2686_vm7, %v406_v15, 0.0  ;;  %v2745_v21 = vpack.i.bf16 %v2702_v16, %v423_v14  ;;  %vm634_vm6 = vcmask 130048   ;;  %vm649_vm7 = vcmask 64512  }
  0xb4   : > { %v1827_v19 = vpack.i.bf16 %v2709_v18, %v2702_v16  ;;  %1838 = vrot.lane.b32.xlu0 %v2704_v17, %s2549_s15  ;;  %vm682_vm9 = vcmask 392192   ;;  %vm697_vm10 = vcmask 384000   ;;  %vm712_vm11 = vcmask 318464  }
  0xb5   : > { %vm727_vm12 = vcmask 310272   ;;  %vm742_vm13 = vcmask 302080  }
  0xb6   : > { %1828 = vrot.lane.b32.xlu2 %v1827_v19, %s2548_s14 }
  0xba   : > { %1823 = vrot.lane.b32.xlu1 %v2704_v17, %s2548_s14  ;;  %s2566_s14 = smov 39  }
  0xbc   : > { %1848 = vrot.lane.b32.xlu0 %v2704_v17, %s2550_s17 }
  0xbe   : > { %1833 = vrot.lane.b32.xlu2 %v2696_v11, %s2549_s15 }
  0xc2   : > { %454 = vrot.lane.b32.xlu1 %v2702_v16, %s2549_s15  ;;  %s2567_s15 = smov 38  }
  0xc4   : > { %1858 = vrot.lane.b32.xlu0 %v2704_v17, %s2551_s18 }
  0xc6   : > { %1843 = vrot.lane.b32.xlu2 %v2696_v11, %s2550_s17 }
  0xca   : > { %469 = vrot.lane.b32.xlu1 %v2702_v16, %s2550_s17  ;;  %s2568_s17 = smov 37  }
  0xcc   : > { %1868 = vrot.lane.b32.xlu0 %v2704_v17, %s2552_s20 }
  0xce   : > { %1853 = vrot.lane.b32.xlu2 %v2696_v11, %s2551_s18 }
  0xd2   : > { %484 = vrot.lane.b32.xlu1 %v2702_v16, %s2551_s18  ;;  %s2569_s18 = smov 29  }
  0xd4   : > { %1878 = vrot.lane.b32.xlu0 %v2704_v17, %s2553_s21 }
  0xd6   : > { %1863 = vrot.lane.b32.xlu2 %v2696_v11, %s2552_s20 }
  0xda   : > { %499 = vrot.lane.b32.xlu1 %v2702_v16, %s2552_s20  ;;  %s2570_s20 = smov 111  }
  0xdc   : > { %1888 = vrot.lane.b32.xlu0 %v2704_v17, %s2554_s23 }
  0xde   : > { %1873 = vrot.lane.b32.xlu2 %v2696_v11, %s2553_s21 }
  0xe2   : > { %514 = vrot.lane.b32.xlu1 %v2702_v16, %s2553_s21  ;;  %s2571_s21 = smov 7  }
  0xe4   : > { %1898 = vrot.lane.b32.xlu0 %v2704_v17, %s2555_s24 }
  0xe6   : > { %1883 = vrot.lane.b32.xlu2 %v2696_v11, %s2554_s23 }
  0xea   : > { %529 = vrot.lane.b32.xlu1 %v2702_v16, %s2554_s23 }
  0xec   : > { %1908 = vrot.lane.b32.xlu0 %v2704_v17, %s2556_s25 }
  0xee   : > { %1893 = vrot.lane.b32.xlu2 %v2696_v11, %s2555_s24 }
  0xf2   : > { %544 = vrot.lane.b32.xlu1 %v2702_v16, %s2555_s24 }
  0xf4   : > { %1923 = vrot.lane.b32.xlu0 %v2704_v17, %s2557_s26 }
  0xf6   : > { %1903 = vrot.lane.b32.xlu2 %v2696_v11, %s2556_s25 }
  0xfa   : > { %1913 = vrot.lane.b32.xlu1 %v1827_v19, %s2556_s25 }
  0xfc   : > { %1938 = vrot.lane.b32.xlu0 %v2704_v17, %s2558_s28 }
  0xfe   : > { %1918 = vrot.lane.b32.xlu2 %v2696_v11, %s2557_s26 }
 0x102   : > { %1928 = vrot.lane.b32.xlu1 %v1827_v19, %s2557_s26 }
 0x104   : > { %1948 = vrot.lane.b32.xlu0 %v2704_v17, %s2559_s29 }
 0x106   : > { %1933 = vrot.lane.b32.xlu2 %v2696_v11, %s2558_s28 }
 0x10a   : > { %589 = vrot.lane.b32.xlu1 %v2702_v16, %s2558_s28 }
 0x10c   : > { %1958 = vrot.lane.b32.xlu0 %v2745_v21, %s2560_s30 }
 0x10e   : > { %1943 = vrot.lane.b32.xlu2 %v2696_v11, %s2559_s29 }
 0x110   : > { %v2750_v22 = vpop.permute.xlu2 %1828 }
 0x111   : > { %v2775_v34 = vunpack.i.l.bf16 %v2750_v22 }
 0x112   : > { %604 = vrot.lane.b32.xlu1 %v2702_v16, %s2559_s29 }
 0x114   : > { %632 = vrot.lane.b32.xlu0 %v2709_v18, %s2561_s9 }
 0x116   : > { %1953 = vrot.lane.b32.xlu2 %v2714_v20, %s2560_s30 }
 0x118   : > { %v2755_v23 = vpop.permute.xlu2 %1833 }
 0x11a   : > { %1963 = vrot.lane.b32.xlu1 %v2714_v20, %s2561_s9 }
 0x11c   : > { %647 = vrot.lane.b32.xlu0 %v2709_v18, %s2562_s10 }
 0x11e   : > { %1968 = vrot.lane.b32.xlu2 %v2745_v21, %s2561_s9 }
 0x120   : > { %v2760_v24 = vpop.permute.xlu2 %1843 }
 0x122   : > { %1973 = vrot.lane.b32.xlu1 %v2714_v20, %s2562_s10 }
 0x124   : > { %665 = vrot.lane.b32.xlu0 %v2709_v18, %s2563_s11  ;;  %v1819_v25 = vpop.permute.xlu1 %1818 }
 0x125   : > { %v1821_v26 = vunpack.i.h.bf16 %v1819_v25  ;;  %v1820_v27 = vunpack.i.l.bf16 %v1819_v25 }
 0x126   : > { %1978 = vrot.lane.b32.xlu2 %v2745_v21, %s2562_s10  ;;  %v2765_v28 = vpop.permute.xlu0 %1838 }
 0x127   : > { %v2768_v29 = vsel %vm441_vm14, %v1820_v27, %v1821_v26 }
 0x128   : > { %v2770_v30 = vpop.permute.xlu2 %1853 }
 0x12a   : > { %1983 = vrot.lane.b32.xlu1 %v2714_v20, %s2563_s11 }
 0x12c   : > { %680 = vrot.lane.b32.xlu0 %v2709_v18, %s2564_s12  ;;  %v1824_v31 = vpop.permute.xlu1 %1823 }
 0x12d   : > { %v1826_v32 = vunpack.i.h.bf16 %v1824_v31  ;;  %v1825_v33 = vunpack.i.l.bf16 %v1824_v31 }
 0x12e   : > { %1988 = vrot.lane.b32.xlu2 %v2745_v21, %s2563_s11  ;;  %v2778_v35 = vpop.permute.xlu0 %1848 }
 0x12f   : > { %v2781_v36 = vsel %vm441_vm14, %v1821_v26, %v1825_v33  ;;  %v2784_v37 = vsel %vm441_vm14, %v1825_v33, %v1826_v32  ;;  %v2790_v39 = vsel %vm441_vm14, %v1826_v32, %v2775_v34 }
 0x130   : > { %v2786_v38 = vpop.permute.xlu2 %1863 }
 0x132   : > { %1993 = vrot.lane.b32.xlu1 %v2714_v20, %s2564_s12 }
 0x134   : > { %695 = vrot.lane.b32.xlu0 %v2709_v18, %s2565_s13  ;;  %v2798_v42 = vpop.permute.xlu1 %454 }
 0x136   : > { %1998 = vrot.lane.b32.xlu2 %v2745_v21, %s2564_s12  ;;  %v2801_v43 = vpop.permute.xlu0 %1858 }
 0x138   : > { %v2803_v44 = vpop.permute.xlu2 %1873 }
 0x13a   : > { %2003 = vrot.lane.b32.xlu1 %v2714_v20, %s2565_s13 }
 0x13c   : > { %710 = vrot.lane.b32.xlu0 %v2709_v18, %s2566_s14  ;;  %v2807_v45 = vpop.permute.xlu1 %469 }
 0x13e   : > { %2008 = vrot.lane.b32.xlu2 %v2745_v21, %s2565_s13  ;;  %v2810_v46 = vpop.permute.xlu0 %1868 }
 0x140   : > { %v1884_v47 = vpop.permute.xlu2 %1883 }
 0x141   : > { %v1886_v53 = vunpack.i.h.bf16 %v1884_v47  ;;  %v1885_v56 = vunpack.i.l.bf16 %v1884_v47 }
 0x142   : > { %2013 = vrot.lane.b32.xlu1 %v2714_v20, %s2566_s14 }
 0x143   : > { %v2838_v0 = vsel %vm531_vm15, %v1885_v56, %v1886_v53 }
 0x144   : > { %725 = vrot.lane.b32.xlu0 %v2709_v18, %s2567_s15  ;;  %v2814_v48 = vpop.permute.xlu1 %484 }
 0x146   : > { %2018 = vrot.lane.b32.xlu2 %v2745_v21, %s2566_s14  ;;  %v2817_v49 = vpop.permute.xlu0 %1878 }
 0x148   : > { %v1894_v50 = vpop.permute.xlu2 %1893 }
 0x149   : > { %v1896_v6 = vunpack.i.h.bf16 %v1894_v50  ;;  %v1895_v7 = vunpack.i.l.bf16 %v1894_v50 }
 0x14a   : > { %2023 = vrot.lane.b32.xlu1 %v2714_v20, %s2567_s15 }
 0x14b   : > { %v2846_v19 = vsel %vm546_vm1, %v1895_v7, %v1896_v6 }
 0x14c   : > { %740 = vrot.lane.b32.xlu0 %v2709_v18, %s2568_s17  ;;  %v2821_v51 = vpop.permute.xlu1 %499 }
 0x14e   : > { %2028 = vrot.lane.b32.xlu2 %v2745_v21, %s2567_s15  ;;  %v1889_v52 = vpop.permute.xlu0 %1888 }
 0x14f   : > { %v1891_v54 = vunpack.i.h.bf16 %v1889_v52  ;;  %v1890_v55 = vunpack.i.l.bf16 %v1889_v52 }
 0x150   : > { %v1904_v57 = vpop.permute.xlu2 %1903 }
 0x151   : > { %v1906_v58 = vunpack.i.h.bf16 %v1904_v57  ;;  %v1905_v59 = vunpack.i.l.bf16 %v1904_v57  ;;  %v2825_v60 = vsel %vm531_vm15, %v1886_v53, %v1890_v55  ;;  %v2828_v61 = vsel %vm531_vm15, %v1890_v55, %v1891_v54 }
 0x152   : > { %2033 = vrot.lane.b32.xlu1 %v2714_v20, %s2568_s17 }
 0x153   : > { %v2834_v63 = vsel %vm561_vm0, %v1905_v59, %v1906_v58 }
 0x154   : > { %755 = vrot.lane.b32.xlu0 %v2709_v18, %s2569_s18  ;;  %v2840_v5 = vpop.permute.xlu1 %514 }
 0x156   : > { %2038 = vrot.lane.b32.xlu2 %v2745_v21, %s2568_s17  ;;  %v1899_v9 = vpop.permute.xlu0 %1898 }
 0x157   : > { %v1900_v10 = vunpack.i.l.bf16 %v1899_v9  ;;  %v1901_v53 = vunpack.i.h.bf16 %v1899_v9 }
 0x158   : > { %v1919_v12 = vpop.permute.xlu2 %1918 }
 0x159   : > { %v1921_v14 = vunpack.i.h.bf16 %v1919_v12  ;;  %v1920_v15 = vunpack.i.l.bf16 %v1919_v12  ;;  %v2849_v25 = vsel %vm546_vm1, %v1896_v6, %v1900_v10  ;;  %v2881_v56 = vsel %vm546_vm1, %v1900_v10, %v1901_v53 }
 0x15a   : > { %2043 = vrot.lane.b32.xlu1 %v2714_v20, %s2569_s18  ;;  %4314 = vst [vmem:[#allocation15_spill] sm:$0xff] %v2881_v56 }
 0x15b   : > { %v2855_v27 = vsel %vm576_vm2, %v1920_v15, %v1921_v14  ;;  %v925_v15 = vld [vmem:[%s4209_s3] sm:$0xff] }
 0x15c   : > { %2064 = vrot.lane.b32.xlu0 %v2696_v11, %s2570_s20  ;;  %v2859_v31 = vpop.permute.xlu1 %529  ;;  %v2073_v11 = vpack.i.bf16 %v2781_v36, %v2709_v18 }
 0x15d   : > { %v2863_v32 = vsel %vm531_vm15, %v1891_v54, %v2859_v31  ;;  %vm878_vm15 = vcmask 56320  }
 0x15e   : > { %2048 = vrot.lane.b32.xlu2 %v2745_v21, %s2569_s18  ;;  %v1909_v33 = vpop.permute.xlu0 %1908 }
 0x15f   : > { %v1910_v50 = vunpack.i.l.bf16 %v1909_v33  ;;  %v1911_v12 = vunpack.i.h.bf16 %v1909_v33 }
 0x160   : > { %v2868_v52 = vpop.permute.xlu2 %1933 }
 0x161   : > { %4313 = vst [vmem:[#allocation14_spill] sm:$0xff] %v2868_v52  ;;  %v2875_v54 = vsel %vm561_vm0, %v1906_v58, %v1910_v50 }
 0x162   : > { %2053 = vrot.lane.b32.xlu1 %v2714_v20, %s2571_s21 }
 0x164   : > { %2074 = vrot.lane.b32.xlu0 %v2073_v11, %s2571_s21  ;;  %v2878_v55 = vpop.permute.xlu1 %544 }
 0x165   : > { %v2885_v57 = vsel %vm546_vm1, %v1901_v53, %v2878_v55  ;;  %vm456_vm1 = vcmask 1031168  }
 0x166   : > { %4315 = vst [vmem:[#allocation16_spill] sm:$0xff] %v2885_v57  ;;  %2058 = vrot.lane.b32.xlu2 %v2745_v21, %s2571_s21  ;;  %v1924_v18 = vpop.permute.xlu0 %1923  ;;  %v2918_v21 = vsel %vm561_vm0, %v1910_v50, %v1911_v12 }
 0x167   : > { %v1926_v59 = vunpack.i.h.bf16 %v1924_v18  ;;  %v1925_v6 = vunpack.i.l.bf16 %v1924_v18  ;;  %v4215_v18 = vunpack.i.h.bf16 %v2868_v52 }
 0x168   : > { %v2893_v7 = vpop.permute.xlu2 %1943 }
 0x169   : > { %4316 = vst [vmem:[#allocation17_spill] sm:$0xff] %v2893_v7  ;;  %v2896_v9 = vsel %vm576_vm2, %v1921_v14, %v1925_v6  ;;  %v2901_v10 = vsel %vm576_vm2, %v1925_v6, %v1926_v59  ;;  %v1831_v14 = vunpack.i.h.bf16 %v2750_v22  ;;  %v4218_v22 = vunpack.i.h.bf16 %v2893_v7 }
 0x16a   : > { %2069 = vrot.lane.b32.xlu1 %v2704_v17, %s2570_s20 }
 0x16c   : > { %v2910_v11 = vpop.permute.xlu1 %1913 }
 0x16d   : > { %v2914_v17 = vunpack.i.l.bf16 %v2910_v11 }
 0x16e   : > { %928 = vperm.xlu2 %2062, %v925_v15   ;;  %v1939_v6 = vpop.permute.xlu0 %1938  ;;  %v656_v15 = vsel %vm441_vm14, %v2775_v34, %v1831_v14  ;;  %vm757_vm14 = vcmask 236544  }
 0x16f   : > { %v1941_v58 = vunpack.i.h.bf16 %v1939_v6  ;;  %v1940_v33 = vunpack.i.l.bf16 %v1939_v6  ;;  %v2922_v62 = vsel %vm561_vm0, %v1911_v12, %v2914_v17  ;;  %v2083_v8 = vpack.i.bf16 %v1831_v14, %v656_v15 }
 0x170   : > { %v2924_v26 = vpop.permute.xlu2 %1953 }
 0x171   : > { %4317 = vst [vmem:[#allocation18_spill] sm:$0xff] %v2924_v26  ;;  %v2935_v50 = vsel %vm591_vm3, %v4215_v18, %v1940_v33  ;;  %v2938_v12 = vsel %vm591_vm3, %v1940_v33, %v1941_v58  ;;  %v4227_v3 = vunpack.i.l.bf16 %v2924_v26 }
 0x172   : > { %4318 = vst [vmem:[#allocation19_spill] sm:$0xff] %v2935_v50 }
 0x173   : > { %4319 = vst [vmem:[#allocation20_spill] sm:$0xff] %v2938_v12 }
 0x174   : > { %v1929_v47 = vpop.permute.xlu1 %1928 }
 0x175   : > { %v1931_v40 = vunpack.i.h.bf16 %v1929_v47  ;;  %v2942_v41 = vunpack.i.l.bf16 %v1929_v47 }
 0x176   : > { %2084 = vrot.lane.b32.xlu2 %v2083_v8, %s2571_s21  ;;  %v1949_v20 = vpop.permute.xlu0 %1948 }
 0x177   : > { %4320 = vst [vmem:[#allocation21_spill] sm:$0xff] %v2942_v41  ;;  %v1950_v53 = vunpack.i.l.bf16 %v1949_v20  ;;  %876 = vrot.lane.b32.xlu1 %v1931_v40, %s2571_s21  ;;  %v2949_v33 = vsel %vm576_vm2, %v1926_v59, %v2942_v41  ;;  %v2953_v18 = vsel %vm576_vm2, %v2942_v41, %v1931_v40  ;;  %v1956_v59 = vunpack.i.h.bf16 %v2924_v26 }
 0x178   : > { %v1969_v14 = vpop.permute.xlu2 %1968  ;;  %v2078_v40 = vpack.i.bf16 %v2790_v39, %v2784_v37  ;;  %v1951_v13 = vunpack.i.h.bf16 %v1949_v20  ;;  %vm471_vm2 = vcmask 965632  }
 0x179   : > { %v608_v15 = vsel %vm606_vm4, %v4218_v22, %v1950_v53  ;;  %v2977_v22 = vsel %vm619_vm5, %v4227_v3, %v1956_v59  ;;  %v1971_v52 = vunpack.i.h.bf16 %v1969_v14 }
 0x17a   : > { %4324 = vst [vmem:[#allocation25_spill] sm:$0xff] %v2977_v22 }
 0x17c   : > { %v2962_v6 = vpop.permute.xlu1 %589 }
 0x17d   : > { %4321 = vst [vmem:[#allocation22_spill] sm:$0xff] %v2962_v6 }
 0x17e   : > { %v2968_v4 = vpop.permute.xlu0 %1958 }
 0x17f   : > { %4322 = vst [vmem:[#allocation23_spill] sm:$0xff] %v2968_v4  ;;  %v4228_v47 = vunpack.i.l.bf16 %v2968_v4  ;;  %2079 = vrot.lane.b32.xlu1 %v2078_v40, %s2571_s21  ;;  %v4236_v41 = vunpack.i.h.bf16 %v2968_v4  ;;  %v2989_v40 = vsel %vm591_vm3, %v1941_v58, %v2962_v6  ;;  %v1970_v6 = vunpack.i.l.bf16 %v1969_v14 }
 0x180   : > { %v2972_v8 = vpop.permute.xlu2 %1978  ;;  %4326 = vst [vmem:[#allocation27_spill] sm:$0xff] %v2989_v40  ;;  %v609_v40 = vsel %vm606_vm4, %v1950_v53, %v1951_v13 }
 0x181   : > { %4323 = vst [vmem:[#allocation24_spill] sm:$0xff] %v2972_v8  ;;  %v2982_v1 = vsel %vm619_vm5, %v1956_v59, %v4228_v47  ;;  %v4237_v50 = vunpack.i.h.bf16 %v2972_v8  ;;  %v3006_v59 = vsel %vm634_vm6, %v1970_v6, %v1971_v52 }
 0x182   : > { %4325 = vst [vmem:[#allocation26_spill] sm:$0xff] %v2982_v1 }
 0x183   : > { %4330 = vst [vmem:[#allocation31_spill] sm:$0xff] %v3006_v59 }
 0x184   : > { %v2991_v7 = vpop.permute.xlu1 %604 }
 0x185   : > { %4327 = vst [vmem:[#allocation28_spill] sm:$0xff] %v2991_v7  ;;  %v610_v3 = vsel %vm606_vm4, %v1951_v13, %v2991_v7 }
 0x186   : > { %v633_v47 = vpop.permute.xlu0 %632  ;;  %v2999_v20 = vpack.i.bf16 %v4236_v41, %v610_v3 }
 0x187   : > { %v3002_v2 = vsel %vm634_vm6, %v1971_v52, %v633_v47 }
 0x188   : > { %4328 = vst [vmem:[#allocation29_spill] sm:$0xff] %v2999_v20  ;;  %v1989_v58 = vpop.permute.xlu2 %1988 }
 0x189   : > { %4329 = vst [vmem:[#allocation30_spill] sm:$0xff] %v3002_v2  ;;  %v1991_v53 = vunpack.i.h.bf16 %v1989_v58  ;;  %v1990_v2 = vunpack.i.l.bf16 %v1989_v58 }
 0x18b   : > { %v670_v4 = vsel %vm667_vm8, %v1990_v2, %v1991_v53 }
 0x18c   : > { %v1964_v26 = vpop.permute.xlu1 %1963 }
 0x18d   : > { %v1966_v12 = vunpack.i.h.bf16 %v1964_v26  ;;  %v1965_v22 = vunpack.i.l.bf16 %v1964_v26 }
 0x18e   : > { %v648_v1 = vpop.permute.xlu0 %647 }
 0x18f   : > { %v3012_v3 = vsel %vm649_vm7, %v4237_v50, %v648_v1  ;;  %v3014_v47 = vpack.i.bf16 %v1965_v22, %v609_v40  ;;  %v3017_v14 = vsel %vm634_vm6, %v1965_v22, %v1966_v12  ;;  %v3020_v41 = vsel %vm634_vm6, %v1966_v12, %v1970_v6 }
 0x190   : > { %4331 = vst [vmem:[#allocation32_spill] sm:$0xff] %v3012_v3  ;;  %v1999_v52 = vpop.permute.xlu2 %1998  ;;  %v4245_v40 = vunpack.i.l.bf16 %v2972_v8  ;;  %vm486_vm6 = vcmask 957440  }
 0x191   : > { %4332 = vst [vmem:[#allocation33_spill] sm:$0xff] %v3014_v47  ;;  %v2001_v3 = vunpack.i.h.bf16 %v1999_v52 }
 0x192   : > { %4333 = vst [vmem:[#allocation34_spill] sm:$0xff] %v3017_v14 }
 0x193   : > { %4334 = vst [vmem:[#allocation35_spill] sm:$0xff] %v3020_v41 }
 0x194   : > { %v1974_v1 = vpop.permute.xlu1 %1973 }
 0x195   : > { %v1976_v50 = vunpack.i.h.bf16 %v1974_v1  ;;  %v1975_v7 = vunpack.i.l.bf16 %v1974_v1 }
 0x196   : > { %v666_v22 = vpop.permute.xlu0 %665 }
 0x197   : > { %v671_v12 = vsel %vm667_vm8, %v1991_v53, %v666_v22  ;;  %v3029_v6 = vpack.i.bf16 %v608_v15, %v1975_v7  ;;  %v3032_v26 = vsel %vm649_vm7, %v1975_v7, %v1976_v50  ;;  %v3037_v58 = vsel %vm649_vm7, %v1976_v50, %v4245_v40 }
 0x198   : > { %4336 = vst [vmem:[#allocation37_spill] sm:$0xff] %v3032_v26  ;;  %v2093_v13 = vpack.i.bf16 %v671_v12, %v670_v4  ;;  %v2009_v20 = vpop.permute.xlu2 %2008 }
 0x199   : > { %4335 = vst [vmem:[#allocation36_spill] sm:$0xff] %v3029_v6 }
 0x19a   : > { %4337 = vst [vmem:[#allocation38_spill] sm:$0xff] %v3037_v58  ;;  %2094 = vrot.lane.b32.xlu1 %v2093_v13, %s2571_s21  ;;  %v2000_v13 = vunpack.i.l.bf16 %v1999_v52 }
 0x19c   : > { %v1984_v59 = vpop.permute.xlu1 %1983 }
 0x19d   : > { %v1986_v53 = vunpack.i.h.bf16 %v1984_v59  ;;  %v1985_v15 = vunpack.i.l.bf16 %v1984_v59 }
 0x19e   : > { %v681_v6 = vpop.permute.xlu0 %680 }
 0x19f   : > { %v686_v7 = vsel %vm682_vm9, %v2001_v3, %v681_v6  ;;  %v668_v8 = vsel %vm667_vm8, %v1985_v15, %v1986_v53  ;;  %v669_v50 = vsel %vm667_vm8, %v1986_v53, %v1990_v2  ;;  %v685_v15 = vsel %vm682_vm9, %v2000_v13, %v2001_v3 }
 0x1a0   : > { %v2108_v40 = vpack.i.bf16 %v681_v6, %v686_v7  ;;  %v2019_v4 = vpop.permute.xlu2 %2018  ;;  %v2088_v12 = vpack.i.bf16 %v669_v50, %v668_v8  ;;  %v2011_v8 = vunpack.i.h.bf16 %v2009_v20  ;;  %vm501_vm8 = vcmask 949248  }
 0x1a2   : > { %2109 = vrot.lane.b32.xlu1 %v2108_v40, %s2571_s21  ;;  %2089 = vrot.lane.b32.xlu0 %v2088_v12, %s2571_s21  ;;  %v2010_v40 = vunpack.i.l.bf16 %v2009_v20 }
 0x1a4   : > { %v1994_v1 = vpop.permute.xlu1 %1993 }
 0x1a5   : > { %v1996_v26 = vunpack.i.h.bf16 %v1994_v1  ;;  %v1995_v58 = vunpack.i.l.bf16 %v1994_v1 }
 0x1a6   : > { %v696_v59 = vpop.permute.xlu0 %695 }
 0x1a7   : > { %v683_v47 = vsel %vm682_vm9, %v1995_v58, %v1996_v26  ;;  %v684_v14 = vsel %vm682_vm9, %v1996_v26, %v2000_v13  ;;  %v701_v53 = vsel %vm697_vm10, %v2011_v8, %v696_v59  ;;  %v700_v58 = vsel %vm697_vm10, %v2010_v40, %v2011_v8 }
 0x1a8   : > { %v2029_v41 = vpop.permute.xlu2 %2028  ;;  %v2098_v2 = vpack.i.bf16 %v683_v47, %v666_v22  ;;  %v2103_v6 = vpack.i.bf16 %v685_v15, %v684_v14  ;;  %v2118_v56 = vpack.i.bf16 %v701_v53, %v700_v58  ;;  %v2021_v47 = vunpack.i.h.bf16 %v2019_v4 }
 0x1a9   : > { %v2020_v14 = vunpack.i.l.bf16 %v2019_v4  ;;  %v2030_v58 = vunpack.i.l.bf16 %v2029_v41  ;;  %vm516_vm9 = vcmask 883712  }
 0x1aa   : > { %2099 = vrot.lane.b32.xlu2 %v2098_v2, %s2571_s21  ;;  %2104 = vrot.lane.b32.xlu0 %v2103_v6, %s2571_s21 }
 0x1ab   : > { %v715_v57 = vsel %vm712_vm11, %v2020_v14, %v2021_v47 }
 0x1ac   : > { %v2004_v52 = vpop.permute.xlu1 %2003 }
 0x1ad   : > { %v2006_v1 = vunpack.i.h.bf16 %v2004_v52  ;;  %v2005_v7 = vunpack.i.l.bf16 %v2004_v52 }
 0x1ae   : > { %v711_v50 = vpop.permute.xlu0 %710 }
 0x1af   : > { %v698_v12 = vsel %vm697_vm10, %v2005_v7, %v2006_v1  ;;  %v699_v26 = vsel %vm697_vm10, %v2006_v1, %v2010_v40  ;;  %v716_v2 = vsel %vm712_vm11, %v2021_v47, %v711_v50 }
 0x1b0   : > { %v2039_v3 = vpop.permute.xlu2 %2038  ;;  %v2113_v13 = vpack.i.bf16 %v699_v26, %v698_v12  ;;  %v2133_v1 = vpack.i.bf16 %v711_v50, %v716_v2 }
 0x1b2   : > { %2114 = vrot.lane.b32.xlu2 %v2113_v13, %s2571_s21  ;;  %2119 = vrot.lane.b32.xlu0 %v2118_v56, %s2571_s21  ;;  %v2031_v56 = vunpack.i.h.bf16 %v2029_v41  ;;  %v2040_v41 = vunpack.i.l.bf16 %v2039_v3 }
 0x1b4   : > { %v2014_v20 = vpop.permute.xlu1 %2013  ;;  %v730_v47 = vsel %vm727_vm12, %v2030_v58, %v2031_v56 }
 0x1b5   : > { %v2016_v22 = vunpack.i.h.bf16 %v2014_v20  ;;  %v2015_v15 = vunpack.i.l.bf16 %v2014_v20 }
 0x1b6   : > { %v726_v6 = vpop.permute.xlu0 %725 }
 0x1b7   : > { %v714_v52 = vsel %vm712_vm11, %v2016_v22, %v2020_v14  ;;  %v713_v8 = vsel %vm712_vm11, %v2015_v15, %v2016_v22  ;;  %v731_v12 = vsel %vm727_vm12, %v2031_v56, %v726_v6  ;;  %v2041_v15 = vunpack.i.h.bf16 %v2039_v3 }
 0x1b8   : > { %v2049_v7 = vpop.permute.xlu2 %2048  ;;  %v2128_v40 = vpack.i.bf16 %v715_v57, %v714_v52  ;;  %v2123_v53 = vpack.i.bf16 %v713_v8, %v696_v59  ;;  %v2143_v57 = vpack.i.bf16 %v731_v12, %v730_v47 }
 0x1b9   : > { %v2051_v47 = vunpack.i.h.bf16 %v2049_v7 }
 0x1ba   : > { %2129 = vrot.lane.b32.xlu2 %v2128_v40, %s2571_s21  ;;  %2124 = vrot.lane.b32.xlu1 %v2123_v53, %s2571_s21 }
 0x1bb   : > { %2134 = vrot.lane.b32.xlu0 %v2133_v1, %s2571_s21 }
 0x1bc   : > { %v2024_v4 = vpop.permute.xlu1 %2023 }
 0x1bd   : > { %v2026_v26 = vunpack.i.h.bf16 %v2024_v4  ;;  %v2025_v13 = vunpack.i.l.bf16 %v2024_v4  ;;  %v745_v4 = vsel %vm742_vm13, %v2040_v41, %v2041_v15 }
 0x1be   : > { %v741_v20 = vpop.permute.xlu0 %740 }
 0x1bf   : > { %v728_v14 = vsel %vm727_vm12, %v2025_v13, %v2026_v26  ;;  %v729_v22 = vsel %vm727_vm12, %v2026_v26, %v2030_v58  ;;  %v746_v52 = vsel %vm742_vm13, %v2041_v15, %v741_v20 }
 0x1c0   : > { %v2059_v59 = vpop.permute.xlu2 %2058  ;;  %v2138_v50 = vpack.i.bf16 %v729_v22, %v728_v14  ;;  %v2158_v13 = vpack.i.bf16 %v741_v20, %v746_v52  ;;  %v2050_v14 = vunpack.i.l.bf16 %v2049_v7 }
 0x1c1   : > { %v2061_v20 = vunpack.i.h.bf16 %v2059_v59 }
 0x1c2   : > { %2144 = vrot.lane.b32.xlu2 %v2143_v57, %s2571_s21  ;;  %2139 = vrot.lane.b32.xlu1 %v2138_v50, %s2571_s21  ;;  %v760_v15 = vsel %vm757_vm14, %v2050_v14, %v2051_v47 }
 0x1c4   : > { %v2034_v2 = vpop.permute.xlu1 %2033 }
 0x1c5   : > { %v2036_v8 = vunpack.i.h.bf16 %v2034_v2  ;;  %v2035_v40 = vunpack.i.l.bf16 %v2034_v2  ;;  %v2060_v2 = vunpack.i.l.bf16 %v2059_v59 }
 0x1c6   : > { %v756_v53 = vpop.permute.xlu0 %755 }
 0x1c7   : > { %v744_v1 = vsel %vm742_vm13, %v2036_v8, %v2040_v41  ;;  %v743_v56 = vsel %vm742_vm13, %v2035_v40, %v2036_v8  ;;  %v761_v22 = vsel %vm757_vm14, %v2051_v47, %v756_v53  ;;  %v2173_v8 = vpack.i.bf16 %v2875_v54, %v756_v53 }
 0x1c8   : > { %v3059_v58 = vpop.permute.xlu2 %928  ;;  %v2153_v12 = vpack.i.bf16 %v745_v4, %v744_v1  ;;  %v2148_v26 = vpack.i.bf16 %v743_v56, %v726_v6  ;;  %v2168_v7 = vpack.i.bf16 %v761_v22, %v760_v15  ;;  %v1916_v4 = vunpack.i.h.bf16 %v2910_v11 }
 0x1c9   : > { %4338 = vst [vmem:[#allocation39_spill] sm:$0xff] %v3059_v58  ;;  %v3075_v59 = vsel %vm878_vm15, %v2060_v2, %v2061_v20  ;;  %v4340_v15 = vpack.i.bf16 %v2901_v10, %v2896_v9 }
 0x1ca   : > { %2159 = vrot.lane.b32.xlu2 %v2158_v13, %s2571_s21  ;;  %2154 = vrot.lane.b32.xlu1 %v2153_v12, %s2571_s21 }
 0x1cb   : > { %2149 = vrot.lane.b32.xlu0 %v2148_v26, %s2571_s21  ;;  %v764_v26 = vsel %vm561_vm0, %v2914_v17, %v1916_v4  ;;  %vm1201_vm0 = vcmask 908288  }
 0x1cc   : > { %v2044_v3 = vpop.permute.xlu1 %2043 }
 0x1cd   : > { %v2046_v57 = vunpack.i.h.bf16 %v2044_v3  ;;  %v2045_v50 = vunpack.i.l.bf16 %v2044_v3 }
 0x1ce   : > { %v3064_v41 = vpop.permute.xlu0 %2064 }
 0x1cf   : > { %4339 = vst [vmem:[#allocation40_spill] sm:$0xff] %v3064_v41  ;;  %v758_v52 = vsel %vm757_vm14, %v2045_v50, %v2046_v57  ;;  %v759_v6 = vsel %vm757_vm14, %v2046_v57, %v2050_v14  ;;  %v2183_v57 = vpack.i.bf16 %v1916_v4, %v764_v26  ;;  %v2198_v4 = vpack.i.bf16 %v2768_v29, %v2702_v16 }
 0x1d0   : > { %v3067_v40 = vpop.permute.xlu2 %2084  ;;  %v2163_v1 = vpack.i.bf16 %v759_v6, %v758_v52  ;;  %v4341_v52 = vpack.i.bf16 %v2922_v62, %v2918_v21  ;;  %v4344_v26 = vpack.i.bf16 %v2775_v34, %v2790_v39  ;;  %v4345_v16 = vpack.i.bf16 %v2953_v18, %v2949_v33 }
 0x1d1   : > { %v2087_v56 = vunpack.i.h.bf16 %v3067_v40  ;;  %v2086_v13 = vunpack.i.l.bf16 %v3067_v40  ;;  %v1856_v18 = vunpack.i.h.bf16 %v2770_v30 }
 0x1d2   : > { %2174 = vrot.lane.b32.xlu2 %v2173_v8, %s2571_s21  ;;  %2169 = vrot.lane.b32.xlu1 %v2168_v7, %s2571_s21 }
 0x1d3   : > { %v3080_v53 = vsel %vm878_vm15, %v2086_v13, %v2087_v56  ;;  %2164 = vrot.lane.b32.xlu0 %v2163_v1, %s2571_s21  ;;  %v1840_v56 = vunpack.i.l.bf16 %v2765_v28 }
 0x1d4   : > { %v3085_v12 = vpop.permute.xlu1 %2053 }
 0x1d5   : > { %v4253_v47 = vunpack.i.h.bf16 %v3085_v12 }
 0x1d6   : > { %v3090_v14 = vpop.permute.xlu0 %2074 }
 0x1d7   : > { %v2076_v3 = vunpack.i.l.bf16 %v3090_v14  ;;  %v3096_v22 = vsel %vm878_vm15, %v4253_v47, %v2060_v2  ;;  %v4252_v2 = vunpack.i.h.bf16 %v3064_v41  ;;  %v2077_v11 = vunpack.i.h.bf16 %v3090_v14 }
 0x1d8   : > { %v4360_v14 = vpack.i.bf16 %v2914_v17, %v2922_v62 }
 0x1d9   : > { %v3099_v50 = vsel %vm878_vm15, %v2061_v20, %v2076_v3  ;;  %v1836_v3 = vunpack.i.h.bf16 %v2755_v23 }
 0x1da   : > { %2189 = vrot.lane.b32.xlu2 %v4340_v15, %s2571_s21  ;;  %2184 = vrot.lane.b32.xlu1 %v2183_v57, %s2571_s21  ;;  %v1835_v57 = vunpack.i.l.bf16 %v2755_v23  ;;  %v1846_v15 = vunpack.i.h.bf16 %v2760_v24 }
 0x1db   : > { %2179 = vrot.lane.b32.xlu0 %v4341_v52, %s2571_s21  ;;  %v1845_v52 = vunpack.i.l.bf16 %v2760_v24  ;;  %v458_v29 = vsel %vm456_vm1, %v1836_v3, %v1840_v56  ;;  %v1850_v24 = vunpack.i.l.bf16 %v2778_v35 }
 0x1dc   : > { %v3110_v6 = vpop.permute.xlu1 %2069  ;;  %v457_v39 = vsel %vm456_vm1, %v1835_v57, %v1836_v3  ;;  %v4346_v3 = vpack.i.bf16 %v2784_v37, %v2781_v36  ;;  %v1841_v57 = vunpack.i.h.bf16 %v2765_v28  ;;  %v1871_v36 = vunpack.i.h.bf16 %v2810_v46 }
 0x1dd   : > { %v2072_v7 = vunpack.i.h.bf16 %v3110_v6  ;;  %v2071_v20 = vunpack.i.l.bf16 %v3110_v6  ;;  %v472_v34 = vsel %vm471_vm2, %v1845_v52, %v1846_v15  ;;  %v2213_v23 = vpack.i.bf16 %v458_v29, %v457_v39 }
 0x1de   : > { %v1855_v52 = vunpack.i.l.bf16 %v2770_v30  ;;  %v1870_v28 = vunpack.i.l.bf16 %v2810_v46 }
 0x1df   : > { %v3118_v8 = vsel %vm1201_vm0, %v4252_v2, %v2071_v20  ;;  %v3123_v1 = vsel %vm1201_vm0, %v2071_v20, %v2072_v7  ;;  %v2223_v20 = vpack.i.bf16 %v472_v34, %v2798_v42  ;;  %v460_v34 = vsel %vm456_vm1, %v1841_v57, %v2798_v42 }
 0x1e0   : > { %4342 = vst [vmem:[#allocation41_spill] sm:$0xff] %v3118_v8  ;;  %v487_v39 = vsel %vm486_vm6, %v1855_v52, %v1856_v18  ;;  %v1866_v42 = vunpack.i.h.bf16 %v2786_v38  ;;  %v504_v40 = vsel %vm501_vm8, %v1870_v28, %v1871_v36 }
 0x1e1   : > { %4343 = vst [vmem:[#allocation42_spill] sm:$0xff] %v3123_v1 }
 0x1e2   : > { %2209 = vrot.lane.b32.xlu1 %v4344_v26, %s2570_s20  ;;  %2199 = vrot.lane.b32.xlu2 %v2198_v4, %s2570_s20  ;;  %v1851_v4 = vunpack.i.h.bf16 %v2778_v35  ;;  %v1860_v26 = vunpack.i.l.bf16 %v2801_v43 }
 0x1e3   : > { %2194 = vrot.lane.b32.xlu0 %v4345_v16, %s2571_s21  ;;  %v473_v16 = vsel %vm471_vm2, %v1846_v15, %v1850_v24 }
 0x1e4   : > { %v488_v35 = vsel %vm486_vm6, %v1856_v18, %v1860_v26  ;;  %v474_v29 = vsel %vm471_vm2, %v1850_v24, %v1851_v4  ;;  %v1861_v24 = vunpack.i.h.bf16 %v2801_v43 }
 0x1e5   : > { %v2238_v30 = vpack.i.bf16 %v488_v35, %v487_v39  ;;  %v1880_v39 = vunpack.i.l.bf16 %v2817_v49 }
 0x1e6   : > { %v490_v52 = vsel %vm486_vm6, %v1861_v24, %v2814_v48  ;;  %v489_v35 = vsel %vm486_vm6, %v1860_v26, %v1861_v24 }
 0x1e9   : > { %v3148_v2 = vpop.permute.xlu1 %876 }
 0x1ea   : > { %2224 = vrot.lane.b32.xlu1 %v2223_v20, %s2570_s20  ;;  %2214 = vrot.lane.b32.xlu2 %v2213_v23, %s2570_s20  ;;  %v459_v20 = vsel %vm456_vm1, %v1840_v56, %v1841_v57  ;;  %v2228_v23 = vpack.i.bf16 %v474_v29, %v473_v16  ;;  %v503_v57 = vsel %vm501_vm8, %v1866_v42, %v1870_v28 }
 0x1eb   : > { %2204 = vrot.lane.b32.xlu0 %v4346_v3, %s2570_s20  ;;  %v2218_v3 = vpack.i.bf16 %v460_v34, %v459_v20  ;;  %v2253_v16 = vpack.i.bf16 %v504_v40, %v503_v57  ;;  %v2243_v29 = vpack.i.bf16 %v490_v52, %v489_v35  ;;  %v1881_v34 = vunpack.i.h.bf16 %v2817_v49 }
 0x1ec   : > { %v1875_v49 = vunpack.i.l.bf16 %v2803_v44 }
 0x1ed   : > { %v520_v26 = vsel %vm516_vm9, %v1881_v34, %v2840_v5  ;;  %v519_v20 = vsel %vm516_vm9, %v1880_v39, %v1881_v34 }
 0x1ee   : > { %v2268_v28 = vpack.i.bf16 %v520_v26, %v519_v20  ;;  %v4352_v20 = vpack.i.bf16 %v2896_v9, %v2855_v27 }
 0x1f1   : > { %v2080_v37 = vpop.permute.xlu1 %2079 }
 0x1f2   : > { %v2082_v15 = vunpack.i.h.bf16 %v2080_v37  ;;  %v2081_v47 = vunpack.i.l.bf16 %v2080_v37  ;;  %2239 = vrot.lane.b32.xlu1 %v2238_v30, %s2570_s20  ;;  %2229 = vrot.lane.b32.xlu2 %v2228_v23, %s2570_s20  ;;  %v1865_v30 = vunpack.i.l.bf16 %v2786_v38  ;;  %v1876_v38 = vunpack.i.h.bf16 %v2803_v44 }
 0x1f3   : > { %2219 = vrot.lane.b32.xlu0 %v2218_v3, %s2570_s20 }
 0x1f4   : > { %v3177_v46 = vsel %vm878_vm15, %v2082_v15, %v2086_v13  ;;  %v3182_v56 = vsel %vm878_vm15, %v2077_v11, %v2081_v47  ;;  %v3185_v18 = vsel %vm878_vm15, %v2081_v47, %v2082_v15  ;;  %v475_v13 = vsel %vm471_vm2, %v1851_v4, %v2807_v45 }
 0x1f5   : > { %v2233_v47 = vpack.i.bf16 %v2807_v45, %v475_v13  ;;  %v505_v4 = vsel %vm501_vm8, %v1871_v36, %v2821_v51  ;;  %v502_v45 = vsel %vm501_vm8, %v1865_v30, %v1866_v42  ;;  %v518_v3 = vsel %vm516_vm9, %v1876_v38, %v1880_v39 }
 0x1f6   : > { %v2258_v23 = vpack.i.bf16 %v2821_v51, %v505_v4  ;;  %v2248_v37 = vpack.i.bf16 %v502_v45, %v2814_v48  ;;  %v517_v15 = vsel %vm516_vm9, %v1875_v49, %v1876_v38  ;;  %v4347_v51 = vpack.i.bf16 %v2859_v31, %v2863_v32 }
 0x1f7   : > { %v2263_v42 = vpack.i.bf16 %v518_v3, %v517_v15  ;;  %v4348_v48 = vpack.i.bf16 %v2838_v0, %v2840_v5  ;;  %v4349_v31 = vpack.i.bf16 %v2834_v63, %v2878_v55  ;;  %v4350_v0 = vpack.i.bf16 %v2849_v25, %v2846_v19 }
 0x1f8   : > { %v4351_v32 = vpack.i.bf16 %v2828_v61, %v2825_v60  ;;  %v2303_v60 = vpack.i.bf16 %v2918_v21, %v2875_v54  ;;  %v4353_v54 = vld [vmem:[#allocation16_spill] sm:$0xff]  ;;  %v4354_v21 = vld [vmem:[#allocation15_spill] sm:$0xff] }
 0x1f9   : > { %v4355_v45 = vpack.i.bf16 %v4353_v54, %v4354_v21  ;;  %v4366_v54 = vld [vmem:[#allocation37_spill] sm:$0xff] }
 0x1fa   : > { %2254 = vrot.lane.b32.xlu1 %v2253_v16, %s2570_s20  ;;  %2244 = vrot.lane.b32.xlu2 %v2243_v29, %s2570_s20 }
 0x1fb   : > { %2234 = vrot.lane.b32.xlu0 %v2233_v47, %s2570_s20 }
 0x202   : > { %2269 = vrot.lane.b32.xlu1 %v2268_v28, %s2570_s20  ;;  %2259 = vrot.lane.b32.xlu2 %v2258_v23, %s2570_s20 }
 0x203   : > { %2249 = vrot.lane.b32.xlu0 %v2248_v37, %s2570_s20 }
 0x204   : > { %v3214_v36 = vpop.permute.xlu2 %2099 }
 0x205   : > { %v2101_v44 = vunpack.i.l.bf16 %v3214_v36 }
 0x20a   : > { %2284 = vrot.lane.b32.xlu1 %v4347_v51, %s2570_s20  ;;  %2274 = vrot.lane.b32.xlu2 %v4348_v48, %s2570_s20  ;;  %v4359_v48 = vpack.i.bf16 %v2949_v33, %v2901_v10 }
 0x20b   : > { %2264 = vrot.lane.b32.xlu0 %v2263_v42, %s2570_s20  ;;  %v4356_v42 = vld [vmem:[#allocation35_spill] sm:$0xff] }
 0x20c   : > { %v2095_v24 = vpop.permute.xlu1 %2094  ;;  %v2115_v52 = vpop.permute.xlu2 %2114 }
 0x20d   : > { %v2097_v57 = vunpack.i.h.bf16 %v2095_v24  ;;  %v2096_v5 = vunpack.i.l.bf16 %v2095_v24  ;;  %v2116_v25 = vunpack.i.l.bf16 %v2115_v52 }
 0x20f   : > { %v3227_v40 = vsel %vm878_vm15, %v2097_v57, %v2101_v44  ;;  %v3250_v19 = vsel %vm878_vm15, %v2096_v5, %v2097_v57 }
 0x212   : > { %2299 = vrot.lane.b32.xlu1 %v4349_v31, %s2570_s20  ;;  %2289 = vrot.lane.b32.xlu2 %v4350_v0, %s2570_s20 }
 0x213   : > { %2279 = vrot.lane.b32.xlu0 %v4351_v32, %s2570_s20 }
 0x214   : > { %v2110_v35 = vpop.permute.xlu1 %2109  ;;  %v3243_v16 = vpop.permute.xlu2 %2129 }
 0x215   : > { %v2112_v29 = vunpack.i.h.bf16 %v2110_v35  ;;  %v2111_v47 = vunpack.i.l.bf16 %v2110_v35  ;;  %v3245_v34 = vpop.permute.xlu0 %2089 }
 0x216   : > { %v4257_v63 = vunpack.i.h.bf16 %v3245_v34  ;;  %v4256_v55 = vunpack.i.l.bf16 %v3245_v34 }
 0x217   : > { %v3253_v39 = vsel %vm878_vm15, %v2111_v47, %v2112_v29  ;;  %v4361_v29 = vld [vmem:[#allocation33_spill] sm:$0xff] }
 0x218   : > { %v888_v30 = vsel %vm878_vm15, %v4257_v63, %v2096_v5  ;;  %v3265_v4 = vpack.i.bf16 %v4256_v55, %v3096_v22  ;;  %v2102_v22 = vunpack.i.h.bf16 %v3214_v36  ;;  %v4357_v36 = vld [vmem:[#allocation34_spill] sm:$0xff] }
 0x219   : > { %v3267_v26 = vpack.i.bf16 %v2116_v25, %v888_v30  ;;  %v4358_v51 = vpack.i.bf16 %v4356_v42, %v4357_v36  ;;  %v4255_v42 = vunpack.i.h.bf16 %v3243_v16 }
 0x21a   : > { %2314 = vrot.lane.b32.xlu1 %v4352_v20, %s2570_s20  ;;  %2304 = vrot.lane.b32.xlu2 %v2303_v60, %s2570_s20  ;;  %v4363_v60 = vld [vmem:[#allocation25_spill] sm:$0xff]  ;;  %v4365_v20 = vld [vmem:[#allocation38_spill] sm:$0xff] }
 0x21b   : > { %2294 = vrot.lane.b32.xlu0 %v4355_v45, %s2570_s20  ;;  %v4367_v21 = vpack.i.bf16 %v4365_v20, %v4366_v54  ;;  %v4372_v54 = vld [vmem:[#allocation19_spill] sm:$0xff] }
 0x21c   : > { %v3278_v23 = vpop.permute.xlu2 %2144 }
 0x21d   : > { %v2105_v28 = vpop.permute.xlu0 %2104  ;;  %v2147_v24 = vunpack.i.h.bf16 %v3278_v23  ;;  %v4259_v44 = vunpack.i.l.bf16 %v3278_v23 }
 0x21e   : > { %v2107_v37 = vunpack.i.h.bf16 %v2105_v28  ;;  %v2106_v38 = vunpack.i.l.bf16 %v2105_v28 }
 0x21f   : > { %v3315_v10 = vsel %vm878_vm15, %v4259_v44, %v2147_v24 }
 0x220   : > { %v893_v49 = vsel %vm878_vm15, %v2107_v37, %v2111_v47  ;;  %v3283_v3 = vsel %vm878_vm15, %v2102_v22, %v2106_v38  ;;  %v3286_v27 = vsel %vm878_vm15, %v2106_v38, %v2107_v37  ;;  %v4362_v47 = vld [vmem:[#allocation26_spill] sm:$0xff] }
 0x221   : > { %v3292_v15 = vpack.i.bf16 %v893_v49, %v2077_v11  ;;  %v2117_v11 = vunpack.i.h.bf16 %v2115_v52  ;;  %v4364_v30 = vpack.i.bf16 %v4362_v47, %v4363_v60  ;;  %v2055_v49 = vunpack.i.l.bf16 %v3085_v12  ;;  %v4368_v60 = vld [vmem:[#allocation32_spill] sm:$0xff] }
 0x222   : > { %2329 = vrot.lane.b32.xlu1 %v4358_v51, %s2570_s20  ;;  %2319 = vrot.lane.b32.xlu2 %v4359_v48, %s2570_s20 }
 0x223   : > { %2309 = vrot.lane.b32.xlu0 %v4360_v14, %s2570_s20  ;;  %v3325_v17 = vsel %vm878_vm15, %v2116_v25, %v2117_v11 }
 0x224   : > { %v3308_v57 = vpop.permute.xlu2 %2159 }
 0x225   : > { %v2162_v31 = vunpack.i.h.bf16 %v3308_v57  ;;  %v4254_v0 = vunpack.i.l.bf16 %v3308_v57  ;;  %v2120_v5 = vpop.permute.xlu0 %2119 }
 0x226   : > { %v2121_v32 = vunpack.i.l.bf16 %v2120_v5  ;;  %v2122_v25 = vunpack.i.h.bf16 %v2120_v5 }
 0x227   : > { %v3320_v33 = vsel %vm878_vm15, %v4254_v0, %v2162_v31 }
 0x228   : > { %v3328_v52 = vsel %vm878_vm15, %v2117_v11, %v2121_v32  ;;  %v3351_v14 = vsel %vm878_vm15, %v2121_v32, %v2122_v25  ;;  %v4371_v32 = vld [vmem:[#allocation20_spill] sm:$0xff] }
 0x22a   : > { %2344 = vrot.lane.b32.xlu1 %v4361_v29, %s2570_s20  ;;  %2334 = vrot.lane.b32.xlu2 %v4364_v30, %s2570_s20  ;;  %v4369_v30 = vld [vmem:[#allocation31_spill] sm:$0xff] }
 0x22b   : > { %2324 = vrot.lane.b32.xlu0 %v4367_v21, %s2570_s20  ;;  %v4370_v20 = vpack.i.bf16 %v4368_v60, %v4369_v30  ;;  %v4373_v21 = vpack.i.bf16 %v4371_v32, %v4372_v54  ;;  %v4377_v32 = vunpack.i.h.bf16 %v3085_v12 }
 0x22c   : > { %v3342_v45 = vpop.permute.xlu2 %2174  ;;  %v3344_v28 = vpop.permute.xlu1 %2124 }
 0x22d   : > { %v2126_v37 = vunpack.i.l.bf16 %v3344_v28  ;;  %v2135_v38 = vpop.permute.xlu0 %2134  ;;  %v3395_v54 = vsel %vm878_vm15, %v2055_v49, %v4377_v32  ;;  %v2177_v6 = vunpack.i.h.bf16 %v3342_v45 }
 0x22e   : > { %v2137_v36 = vunpack.i.h.bf16 %v2135_v38  ;;  %v2136_v51 = vunpack.i.l.bf16 %v2135_v38 }
 0x22f   : > { %v898_v48 = vsel %vm878_vm15, %v2122_v25, %v2126_v37  ;;  %v4374_v25 = vld [vmem:[#allocation36_spill] sm:$0xff] }
 0x230   : > { %v3353_v11 = vpack.i.bf16 %v2055_v49, %v898_v48  ;;  %v901_v31 = vsel %vm878_vm15, %v4255_v42, %v2136_v51  ;;  %v3359_v5 = vsel %vm878_vm15, %v2136_v51, %v2137_v36 }
 0x231   : > { %v3361_v29 = vpack.i.bf16 %v901_v31, %v2102_v22  ;;  %v4375_v22 = vld [vmem:[#allocation29_spill] sm:$0xff] }
 0x232   : > { %2354 = vrot.lane.b32.xlu1 %v4370_v20, %s2570_s20  ;;  %2349 = vrot.lane.b32.xlu2 %v4373_v21, %s2570_s20  ;;  %v4378_v21 = vld [vmem:[#allocation23_spill] sm:$0xff] }
 0x233   : > { %2339 = vrot.lane.b32.xlu0 %v4374_v25, %s2570_s20  ;;  %v4379_v25 = vunpack.i.h.bf16 %v4378_v21 }
 0x234   : > { %v2190_v37 = vpop.permute.xlu2 %2189  ;;  %v3375_v38 = vpop.permute.xlu1 %2139 }
 0x235   : > { %v2191_v48 = vunpack.i.l.bf16 %v2190_v37 }
 0x23b   : > { %2359 = vrot.lane.b32.xlu0 %v4375_v22, %s2570_s20  ;;  %v4380_v22 = vunpack.i.l.bf16 %v4378_v21  ;;  %v4381_v21 = vld [vmem:[#allocation18_spill] sm:$0xff] }
 0x23c   : > { %v3379_v36 = vpop.permute.xlu1 %2154  ;;  %v3381_v51 = vpop.permute.xlu2 %2199 }
 0x23d   : > { %v3383_v31 = vpop.permute.xlu0 %2149  ;;  %v2201_v60 = vunpack.i.l.bf16 %v3381_v51  ;;  %v622_v13 = vsel %vm619_vm5, %v4380_v22, %v4379_v25  ;;  %v4382_v25 = vunpack.i.l.bf16 %v4381_v21  ;;  %v2156_v1 = vunpack.i.l.bf16 %v3379_v36 }
 0x23e   : > { %v2151_v30 = vunpack.i.l.bf16 %v3383_v31  ;;  %v2363_v47 = vpack.i.bf16 %v622_v13, %v2191_v48  ;;  %v4383_v13 = vld [vmem:[#allocation14_spill] sm:$0xff] }
 0x23f   : > { %v3390_v20 = vsel %vm1201_vm0, %v2072_v7, %v2201_v60  ;;  %v2192_v7 = vunpack.i.h.bf16 %v2190_v37 }
 0x240   : > { %4376 = vst [vmem:[#allocation16_spill] sm:$0xff] %v3390_v20  ;;  %v3403_v61 = vsel %vm878_vm15, %v2147_v24, %v2151_v30  ;;  %v1935_v24 = vunpack.i.l.bf16 %v4383_v13  ;;  %v4267_v20 = vunpack.i.h.bf16 %v3383_v31 }
 0x241   : > { %v919_v32 = vsel %vm878_vm15, %v2191_v48, %v2192_v7  ;;  %v4384_v48 = vunpack.i.h.bf16 %v4383_v13 }
 0x242   : > { %v2368_v22 = vpack.i.bf16 %v919_v32, %v4382_v25  ;;  %v4385_v25 = vld [vmem:[#allocation24_spill] sm:$0xff] }
 0x243   : > { %2364 = vrot.lane.b32.xlu0 %v2363_v47, %s2570_s20  ;;  %v592_v32 = vsel %vm591_vm3, %v1935_v24, %v4384_v48  ;;  %v4387_v0 = vunpack.i.l.bf16 %v4385_v25  ;;  %v4388_v48 = vld [vmem:[#allocation17_spill] sm:$0xff]  ;;  %vm1418_vm3 = vcmask 719872  }
 0x244   : > { %v3408_v12 = vpop.permute.xlu1 %2169  ;;  %v3410_v49 = vpop.permute.xlu2 %2214 }
 0x245   : > { %v3412_v60 = vpop.permute.xlu0 %2164  ;;  %v4265_v63 = vunpack.i.l.bf16 %v3408_v12 }
 0x246   : > { %v2167_v13 = vunpack.i.h.bf16 %v3412_v60  ;;  %v4261_v24 = vunpack.i.l.bf16 %v3412_v60 }
 0x24b   : > { %2369 = vrot.lane.b32.xlu0 %v2368_v22, %s2570_s20  ;;  %v4386_v22 = vunpack.i.h.bf16 %v4385_v25 }
 0x24c   : > { %v3419_v30 = vpop.permute.xlu1 %2184  ;;  %v3421_v37 = vpop.permute.xlu2 %2229 }
 0x24d   : > { %v3423_v47 = vpop.permute.xlu0 %2179  ;;  %v652_v43 = vsel %vm649_vm7, %v4387_v0, %v4386_v22 }
 0x24e   : > { %v4258_v62 = vunpack.i.h.bf16 %v3423_v47  ;;  %v2181_v9 = vunpack.i.l.bf16 %v3423_v47 }
 0x250   : > { %v916_v21 = vsel %vm878_vm15, %v2181_v9, %v4258_v62  ;;  %v915_v35 = vsel %vm878_vm15, %v2177_v6, %v2181_v9  ;;  %v1945_v62 = vunpack.i.l.bf16 %v4388_v48 }
 0x251   : > { %v2383_v42 = vpack.i.bf16 %v592_v32, %v916_v21  ;;  %v2378_v55 = vpack.i.bf16 %v915_v35, %v652_v43  ;;  %v911_v32 = vsel %vm878_vm15, %v4261_v24, %v2167_v13  ;;  %v4391_v21 = vunpack.i.h.bf16 %v4388_v48 }
 0x252   : > { %v2202_v48 = vunpack.i.h.bf16 %v3381_v51 }
 0x253   : > { %2384 = vrot.lane.b32.xlu0 %v2383_v42, %s2570_s20  ;;  %2379 = vrot.lane.b32.xlu2 %v2378_v55, %s2570_s20  ;;  %v912_v55 = vsel %vm878_vm15, %v2167_v13, %v4265_v63  ;;  %v607_v22 = vsel %vm606_vm4, %v1945_v62, %v4391_v21  ;;  %v4266_v13 = vunpack.i.h.bf16 %v3379_v36  ;;  %v4393_v63 = vld [vmem:[#allocation27_spill] sm:$0xff] }
 0x254   : > { %v3446_v44 = vpop.permute.xlu1 %2209  ;;  %v3448_v25 = vpop.permute.xlu2 %2244  ;;  %v2393_v8 = vpack.i.bf16 %v912_v55, %v911_v32 }
 0x255   : > { %4389 = vst [vmem:[#allocation15_spill] sm:$0xff] %v3446_v44  ;;  %v2195_v0 = vpop.permute.xlu0 %2194  ;;  %v4264_v9 = vunpack.i.h.bf16 %v3448_v25  ;;  %v2246_v43 = vunpack.i.l.bf16 %v3448_v25  ;;  %v4270_v55 = vunpack.i.l.bf16 %v3446_v44  ;;  %v908_v51 = vsel %vm878_vm15, %v2156_v1, %v4266_v13  ;;  %v4397_v13 = vld [vmem:[#allocation22_spill] sm:$0xff] }
 0x256   : > { %v2196_v35 = vunpack.i.l.bf16 %v2195_v0  ;;  %v2197_v41 = vunpack.i.h.bf16 %v2195_v0  ;;  %v4401_v44 = vunpack.i.h.bf16 %v3410_v49 }
 0x257   : > { %v3461_v42 = vsel %vm1201_vm0, %v2246_v43, %v4264_v9  ;;  %v4392_v9 = vld [vmem:[#allocation28_spill] sm:$0xff] }
 0x258   : > { %4390 = vst [vmem:[#allocation35_spill] sm:$0xff] %v3461_v42  ;;  %v920_v58 = vsel %vm878_vm15, %v2192_v7, %v2196_v35  ;;  %v4394_v42 = vpack.i.bf16 %v4392_v9, %v4393_v63  ;;  %v922_v9 = vsel %vm878_vm15, %v2197_v41, %v3148_v2 }
 0x259   : > { %v2373_v24 = vpack.i.bf16 %v607_v22, %v920_v58  ;;  %v4268_v58 = vunpack.i.l.bf16 %v3421_v37  ;;  %v2142_v22 = vunpack.i.h.bf16 %v3375_v38 }
 0x25b   : > { %2374 = vrot.lane.b32.xlu1 %v2373_v24, %s2570_s20  ;;  %2389 = vrot.lane.b32.xlu0 %v4394_v42, %s2570_s20  ;;  %v907_v24 = vsel %vm878_vm15, %v4267_v20, %v2156_v1  ;;  %v2428_v20 = vpack.i.bf16 %v4397_v13, %v922_v9  ;;  %v4399_v9 = vunpack.i.l.bf16 %v3375_v38 }
 0x25c   : > { %2394 = vrot.lane.b32.xlu2 %v2393_v8, %s2570_s20  ;;  %v2225_v62 = vpop.permute.xlu1 %2224  ;;  %v3476_v7 = vpop.permute.xlu2 %2259 }
 0x25d   : > { %v2227_v0 = vunpack.i.h.bf16 %v2225_v62  ;;  %v3480_v32 = vpop.permute.xlu0 %2204 }
 0x25e   : > { %v4271_v63 = vunpack.i.h.bf16 %v3480_v32  ;;  %v4269_v8 = vunpack.i.l.bf16 %v3480_v32 }
 0x25f   : > { %v3496_v42 = vsel %vm1201_vm0, %v2227_v0, %v4268_v58  ;;  %v4398_v0 = vld [vmem:[#allocation30_spill] sm:$0xff] }
 0x260   : > { %4395 = vst [vmem:[#allocation34_spill] sm:$0xff] %v3496_v42  ;;  %v3501_v21 = vsel %vm1201_vm0, %v2202_v48, %v4269_v8  ;;  %v3508_v2 = vsel %vm1201_vm0, %v4271_v63, %v4270_v55  ;;  %v2398_v58 = vpack.i.bf16 %v907_v24, %v4398_v0  ;;  %v2187_v42 = vunpack.i.h.bf16 %v3419_v30 }
 0x261   : > { %4396 = vst [vmem:[#allocation33_spill] sm:$0xff] %v3508_v2  ;;  %v2186_v48 = vunpack.i.l.bf16 %v3419_v30  ;;  %v2403_v8 = vpack.i.bf16 %v2177_v6, %v908_v51  ;;  %v903_v30 = vsel %vm878_vm15, %v4399_v9, %v2142_v22  ;;  %v4400_v6 = vunpack.i.l.bf16 %v3278_v23 }
 0x262   : > { %v921_v2 = vsel %vm878_vm15, %v2196_v35, %v2197_v41  ;;  %v2127_v41 = vunpack.i.h.bf16 %v3344_v28  ;;  %v2172_v35 = vunpack.i.h.bf16 %v3408_v12  ;;  %v4275_v28 = vunpack.i.l.bf16 %v3476_v7 }
 0x263   : > { %2429 = vrot.lane.b32.xlu0 %v2428_v20, %s2570_s20  ;;  %2399 = vrot.lane.b32.xlu1 %v2398_v58, %s2570_s20  ;;  %v904_v20 = vsel %vm878_vm15, %v2142_v22, %v4400_v6  ;;  %v918_v58 = vsel %vm878_vm15, %v2186_v48, %v2187_v42 }
 0x264   : > { %2404 = vrot.lane.b32.xlu2 %v2403_v8, %s2570_s20  ;;  %v3519_v55 = vpop.permute.xlu1 %2239  ;;  %v3521_v63 = vpop.permute.xlu2 %2274  ;;  %v2226_v8 = vunpack.i.l.bf16 %v2225_v62  ;;  %v4403_v62 = vld [vmem:[#allocation21_spill] sm:$0xff] }
 0x265   : > { %v4274_v13 = vunpack.i.h.bf16 %v3519_v55  ;;  %v2220_v24 = vpop.permute.xlu0 %2219  ;;  %v2443_v22 = vpack.i.bf16 %v4403_v62, %v918_v58  ;;  %v4405_v62 = vunpack.i.h.bf16 %v3423_v47  ;;  %v4409_v47 = vunpack.i.h.bf16 %v3421_v37 }
 0x266   : > { %v2222_v51 = vunpack.i.h.bf16 %v2220_v24  ;;  %v2221_v0 = vunpack.i.l.bf16 %v2220_v24  ;;  %v2408_v24 = vpack.i.bf16 %v904_v20, %v903_v30 }
 0x267   : > { %v3536_v1 = vsel %vm1201_vm0, %v4274_v13, %v2246_v43  ;;  %v4404_v43 = vunpack.i.l.bf16 %v3412_v60  ;;  %v4408_v13 = vunpack.i.h.bf16 %v3243_v16 }
 0x268   : > { %v3541_v9 = vsel %vm1201_vm0, %v4401_v44, %v2221_v0  ;;  %v3544_v23 = vsel %vm1201_vm0, %v2222_v51, %v2226_v8  ;;  %v3547_v42 = vsel %vm1201_vm0, %v2221_v0, %v2222_v51  ;;  %v2131_v44 = vunpack.i.l.bf16 %v3243_v16 }
 0x269   : > { %4402 = vst [vmem:[#allocation26_spill] sm:$0xff] %v3547_v42  ;;  %v2413_v6 = vpack.i.bf16 %v921_v2, %v4404_v43  ;;  %v2176_v8 = vunpack.i.l.bf16 %v3342_v45  ;;  %v4406_v43 = vunpack.i.h.bf16 %v3245_v34 }
 0x26a   : > { %v899_v45 = vsel %vm878_vm15, %v2127_v41, %v2131_v44  ;;  %v900_v58 = vsel %vm878_vm15, %v2131_v44, %v4408_v13  ;;  %v2276_v13 = vunpack.i.l.bf16 %v3521_v63 }
 0x26b   : > { %2444 = vrot.lane.b32.xlu0 %v2443_v22, %s2570_s20  ;;  %2409 = vrot.lane.b32.xlu1 %v2408_v24, %s2570_s20  ;;  %v914_v2 = vsel %vm878_vm15, %v2172_v35, %v2176_v8  ;;  %v917_v22 = vsel %vm878_vm15, %v4405_v62, %v2186_v48 }
 0x26c   : > { %2414 = vrot.lane.b32.xlu2 %v2413_v6, %s2570_s20  ;;  %v3559_v51 = vpop.permute.xlu1 %2254  ;;  %v3561_v30 = vpop.permute.xlu2 %2289  ;;  %v4407_v6 = vunpack.i.l.bf16 %v3245_v34 }
 0x26d   : > { %v4276_v20 = vunpack.i.h.bf16 %v3559_v51  ;;  %v3565_v60 = vpop.permute.xlu0 %2234 }
 0x26e   : > { %v4281_v0 = vunpack.i.l.bf16 %v3565_v60  ;;  %v887_v8 = vsel %vm878_vm15, %v4407_v6, %v4406_v43  ;;  %v4413_v6 = vunpack.i.l.bf16 %v3375_v38 }
 0x26f   : > { %v3579_v24 = vsel %vm1201_vm0, %v4276_v20, %v4275_v28  ;;  %v2458_v62 = vpack.i.bf16 %v887_v8, %v914_v2  ;;  %v2418_v28 = vpack.i.bf16 %v900_v58, %v899_v45  ;;  %v4410_v20 = vunpack.i.h.bf16 %v3383_v31 }
 0x270   : > { %v3594_v48 = vsel %vm1201_vm0, %v4409_v47, %v4281_v0 }
 0x271   : > { %v2423_v42 = vpack.i.bf16 %v917_v22, %v4410_v20  ;;  %v4412_v22 = vunpack.i.h.bf16 %v3448_v25 }
 0x273   : > { %2419 = vrot.lane.b32.xlu1 %v2418_v28, %s2570_s20  ;;  %2459 = vrot.lane.b32.xlu0 %v2458_v62, %s2570_s20  ;;  %v4411_v28 = vunpack.i.l.bf16 %v3408_v12  ;;  %v4414_v12 = vpack.i.bf16 %v3328_v52, %v3325_v17  ;;  %v4416_v17 = vunpack.i.l.bf16 %v3308_v57  ;;  %v4417_v52 = vunpack.i.h.bf16 %v3379_v36 }
 0x274   : > { %2424 = vrot.lane.b32.xlu2 %v2423_v42, %s2570_s20  ;;  %v3601_v16 = vpop.permute.xlu1 %2269  ;;  %v3603_v34 = vpop.permute.xlu2 %2304 }
 0x275   : > { %v2272_v44 = vunpack.i.h.bf16 %v3601_v16  ;;  %v2271_v2 = vunpack.i.l.bf16 %v3601_v16  ;;  %v3608_v58 = vpop.permute.xlu0 %2249  ;;  %v913_v20 = vsel %vm878_vm15, %v4411_v28, %v2172_v35  ;;  %v4415_v35 = vpack.i.bf16 %v3185_v18, %v3182_v56 }
 0x276   : > { %v2251_v31 = vunpack.i.l.bf16 %v3608_v58  ;;  %v2438_v8 = vpack.i.bf16 %v913_v20, %v4413_v6  ;;  %v4427_v16 = vunpack.i.l.bf16 %v3421_v37 }
 0x277   : > { %v3615_v42 = vsel %vm1201_vm0, %v2272_v44, %v2276_v13  ;;  %v3620_v45 = vsel %vm1201_vm0, %v2271_v2, %v2272_v44  ;;  %v909_v44 = vsel %vm878_vm15, %v4417_v52, %v4416_v17 }
 0x278   : > { %v3625_v43 = vsel %vm1201_vm0, %v4412_v22, %v2251_v31  ;;  %v2453_v18 = vpack.i.bf16 %v909_v44, %v2127_v41  ;;  %v4418_v31 = vpack.i.bf16 %v3286_v27, %v3283_v3 }
 0x27b   : > { %2434 = vrot.lane.b32.xlu1 %v4414_v12, %s2570_s20  ;;  %2474 = vrot.lane.b32.xlu0 %v4415_v35, %s2570_s20  ;;  %v2307_v35 = vunpack.i.h.bf16 %v3603_v34 }
 0x27c   : > { %2439 = vrot.lane.b32.xlu2 %v2438_v8, %s2570_s20  ;;  %v3638_v47 = vpop.permute.xlu1 %2284  ;;  %v3640_v25 = vpop.permute.xlu2 %2319 }
 0x27d   : > { %v3642_v62 = vpop.permute.xlu0 %2264  ;;  %v4284_v38 = vunpack.i.h.bf16 %v3640_v25  ;;  %v2321_v13 = vunpack.i.l.bf16 %v3640_v25  ;;  %v4282_v28 = vunpack.i.l.bf16 %v3638_v47 }
 0x27f   : > { %v3656_v56 = vsel %vm1201_vm0, %v2321_v13, %v4284_v38 }
 0x283   : > { %2449 = vrot.lane.b32.xlu1 %v4418_v31, %s2570_s20  ;;  %2489 = vrot.lane.b32.xlu0 %v3265_v4, %s2570_s20  ;;  %v4419_v4 = vpack.i.bf16 %v3320_v33, %v3315_v10  ;;  %v4420_v10 = vpack.i.bf16 %v3080_v53, %v3075_v59  ;;  %v4421_v33 = vpack.i.bf16 %v3395_v54, %v3403_v61 }
 0x284   : > { %2454 = vrot.lane.b32.xlu2 %v2453_v18, %s2570_s20  ;;  %v3665_v57 = vpop.permute.xlu1 %2299  ;;  %v3720_v59 = vpop.permute.xlu2 %2334  ;;  %v4422_v53 = vpack.i.bf16 %v3359_v5, %v3351_v14 }
 0x285   : > { %v3667_v36 = vpop.permute.xlu0 %2279  ;;  %v2301_v41 = vunpack.i.l.bf16 %v3665_v57 }
 0x286   : > { %v2282_v20 = vunpack.i.h.bf16 %v3667_v36 }
 0x288   : > { %v3676_v3 = vsel %vm1201_vm0, %v2282_v20, %v4282_v28 }
 0x28b   : > { %2464 = vrot.lane.b32.xlu1 %v3267_v26, %s2570_s20  ;;  %2504 = vrot.lane.b32.xlu0 %v3353_v11, %s2570_s20 }
 0x28c   : > { %2469 = vrot.lane.b32.xlu2 %v4419_v4, %s2570_s20  ;;  %v3691_v8 = vpop.permute.xlu1 %2314  ;;  %v4277_v4 = vunpack.i.h.bf16 %v3720_v59 }
 0x28d   : > { %v3686_v27 = vpop.permute.xlu0 %2294 }
 0x28e   : > { %v2297_v22 = vunpack.i.h.bf16 %v3686_v27  ;;  %v2296_v6 = vunpack.i.l.bf16 %v3686_v27  ;;  %v2336_v27 = vunpack.i.l.bf16 %v3720_v59 }
 0x290   : > { %v3694_v26 = vsel %vm1201_vm0, %v2297_v22, %v2301_v41  ;;  %v3697_v11 = vsel %vm1201_vm0, %v2296_v6, %v2297_v22  ;;  %v4423_v41 = vpack.i.bf16 %v3253_v39, %v3250_v19  ;;  %v3746_v22 = vpop.permute.xlu2 %2349 }
 0x293   : > { %2479 = vrot.lane.b32.xlu1 %v3361_v29, %s2570_s20  ;;  %2519 = vrot.lane.b32.xlu0 %v4420_v10, %s2570_s20  ;;  %v4424_v10 = vpack.i.bf16 %v3227_v40, %v3177_v46  ;;  %v2351_v46 = vunpack.i.l.bf16 %v3746_v22 }
 0x294   : > { %2484 = vrot.lane.b32.xlu2 %v4421_v33, %s2570_s20  ;;  %v3718_v52 = vpop.permute.xlu1 %2329  ;;  %v1255_v33 = vsel %vm1201_vm0, %v2336_v27, %v4277_v4  ;;  %v2317_v4 = vunpack.i.h.bf16 %v3691_v8 }
 0x295   : > { %v3709_v12 = vpop.permute.xlu0 %2309  ;;  %v4278_v54 = vunpack.i.h.bf16 %v3718_v52  ;;  %v2331_v44 = vunpack.i.l.bf16 %v3718_v52 }
 0x296   : > { %v4283_v17 = vunpack.i.l.bf16 %v3709_v12 }
 0x298   : > { %v3716_v29 = vsel %vm1201_vm0, %v2307_v35, %v4283_v17 }
 0x29b   : > { %2494 = vrot.lane.b32.xlu1 %v4422_v53, %s2570_s20 }
 0x29c   : > { %2499 = vrot.lane.b32.xlu2 %v3292_v15, %s2570_s20  ;;  %v1259_v15 = vsel %vm1201_vm0, %v2331_v44, %v4278_v54  ;;  %v2345_v5 = vpop.permute.xlu1 %2344 }
 0x29d   : > { %v3728_v61 = vpop.permute.xlu0 %2324 }
 0x29e   : > { %v4280_v18 = vunpack.i.h.bf16 %v3728_v61  ;;  %v2326_v31 = vunpack.i.l.bf16 %v3728_v61 }
 0x2a0   : > { %v1263_v14 = vsel %vm1201_vm0, %v2326_v31, %v4280_v18 }
 0x2a1   : > { %1462 = vmatpush.msra.mxu2 %v1263_v14  ;;  %v2347_v14 = vunpack.i.h.bf16 %v2345_v5 }
 0x2a3   : > { %1463 = vmatpush.msra.mxu2 %v1259_v15  ;;  %2509 = vrot.lane.b32.xlu1 %v4423_v41, %s2570_s20  ;;  %v2346_v15 = vunpack.i.l.bf16 %v2345_v5  ;;  %v4279_v41 = vunpack.i.h.bf16 %v3746_v22  ;;  %v1258_v5 = vsel %vm1201_vm0, %v2347_v14, %v2331_v44  ;;  %v1243_v44 = vsel %vm1201_vm0, %v2317_v4, %v2321_v13 }
 0x2a4   : > { %2514 = vrot.lane.b32.xlu2 %v4424_v10, %s2570_s20 }
 0x2a5   : > { %v3757_v53 = vpop.permute.xlu0 %2339  ;;  %1464 = vmatpush.msra.mxu2 %v1255_v33  ;;  %v2306_v33 = vunpack.i.l.bf16 %v3603_v34  ;;  %v2266_v34 = vunpack.i.l.bf16 %v3642_v62 }
 0x2a6   : > { %v2342_v19 = vunpack.i.h.bf16 %v3757_v53  ;;  %v2341_v39 = vunpack.i.l.bf16 %v3757_v53  ;;  %v2291_v53 = vunpack.i.l.bf16 %v3561_v30 }
 0x2a8   : > { %v1262_v40 = vsel %vm1201_vm0, %v2341_v39, %v2326_v31  ;;  %v1251_v10 = vsel %vm1201_vm0, %v2342_v19, %v2346_v15  ;;  %v1247_v31 = vsel %vm1201_vm0, %v2351_v46, %v4279_v41 }
 0x2a9   : > { %1422 = vmatpush.msra.mxu0 %v1262_v40  ;;  %1465 = vmatpush.msra.mxu2 %v1251_v10  ;;  %v4288_v40 = vunpack.i.l.bf16 %v3667_v36  ;;  %v1239_v10 = vsel %vm1201_vm0, %v2306_v33, %v2307_v35 }
 0x2ab   : > { %1423 = vmatpush.msra.mxu0 %v1258_v5  ;;  %1099 = vrot.lane.b32.xlu1 %v3099_v50, %s2570_s20  ;;  %v4289_v50 = vunpack.i.h.bf16 %v3561_v30  ;;  %v1231_v35 = vsel %vm1201_vm0, %v4288_v40, %v2282_v20  ;;  %v4426_v20 = vunpack.i.h.bf16 %v3421_v37 }
 0x2ac   : > { %1466 = vmatpush.msra.mxu2 %v1247_v31  ;;  %v4287_v31 = vunpack.i.h.bf16 %v3642_v62 }
 0x2ad   : > { %v3777_v39 = vpop.permute.xlu0 %2359  ;;  %v3779_v54 = vpop.permute.xlu2 %2379  ;;  %v1235_v13 = vsel %vm1201_vm0, %v4289_v50, %v2296_v6  ;;  %v4425_v6 = vunpack.i.h.bf16 %v3559_v51 }
 0x2ae   : > { %v4285_v14 = vunpack.i.l.bf16 %v3777_v39  ;;  %1467 = vmatpush.msra.mxu2 %v1243_v44  ;;  %v4286_v44 = vunpack.i.l.bf16 %v3559_v51 }
 0x2b0   : > { %1468 = vmatpush.msra.mxu2 %v1239_v10  ;;  %v3795_v5 = vsel %vm1201_vm0, %v2346_v15, %v4285_v14  ;;  %v1227_v15 = vsel %vm1201_vm0, %v4287_v31, %v2271_v2  ;;  %v2316_v14 = vunpack.i.l.bf16 %v3691_v8  ;;  %v2302_v31 = vunpack.i.h.bf16 %v3665_v57 }
 0x2b2   : > { %1469 = vmatpush.msra.mxu2 %v1235_v13  ;;  %v1223_v13 = vsel %vm1201_vm0, %v4286_v44, %v4425_v6 }
 0x2b4   : > { %1470 = vmatpush.msra.mxu2 %v1231_v35  ;;  %v1215_v35 = vsel %vm1201_vm0, %v4427_v16, %v4426_v20  ;;  %v2382_v20 = vunpack.i.h.bf16 %v3779_v54 }
 0x2b5   : > { %v3807_v10 = vpop.permute.xlu0 %2364 }
 0x2b6   : > { %v3814_v41 = vpop.permute.xlu2 %2394  ;;  %1471 = vmatpush.msra.mxu2 %v1227_v15  ;;  %v2366_v18 = vunpack.i.l.bf16 %v3807_v10 }
 0x2b7   : > { %v2397_v44 = vunpack.i.h.bf16 %v3814_v41 }
 0x2b8   : > { %1472 = vmatpush.msra.mxu2 %v1223_v13  ;;  %v4429_v13 = vunpack.i.l.bf16 %v3480_v32 }
 0x2ba   : > { %1473 = vmatpush.msra.mxu2 %v3536_v1  ;;  %v4428_v1 = vunpack.i.h.bf16 %v3480_v32 }
 0x2bc   : > { %1474 = vmatpush.msra.mxu2 %v1215_v35  ;;  %v1207_v37 = vsel %vm1201_vm0, %v4429_v13, %v4428_v1  ;;  %v3850_v1 = vpop.permute.xlu1 %2354 }
 0x2bd   : > { %v2370_v2 = vpop.permute.xlu0 %2369 }
 0x2be   : > { %v2372_v15 = vunpack.i.h.bf16 %v2370_v2  ;;  %v2371_v0 = vunpack.i.l.bf16 %v2370_v2  ;;  %v3828_v28 = vpop.permute.xlu2 %2404  ;;  %1475 = vmatpush.msra.mxu2 %v3541_v9  ;;  %v3845_v9 = vld [vmem:[%s4208_s2] sm:$0xff] }
 0x2bf   : > { %v2407_v6 = vunpack.i.h.bf16 %v3828_v28  ;;  %v4430_v2 = vld [vmem:[#allocation41_spill] sm:$0xff] }
 0x2c0   : > { %1476 = vmatpush.msra.mxu2 %v1207_v37  ;;  %v1254_v16 = vsel %vm1201_vm0, %v2371_v0, %v2336_v27  ;;  %v1306_v35 = vsel %vm1201_vm0, %v2366_v18, %v2372_v15  ;;  %v2396_v18 = vunpack.i.l.bf16 %v3814_v41 }
 0x2c1   : > { %1424 = vmatpush.msra.mxu0 %v1254_v16  ;;  %1447 = vmatpush.msra.mxu1 %v1306_v35  ;;  %v1302_v32 = vsel %vm1201_vm0, %v2407_v6, %v2382_v20 }
 0x2c2   : > { %1477 = vmatpush.msra.mxu2 %v4430_v2  ;;  %v1299_v57 = vsel %vm1201_vm0, %v2396_v18, %v2397_v44 }
 0x2c3   : > { %1478 = vmatmul.f32.vlgmr.msra.gmra.mxu2 %v3845_v9  ;;  %1448 = vmatpush.msra.mxu1 %v1302_v32 }
 0x2c5   : > { %v3852_v13 = vpop.permute.xlu0 %2384 }
 0x2c6   : > { %v3854_v0 = vpop.permute.xlu2 %2414  ;;  %v2387_v6 = vunpack.i.h.bf16 %v3852_v13  ;;  %v2386_v2 = vunpack.i.l.bf16 %v3852_v13 }
 0x2c7   : > { %v2416_v27 = vunpack.i.l.bf16 %v3854_v0  ;;  %v2417_v8 = vunpack.i.h.bf16 %v3854_v0 }
 0x2c8   : > { %v1246_v40 = vsel %vm1201_vm0, %v2387_v6, %v2351_v46  ;;  %v1303_v50 = vsel %vm1201_vm0, %v2382_v20, %v2386_v2  ;;  %v4431_v6 = vunpack.i.h.bf16 %v3561_v30 }
 0x2c9   : > { %v1298_v37 = vsel %vm1201_vm0, %v2416_v27, %v2396_v18  ;;  %v2277_v18 = vunpack.i.h.bf16 %v3521_v63  ;;  %v4432_v63 = vunpack.i.l.bf16 %v3667_v36 }
 0x2ca   : > { %1449 = vmatpush.msra.mxu1 %v1298_v37 }
 0x2cb   : > { %v1230_v30 = vsel %vm1201_vm0, %v2277_v18, %v4432_v63 }
 0x2cd   : > { %v3859_v16 = vpop.permute.xlu1 %2374  ;;  %v3861_v35 = vpop.permute.xlu0 %2389 }
 0x2ce   : > { %v2377_v32 = vunpack.i.h.bf16 %v3859_v16  ;;  %v2376_v17 = vunpack.i.l.bf16 %v3859_v16  ;;  %v3867_v38 = vpop.permute.xlu2 %2424 }
 0x2d0   : > { %v1250_v27 = vsel %vm1201_vm0, %v2377_v32, %v2342_v19  ;;  %v1307_v37 = vsel %vm1201_vm0, %v2372_v15, %v2376_v17  ;;  %v1242_v19 = vsel %vm1201_vm0, %v2316_v14, %v2317_v4  ;;  %v4291_v15 = vunpack.i.l.bf16 %v3828_v28 }
 0x2d1   : > { %1425 = vmatpush.msra.mxu0 %v1250_v27  ;;  %1487 = vmatpush.msra.mxu3 %v1307_v37  ;;  %v2426_v4 = vunpack.i.l.bf16 %v3867_v38  ;;  %v1234_v27 = vsel %vm1201_vm0, %v2291_v53, %v4431_v6  ;;  %v2241_v53 = vunpack.i.l.bf16 %v3519_v55 }
 0x2d3   : > { %1426 = vmatpush.msra.mxu0 %v1246_v40  ;;  %1488 = vmatpush.msra.mxu3 %v1303_v50  ;;  %v1238_v50 = vsel %vm1201_vm0, %v2302_v31, %v2306_v33 }
 0x2d5   : > { %v3892_v32 = vpop.permute.xlu0 %2429  ;;  %v3894_v46 = vpop.permute.xlu1 %2399  ;;  %1427 = vmatpush.msra.mxu0 %v1242_v19  ;;  %1489 = vmatpush.msra.mxu3 %v1299_v57  ;;  %v2252_v19 = vunpack.i.h.bf16 %v3608_v58  ;;  %v4433_v57 = vunpack.i.h.bf16 %v3642_v62 }
 0x2d6   : > { %v2431_v14 = vunpack.i.l.bf16 %v3892_v32  ;;  %v2402_v40 = vunpack.i.h.bf16 %v3894_v46  ;;  %v3903_v20 = vpop.permute.xlu2 %2439 }
 0x2d7   : > { %1428 = vmatpush.msra.mxu0 %v1238_v50  ;;  %v1226_v50 = vsel %vm1201_vm0, %v2266_v34, %v4433_v57  ;;  %v2441_v18 = vunpack.i.l.bf16 %v3903_v20  ;;  %v4437_v57 = vld [vmem:[#allocation40_spill] sm:$0xff] }
 0x2d8   : > { %v1294_v33 = vsel %vm1201_vm0, %v2426_v4, %v2402_v40  ;;  %v1295_v31 = vsel %vm1201_vm0, %v2402_v40, %v4291_v15  ;;  %v1309_v37 = vsel %vm1201_vm0, %v2417_v8, %v2431_v14  ;;  %v2427_v4 = vunpack.i.h.bf16 %v3867_v38 }
 0x2d9   : > { %1429 = vmatpush.msra.mxu0 %v1234_v27  ;;  %1450 = vmatpush.msra.mxu1 %v1294_v33  ;;  %v4434_v40 = vunpack.i.l.bf16 %v3559_v51  ;;  %v2216_v33 = vunpack.i.l.bf16 %v3410_v49  ;;  %v2401_v15 = vunpack.i.l.bf16 %v3894_v46 }
 0x2da   : > { %1490 = vmatpush.msra.mxu3 %v1295_v31  ;;  %1567 = vmatpush.msrb.mxu2 %v1309_v37  ;;  %v4435_v31 = vunpack.i.h.bf16 %v3519_v55  ;;  %v2066_v55 = vunpack.i.l.bf16 %v4437_v57 }
 0x2db   : > { %1430 = vmatpush.msra.mxu0 %v1230_v30  ;;  %v1222_v36 = vsel %vm1201_vm0, %v2252_v19, %v4434_v40  ;;  %v4436_v30 = vld [vmem:[#allocation34_spill] sm:$0xff]  ;;  %v2442_v40 = vunpack.i.h.bf16 %v3903_v20 }
 0x2dc   : > { %v1218_v37 = vsel %vm1201_vm0, %v2241_v53, %v4435_v31  ;;  %v4438_v53 = vunpack.i.h.bf16 %v3410_v49  ;;  %v4293_v49 = vunpack.i.l.bf16 %v3779_v54 }
 0x2dd   : > { %v3926_v14 = vpop.permute.xlu0 %2444  ;;  %v3928_v58 = vpop.permute.xlu1 %2409  ;;  %1431 = vmatpush.msra.mxu0 %v1226_v50 }
 0x2de   : > { %v2446_v6 = vunpack.i.l.bf16 %v3926_v14  ;;  %v4290_v27 = vunpack.i.h.bf16 %v3928_v58  ;;  %v2411_v62 = vunpack.i.l.bf16 %v3928_v58  ;;  %v3937_v34 = vpop.permute.xlu2 %2454  ;;  %v1210_v50 = vsel %vm1201_vm0, %v2216_v33, %v4438_v53 }
 0x2df   : > { %1432 = vmatpush.msra.mxu0 %v1222_v36 }
 0x2e0   : > { %v1290_v51 = vsel %vm1201_vm0, %v2441_v18, %v2411_v62  ;;  %v1291_v19 = vsel %vm1201_vm0, %v2411_v62, %v4290_v27  ;;  %v1305_v63 = vsel %vm1201_vm0, %v2427_v4, %v2446_v6  ;;  %v2456_v6 = vunpack.i.l.bf16 %v3937_v34 }
 0x2e1   : > { %1433 = vmatpush.msra.mxu0 %v1218_v37  ;;  %1451 = vmatpush.msra.mxu1 %v1290_v51  ;;  %v2357_v27 = vunpack.i.h.bf16 %v3850_v1 }
 0x2e2   : > { %1491 = vmatpush.msra.mxu3 %v1291_v19  ;;  %1568 = vmatpush.msrb.mxu2 %v1305_v63  ;;  %v4439_v19 = vunpack.i.h.bf16 %v4437_v57  ;;  %v4292_v57 = vunpack.i.l.bf16 %v3850_v1 }
 0x2e3   : > { %1434 = vmatpush.msra.mxu0 %v4436_v30 }
 0x2e4   : > { %v1202_v63 = vsel %vm1201_vm0, %v2066_v55, %v4439_v19  ;;  %v4295_v55 = vunpack.i.h.bf16 %v3807_v10  ;;  %v1261_v19 = vsel %vm1201_vm0, %v4292_v57, %v2401_v15  ;;  %v2447_v57 = vunpack.i.h.bf16 %v3926_v14 }
 0x2e5   : > { %v3956_v36 = vpop.permute.xlu1 %2419  ;;  %v3958_v18 = vpop.permute.xlu0 %2459  ;;  %1435 = vmatpush.msra.mxu0 %v1210_v50 }
 0x2e6   : > { %v4294_v62 = vunpack.i.h.bf16 %v3956_v36  ;;  %v2421_v31 = vunpack.i.l.bf16 %v3956_v36  ;;  %v2461_v37 = vunpack.i.l.bf16 %v3958_v18  ;;  %v3964_v51 = vpop.permute.xlu2 %2469 }
 0x2e7   : > { %v2472_v33 = vunpack.i.h.bf16 %v3964_v51  ;;  %1436 = vmatpush.msra.mxu0 %v3501_v21  ;;  %v2457_v21 = vunpack.i.h.bf16 %v3937_v34 }
 0x2e8   : > { %v1286_v30 = vsel %vm1201_vm0, %v2456_v6, %v2421_v31  ;;  %v1287_v53 = vsel %vm1201_vm0, %v2421_v31, %v4294_v62  ;;  %v1301_v50 = vsel %vm1201_vm0, %v2442_v40, %v2461_v37  ;;  %v1265_v6 = vsel %vm1201_vm0, %v4293_v49, %v2357_v27 }
 0x2e9   : > { %1437 = vmatpush.msra.mxu0 %v1202_v63  ;;  %1452 = vmatpush.msra.mxu1 %v1286_v30  ;;  %v1297_v46 = vsel %vm1201_vm0, %v2457_v21, %v2472_v33  ;;  %v2362_v31 = vunpack.i.h.bf16 %v3777_v39  ;;  %v2392_v37 = vunpack.i.h.bf16 %v3861_v35  ;;  %v2432_v33 = vunpack.i.h.bf16 %v3892_v32 }
 0x2ea   : > { %1492 = vmatpush.msra.mxu3 %v1287_v53  ;;  %1569 = vmatpush.msrb.mxu2 %v1301_v50  ;;  %v2471_v50 = vunpack.i.l.bf16 %v3964_v51  ;;  %v4440_v49 = vunpack.i.l.bf16 %v3777_v39  ;;  %v4441_v39 = vunpack.i.h.bf16 %v3640_v25 }
 0x2eb   : > { %1438 = vmatmul.f32.vlgmr.msra.gmra.mxu0 %v3845_v9 }
 0x2ec   : > { %1542 = vmatpush.msrb.mxu0 %v1265_v6  ;;  %1570 = vmatpush.msrb.mxu2 %v1297_v46  ;;  %v1257_v46 = vsel %vm1201_vm0, %v4295_v55, %v2362_v31  ;;  %v1253_v32 = vsel %vm1201_vm0, %v4440_v49, %v2392_v37  ;;  %v2312_v31 = vunpack.i.h.bf16 %v3709_v12  ;;  %v1245_v14 = vsel %vm1201_vm0, %v4441_v39, %v2447_v57 }
 0x2ed   : > { %v3996_v63 = vpop.permute.xlu1 %2434  ;;  %v2262_v57 = vunpack.i.h.bf16 %v3476_v7  ;;  %v2462_v39 = vunpack.i.h.bf16 %v3958_v18 }
 0x2ee   : > { %1543 = vmatpush.msrb.mxu0 %v1261_v19  ;;  %v2437_v30 = vunpack.i.h.bf16 %v3996_v63  ;;  %v2436_v27 = vunpack.i.l.bf16 %v3996_v63  ;;  %v4000_v53 = vpop.permute.xlu2 %2484  ;;  %v2391_v19 = vunpack.i.l.bf16 %v3861_v35  ;;  %v4455_v63 = vunpack.i.h.bf16 %v3718_v52 }
 0x2ef   : > { %v2486_v6 = vunpack.i.l.bf16 %v4000_v53 }
 0x2f0   : > { %1544 = vmatpush.msrb.mxu0 %v1257_v46  ;;  %v1283_v15 = vsel %vm1201_vm0, %v2436_v27, %v2437_v30  ;;  %v4020_v46 = vpop.permute.xlu0 %2474  ;;  %v1249_v55 = vsel %vm1201_vm0, %v2391_v19, %v2432_v33 }
 0x2f1   : > { %1493 = vmatpush.msra.mxu3 %v1283_v15  ;;  %v1293_v62 = vsel %vm1201_vm0, %v2471_v50, %v2486_v6  ;;  %v2287_v6 = vunpack.i.h.bf16 %v3638_v47  ;;  %v4442_v15 = vunpack.i.l.bf16 %v3709_v12 }
 0x2f2   : > { %1545 = vmatpush.msrb.mxu0 %v1253_v32  ;;  %1571 = vmatpush.msrb.mxu2 %v1293_v62 }
 0x2f3   : > { %v1241_v32 = vsel %vm1201_vm0, %v4442_v15, %v2312_v31  ;;  %v2476_v15 = vunpack.i.l.bf16 %v4020_v46 }
 0x2f4   : > { %1546 = vmatpush.msrb.mxu0 %v1249_v55  ;;  %v4443_v55 = vunpack.i.l.bf16 %v3638_v47  ;;  %v2237_v47 = vunpack.i.h.bf16 %v3565_v60 }
 0x2f5   : > { %v4028_v49 = vpop.permute.xlu1 %2449 }
 0x2f6   : > { %1547 = vmatpush.msrb.mxu0 %v1245_v14  ;;  %v2452_v37 = vunpack.i.h.bf16 %v4028_v49  ;;  %v2451_v62 = vunpack.i.l.bf16 %v4028_v49  ;;  %v1233_v33 = vsel %vm1201_vm0, %v4443_v55, %v2287_v6  ;;  %v2477_v14 = vunpack.i.h.bf16 %v4020_v46 }
 0x2f7   : > { %v4444_v6 = vunpack.i.l.bf16 %v3476_v7 }
 0x2f8   : > { %1548 = vmatpush.msrb.mxu0 %v1241_v32  ;;  %v1279_v25 = vsel %vm1201_vm0, %v2451_v62, %v2452_v37  ;;  %v4045_v12 = vpop.permute.xlu0 %2489  ;;  %v1271_v7 = vsel %vm1201_vm0, %v2476_v15, %v2477_v14 }
 0x2f9   : > { %1494 = vmatpush.msra.mxu3 %v1279_v25  ;;  %v1225_v18 = vsel %vm1201_vm0, %v4444_v6, %v2262_v57  ;;  %v2491_v25 = vunpack.i.l.bf16 %v4045_v12  ;;  %v4445_v57 = vld [vmem:[#allocation15_spill] sm:$0xff] }
 0x2fa   : > { %1549 = vmatpush.msrb.mxu0 %v3694_v26  ;;  %v2212_v6 = vunpack.i.h.bf16 %v4445_v57 }
 0x2fc   : > { %1550 = vmatpush.msrb.mxu0 %v1233_v33 }
 0x2fd   : > { %v4047_v31 = vpop.permute.xlu1 %2464 }
 0x2fe   : > { %1551 = vmatpush.msrb.mxu0 %v3615_v42  ;;  %v2467_v26 = vunpack.i.h.bf16 %v4047_v31  ;;  %v2466_v32 = vunpack.i.l.bf16 %v4047_v31  ;;  %v2487_v42 = vunpack.i.h.bf16 %v4000_v53  ;;  %v4462_v31 = vld [vmem:[#allocation42_spill] sm:$0xff] }
 0x300   : > { %1552 = vmatpush.msrb.mxu0 %v1225_v18  ;;  %v1282_v55 = vsel %vm1201_vm0, %v2467_v26, %v2436_v27  ;;  %v1275_v33 = vsel %vm1201_vm0, %v2462_v39, %v2466_v32  ;;  %v4446_v18 = vunpack.i.l.bf16 %v3565_v60  ;;  %v4075_v26 = vld [vmem:[%s4208_s2 + $0x8] sm:$0xff] }
 0x301   : > { %1453 = vmatpush.msra.mxu1 %v1282_v55  ;;  %1495 = vmatpush.msra.mxu3 %v1275_v33  ;;  %v4080_v55 = vpop.permute.xlu2 %2499  ;;  %v2492_v33 = vunpack.i.h.bf16 %v4045_v12  ;;  %v4461_v12 = vld [vmem:[#allocation33_spill] sm:$0xff] }
 0x302   : > { %1553 = vmatpush.msrb.mxu0 %v3625_v43  ;;  %v1217_v27 = vsel %vm1201_vm0, %v4446_v18, %v2237_v47  ;;  %v1267_v43 = vsel %vm1201_vm0, %v2487_v42, %v2491_v25  ;;  %v1308_v47 = vsel %vm1201_vm0, %v2376_v17, %v2417_v8  ;;  %v2501_v16 = vunpack.i.l.bf16 %v4080_v55  ;;  %v4448_v17 = vld [vmem:[#allocation16_spill] sm:$0xff] }
 0x303   : > { %1496 = vmatpush.msra.mxu3 %v1271_v7  ;;  %v4447_v7 = vunpack.i.l.bf16 %v4445_v57  ;;  %v1300_v8 = vsel %vm1201_vm0, %v2397_v44, %v2442_v40  ;;  %v1274_v38 = vsel %vm1201_vm0, %v2492_v33, %v2462_v39  ;;  %v4450_v40 = vunpack.i.h.bf16 %v3928_v58 }
 0x304   : > { %1554 = vmatpush.msrb.mxu0 %v1217_v27  ;;  %v2505_v27 = vpop.permute.xlu0 %2504  ;;  %v1270_v41 = vsel %vm1201_vm0, %v2501_v16, %v2476_v15  ;;  %v4452_v58 = vunpack.i.l.bf16 %v3779_v54 }
 0x305   : > { %v2480_v53 = vpop.permute.xlu1 %2479  ;;  %1497 = vmatpush.msra.mxu3 %v1267_v43  ;;  %v1209_v18 = vsel %vm1201_vm0, %v4447_v7, %v2212_v6  ;;  %v2507_v57 = vunpack.i.h.bf16 %v2505_v27  ;;  %v1292_v39 = vsel %vm1201_vm0, %v4450_v40, %v2471_v50  ;;  %v2506_v43 = vunpack.i.l.bf16 %v2505_v27 }
 0x306   : > { %1555 = vmatpush.msrb.mxu0 %v3544_v23  ;;  %v2481_v60 = vunpack.i.l.bf16 %v2480_v53  ;;  %1772 = vmatmul.msk.f32.vlgmr.msra.gmra.mxu3 %vm1418_vm3, %v4075_v26  ;;  %v1304_v23 = vsel %vm1201_vm0, %v2386_v2, %v2427_v4  ;;  %v2482_v13 = vunpack.i.h.bf16 %v2480_v53  ;;  %v4449_v2 = vunpack.i.l.bf16 %v3828_v28 }
 0x307   : > { %1527 = vmatpush.msrb.mxu3 %v1308_v47  ;;  %v1266_v34 = vsel %vm1201_vm0, %v2507_v57, %v2487_v42  ;;  %v2502_v28 = vunpack.i.h.bf16 %v4080_v55  ;;  %v4453_v50 = vunpack.i.h.bf16 %v3728_v61  ;;  %v4454_v53 = vunpack.i.l.bf16 %v3850_v1 }
 0x308   : > { %1556 = vmatpush.msrb.mxu0 %v1209_v18  ;;  %v1278_v0 = vsel %vm1201_vm0, %v2481_v60, %v2451_v62  ;;  %v1296_v4 = vsel %vm1201_vm0, %v4449_v2, %v2457_v21  ;;  %v4451_v21 = vunpack.i.h.bf16 %v3956_v36  ;;  %v4456_v60 = vunpack.i.h.bf16 %v3807_v10  ;;  %v4466_v2 = vld [vmem:[#allocation9_spill] sm:$0xff] }
 0x309   : > { %1528 = vmatpush.msrb.mxu3 %v1304_v23  ;;  %1454 = vmatpush.msra.mxu1 %v1278_v0  ;;  %v1264_v42 = vsel %vm1201_vm0, %v4453_v50, %v4452_v58  ;;  %v2515_v36 = vpop.permute.xlu2 %2514  ;;  %v1280_v61 = vsel %vm1201_vm0, %v2452_v37, %v2502_v28  ;;  %v4457_v47 = vunpack.i.h.bf16 %v3720_v59  ;;  %v4458_v59 = vunpack.i.h.bf16 %v3746_v22 }
 0x30a   : > { %1557 = vmatpush.msrb.mxu0 %v4448_v17  ;;  %v1288_v6 = vsel %vm1201_vm0, %v4451_v21, %v2482_v13  ;;  %v2516_v33 = vunpack.i.l.bf16 %v2515_v36  ;;  %v2517_v27 = vunpack.i.h.bf16 %v2515_v36 }
 0x30b   : > { %1558 = vmatmul.f32.vlgmr.msrb.gmra.mxu0 %v3845_v9  ;;  %1529 = vmatpush.msrb.mxu3 %v1300_v8  ;;  %v1256_v1 = vsel %vm1201_vm0, %v4457_v47, %v4456_v60  ;;  %v1248_v37 = vsel %vm1201_vm0, %v4458_v59, %v2391_v19 }
 0x30c   : > { %1455 = vmatpush.msra.mxu1 %v1274_v38  ;;  %v2520_v54 = vpop.permute.xlu0 %2519  ;;  %v1272_v16 = vsel %vm1201_vm0, %v2477_v14, %v2516_v33  ;;  %v4463_v14 = vld [vmem:[#allocation13_spill] sm:$0xff] }
 0x30d   : > { %1530 = vmatpush.msrb.mxu3 %v1296_v4  ;;  %v2495_v20 = vpop.permute.xlu1 %2494  ;;  %v2522_v23 = vunpack.i.h.bf16 %v2520_v54  ;;  %v2521_v0 = vunpack.i.l.bf16 %v2520_v54  ;;  %v1589_v8 = vperm.slane %v4463_v14, 0 }
 0x30e   : > { %v2497_v62 = vunpack.i.h.bf16 %v2495_v20  ;;  %v2496_v44 = vunpack.i.l.bf16 %v2495_v20  ;;  %1456 = vmatpush.msra.mxu1 %v1270_v41 }
 0x30f   : > { %1531 = vmatpush.msrb.mxu3 %v1292_v39  ;;  %v1268_v35 = vsel %vm1201_vm0, %v2491_v25, %v2521_v0  ;;  %v1273_v22 = vsel %vm1201_vm0, %v2516_v33, %v2522_v23  ;;  %vm1593_vm5 = vcmp.eq.s32.totalorder %v1589_v8, 1 }
 0x310   : > { %1457 = vmatpush.msra.mxu1 %v1266_v34  ;;  %v1289_v15 = vsel %vm1201_vm0, %v2482_v13, %v2497_v62  ;;  %v1284_v51 = vsel %vm1201_vm0, %v2437_v30, %v2496_v44  ;;  %v1260_v30 = vsel %vm1201_vm0, %v4455_v63, %v4454_v53  ;;  %v1285_v55 = vsel %vm1201_vm0, %v2496_v44, %v2506_v43  ;;  %v4467_v34 = vld [vmem:[#allocation12_spill] sm:$0xff] }
 0x311   : > { %1771 = vmatmul.msk.f32.vlgmr.msra.gmra.mxu1 %vm1418_vm3, %v4075_v26  ;;  %1532 = vmatpush.msrb.mxu3 %v1288_v6  ;;  %v1592_v62 = vperm.slane %v4463_v14, 3 }
 0x312   : > { %1502 = vmatpush.msrb.mxu1 %v1264_v42  ;;  %1572 = vmatpush.msrb.mxu2 %v1289_v15  ;;  %v4468_v42 = vld [vmem:[#allocation11_spill] sm:$0xff] }
 0x313   : > { %1533 = vmatpush.msrb.mxu3 %v1284_v51  ;;  %vm1596_vm7 = vcmp.eq.s32.totalorder %v1592_v62, 1  ;;  %v1591_v51 = vperm.slane %v4463_v14, 2 }
 0x314   : > { %1503 = vmatpush.msrb.mxu1 %v1260_v30  ;;  %1573 = vmatpush.msrb.mxu2 %v1285_v55 }
 0x315   : > { %1534 = vmatpush.msrb.mxu3 %v1280_v61  ;;  %v2510_v52 = vpop.permute.xlu1 %2509  ;;  %vm1595_vm10 = vcmp.eq.s32.totalorder %v1591_v51, 1 }
 0x316   : > { %1504 = vmatpush.msrb.mxu1 %v1256_v1  ;;  %v2512_v7 = vunpack.i.h.bf16 %v2510_v52  ;;  %v2511_v18 = vunpack.i.l.bf16 %v2510_v52 }
 0x318   : > { %1505 = vmatpush.msrb.mxu1 %v3795_v5  ;;  %v1276_v49 = vsel %vm1201_vm0, %v2466_v32, %v2511_v18  ;;  %v1281_v10 = vsel %vm1201_vm0, %v2502_v28, %v2512_v7  ;;  %v1277_v5 = vsel %vm1201_vm0, %v2511_v18, %v2517_v27  ;;  %v4464_v32 = vld [vmem:[#allocation39_spill] sm:$0xff] }
 0x319   : > { %1535 = vmatpush.msrb.mxu3 %v1276_v49  ;;  %1574 = vmatpush.msrb.mxu2 %v1281_v10 }
 0x31a   : > { %1506 = vmatpush.msrb.mxu1 %v1248_v37 }
 0x31b   : > { %1536 = vmatpush.msrb.mxu3 %v1272_v16  ;;  %1575 = vmatpush.msrb.mxu2 %v1277_v5 }
 0x31c   : > { %1507 = vmatpush.msrb.mxu1 %v3656_v56  ;;  %v4459_v56 = vld [vmem:[#allocation35_spill] sm:$0xff] }
 0x31d   : > { %v1100_v19 = vpop.permute.xlu1 %1099  ;;  %1537 = vmatpush.msrb.mxu3 %v1268_v35  ;;  %1576 = vmatpush.msrb.mxu2 %v1273_v22 }
 0x31e   : > { %1508 = vmatpush.msrb.mxu1 %v3716_v29  ;;  %v1269_v46 = vsel %vm1201_vm0, %v2521_v0, %v1100_v19  ;;  %1773 = vmatmul.msk.f32.vlgmr.msrb.gmra.mxu3 %vm1418_vm3, %v4075_v26  ;;  %v4460_v29 = vld [vmem:[#allocation26_spill] sm:$0xff] }
 0x31f   : > { %1577 = vmatpush.msrb.mxu2 %v1269_v46 }
 0x320   : > { %1509 = vmatpush.msrb.mxu1 %v3697_v11  ;;  %1774 = vmatmul.msk.f32.vlgmr.msrb.gmra.mxu2 %vm1418_vm3, %v4075_v26 }
 0x322   : > { %1510 = vmatpush.msrb.mxu1 %v3676_v3  ;;  %v1590_v3 = vperm.slane %v4463_v14, 1 }
 0x324   : > { %1511 = vmatpush.msrb.mxu1 %v3620_v45  ;;  %vm1594_vm4 = vcmp.eq.s32.totalorder %v1590_v3, 1 }
 0x326   : > { %1512 = vmatpush.msrb.mxu1 %v3579_v24 }
 0x328   : > { %1513 = vmatpush.msrb.mxu1 %v4459_v56 }
 0x32a   : > { %1514 = vmatpush.msrb.mxu1 %v3594_v48  ;;  %v4465_v48 = vld [vmem:[#allocation10_spill] sm:$0xff] }
 0x32c   : > { %1515 = vmatpush.msrb.mxu1 %v4460_v29 }
 0x32e   : > { %1516 = vmatpush.msrb.mxu1 %v4461_v12 }
 0x330   : > { %1517 = vmatpush.msrb.mxu1 %v4462_v31 }
 0x331   : > { %1518 = vmatmul.f32.vlgmr.msrb.gmra.mxu1 %v3845_v9 }
 0x346   : > { %v1479_v11 = vpop.f32.mrf.mxu2 }
 0x347   : > { %v1480_v45 = vadd.f32 %v1479_v11, %v4464_v32 }
 0x368   : > { %v1439_v25 = vpop.f32.mrf.mxu0 }
 0x369   : > { %v1440_v57 = vadd.f32 %v1439_v25, %v4464_v32 }
 0x388   : > { %v1559_v41 = vpop.f32.mrf.mxu0 }
 0x389   : > { %v1499_v24 = vpop.f32.mrf.mxu3  ;;  %v1560_v44 = vadd.f32 %v1559_v41, %v4464_v32 }
 0x38a   : > { %v1500_v26 = vadd.f32 %v1499_v24, %v1480_v45 }
 0x38c   : > { %v1583_v17 = vadd.f32 %v1500_v26, %v4465_v48 }
 0x38e   : > { %v1598_v38 = vsel %vm1594_vm4, %v1583_v17, 0.0  ;;  %v1459_v13 = vpop.f32.mrf.mxu1 }
 0x38f   : > { %1602 = vst [vmem:[%s2633_s19 + $0x8] sm:$0xff] %v1598_v38  ;;  %v1460_v9 = vadd.f32 %v1459_v13, %v1440_v57  ;;  %v1612_v53 = vmul.f32 %v1598_v38, %v1598_v38 }
 0x391   : > { %v1582_v4 = vadd.f32 %v1460_v9, %v4466_v2 }
 0x393   : > { %v1597_v20 = vsel %vm1593_vm5, %v1582_v4, 0.0 }
 0x394   : > { %1601 = vst [vmem:[%s2633_s19] sm:$0xff] %v1597_v20  ;;  %v1611_v50 = vmul.f32 %v1597_v20, %v1597_v20  ;;  %v1605_v63 = vadd.f32 %v1598_v38, %v1597_v20 }
 0x396   : > { %v1615_v55 = vadd.f32 %v1612_v53, %v1611_v50 }
 0x3a1   : > { %v1539_v15 = vpop.f32.mrf.mxu3 }
 0x3a3   : > { %v1579_v40 = vpop.f32.mrf.mxu2 }
 0x3a4   : > { %v1580_v39 = vadd.f32 %v1579_v40, %v1560_v44 }
 0x3a6   : > { %v1585_v28 = vadd.f32 %v1580_v39, %v4467_v34 }
 0x3a8   : > { %v1600_v21 = vsel %vm1596_vm7, %v1585_v28, 0.0 }
 0x3a9   : > { %1604 = vst [vmem:[%s2633_s19 + $0x18] sm:$0xff] %v1600_v21  ;;  %v1614_v60 = vmul.f32 %v1600_v21, %v1600_v21 }
 0x3ae   : > { %v1519_v6 = vpop.f32.mrf.mxu1 }
 0x3af   : > { %v1520_v43 = vadd.f32 %v1519_v6, %v4464_v32 }
 0x3b1   : > { %v1540_v58 = vadd.f32 %v1539_v15, %v1520_v43 }
 0x3b3   : > { %v1584_v36 = vadd.f32 %v1540_v58, %v4468_v42 }
 0x3b5   : > { %v1599_v30 = vsel %vm1595_vm10, %v1584_v36, 0.0 }
 0x3b6   : > { %1603 = vst [vmem:[%s2633_s19 + $0x10] sm:$0xff] %v1599_v30  ;;  %v1606_v61 = vadd.f32 %v1605_v63, %v1599_v30  ;;  %v1613_v54 = vmul.f32 %v1599_v30, %v1599_v30 }
 0x3b8   : > { %v1607_v47 = vadd.f32 %v1606_v61, %v1600_v21  ;;  %v1616_v1 = vadd.f32 %v1615_v55, %v1613_v54 }
 0x3ba   : > { %1608 = vadd.xlane.f32.xlu2 %v1607_v47  ;;  %v1617_v52 = vadd.f32 %v1616_v1, %v1614_v60 }
 0x3bc   : > { %1618 = vadd.xlane.f32.xlu0 %v1617_v52 }
 0x42d   : > { %v1609_v33 = vpop.xlane.xlu2 %1608 }
 0x42e   : > { %1610 = vst [vmem:[%s2628_s16] sm:$0xff] %v1609_v33 }
 0x42f   : > { %v1619_v7 = vpop.xlane.xlu0 %1618 }
 0x430   : > { %1620 = vst [vmem:[%s2638_s22] sm:$0xff] %v1619_v7 }
 0x431 PF: > { %s19_s27 = sadd.s32 1, %s2545_s27  }
 0x432   : > { %p16_p5 = scmp.ge.s32.totalorder %s19_s27, 6  }
 0x434   :  { %18 = sbr.rel (!%p16_p5) target bundleno = 1 (0x1), region = 148 }
 0x439   :  { %1674 = vsyncmov [#allocation4] }
 0x43c   :  { %s1675_s19 = vpop.sfrf %1674 }
 0x43d   :  { %p1777_p6 = scmp.ne.s32.totalorder %s1675_s19, 0 }
 0x43f   :  { %1679 = shalt.err (%p1777_p6)  }
 0x440   :  { %1681 = vsyncmov [#allocation4 + $0x1] }
 0x443   :  { %s1682_s30 = vpop.sfrf %1681 }
 0x444   :  { %p1778_p7 = scmp.ne.s32.totalorder %s1682_s30, 0 }
 0x446   :  { %1686 = shalt.err (%p1778_p7)  }

// kernel: dcsrn_forward.11
= control target key start
LH: loop header
LB: loop body
LE: loop exit
PB: predicated region body
PF: predicated region fallthrough
CT: control target
= control target key end

     0   :  { %s2369_s21 = smov 0   ;;  %s3845_s0 = inlined_call_operand.vmem [shape: f32[8,3072], index: 0, kind: input, shape index: {}]   ;;  %s3846_s1 = inlined_call_operand.vmem [shape: f32[1,3072], index: 1, kind: input, shape index: {}]   ;;  %s3847_s2 = inlined_call_operand.vmem [shape: f32[8,216], index: 2, kind: input, shape index: {}]   ;;  %s3848_s3 = inlined_call_operand.vmem [shape: f32[8,1], index: 3, kind: input, shape index: {}]   ;;  %s3849_s4 = inlined_call_operand.vmem [shape: f32[8,1], index: 4, kind: input, shape index: {}]   ;;  %s3850_s5 = inlined_call_operand.vmem [shape: f32[8,1], index: 5, kind: input, shape index: {}]   ;;  %s3851_s6 = inlined_call_operand.vmem [shape: f32[8,3072], index: 6, kind: output, shape index: {}]  }
   0x1 LB: > { %s1537_s22 = sadd.s32 4294967295, %s2307_s21   ;;  %p1540_p0 = scmp.ge.s32.totalorder %s2307_s21, 1  ;;  %s2307_s21 = sphi %s2369_s21, %s16_s21  }
   0x2   : > { %p156_p1 = scmp.lt.s32.totalorder %s2307_s21, 5 }
   0x4   : > { %p157_p2 = pnand %p1540_p0, %p156_p1 }
   0x6   : > { %160 = sbr.rel (%p157_p2) target bundleno = 819 (0x333), region = 36 }
   0xb   : > { %s1554_s4 = sshll.u32 %s1537_s22, 2  ;;  %s1556_s5 = sshll.u32 %s1537_s22, 9 }
   0xc   : > { %s1555_s23 = sadd.s32 4, %s1554_s4  ;;  %s1557_s24 = sadd.s32 512, %s1556_s5 }
   0xd   : > { %p180_p3 = scmp.lt.s32.totalorder %s1555_s23, 23  ;;  %s1544_s25 = sadd.s32 4294967168, %s1557_s24 }
   0xe   : > { %s189_s26 = sshra.s32 %s1544_s25, 7 }
   0xf   : > { %s4083_s23 = smov (!%p180_p3, %s1555_s23), 23  ;;  %s1545_s27 = sshll.u32 %s189_s26, 3 }
  0x10   : > { %s1542_s28 = sshll.u32 %s4083_s23, 3  ;;  %s192_s7 = scalar_lea.vmem %s3845_s0, %s1545_s27 }
  0x11   : > { %s2383_s10 = scalar_lea.vmem %s3851_s6, %s1542_s28  ;;  %v203_v0 = vld [vmem:[%s192_s7] sm:$0xff]  ;;  %v205_v1 = vld [vmem:[%s192_s7 + $0x8] sm:$0xff]  ;;  %v207_v2 = vld [vmem:[%s192_s7 + $0x10] sm:$0xff] }
  0x12   : > { %v209_v3 = vld [vmem:[%s192_s7 + $0x18] sm:$0xff]  ;;  %v211_v4 = vld [vmem:[%s192_s7 + $0x20] sm:$0xff]  ;;  %v213_v5 = vld [vmem:[%s192_s7 + $0x28] sm:$0xff] }
  0x13   : > { %220 = vsyncadd [#allocation4], 768  ;;  %s221_s13 = scalar_lea.vmem %s3846_s1, %s189_s26 }
  0x14   : > { %v237_v6 = vld [vmem:[%s221_s13] sm:$0x3f] }
  0x15   : > { %238 = vst [vmem:[#allocation3] sm:$0x3f] %v237_v6 }
  0x16   : > { %256 = vsyncadd [#allocation4 + $0x1], 96 }
  0x17   : > { %2301 = dma.done.wait [#allocation4], 768 }
  0x18   : > { %2302 = vsyncadd [#allocation4], 4294966528 }
  0x19   : > { %2303 = dma.done.wait [#allocation4 + $0x1], 96 }
  0x1a   : > { %2304 = vsyncadd [#allocation4 + $0x1], 4294967200  ;;  %v3852_v7 = vmov 0   ;;  %s2310_s14 = smov 127   ;;  %s2311_s15 = smov 126   ;;  %vm306_vm7 = vcmask 1039360  }
  0x1b   : > { %1961 = vset.pattern.permute.xlu0 %v3852_v7  ;;  %s2312_s16 = smov 118   ;;  %s2313_s17 = smov 117   ;;  %vm381_vm8 = vcmask 883712   ;;  %vm396_vm9 = vcmask 875520   ;;  %vm411_vm10 = vcmask 867328   ;;  %vm426_vm11 = vcmask 228352  }
  0x1c   : > { %v270_v8 = vld [vmem:[#allocation3] sm:$0x3f]  ;;  %s2314_s18 = smov 116   ;;  %s2315_s19 = smov 108   ;;  %vm441_vm12 = vcmask 220160   ;;  %vm456_vm13 = vcmask 211968  }
  0x1d   : > { %vm271_vm0 = vcmp.gt.f32.partialorder %v270_v8, 0.0  ;;  %s2316_s20 = smov 107   ;;  %s2317_s22 = smov 106   ;;  %vm471_vm14 = vcmask 146432   ;;  %vm484_vm15 = vcmask 138240  }
  0x1e   : > { %v2390_v9 = vsel %vm271_vm0, 1, %v3852_v7  ;;  %s2318_s4 = smov 28   ;;  %s2319_s5 = smov 27   ;;  %vm499_vm0 = vcmask 130048  }
  0x1f   : > { %3927 = vst [vmem:[#allocation9_spill] sm:$0xff] %v2390_v9  ;;  %v277_v10 = vperm.slane %v2390_v9, 4  ;;  %v278_v11 = vperm.slane %v2390_v9, 5  ;;  %v274_v12 = vperm.slane %v2390_v9, 1  ;;  %v275_v13 = vperm.slane %v2390_v9, 2  ;;  %s2320_s23 = smov 26  }
  0x20   : > { %v276_v14 = vperm.slane %v2390_v9, 3  ;;  %v273_v15 = vperm.slane %v2390_v9, 0  ;;  %s2321_s24 = smov 18   ;;  %s2322_s25 = smov 17  }
  0x21   : > { %vm283_vm1 = vcmp.eq.s32.totalorder %v277_v10, 1  ;;  %vm284_vm2 = vcmp.eq.s32.totalorder %v278_v11, 1  ;;  %vm280_vm3 = vcmp.eq.s32.totalorder %v274_v12, 1  ;;  %vm281_vm4 = vcmp.eq.s32.totalorder %v275_v13, 1  ;;  %s2323_s26 = smov 16   ;;  %s2324_s27 = smov 8  }
  0x22   : > { %v2398_v16 = vsel %vm283_vm1, %v211_v4, 0.0  ;;  %v2400_v17 = vsel %vm284_vm2, %v213_v5, 0.0  ;;  %vm282_vm5 = vcmp.eq.s32.totalorder %v276_v14, 1  ;;  %v286_v18 = vsel %vm280_vm3, %v205_v1, 0.0  ;;  %s2325_s28 = smov 49   ;;  %s2326_s29 = smov 48  }
  0x23   : > { %v1601_v19 = vpack.i.bf16 %v2400_v17, %v2398_v16  ;;  %v287_v20 = vsel %vm281_vm4, %v207_v2, 0.0  ;;  %v288_v21 = vsel %vm282_vm5, %v209_v3, 0.0  ;;  %vm279_vm6 = vcmp.eq.s32.totalorder %v273_v15, 1  ;;  %s2327_s30 = smov 47   ;;  %s2328_s7 = smov 39  }
  0x24   : > { %v2404_v22 = vpack.i.bf16 %v288_v21, %v287_v20  ;;  %v285_v23 = vsel %vm279_vm6, %v203_v0, 0.0  ;;  %v2444_v26 = vpack.i.bf16 %v2398_v16, %v288_v21  ;;  %v2446_v27 = vpack.i.bf16 %v287_v20, %v286_v18  ;;  %s2329_s8 = smov 38   ;;  %s2330_s9 = smov 37  }
  0x25   : > { %1602 = vrot.lane.b32.xlu1 %v1601_v19, %s2310_s14  ;;  %v2406_v24 = vpack.i.bf16 %v286_v18, %v285_v23  ;;  %s2331_s11 = smov 29   ;;  %s2332_s12 = smov 7   ;;  %vm514_vm1 = vcmask 64512   ;;  %vm547_vm2 = vcmask 392192   ;;  %vm532_vm3 = vcmask 400384  }
  0x26   : > { %1612 = vrot.lane.b32.xlu2 %v2404_v22, %s2311_s15  ;;  %vm577_vm4 = vcmask 318464   ;;  %vm562_vm5 = vcmask 384000   ;;  %vm607_vm6 = vcmask 302080  }
  0x27   : > { %1592 = vrot.lane.b32.xlu0 %v2406_v24, %s2310_s14 }
  0x2d   : > { %1607 = vrot.lane.b32.xlu1 %v2406_v24, %s2311_s15 }
  0x2e   : > { %319 = vrot.lane.b32.xlu2 %v2398_v16, %s2311_s15  ;;  %s2333_s15 = smov 111  }
  0x2f   : > { %1597 = vrot.lane.b32.xlu0 %v2404_v22, %s2310_s14 }
  0x35   : > { %1622 = vrot.lane.b32.xlu1 %v2404_v22, %s2312_s16 }
  0x36   : > { %334 = vrot.lane.b32.xlu2 %v2398_v16, %s2312_s16 }
  0x37   : > { %1617 = vrot.lane.b32.xlu0 %v2406_v24, %s2312_s16 }
  0x3d   : > { %1632 = vrot.lane.b32.xlu1 %v2404_v22, %s2313_s17 }
  0x3e   : > { %349 = vrot.lane.b32.xlu2 %v2398_v16, %s2313_s17 }
  0x3f   : > { %1627 = vrot.lane.b32.xlu0 %v2406_v24, %s2313_s17 }
  0x45   : > { %1642 = vrot.lane.b32.xlu1 %v2404_v22, %s2314_s18 }
  0x46   : > { %364 = vrot.lane.b32.xlu2 %v2398_v16, %s2314_s18 }
  0x47   : > { %1637 = vrot.lane.b32.xlu0 %v2406_v24, %s2314_s18 }
  0x4d   : > { %1652 = vrot.lane.b32.xlu1 %v2404_v22, %s2315_s19 }
  0x4e   : > { %379 = vrot.lane.b32.xlu2 %v2398_v16, %s2315_s19 }
  0x4f   : > { %1647 = vrot.lane.b32.xlu0 %v2406_v24, %s2315_s19 }
  0x55   : > { %1662 = vrot.lane.b32.xlu1 %v2404_v22, %s2316_s20 }
  0x56   : > { %394 = vrot.lane.b32.xlu2 %v2398_v16, %s2316_s20 }
  0x57   : > { %1657 = vrot.lane.b32.xlu0 %v2406_v24, %s2316_s20 }
  0x5d   : > { %1672 = vrot.lane.b32.xlu1 %v2404_v22, %s2317_s22 }
  0x5e   : > { %409 = vrot.lane.b32.xlu2 %v2398_v16, %s2317_s22 }
  0x5f   : > { %1667 = vrot.lane.b32.xlu0 %v2406_v24, %s2317_s22 }
  0x65   : > { %1682 = vrot.lane.b32.xlu1 %v2404_v22, %s2318_s4 }
  0x66   : > { %1687 = vrot.lane.b32.xlu2 %v1601_v19, %s2318_s4 }
  0x67   : > { %1677 = vrot.lane.b32.xlu0 %v2406_v24, %s2318_s4 }
  0x6d   : > { %1697 = vrot.lane.b32.xlu1 %v2404_v22, %s2319_s5 }
  0x6e   : > { %1702 = vrot.lane.b32.xlu2 %v1601_v19, %s2319_s5 }
  0x6f   : > { %1692 = vrot.lane.b32.xlu0 %v2406_v24, %s2319_s5 }
  0x75   : > { %1712 = vrot.lane.b32.xlu1 %v2404_v22, %s2320_s23 }
  0x76   : > { %454 = vrot.lane.b32.xlu2 %v2398_v16, %s2320_s23 }
  0x77   : > { %1707 = vrot.lane.b32.xlu0 %v2406_v24, %s2320_s23 }
  0x7d   : > { %1722 = vrot.lane.b32.xlu1 %v2404_v22, %s2321_s24 }
  0x7e   : > { %469 = vrot.lane.b32.xlu2 %v2398_v16, %s2321_s24 }
  0x7f   : > { %1717 = vrot.lane.b32.xlu0 %v2406_v24, %s2321_s24 }
  0x80   : > { %v2441_v25 = vpop.permute.xlu2 %1612 }
  0x85   : > { %1732 = vrot.lane.b32.xlu1 %v2444_v26, %s2322_s25 }
  0x86   : > { %1737 = vrot.lane.b32.xlu2 %v2446_v27, %s2323_s26 }
  0x87   : > { %1727 = vrot.lane.b32.xlu0 %v2446_v27, %s2322_s25 }
  0x88   : > { %v2451_v28 = vpop.permute.xlu2 %319 }
  0x8d   : > { %497 = vrot.lane.b32.xlu1 %v2400_v17, %s2323_s26 }
  0x8e   : > { %1747 = vrot.lane.b32.xlu2 %v2446_v27, %s2324_s27 }
  0x8f   : > { %1742 = vrot.lane.b32.xlu0 %v2444_v26, %s2323_s26 }
  0x90   : > { %v2456_v29 = vpop.permute.xlu2 %334 }
  0x95   : > { %512 = vrot.lane.b32.xlu1 %v2400_v17, %s2324_s27 }
  0x96   : > { %1757 = vrot.lane.b32.xlu2 %v2446_v27, %s2325_s28 }
  0x97   : > { %1752 = vrot.lane.b32.xlu0 %v2444_v26, %s2324_s27  ;;  %v2461_v30 = vpop.permute.xlu1 %1602 }
  0x98   : > { %v2463_v31 = vpop.permute.xlu2 %349  ;;  %v2474_v37 = vunpack.i.l.bf16 %v2461_v30 }
  0x99   : > { %v1593_v32 = vpop.permute.xlu0 %1592 }
  0x9a   : > { %v1595_v33 = vunpack.i.h.bf16 %v1593_v32  ;;  %v1594_v34 = vunpack.i.l.bf16 %v1593_v32 }
  0x9c   : > { %v2466_v35 = vsel %vm306_vm7, %v1594_v34, %v1595_v33 }
  0x9d   : > { %530 = vrot.lane.b32.xlu1 %v2400_v17, %s2325_s28 }
  0x9e   : > { %1767 = vrot.lane.b32.xlu2 %v2446_v27, %s2326_s29 }
  0x9f   : > { %1762 = vrot.lane.b32.xlu0 %v2444_v26, %s2325_s28  ;;  %v2471_v36 = vpop.permute.xlu1 %1607 }
  0xa0   : > { %v2476_v38 = vpop.permute.xlu2 %364 }
  0xa1   : > { %v1598_v39 = vpop.permute.xlu0 %1597 }
  0xa2   : > { %v1600_v40 = vunpack.i.h.bf16 %v1598_v39  ;;  %v1599_v41 = vunpack.i.l.bf16 %v1598_v39 }
  0xa4   : > { %v2479_v42 = vsel %vm306_vm7, %v1599_v41, %v1600_v40  ;;  %v2483_v43 = vsel %vm306_vm7, %v1600_v40, %v2474_v37  ;;  %v2486_v44 = vsel %vm306_vm7, %v1595_v33, %v1599_v41 }
  0xa5   : > { %545 = vrot.lane.b32.xlu1 %v2400_v17, %s2326_s29 }
  0xa6   : > { %1777 = vrot.lane.b32.xlu2 %v2446_v27, %s2327_s30 }
  0xa7   : > { %1772 = vrot.lane.b32.xlu0 %v2444_v26, %s2326_s29  ;;  %v2495_v47 = vpop.permute.xlu1 %1622 }
  0xa8   : > { %v2497_v48 = vpop.permute.xlu2 %379 }
  0xa9   : > { %v2499_v49 = vpop.permute.xlu0 %1617 }
  0xad   : > { %560 = vrot.lane.b32.xlu1 %v2400_v17, %s2327_s30 }
  0xae   : > { %1787 = vrot.lane.b32.xlu2 %v2446_v27, %s2328_s7 }
  0xaf   : > { %1782 = vrot.lane.b32.xlu0 %v2444_v26, %s2327_s30  ;;  %v2504_v50 = vpop.permute.xlu1 %1632 }
  0xb0   : > { %v2506_v51 = vpop.permute.xlu2 %394 }
  0xb1   : > { %v2508_v52 = vpop.permute.xlu0 %1627 }
  0xb5   : > { %575 = vrot.lane.b32.xlu1 %v2400_v17, %s2328_s7 }
  0xb6   : > { %1797 = vrot.lane.b32.xlu2 %v2446_v27, %s2329_s8 }
  0xb7   : > { %1792 = vrot.lane.b32.xlu0 %v2444_v26, %s2328_s7  ;;  %v2513_v53 = vpop.permute.xlu1 %1642 }
  0xb8   : > { %v2515_v54 = vpop.permute.xlu2 %409 }
  0xb9   : > { %v2517_v55 = vpop.permute.xlu0 %1637 }
  0xbd   : > { %590 = vrot.lane.b32.xlu1 %v2400_v17, %s2329_s8 }
  0xbe   : > { %1807 = vrot.lane.b32.xlu2 %v2446_v27, %s2330_s9 }
  0xbf   : > { %1802 = vrot.lane.b32.xlu0 %v2444_v26, %s2329_s8  ;;  %v1653_v56 = vpop.permute.xlu1 %1652 }
  0xc0   : > { %v2522_v57 = vpop.permute.xlu2 %1687  ;;  %v1655_v58 = vunpack.i.h.bf16 %v1653_v56  ;;  %v1654_v59 = vunpack.i.l.bf16 %v1653_v56 }
  0xc1   : > { %v1648_v60 = vpop.permute.xlu0 %1647 }
  0xc2   : > { %v1650_v61 = vunpack.i.h.bf16 %v1648_v60  ;;  %v1649_v62 = vunpack.i.l.bf16 %v1648_v60  ;;  %v2524_v63 = vsel %vm381_vm8, %v1654_v59, %v1655_v58  ;;  %v2527_v0 = vsel %vm381_vm8, %v1655_v58, %v2497_v48 }
  0xc3   : > { %v1836_v60 = vpack.i.bf16 %v2486_v44, %v2400_v17 }
  0xc4   : > { %v2531_v2 = vsel %vm381_vm8, %v1649_v62, %v1650_v61  ;;  %v2533_v3 = vsel %vm381_vm8, %v1650_v61, %v1654_v59  ;;  %v1841_v61 = vpack.i.bf16 %v2483_v43, %v2479_v42  ;;  %vm622_vm8 = vcmask 236544  }
  0xc5   : > { %605 = vrot.lane.b32.xlu1 %v2400_v17, %s2330_s9 }
  0xc6   : > { %1817 = vrot.lane.b32.xlu2 %v2446_v27, %s2331_s11 }
  0xc7   : > { %1812 = vrot.lane.b32.xlu0 %v2444_v26, %s2330_s9  ;;  %v1663_v5 = vpop.permute.xlu1 %1662 }
  0xc8   : > { %v2540_v6 = vpop.permute.xlu2 %1702  ;;  %v1665_v8 = vunpack.i.h.bf16 %v1663_v5  ;;  %v1664_v10 = vunpack.i.l.bf16 %v1663_v5 }
  0xc9   : > { %v1658_v11 = vpop.permute.xlu0 %1657 }
  0xca   : > { %v1660_v12 = vunpack.i.h.bf16 %v1658_v11  ;;  %v1659_v13 = vunpack.i.l.bf16 %v1658_v11  ;;  %v2543_v14 = vsel %vm396_vm9, %v1665_v8, %v2506_v51  ;;  %v2545_v15 = vsel %vm396_vm9, %v1664_v10, %v1665_v8 }
  0xcb   : > { %v1605_v8 = vunpack.i.h.bf16 %v2461_v30  ;;  %v2583_v11 = vunpack.i.l.bf16 %v2522_v57 }
  0xcc   : > { %v2549_v19 = vsel %vm396_vm9, %v1660_v12, %v1664_v10  ;;  %v2551_v20 = vsel %vm396_vm9, %v1659_v13, %v1660_v12  ;;  %vm743_vm9 = vcmask 56320  }
  0xcd   : > { %620 = vrot.lane.b32.xlu1 %v2400_v17, %s2331_s11 }
  0xce   : > { %1827 = vrot.lane.b32.xlu2 %v2446_v27, %s2332_s12 }
  0xcf   : > { %1822 = vrot.lane.b32.xlu0 %v2444_v26, %s2331_s11  ;;  %v1673_v32 = vpop.permute.xlu1 %1672 }
  0xd0   : > { %v2561_v33 = vpop.permute.xlu2 %454  ;;  %v1675_v34 = vunpack.i.h.bf16 %v1673_v32  ;;  %v1674_v39 = vunpack.i.l.bf16 %v1673_v32 }
  0xd1   : > { %3928 = vst [vmem:[#allocation10_spill] sm:$0xff] %v2561_v33  ;;  %v1668_v40 = vpop.permute.xlu0 %1667 }
  0xd2   : > { %v1670_v41 = vunpack.i.h.bf16 %v1668_v40  ;;  %v1669_v56 = vunpack.i.l.bf16 %v1668_v40  ;;  %v2563_v58 = vsel %vm411_vm10, %v1674_v39, %v1675_v34  ;;  %v2566_v59 = vsel %vm411_vm10, %v1675_v34, %v2515_v54 }
  0xd3   : > { %3929 = vst [vmem:[#allocation11_spill] sm:$0xff] %v2563_v58  ;;  %v521_v34 = vsel %vm306_vm7, %v2474_v37, %v1605_v8  ;;  %vm592_vm7 = vcmask 310272  }
  0xd4   : > { %3930 = vst [vmem:[#allocation12_spill] sm:$0xff] %v2566_v59  ;;  %v2574_v62 = vsel %vm411_vm10, %v1669_v56, %v1670_v41  ;;  %v2576_v5 = vsel %vm411_vm10, %v1670_v41, %v1674_v39  ;;  %v1846_v10 = vpack.i.bf16 %v1605_v8, %v521_v34  ;;  %vm336_vm10 = vcmask 965632  }
  0xd5   : > { %3931 = vst [vmem:[#allocation13_spill] sm:$0xff] %v2574_v62  ;;  %1837 = vrot.lane.b32.xlu1 %v1836_v60, %s2332_s12 }
  0xd6   : > { %3932 = vst [vmem:[#allocation14_spill] sm:$0xff] %v2576_v5  ;;  %1842 = vrot.lane.b32.xlu2 %v1841_v61, %s2332_s12  ;;  %v3853_v61 = vunpack.i.h.bf16 %v2540_v6 }
  0xd7   : > { %1832 = vrot.lane.b32.xlu0 %v2444_v26, %s2332_s12  ;;  %v1683_v17 = vpop.permute.xlu1 %1682 }
  0xd8   : > { %v2588_v12 = vpop.permute.xlu2 %469  ;;  %v1685_v13 = vunpack.i.h.bf16 %v1683_v17  ;;  %v1684_v32 = vunpack.i.l.bf16 %v1683_v17  ;;  %v2605_v17 = vunpack.i.l.bf16 %v2540_v6 }
  0xd9   : > { %3933 = vst [vmem:[#allocation15_spill] sm:$0xff] %v2588_v12  ;;  %v1678_v30 = vpop.permute.xlu0 %1677 }
  0xda   : > { %v1680_v39 = vunpack.i.h.bf16 %v1678_v30  ;;  %v1679_v40 = vunpack.i.l.bf16 %v1678_v30  ;;  %v2593_v41 = vsel %vm426_vm11, %v1684_v32, %v1685_v13  ;;  %v2597_v56 = vsel %vm426_vm11, %v1685_v13, %v2583_v11  ;;  %3934 = vst [vmem:[#allocation16_spill] sm:$0xff] %v2605_v17 }
  0xdb   : > { %v2619_v4 = vsel %vm441_vm12, %v2605_v17, %v3853_v61 }
  0xdc   : > { %v2608_v30 = vsel %vm426_vm11, %v1680_v39, %v1684_v32  ;;  %v2611_v7 = vsel %vm426_vm11, %v1679_v40, %v1680_v39 }
  0xdf   : > { %1847 = vrot.lane.b32.xlu0 %v1846_v10, %s2332_s12  ;;  %v1698_v27 = vpop.permute.xlu1 %1697 }
  0xe0   : > { %v1738_v60 = vpop.permute.xlu2 %1737  ;;  %v1700_v23 = vunpack.i.h.bf16 %v1698_v27  ;;  %v1699_v21 = vunpack.i.l.bf16 %v1698_v27 }
  0xe1   : > { %v1693_v32 = vpop.permute.xlu0 %1692  ;;  %v1739_v46 = vunpack.i.l.bf16 %v1738_v60 }
  0xe2   : > { %v1695_v18 = vunpack.i.h.bf16 %v1693_v32  ;;  %v1694_v39 = vunpack.i.l.bf16 %v1693_v32  ;;  %v2621_v40 = vsel %vm441_vm12, %v1699_v21, %v1700_v23  ;;  %v2624_v8 = vsel %vm441_vm12, %v1700_v23, %v2605_v17 }
  0xe4   : > { %v2630_v27 = vsel %vm441_vm12, %v1695_v18, %v1699_v21  ;;  %v2632_v13 = vsel %vm441_vm12, %v1694_v39, %v1695_v18  ;;  %vm351_vm12 = vcmask 957440  }
  0xe7   : > { %v1713_v45 = vpop.permute.xlu1 %1712 }
  0xe8   : > { %v1748_v23 = vpop.permute.xlu2 %1747  ;;  %v1715_v61 = vunpack.i.h.bf16 %v1713_v45  ;;  %v1714_v26 = vunpack.i.l.bf16 %v1713_v45 }
  0xe9   : > { %v1749_v10 = vunpack.i.l.bf16 %v1748_v23  ;;  %v1708_v9 = vpop.permute.xlu0 %1707 }
  0xea   : > { %v1710_v12 = vunpack.i.h.bf16 %v1708_v9  ;;  %v1709_v34 = vunpack.i.l.bf16 %v1708_v9  ;;  %v2638_v21 = vsel %vm456_vm13, %v1714_v26, %v1715_v61  ;;  %v2641_v18 = vsel %vm456_vm13, %v1715_v61, %v2561_v33 }
  0xeb   : > { %3935 = vst [vmem:[#allocation17_spill] sm:$0xff] %v2638_v21  ;;  %v2643_v39 = vpack.i.bf16 %v1739_v46, %v1749_v10  ;;  %v1740_v33 = vunpack.i.h.bf16 %v1738_v60 }
  0xec   : > { %3936 = vst [vmem:[#allocation18_spill] sm:$0xff] %v2641_v18  ;;  %v2647_v1 = vsel %vm456_vm13, %v1710_v12, %v1714_v26  ;;  %v2649_v62 = vsel %vm456_vm13, %v1709_v34, %v1710_v12  ;;  %vm366_vm13 = vcmask 949248  }
  0xed   : > { %3937 = vst [vmem:[#allocation19_spill] sm:$0xff] %v2643_v39 }
  0xee   : > { %3938 = vst [vmem:[#allocation20_spill] sm:$0xff] %v2647_v1 }
  0xef   : > { %3939 = vst [vmem:[#allocation21_spill] sm:$0xff] %v2649_v62  ;;  %v2655_v5 = vpop.permute.xlu1 %1722 }
  0xf0   : > { %3940 = vst [vmem:[#allocation22_spill] sm:$0xff] %v2655_v5  ;;  %v3861_v61 = vunpack.i.l.bf16 %v2655_v5  ;;  %v1758_v18 = vpop.permute.xlu2 %1757 }
  0xf1   : > { %v1718_v58 = vpop.permute.xlu0 %1717 }
  0xf2   : > { %v1720_v39 = vunpack.i.h.bf16 %v1718_v58  ;;  %v1719_v59 = vunpack.i.l.bf16 %v1718_v58 }
  0xf4   : > { %v2659_v32 = vsel %vm471_vm14, %v1719_v59, %v1720_v39  ;;  %v2664_v12 = vsel %vm471_vm14, %v1720_v39, %v3861_v61  ;;  %v1750_v61 = vunpack.i.h.bf16 %v1748_v23 }
  0xf5   : > { %3941 = vst [vmem:[#allocation23_spill] sm:$0xff] %v2659_v32 }
  0xf6   : > { %3942 = vst [vmem:[#allocation24_spill] sm:$0xff] %v2664_v12 }
  0xf7   : > { %v2668_v34 = vpop.permute.xlu1 %1732 }
  0xf8   : > { %3943 = vst [vmem:[#allocation25_spill] sm:$0xff] %v2668_v34  ;;  %v3869_v9 = vunpack.i.l.bf16 %v2668_v34  ;;  %v1768_v62 = vpop.permute.xlu2 %1767 }
  0xf9   : > { %v2671_v45 = vpop.permute.xlu0 %1727 }
  0xfa   : > { %3944 = vst [vmem:[#allocation26_spill] sm:$0xff] %v2671_v45  ;;  %v1730_v58 = vunpack.i.h.bf16 %v2671_v45  ;;  %v3867_v59 = vunpack.i.l.bf16 %v2671_v45 }
  0xfc   : > { %v2678_v39 = vsel %vm484_vm15, %v3867_v59, %v1730_v58  ;;  %v2683_v26 = vsel %vm484_vm15, %v1730_v58, %v3869_v9  ;;  %v2692_v59 = vsel %vm499_vm0, %v1739_v46, %v1740_v33  ;;  %v1769_v46 = vunpack.i.l.bf16 %v1768_v62 }
  0xfd   : > { %3945 = vst [vmem:[#allocation27_spill] sm:$0xff] %v2678_v39  ;;  %v1770_v39 = vunpack.i.h.bf16 %v1768_v62  ;;  %v1760_v9 = vunpack.i.h.bf16 %v1758_v18 }
  0xfe   : > { %3946 = vst [vmem:[#allocation28_spill] sm:$0xff] %v2683_v26 }
  0xff   : > { %v498_v32 = vpop.permute.xlu1 %497  ;;  %3948 = vst [vmem:[#allocation30_spill] sm:$0xff] %v2692_v59  ;;  %v548_v62 = vsel %vm547_vm2, %v1769_v46, %v1770_v39 }
 0x101   : > { %v2687_v12 = vpop.permute.xlu0 %1742 }
 0x102   : > { %3947 = vst [vmem:[#allocation29_spill] sm:$0xff] %v2687_v12  ;;  %v3876_v17 = vunpack.i.h.bf16 %v2687_v12  ;;  %v3875_v45 = vunpack.i.l.bf16 %v2687_v12  ;;  %v1778_v12 = vpop.permute.xlu2 %1777 }
 0x104   : > { %v2697_v58 = vsel %vm499_vm0, %v1740_v33, %v3875_v45  ;;  %v2702_v60 = vsel %vm499_vm0, %v3876_v17, %v498_v32  ;;  %v2711_v45 = vsel %vm514_vm1, %v1749_v10, %v1750_v61 }
 0x105   : > { %3949 = vst [vmem:[#allocation31_spill] sm:$0xff] %v2697_v58 }
 0x106   : > { %3950 = vst [vmem:[#allocation32_spill] sm:$0xff] %v2702_v60  ;;  %v1759_v60 = vunpack.i.l.bf16 %v1758_v18 }
 0x107   : > { %v513_v34 = vpop.permute.xlu1 %512  ;;  %3952 = vst [vmem:[#allocation34_spill] sm:$0xff] %v2711_v45 }
 0x109   : > { %v2706_v26 = vpop.permute.xlu0 %1752 }
 0x10a   : > { %3951 = vst [vmem:[#allocation33_spill] sm:$0xff] %v2706_v26  ;;  %v3885_v1 = vunpack.i.h.bf16 %v2706_v26  ;;  %v3882_v33 = vunpack.i.l.bf16 %v2706_v26  ;;  %v1788_v17 = vpop.permute.xlu2 %1787 }
 0x10c   : > { %v2716_v32 = vsel %vm514_vm1, %v1750_v61, %v3882_v33  ;;  %v2721_v23 = vsel %vm514_vm1, %v3885_v1, %v513_v34  ;;  %v533_v33 = vsel %vm532_vm3, %v1759_v60, %v1760_v9  ;;  %v1790_v60 = vunpack.i.h.bf16 %v1788_v17 }
 0x10d   : > { %3953 = vst [vmem:[#allocation35_spill] sm:$0xff] %v2716_v32 }
 0x10e   : > { %3954 = vst [vmem:[#allocation36_spill] sm:$0xff] %v2721_v23 }
 0x10f   : > { %v531_v10 = vpop.permute.xlu1 %530 }
 0x110   : > { %v1861_v59 = vpack.i.bf16 %v548_v62, %v531_v10 }
 0x111   : > { %v1763_v58 = vpop.permute.xlu0 %1762 }
 0x112   : > { %v1765_v21 = vunpack.i.h.bf16 %v1763_v58  ;;  %v1764_v61 = vunpack.i.l.bf16 %v1763_v58  ;;  %1862 = vrot.lane.b32.xlu0 %v1861_v59, %s2332_s12 }
 0x114   : > { %v535_v26 = vsel %vm532_vm3, %v1764_v61, %v1765_v21  ;;  %v536_v34 = vsel %vm532_vm3, %v1765_v21, %v531_v10  ;;  %v534_v1 = vsel %vm532_vm3, %v1760_v9, %v1764_v61  ;;  %v1789_v21 = vunpack.i.l.bf16 %v1788_v17  ;;  %v1798_v61 = vpop.permute.xlu2 %1797 }
 0x115   : > { %v1856_v23 = vpack.i.bf16 %v536_v34, %v535_v26  ;;  %v1851_v46 = vpack.i.bf16 %v534_v1, %v533_v33  ;;  %v1780_v1 = vunpack.i.h.bf16 %v1778_v12  ;;  %v1779_v33 = vunpack.i.l.bf16 %v1778_v12 }
 0x117   : > { %1857 = vrot.lane.b32.xlu2 %v1856_v23, %s2332_s12  ;;  %1852 = vrot.lane.b32.xlu1 %v1851_v46, %s2332_s12  ;;  %v546_v18 = vpop.permute.xlu1 %545 }
 0x119   : > { %v1773_v45 = vpop.permute.xlu0 %1772 }
 0x11a   : > { %v1775_v32 = vunpack.i.h.bf16 %v1773_v45  ;;  %v1774_v62 = vunpack.i.l.bf16 %v1773_v45  ;;  %v578_v45 = vsel %vm577_vm4, %v1789_v21, %v1790_v60 }
 0x11c   : > { %v551_v5 = vsel %vm547_vm2, %v1775_v32, %v546_v18  ;;  %v549_v58 = vsel %vm547_vm2, %v1770_v39, %v1774_v62  ;;  %v550_v59 = vsel %vm547_vm2, %v1774_v62, %v1775_v32  ;;  %v563_v32 = vsel %vm562_vm5, %v1779_v33, %v1780_v1 }
 0x11d   : > { %v1871_v9 = vpack.i.bf16 %v546_v18, %v551_v5  ;;  %v1866_v26 = vpack.i.bf16 %v550_v59, %v549_v58 }
 0x11f   : > { %1872 = vrot.lane.b32.xlu2 %v1871_v9, %s2332_s12  ;;  %1867 = vrot.lane.b32.xlu1 %v1866_v26, %s2332_s12  ;;  %v561_v23 = vpop.permute.xlu1 %560  ;;  %v1808_v26 = vpop.permute.xlu2 %1807 }
 0x120   : > { %v1886_v46 = vpack.i.bf16 %v578_v45, %v561_v23  ;;  %v1809_v45 = vunpack.i.l.bf16 %v1808_v26 }
 0x121   : > { %v1783_v10 = vpop.permute.xlu0 %1782 }
 0x122   : > { %v1785_v39 = vunpack.i.h.bf16 %v1783_v10  ;;  %v1784_v34 = vunpack.i.l.bf16 %v1783_v10 }
 0x124   : > { %v564_v17 = vsel %vm562_vm5, %v1780_v1, %v1784_v34  ;;  %v565_v5 = vsel %vm562_vm5, %v1784_v34, %v1785_v39  ;;  %v566_v18 = vsel %vm562_vm5, %v1785_v39, %v561_v23  ;;  %v1810_v23 = vunpack.i.h.bf16 %v1808_v26 }
 0x125   : > { %v1876_v62 = vpack.i.bf16 %v564_v17, %v563_v32  ;;  %v1881_v12 = vpack.i.bf16 %v566_v18, %v565_v5  ;;  %v1800_v32 = vunpack.i.h.bf16 %v1798_v61  ;;  %v1799_v17 = vunpack.i.l.bf16 %v1798_v61 }
 0x126   : > { %v608_v5 = vsel %vm607_vm6, %v1809_v45, %v1810_v23 }
 0x127   : > { %1877 = vrot.lane.b32.xlu0 %v1876_v62, %s2332_s12  ;;  %1882 = vrot.lane.b32.xlu1 %v1881_v12, %s2332_s12  ;;  %v576_v58 = vpop.permute.xlu1 %575  ;;  %v593_v12 = vsel %vm592_vm7, %v1799_v17, %v1800_v32 }
 0x128   : > { %1887 = vrot.lane.b32.xlu2 %v1886_v46, %s2332_s12 }
 0x129   : > { %v1793_v59 = vpop.permute.xlu0 %1792 }
 0x12a   : > { %v1795_v21 = vunpack.i.h.bf16 %v1793_v59  ;;  %v1794_v9 = vunpack.i.l.bf16 %v1793_v59 }
 0x12c   : > { %v579_v10 = vsel %vm577_vm4, %v1790_v60, %v1794_v9  ;;  %v580_v33 = vsel %vm577_vm4, %v1794_v9, %v1795_v21  ;;  %v581_v1 = vsel %vm577_vm4, %v1795_v21, %v576_v58 }
 0x12d   : > { %v1891_v39 = vpack.i.bf16 %v580_v33, %v579_v10  ;;  %v1896_v34 = vpack.i.bf16 %v576_v58, %v581_v1 }
 0x12f   : > { %1892 = vrot.lane.b32.xlu0 %v1891_v39, %s2332_s12  ;;  %1897 = vrot.lane.b32.xlu1 %v1896_v34, %s2332_s12  ;;  %v591_v46 = vpop.permute.xlu1 %590  ;;  %v1818_v39 = vpop.permute.xlu2 %1817 }
 0x130   : > { %v1911_v59 = vpack.i.bf16 %v608_v5, %v591_v46 }
 0x131   : > { %v1803_v60 = vpop.permute.xlu0 %1802 }
 0x132   : > { %v1805_v18 = vunpack.i.h.bf16 %v1803_v60  ;;  %v1804_v62 = vunpack.i.l.bf16 %v1803_v60  ;;  %v1820_v60 = vunpack.i.h.bf16 %v1818_v39 }
 0x134   : > { %v595_v21 = vsel %vm592_vm7, %v1804_v62, %v1805_v18  ;;  %v596_v9 = vsel %vm592_vm7, %v1805_v18, %v591_v46  ;;  %v594_v26 = vsel %vm592_vm7, %v1800_v32, %v1804_v62  ;;  %v1819_v18 = vunpack.i.l.bf16 %v1818_v39 }
 0x135   : > { %v1906_v58 = vpack.i.bf16 %v596_v9, %v595_v21  ;;  %v1901_v10 = vpack.i.bf16 %v594_v26, %v593_v12 }
 0x136   : > { %v623_v9 = vsel %vm622_vm8, %v1819_v18, %v1820_v60 }
 0x137   : > { %1907 = vrot.lane.b32.xlu0 %v1906_v58, %s2332_s12  ;;  %1902 = vrot.lane.b32.xlu2 %v1901_v10, %s2332_s12  ;;  %v606_v61 = vpop.permute.xlu1 %605 }
 0x138   : > { %1912 = vrot.lane.b32.xlu1 %v1911_v59, %s2332_s12 }
 0x139   : > { %v1813_v33 = vpop.permute.xlu0 %1812 }
 0x13a   : > { %v1815_v1 = vunpack.i.h.bf16 %v1813_v33  ;;  %v1814_v45 = vunpack.i.l.bf16 %v1813_v33 }
 0x13c   : > { %v611_v34 = vsel %vm607_vm6, %v1815_v1, %v606_v61  ;;  %v609_v17 = vsel %vm607_vm6, %v1810_v23, %v1814_v45  ;;  %v610_v46 = vsel %vm607_vm6, %v1814_v45, %v1815_v1  ;;  %v2752_v23 = vpop.permute.xlu2 %1827  ;;  %v1690_v45 = vunpack.i.h.bf16 %v2522_v57 }
 0x13d   : > { %v1921_v32 = vpack.i.bf16 %v606_v61, %v611_v34  ;;  %v1916_v5 = vpack.i.bf16 %v610_v46, %v609_v17  ;;  %v1830_v39 = vunpack.i.h.bf16 %v2752_v23  ;;  %v1829_v34 = vunpack.i.l.bf16 %v2752_v23 }
 0x13e   : > { %v629_v46 = vsel %vm426_vm11, %v2583_v11, %v1690_v45  ;;  %vm321_vm11 = vcmask 1031168  }
 0x13f   : > { %1922 = vrot.lane.b32.xlu0 %v1921_v32, %s2332_s12  ;;  %1917 = vrot.lane.b32.xlu2 %v1916_v5, %s2332_s12  ;;  %v621_v12 = vpop.permute.xlu1 %620  ;;  %v2768_v57 = vsel %vm743_vm9, %v1829_v34, %v1830_v39 }
 0x140   : > { %v1936_v61 = vpack.i.bf16 %v2608_v30, %v621_v12 }
 0x141   : > { %v1823_v62 = vpop.permute.xlu0 %1822 }
 0x142   : > { %v1825_v59 = vunpack.i.h.bf16 %v1823_v62  ;;  %v1824_v21 = vunpack.i.l.bf16 %v1823_v62 }
 0x144   : > { %v625_v26 = vsel %vm622_vm8, %v1824_v21, %v1825_v59  ;;  %v626_v58 = vsel %vm622_vm8, %v1825_v59, %v621_v12  ;;  %v624_v10 = vsel %vm622_vm8, %v1820_v60, %v1824_v21  ;;  %v1946_v60 = vpack.i.bf16 %v1690_v45, %v629_v46  ;;  %v2776_v62 = vpop.permute.xlu2 %1842  ;;  %v790_v45 = vld [vmem:[%s3848_s3] sm:$0xff] }
 0x145   : > { %v1931_v33 = vpack.i.bf16 %v626_v58, %v625_v26  ;;  %v1926_v1 = vpack.i.bf16 %v624_v10, %v623_v9  ;;  %v3956_v12 = vpack.i.bf16 %v2621_v40, %v2630_v27  ;;  %v3957_v21 = vpack.i.bf16 %v2597_v56, %v2593_v41 }
 0x146   : > { %v1845_v26 = vunpack.i.h.bf16 %v2776_v62  ;;  %v3958_v46 = vunpack.i.h.bf16 %v2540_v6  ;;  %v1615_v6 = vunpack.i.h.bf16 %v2441_v25 }
 0x147   : > { %1937 = vrot.lane.b32.xlu0 %v1936_v61, %s2332_s12  ;;  %1932 = vrot.lane.b32.xlu2 %v1931_v33, %s2332_s12 }
 0x148   : > { %1927 = vrot.lane.b32.xlu1 %v1926_v1, %s2332_s12 }
 0x149   : > { %v2761_v17 = vpop.permute.xlu0 %1832 }
 0x14a   : > { %3955 = vst [vmem:[#allocation37_spill] sm:$0xff] %v2761_v17  ;;  %v1834_v32 = vunpack.i.l.bf16 %v2761_v17  ;;  %v3890_v59 = vunpack.i.h.bf16 %v2761_v17 }
 0x14c   : > { %v2772_v5 = vsel %vm743_vm9, %v1830_v39, %v1834_v32  ;;  %v2792_v58 = vsel %vm743_vm9, %v1834_v32, %v3890_v59  ;;  %v3959_v32 = vpack.i.bf16 %v2619_v4, %v2624_v8 }
 0x14f   : > { %1952 = vrot.lane.b32.xlu0 %v3956_v12, %s2332_s12  ;;  %1947 = vrot.lane.b32.xlu2 %v1946_v60, %s2332_s12  ;;  %v1620_v60 = vunpack.i.h.bf16 %v2499_v49  ;;  %v1619_v12 = vunpack.i.l.bf16 %v2499_v49 }
 0x150   : > { %1942 = vrot.lane.b32.xlu1 %v3957_v21, %s2332_s12  ;;  %v3960_v21 = vpack.i.bf16 %v2474_v37, %v2483_v43  ;;  %v1630_v37 = vunpack.i.h.bf16 %v2508_v52  ;;  %v1629_v43 = vunpack.i.l.bf16 %v2508_v52  ;;  %v325_v52 = vsel %vm321_vm11, %v1615_v6, %v2451_v28 }
 0x151   : > { %v1848_v9 = vpop.permute.xlu0 %1847  ;;  %v337_v4 = vsel %vm336_vm10, %v1619_v12, %v1620_v60 }
 0x152   : > { %v1850_v10 = vunpack.i.h.bf16 %v1848_v9  ;;  %v1849_v61 = vunpack.i.l.bf16 %v1848_v9  ;;  %v1614_v9 = vunpack.i.l.bf16 %v2441_v25  ;;  %v1997_v49 = vpack.i.bf16 %v337_v4, %v2451_v28 }
 0x153   : > { %v3961_v25 = vpack.i.bf16 %v2479_v42, %v2486_v44  ;;  %v1644_v4 = vunpack.i.l.bf16 %v2513_v53  ;;  %v1640_v42 = vunpack.i.h.bf16 %v2517_v55  ;;  %v1624_v28 = vunpack.i.l.bf16 %v2495_v47 }
 0x154   : > { %v2795_v33 = vsel %vm743_vm9, %v1849_v61, %v1850_v10  ;;  %v2800_v1 = vsel %vm743_vm9, %v1845_v26, %v1849_v61  ;;  %v1634_v10 = vunpack.i.l.bf16 %v2504_v50  ;;  %v1609_v61 = vunpack.i.l.bf16 %v2471_v36 }
 0x157   : > { %793 = vperm.xlu0 %1961, %v790_v45   ;;  %741 = vrot.lane.b32.xlu2 %v3958_v46, %s2332_s12  ;;  %v352_v45 = vsel %vm351_vm12, %v1629_v43, %v1630_v37  ;;  %v368_v43 = vsel %vm366_vm13, %v1640_v42, %v1644_v4 }
 0x158   : > { %1957 = vrot.lane.b32.xlu1 %v3959_v32, %s2332_s12 }
 0x15f   : > { %1983 = vrot.lane.b32.xlu0 %v3960_v21, %s2333_s15  ;;  %1968 = vrot.lane.b32.xlu2 %v2404_v22, %s2333_s15  ;;  %v1972_v22 = vpack.i.bf16 %v2466_v35, %v2398_v16  ;;  %v353_v16 = vsel %vm351_vm12, %v1630_v37, %v1634_v10  ;;  %v324_v35 = vsel %vm321_vm11, %v1614_v9, %v1615_v6  ;;  %v1645_v21 = vunpack.i.h.bf16 %v2513_v53 }
 0x160   : > { %1963 = vrot.lane.b32.xlu1 %v2406_v24, %s2333_s15  ;;  %v1610_v24 = vunpack.i.h.bf16 %v2471_v36  ;;  %v2012_v36 = vpack.i.bf16 %v353_v16, %v352_v45  ;;  %v1992_v12 = vpack.i.bf16 %v325_v52, %v324_v35  ;;  %v1639_v16 = vunpack.i.l.bf16 %v2517_v55 }
 0x162   : > { %v322_v46 = vsel %vm321_vm11, %v1609_v61, %v1610_v24  ;;  %v323_v32 = vsel %vm321_vm11, %v1610_v24, %v1614_v9  ;;  %v338_v24 = vsel %vm336_vm10, %v1620_v60, %v1624_v28  ;;  %v367_v60 = vsel %vm366_vm13, %v1639_v16, %v1640_v42  ;;  %v3970_v16 = vld [vmem:[#allocation11_spill] sm:$0xff] }
 0x163   : > { %v1987_v44 = vpack.i.bf16 %v323_v32, %v322_v46  ;;  %v1635_v46 = vunpack.i.h.bf16 %v2504_v50  ;;  %v3962_v50 = vpack.i.bf16 %v2527_v0, %v2524_v63 }
 0x165   : > { %v354_v23 = vsel %vm351_vm12, %v1634_v10, %v1635_v46  ;;  %v1844_v10 = vunpack.i.l.bf16 %v2776_v62  ;;  %v3989_v62 = vld [vmem:[#allocation24_spill] sm:$0xff] }
 0x167   : > { %1998 = vrot.lane.b32.xlu0 %v1997_v49, %s2333_s15  ;;  %1978 = vrot.lane.b32.xlu2 %v3961_v25, %s2333_s15  ;;  %v1625_v49 = vunpack.i.h.bf16 %v2495_v47  ;;  %v749_v63 = vsel %vm743_vm9, %v1844_v10, %v1845_v26 }
 0x168   : > { %1973 = vrot.lane.b32.xlu1 %v1972_v22, %s2333_s15  ;;  %v369_v22 = vsel %vm366_vm13, %v1644_v4, %v1645_v21 }
 0x169   : > { %v340_v9 = vsel %vm336_vm10, %v1625_v49, %v2456_v29  ;;  %v339_v47 = vsel %vm336_vm10, %v1624_v28, %v1625_v49  ;;  %v2027_v52 = vpack.i.bf16 %v369_v22, %v368_v43  ;;  %v3964_v28 = vpack.i.bf16 %v2533_v3, %v2531_v2 }
 0x16a   : > { %v2007_v45 = vpack.i.bf16 %v2456_v29, %v340_v9  ;;  %v2002_v35 = vpack.i.bf16 %v339_v47, %v338_v24  ;;  %v2022_v29 = vpack.i.bf16 %v367_v60, %v2463_v31  ;;  %v3965_v3 = vpack.i.bf16 %v2611_v7, %v2515_v54  ;;  %v3973_v60 = vld [vmem:[#allocation13_spill] sm:$0xff] }
 0x16f   : > { %2013 = vrot.lane.b32.xlu0 %v2012_v36, %s2333_s15  ;;  %1993 = vrot.lane.b32.xlu2 %v1992_v12, %s2333_s15  ;;  %v2880_v36 = vpop.permute.xlu1 %1837  ;;  %v370_v12 = vsel %vm366_vm13, %v1645_v21, %v2476_v38  ;;  %v3963_v21 = vpack.i.bf16 %v2506_v51, %v2543_v14  ;;  %v3966_v14 = vpack.i.bf16 %v2545_v15, %v2549_v19 }
 0x170   : > { %1988 = vrot.lane.b32.xlu1 %v1987_v44, %s2333_s15  ;;  %v2032_v0 = vpack.i.bf16 %v2476_v38, %v370_v12  ;;  %v4004_v38 = vld [vmem:[#allocation36_spill] sm:$0xff] }
 0x171   : > { %v1858_v6 = vpop.permute.xlu2 %1857 }
 0x172   : > { %v1860_v37 = vunpack.i.h.bf16 %v1858_v6  ;;  %v1859_v53 = vunpack.i.l.bf16 %v1858_v6 }
 0x174   : > { %v754_v61 = vsel %vm743_vm9, %v1859_v53, %v1860_v37 }
 0x175   : > { %v2861_v25 = vpack.i.bf16 %v754_v61, %v1829_v34  ;;  %v355_v34 = vsel %vm351_vm12, %v1635_v46, %v2463_v31  ;;  %v3972_v46 = vld [vmem:[#allocation14_spill] sm:$0xff] }
 0x176   : > { %v2017_v32 = vpack.i.bf16 %v355_v34, %v354_v23  ;;  %v3974_v23 = vpack.i.bf16 %v3972_v46, %v3973_v60 }
 0x177   : > { %2028 = vrot.lane.b32.xlu0 %v2027_v52, %s2333_s15  ;;  %2008 = vrot.lane.b32.xlu2 %v2007_v45, %s2333_s15  ;;  %v3969_v45 = vld [vmem:[#allocation12_spill] sm:$0xff] }
 0x178   : > { %2003 = vrot.lane.b32.xlu1 %v2002_v35, %s2333_s15  ;;  %v3971_v35 = vpack.i.bf16 %v3969_v45, %v3970_v16  ;;  %v3981_v16 = vld [vmem:[#allocation15_spill] sm:$0xff] }
 0x179   : > { %v1873_v55 = vpop.permute.xlu2 %1872 }
 0x17a   : > { %v1875_v22 = vunpack.i.h.bf16 %v1873_v55  ;;  %v1874_v24 = vunpack.i.l.bf16 %v1873_v55 }
 0x17c   : > { %v2936_v54 = vsel %vm743_vm9, %v1874_v24, %v1875_v22 }
 0x17f   : > { %2043 = vrot.lane.b32.xlu0 %v3962_v50, %s2333_s15  ;;  %2023 = vrot.lane.b32.xlu2 %v2022_v29, %s2333_s15 }
 0x180   : > { %2018 = vrot.lane.b32.xlu1 %v2017_v32, %s2333_s15 }
 0x182   : > { %v2904_v6 = vpop.permute.xlu2 %1887 }
 0x183   : > { %v1889_v12 = vunpack.i.l.bf16 %v2904_v6 }
 0x184   : > { %v1863_v4 = vpop.permute.xlu0 %1862 }
 0x185   : > { %v1865_v31 = vunpack.i.h.bf16 %v1863_v4  ;;  %v1864_v42 = vunpack.i.l.bf16 %v1863_v4 }
 0x187   : > { %v2892_v44 = vsel %vm743_vm9, %v1860_v37, %v1864_v42  ;;  %v2894_v49 = vpack.i.bf16 %v1865_v31, %v749_v63  ;;  %2058 = vrot.lane.b32.xlu0 %v3963_v21, %s2333_s15  ;;  %2038 = vrot.lane.b32.xlu2 %v3964_v28, %s2333_s15  ;;  %v2077_v28 = vpack.i.bf16 %v2593_v41, %v2608_v30 }
 0x188   : > { %2033 = vrot.lane.b32.xlu1 %v2032_v0, %s2333_s15  ;;  %v3975_v0 = vld [vmem:[#allocation22_spill] sm:$0xff] }
 0x189   : > { %v1853_v26 = vpop.permute.xlu1 %1852  ;;  %v1725_v21 = vunpack.i.h.bf16 %v3975_v0 }
 0x18a   : > { %v1855_v9 = vunpack.i.h.bf16 %v1853_v26  ;;  %v1854_v37 = vunpack.i.l.bf16 %v1853_v26 }
 0x18c   : > { %v2910_v43 = vsel %vm743_vm9, %v1855_v9, %v1859_v53  ;;  %v2913_v51 = vsel %vm743_vm9, %v1854_v37, %v1855_v9  ;;  %v3967_v53 = vpack.i.bf16 %v2551_v20, %v2497_v48  ;;  %v3968_v20 = vpack.i.bf16 %v2630_v27, %v2632_v13 }
 0x18f   : > { %2073 = vrot.lane.b32.xlu0 %v3965_v3, %s2333_s15  ;;  %2053 = vrot.lane.b32.xlu2 %v3966_v14, %s2333_s15  ;;  %v3976_v3 = vld [vmem:[#allocation17_spill] sm:$0xff]  ;;  %v3977_v14 = vld [vmem:[#allocation20_spill] sm:$0xff] }
 0x190   : > { %2048 = vrot.lane.b32.xlu1 %v3967_v53, %s2333_s15  ;;  %v3978_v22 = vpack.i.bf16 %v3976_v3, %v3977_v14 }
 0x191   : > { %v2929_v47 = vpop.permute.xlu2 %1902  ;;  %v2931_v61 = vpop.permute.xlu1 %1867 }
 0x192   : > { %v3893_v52 = vunpack.i.h.bf16 %v2931_v61  ;;  %v3892_v7 = vunpack.i.l.bf16 %v2931_v61 }
 0x194   : > { %v2941_v15 = vsel %vm743_vm9, %v3893_v52, %v1874_v24  ;;  %v2946_v48 = vsel %vm743_vm9, %v1865_v31, %v3892_v7  ;;  %v3979_v24 = vpack.i.bf16 %v2583_v11, %v2597_v56  ;;  %v4009_v52 = vld [vmem:[#allocation29_spill] sm:$0xff] }
 0x195   : > { %v4010_v9 = vunpack.i.h.bf16 %v4009_v52 }
 0x197   : > { %2088 = vrot.lane.b32.xlu0 %v3968_v20, %s2333_s15  ;;  %2068 = vrot.lane.b32.xlu2 %v3971_v35, %s2333_s15  ;;  %v3980_v20 = vunpack.i.l.bf16 %v3975_v0  ;;  %v475_v35 = vsel %vm471_vm14, %v1725_v21, %v3981_v16 }
 0x198   : > { %2063 = vrot.lane.b32.xlu1 %v3974_v23, %s2333_s15 }
 0x199   : > { %v1878_v34 = vpop.permute.xlu0 %1877  ;;  %v2962_v29 = vpop.permute.xlu2 %1917  ;;  %v474_v45 = vsel %vm471_vm14, %v3980_v20, %v1725_v21  ;;  %v3986_v20 = vld [vmem:[#allocation28_spill] sm:$0xff]  ;;  %vm1066_vm14 = vcmask 908288  }
 0x19a   : > { %v1880_v32 = vunpack.i.h.bf16 %v1878_v34  ;;  %v1879_v55 = vunpack.i.l.bf16 %v1878_v34  ;;  %v1883_v50 = vpop.permute.xlu1 %1882  ;;  %v2117_v23 = vpack.i.bf16 %v475_v35, %v474_v45  ;;  %v3987_v45 = vld [vmem:[#allocation27_spill] sm:$0xff] }
 0x19b   : > { %v1885_v13 = vunpack.i.h.bf16 %v1883_v50  ;;  %v1884_v27 = vunpack.i.l.bf16 %v1883_v50  ;;  %v3983_v50 = vld [vmem:[#allocation16_spill] sm:$0xff]  ;;  %v3988_v35 = vpack.i.bf16 %v3986_v20, %v3987_v45 }
 0x19c   : > { %v2966_v4 = vsel %vm743_vm9, %v1879_v55, %v1880_v32 }
 0x19d   : > { %v2969_v31 = vsel %vm743_vm9, %v1885_v13, %v1889_v12  ;;  %v762_v42 = vsel %vm743_vm9, %v1884_v27, %v1885_v13  ;;  %v2973_v63 = vsel %vm743_vm9, %v1880_v32, %v1884_v27  ;;  %v3982_v32 = vld [vmem:[#allocation21_spill] sm:$0xff]  ;;  %v3985_v13 = vpack.i.bf16 %v2624_v8, %v2621_v40 }
 0x19e   : > { %v2978_v26 = vpack.i.bf16 %v762_v42, %v1854_v37  ;;  %v3984_v12 = vpack.i.bf16 %v3982_v32, %v3983_v50  ;;  %v3891_v27 = vunpack.i.h.bf16 %v2880_v36 }
 0x19f   : > { %2103 = vrot.lane.b32.xlu0 %v3978_v22, %s2333_s15  ;;  %2083 = vrot.lane.b32.xlu2 %v3979_v24, %s2333_s15 }
 0x1a0   : > { %2078 = vrot.lane.b32.xlu1 %v2077_v28, %s2333_s15  ;;  %v3038_v40 = vsel %vm743_vm9, %v3891_v27, %v1844_v10  ;;  %v3992_v10 = vld [vmem:[#allocation10_spill] sm:$0xff] }
 0x1a1   : > { %v2991_v53 = vpop.permute.xlu0 %1892  ;;  %v2993_v41 = vpop.permute.xlu2 %1932 }
 0x1a2   : > { %v3894_v30 = vunpack.i.h.bf16 %v2991_v53  ;;  %v1898_v37 = vpop.permute.xlu1 %1897 }
 0x1a3   : > { %v1900_v46 = vunpack.i.h.bf16 %v1898_v37  ;;  %v1899_v60 = vunpack.i.l.bf16 %v1898_v37 }
 0x1a5   : > { %v3004_v11 = vsel %vm743_vm9, %v3894_v30, %v1899_v60  ;;  %v3007_v56 = vsel %vm743_vm9, %v1899_v60, %v1900_v46  ;;  %v3990_v46 = vld [vmem:[#allocation23_spill] sm:$0xff]  ;;  %v4011_v30 = vunpack.i.l.bf16 %v4009_v52 }
 0x1a6   : > { %v3991_v60 = vpack.i.bf16 %v3989_v62, %v3990_v46  ;;  %v4001_v46 = vld [vmem:[#allocation19_spill] sm:$0xff] }
 0x1a7   : > { %2118 = vrot.lane.b32.xlu0 %v2117_v23, %s2333_s15  ;;  %2098 = vrot.lane.b32.xlu2 %v3984_v12, %s2333_s15  ;;  %v3995_v12 = vld [vmem:[#allocation31_spill] sm:$0xff] }
 0x1a8   : > { %2093 = vrot.lane.b32.xlu1 %v3985_v13, %s2333_s15  ;;  %v3996_v13 = vld [vmem:[#allocation30_spill] sm:$0xff] }
 0x1a9   : > { %v3021_v42 = vpop.permute.xlu0 %1907  ;;  %v3023_v0 = vpop.permute.xlu2 %1947 }
 0x1aa   : > { %v1910_v21 = vunpack.i.h.bf16 %v3021_v42  ;;  %v3895_v28 = vunpack.i.l.bf16 %v3021_v42  ;;  %v3027_v3 = vpop.permute.xlu1 %1912 }
 0x1ab   : > { %v1914_v14 = vunpack.i.l.bf16 %v3027_v3 }
 0x1ac   : > { %v770_v22 = vsel %vm743_vm9, %v3895_v28, %v1910_v21  ;;  %v502_v28 = vsel %vm499_vm0, %v4011_v30, %v4010_v9 }
 0x1ad   : > { %v3040_v8 = vpack.i.bf16 %v770_v22, %v1879_v55  ;;  %v3043_v24 = vsel %vm743_vm9, %v1910_v21, %v1914_v14  ;;  %v3993_v55 = vld [vmem:[#allocation18_spill] sm:$0xff]  ;;  %v3997_v21 = vpack.i.bf16 %v3995_v12, %v3996_v13  ;;  %v3998_v14 = vld [vmem:[#allocation35_spill] sm:$0xff] }
 0x1ae   : > { %v3994_v23 = vpack.i.bf16 %v3992_v10, %v3993_v55  ;;  %v3999_v22 = vld [vmem:[#allocation34_spill] sm:$0xff] }
 0x1af   : > { %2133 = vrot.lane.b32.xlu0 %v3988_v35, %s2333_s15  ;;  %2113 = vrot.lane.b32.xlu2 %v3991_v60, %s2333_s15  ;;  %v4000_v20 = vpack.i.bf16 %v3998_v14, %v3999_v22  ;;  %v4002_v22 = vld [vmem:[#allocation26_spill] sm:$0xff] }
 0x1b0   : > { %2108 = vrot.lane.b32.xlu1 %v3994_v23, %s2333_s15 }
 0x1b1   : > { %v3059_v32 = vpop.permute.xlu0 %1922  ;;  %v3061_v50 = vpop.permute.xlu2 %741 }
 0x1b7   : > { %2128 = vrot.lane.b32.xlu2 %v3997_v21, %s2333_s15 }
 0x1b8   : > { %2123 = vrot.lane.b32.xlu1 %v4000_v20, %s2333_s15  ;;  %v4003_v20 = vunpack.i.l.bf16 %v4002_v22 }
 0x1b9   : > { %v3071_v45 = vpop.permute.xlu0 %1937  ;;  %v3073_v35 = vpop.permute.xlu2 %1968 }
 0x1ba   : > { %v3075_v62 = vpop.permute.xlu1 %1927  ;;  %v1940_v13 = vunpack.i.h.bf16 %v3071_v45 }
 0x1bb   : > { %v1929_v30 = vunpack.i.l.bf16 %v3075_v62 }
 0x1c0   : > { %2138 = vrot.lane.b32.xlu1 %v4001_v46, %s2333_s15 }
 0x1c1   : > { %v1953_v60 = vpop.permute.xlu0 %1952  ;;  %v3079_v10 = vpop.permute.xlu2 %1978 }
 0x1c2   : > { %v1955_v55 = vunpack.i.h.bf16 %v1953_v60  ;;  %v1954_v23 = vunpack.i.l.bf16 %v1953_v60  ;;  %v3081_v12 = vpop.permute.xlu1 %1942  ;;  %v1930_v60 = vunpack.i.h.bf16 %v3075_v62 }
 0x1c3   : > { %v1944_v21 = vunpack.i.l.bf16 %v3081_v12  ;;  %v3896_v46 = vunpack.i.h.bf16 %v3081_v12 }
 0x1c4   : > { %v784_v14 = vsel %vm743_vm9, %v1954_v23, %v1955_v55 }
 0x1c5   : > { %v2142_v59 = vpack.i.bf16 %v784_v14, %v4003_v20  ;;  %v780_v39 = vsel %vm743_vm9, %v1940_v13, %v1944_v21  ;;  %v4006_v20 = vld [vmem:[#allocation33_spill] sm:$0xff] }
 0x1c6   : > { %v2152_v19 = vpack.i.bf16 %v780_v39, %v4004_v38  ;;  %v781_v39 = vsel %vm743_vm9, %v1944_v21, %v3896_v46  ;;  %v4007_v2 = vunpack.i.h.bf16 %v4006_v20  ;;  %v4008_v37 = vunpack.i.l.bf16 %v4006_v20 }
 0x1c7   : > { %2143 = vrot.lane.b32.xlu2 %v2142_v59, %s2333_s15  ;;  %v3900_v59 = vunpack.i.l.bf16 %v2993_v41  ;;  %v1970_v46 = vunpack.i.l.bf16 %v3073_v35 }
 0x1c8   : > { %2153 = vrot.lane.b32.xlu1 %v2152_v19, %s2333_s15  ;;  %v1971_v19 = vunpack.i.h.bf16 %v3073_v35  ;;  %v517_v7 = vsel %vm514_vm1, %v4008_v37, %v4007_v2  ;;  %v2157_v37 = vpack.i.bf16 %v502_v28, %v781_v39 }
 0x1c9   : > { %v3094_v18 = vpop.permute.xlu0 %793  ;;  %v3096_v27 = vpop.permute.xlu2 %1993  ;;  %v777_v38 = vsel %vm743_vm9, %v1930_v60, %v3900_v59 }
 0x1ca   : > { %4005 = vst [vmem:[#allocation12_spill] sm:$0xff] %v3094_v18  ;;  %v1996_v34 = vunpack.i.h.bf16 %v3096_v27  ;;  %v3899_v14 = vunpack.i.l.bf16 %v3096_v27  ;;  %v3100_v22 = vpop.permute.xlu1 %1957  ;;  %v4014_v18 = vld [vmem:[#allocation25_spill] sm:$0xff]  ;;  %v2167_v17 = vpack.i.bf16 %v1954_v23, %v777_v38  ;;  %v776_v38 = vsel %vm743_vm9, %v1929_v30, %v1930_v60 }
 0x1cb   : > { %v4013_v20 = vunpack.i.l.bf16 %v3100_v22  ;;  %v1735_v52 = vunpack.i.h.bf16 %v4014_v18  ;;  %v4017_v28 = vunpack.i.l.bf16 %v4014_v18  ;;  %v1960_v60 = vunpack.i.h.bf16 %v3100_v22 }
 0x1cc   : > { %v3121_v21 = vsel %vm1066_vm14, %v3899_v14, %v1996_v34  ;;  %v3134_v14 = vsel %vm1066_vm14, %v1970_v46, %v1971_v19 }
 0x1cd   : > { %4012 = vst [vmem:[#allocation11_spill] sm:$0xff] %v3121_v21  ;;  %v785_v2 = vsel %vm743_vm9, %v1955_v55, %v4013_v20  ;;  %v487_v55 = vsel %vm484_vm15, %v4017_v28, %v1735_v52  ;;  %v4022_v21 = vunpack.i.h.bf16 %v2962_v29  ;;  %vm1283_vm15 = vcmask 719872  }
 0x1ce   : > { %v2147_v9 = vpack.i.bf16 %v517_v7, %v785_v2  ;;  %4015 = vst [vmem:[#allocation14_spill] sm:$0xff] %v3134_v14  ;;  %v3903_v7 = vunpack.i.h.bf16 %v3079_v10  ;;  %v2172_v18 = vpack.i.bf16 %v1735_v52, %v487_v55  ;;  %v1915_v2 = vunpack.i.h.bf16 %v3027_v3 }
 0x1cf   : > { %2158 = vrot.lane.b32.xlu2 %v2157_v37, %s2333_s15  ;;  %v2182_v37 = vpack.i.bf16 %v3981_v16, %v1940_v13  ;;  %v1905_v14 = vunpack.i.h.bf16 %v2929_v47  ;;  %v1919_v55 = vunpack.i.l.bf16 %v2962_v29  ;;  %v1894_v16 = vunpack.i.l.bf16 %v2991_v53 }
 0x1d0   : > { %2148 = vrot.lane.b32.xlu0 %v2147_v9, %s2333_s15  ;;  %2168 = vrot.lane.b32.xlu1 %v2167_v17, %s2333_s15  ;;  %v4020_v9 = vld [vmem:[#allocation32_spill] sm:$0xff] }
 0x1d1   : > { %v3138_v35 = vpop.permute.xlu0 %1983  ;;  %v3140_v59 = vpop.permute.xlu2 %2008  ;;  %v2162_v28 = vpack.i.bf16 %v776_v38, %v4020_v9  ;;  %v4021_v9 = vunpack.i.l.bf16 %v3021_v42 }
 0x1d2   : > { %4016 = vst [vmem:[#allocation13_spill] sm:$0xff] %v3138_v35  ;;  %v3901_v62 = vunpack.i.l.bf16 %v3138_v35  ;;  %v3147_v23 = vpop.permute.xlu1 %1963 }
 0x1d3   : > { %4018 = vst [vmem:[#allocation22_spill] sm:$0xff] %v3147_v23  ;;  %v3902_v39 = vunpack.i.h.bf16 %v3147_v23 }
 0x1d4   : > { %v3156_v17 = vsel %vm1066_vm14, %v3903_v7, %v3901_v62  ;;  %v1904_v62 = vunpack.i.l.bf16 %v2929_v47  ;;  %v769_v47 = vsel %vm743_vm9, %v1905_v14, %v4021_v9  ;;  %v3914_v7 = vunpack.i.l.bf16 %v3079_v10 }
 0x1d5   : > { %4019 = vst [vmem:[#allocation17_spill] sm:$0xff] %v3156_v17  ;;  %v3161_v20 = vsel %vm1066_vm14, %v3902_v39, %v1970_v46  ;;  %v1890_v46 = vunpack.i.h.bf16 %v2904_v6  ;;  %v772_v39 = vsel %vm743_vm9, %v1915_v2, %v1919_v55  ;;  %v773_v6 = vsel %vm743_vm9, %v1919_v55, %v4022_v21 }
 0x1d6   : > { %v768_v17 = vsel %vm743_vm9, %v1904_v62, %v1905_v14 }
 0x1d7   : > { %2173 = vrot.lane.b32.xlu2 %v2172_v18, %s2333_s15  ;;  %v2187_v42 = vpack.i.bf16 %v769_v47, %v768_v17  ;;  %v764_v9 = vsel %vm743_vm9, %v1890_v46, %v1894_v16  ;;  %v1935_v47 = vunpack.i.h.bf16 %v2993_v41 }
 0x1d8   : > { %2163 = vrot.lane.b32.xlu0 %v2162_v28, %s2333_s15  ;;  %2183 = vrot.lane.b32.xlu1 %v2182_v37, %s2333_s15  ;;  %v787_v37 = vsel %vm743_vm9, %v1960_v60, %v3061_v50  ;;  %v2177_v50 = vpack.i.bf16 %v773_v6, %v772_v39  ;;  %v4024_v39 = vunpack.i.h.bf16 %v2991_v53  ;;  %v4026_v53 = vpack.i.bf16 %v2973_v63, %v2966_v4 }
 0x1d9   : > { %v1999_v3 = vpop.permute.xlu0 %1998  ;;  %v3175_v13 = vpop.permute.xlu2 %2023  ;;  %v2197_v14 = vpack.i.bf16 %v764_v9, %v787_v37  ;;  %v4025_v37 = vunpack.i.l.bf16 %v3096_v27  ;;  %v4028_v9 = vunpack.i.h.bf16 %v2931_v61  ;;  %v4030_v63 = vunpack.i.h.bf16 %v3081_v12 }
 0x1da   : > { %v2000_v38 = vunpack.i.l.bf16 %v1999_v3  ;;  %v1974_v18 = vpop.permute.xlu1 %1973  ;;  %v1924_v12 = vunpack.i.l.bf16 %v3059_v32 }
 0x1db   : > { %v1976_v28 = vunpack.i.h.bf16 %v1974_v18  ;;  %v1975_v52 = vunpack.i.l.bf16 %v1974_v18 }
 0x1dc   : > { %v3190_v35 = vsel %vm1066_vm14, %v1996_v34, %v2000_v38  ;;  %v4023_v38 = vunpack.i.l.bf16 %v3100_v22  ;;  %v1950_v22 = vunpack.i.h.bf16 %v3023_v0 }
 0x1dd   : > { %v3196_v23 = vsel %vm1066_vm14, %v1976_v28, %v3914_v7  ;;  %v3199_v18 = vsel %vm1066_vm14, %v1971_v19, %v1975_v52  ;;  %v765_v52 = vsel %vm743_vm9, %v1894_v16, %v4024_v39  ;;  %v4027_v16 = vunpack.i.l.bf16 %v2993_v41 }
 0x1de   : > { %v786_v19 = vsel %vm743_vm9, %v4023_v38, %v1960_v60  ;;  %v2202_v28 = vpack.i.bf16 %v1915_v2, %v765_v52  ;;  %v1949_v60 = vunpack.i.l.bf16 %v3023_v0  ;;  %v3908_v41 = vunpack.i.l.bf16 %v3140_v59 }
 0x1df   : > { %2188 = vrot.lane.b32.xlu2 %v2187_v42, %s2333_s15  ;;  %v2192_v42 = vpack.i.bf16 %v786_v19, %v1929_v30  ;;  %v778_v30 = vsel %vm743_vm9, %v4027_v16, %v1935_v47  ;;  %v2001_v39 = vunpack.i.h.bf16 %v1999_v3  ;;  %v1939_v16 = vunpack.i.l.bf16 %v3071_v45 }
 0x1e0   : > { %2178 = vrot.lane.b32.xlu0 %v2177_v50, %s2333_s15  ;;  %2198 = vrot.lane.b32.xlu1 %v2197_v14, %s2333_s15  ;;  %v4029_v50 = vunpack.i.l.bf16 %v2931_v61  ;;  %v2026_v14 = vunpack.i.h.bf16 %v3175_v13  ;;  %v782_v19 = vsel %vm743_vm9, %v4030_v63, %v1949_v60  ;;  %v1925_v61 = vunpack.i.h.bf16 %v3059_v32 }
 0x1e1   : > { %v3204_v34 = vpop.permute.xlu0 %2013  ;;  %v3206_v21 = vpop.permute.xlu2 %2038  ;;  %v4032_v32 = vunpack.i.h.bf16 %v2962_v29  ;;  %v2025_v29 = vunpack.i.l.bf16 %v3175_v13 }
 0x1e2   : > { %v3208_v17 = vpop.permute.xlu1 %1988  ;;  %v757_v0 = vsel %vm743_vm9, %v4029_v50, %v4028_v9 }
 0x1e3   : > { %v3911_v55 = vunpack.i.h.bf16 %v3208_v17  ;;  %v774_v45 = vsel %vm743_vm9, %v4032_v32, %v1924_v12 }
 0x1e5   : > { %v3223_v6 = vsel %vm1066_vm14, %v3911_v55, %v4025_v37  ;;  %v783_v37 = vsel %vm743_vm9, %v1949_v60, %v1950_v22  ;;  %v2227_v22 = vpack.i.bf16 %v1890_v46, %v757_v0 }
 0x1e6   : > { %v2207_v60 = vpack.i.bf16 %v783_v37, %v782_v19  ;;  %v3913_v37 = vunpack.i.h.bf16 %v3204_v34 }
 0x1e7   : > { %2203 = vrot.lane.b32.xlu2 %v2202_v28, %s2333_s15 }
 0x1e8   : > { %2193 = vrot.lane.b32.xlu0 %v2192_v42, %s2333_s15  ;;  %2213 = vrot.lane.b32.xlu1 %v4026_v53, %s2333_s15  ;;  %v2217_v42 = vpack.i.bf16 %v778_v30, %v1904_v62  ;;  %v775_v30 = vsel %vm743_vm9, %v1924_v12, %v1925_v61 }
 0x1e9   : > { %v3233_v27 = vpop.permute.xlu0 %2028  ;;  %v3235_v2 = vpop.permute.xlu2 %2053 }
 0x1ea   : > { %v3917_v38 = vunpack.i.l.bf16 %v3233_v27  ;;  %v3247_v4 = vpop.permute.xlu1 %2003 }
 0x1eb   : > { %v3916_v52 = vunpack.i.h.bf16 %v3247_v4  ;;  %v3915_v28 = vunpack.i.l.bf16 %v3247_v4 }
 0x1ec   : > { %v3260_v53 = vsel %vm1066_vm14, %v2026_v14, %v3917_v38  ;;  %v779_v14 = vsel %vm743_vm9, %v1935_v47, %v1939_v16  ;;  %v2232_v16 = vpack.i.bf16 %v775_v30, %v774_v45  ;;  %v3921_v30 = vunpack.i.h.bf16 %v3235_v2 }
 0x1ed   : > { %v3267_v3 = vsel %vm1066_vm14, %v2001_v39, %v3915_v28  ;;  %v3274_v62 = vsel %vm1066_vm14, %v3916_v52, %v3908_v41  ;;  %v2222_v32 = vpack.i.bf16 %v2946_v48, %v779_v14  ;;  %v4036_v14 = vpack.i.bf16 %v3038_v40, %v3043_v24 }
 0x1ee   : > { %4031 = vst [vmem:[#allocation20_spill] sm:$0xff] %v3274_v62 }
 0x1ef   : > { %2218 = vrot.lane.b32.xlu2 %v2217_v42, %s2333_s15 }
 0x1f0   : > { %2208 = vrot.lane.b32.xlu0 %v2207_v60, %s2333_s15  ;;  %2228 = vrot.lane.b32.xlu1 %v2227_v22, %s2333_s15 }
 0x1f1   : > { %v3283_v9 = vpop.permute.xlu0 %2043  ;;  %v3285_v50 = vpop.permute.xlu2 %2068 }
 0x1f2   : > { %v2046_v46 = vunpack.i.h.bf16 %v3283_v9  ;;  %v3919_v0 = vunpack.i.l.bf16 %v3283_v9  ;;  %v2071_v63 = vunpack.i.h.bf16 %v3285_v50  ;;  %v3922_v19 = vunpack.i.l.bf16 %v3285_v50  ;;  %v2019_v39 = vpop.permute.xlu1 %2018 }
 0x1f3   : > { %v2021_v61 = vunpack.i.h.bf16 %v2019_v39  ;;  %v2020_v42 = vunpack.i.l.bf16 %v2019_v39 }
 0x1f4   : > { %v3297_v12 = vsel %vm1066_vm14, %v3922_v19, %v2071_v63  ;;  %v3302_v47 = vsel %vm1066_vm14, %v3919_v0, %v2046_v46 }
 0x1f5   : > { %4033 = vst [vmem:[#allocation15_spill] sm:$0xff] %v3302_v47  ;;  %v3307_v22 = vsel %vm1066_vm14, %v3913_v37, %v2020_v42  ;;  %v3310_v13 = vsel %vm1066_vm14, %v2021_v61, %v2025_v29  ;;  %v3313_v60 = vsel %vm1066_vm14, %v2020_v42, %v2021_v61  ;;  %v3918_v61 = vunpack.i.h.bf16 %v3233_v27 }
 0x1f6   : > { %4034 = vst [vmem:[#allocation21_spill] sm:$0xff] %v3313_v60 }
 0x1f7   : > { %2233 = vrot.lane.b32.xlu2 %v2232_v16, %s2333_s15  ;;  %v4037_v16 = vpack.i.bf16 %v2910_v43, %v2913_v51  ;;  %v4039_v51 = vunpack.i.h.bf16 %v2880_v36 }
 0x1f8   : > { %2223 = vrot.lane.b32.xlu0 %v2222_v32, %s2333_s15  ;;  %2243 = vrot.lane.b32.xlu1 %v3040_v8, %s2333_s15  ;;  %v4038_v32 = vpack.i.bf16 %v3007_v56, %v3004_v11  ;;  %v4040_v56 = vpack.i.bf16 %v2772_v5, %v2768_v57  ;;  %v4042_v57 = vpack.i.bf16 %v2800_v1, %v2892_v44 }
 0x1f9   : > { %v3320_v45 = vpop.permute.xlu0 %2058  ;;  %v3354_v41 = vpop.permute.xlu2 %2083  ;;  %v2272_v11 = vpack.i.bf16 %v4039_v51, %v2969_v31  ;;  %v4041_v31 = vpack.i.bf16 %v2936_v54, %v2941_v15  ;;  %v4043_v1 = vpack.i.bf16 %v2792_v58, %v2795_v33  ;;  %v4044_v58 = vld [vmem:[#allocation37_spill] sm:$0xff] }
 0x1fa   : > { %v3909_v39 = vunpack.i.l.bf16 %v3320_v45  ;;  %v3324_v29 = vpop.permute.xlu1 %2033  ;;  %v4045_v33 = vunpack.i.h.bf16 %v4044_v58 }
 0x1fb   : > { %v3910_v42 = vunpack.i.l.bf16 %v3324_v29 }
 0x1fc   : > { %v3333_v48 = vsel %vm1066_vm14, %v3921_v30, %v3909_v39 }
 0x1fd   : > { %v3340_v8 = vsel %vm1066_vm14, %v3918_v61, %v3910_v42 }
 0x1fe   : > { %4035 = vst [vmem:[#allocation16_spill] sm:$0xff] %v3340_v8 }
 0x1ff   : > { %2248 = vrot.lane.b32.xlu2 %v4036_v14, %s2333_s15 }
 0x200   : > { %2238 = vrot.lane.b32.xlu0 %v4037_v16, %s2333_s15  ;;  %2258 = vrot.lane.b32.xlu1 %v4038_v32, %s2333_s15 }
 0x201   : > { %v3356_v39 = vpop.permute.xlu0 %2073 }
 0x202   : > { %v2075_v42 = vunpack.i.l.bf16 %v3356_v39  ;;  %v3359_v55 = vpop.permute.xlu1 %2048 }
 0x203   : > { %v2050_v40 = vunpack.i.l.bf16 %v3359_v55 }
 0x204   : > { %v3363_v24 = vsel %vm1066_vm14, %v2071_v63, %v2075_v42  ;;  %v3380_v63 = vpop.permute.xlu2 %2098 }
 0x205   : > { %v3366_v43 = vsel %vm1066_vm14, %v2046_v46, %v2050_v40  ;;  %v2100_v32 = vunpack.i.l.bf16 %v3380_v63 }
 0x207   : > { %2263 = vrot.lane.b32.xlu2 %v4040_v56, %s2333_s15 }
 0x208   : > { %2253 = vrot.lane.b32.xlu0 %v2894_v49, %s2333_s15  ;;  %2273 = vrot.lane.b32.xlu1 %v2272_v11, %s2333_s15  ;;  %v3912_v49 = vunpack.i.l.bf16 %v3354_v41 }
 0x209   : > { %v3382_v46 = vpop.permute.xlu0 %2088 }
 0x20a   : > { %v3378_v14 = vpop.permute.xlu1 %2063 }
 0x20c   : > { %v3398_v16 = vpop.permute.xlu2 %2113 }
 0x20d   : > { %v2116_v52 = vunpack.i.h.bf16 %v3398_v16 }
 0x20f   : > { %2278 = vrot.lane.b32.xlu2 %v4041_v31, %s2333_s15 }
 0x210   : > { %2268 = vrot.lane.b32.xlu0 %v2978_v26, %s2333_s15  ;;  %2288 = vrot.lane.b32.xlu1 %v4042_v57, %s2333_s15  ;;  %v1839_v26 = vunpack.i.l.bf16 %v2880_v36 }
 0x211   : > { %v3405_v15 = vpop.permute.xlu0 %2103 }
 0x212   : > { %v3394_v5 = vpop.permute.xlu1 %2078  ;;  %v747_v57 = vsel %vm743_vm9, %v4045_v33, %v1839_v26  ;;  %v2105_v61 = vunpack.i.l.bf16 %v3405_v15  ;;  %v4046_v8 = vunpack.i.h.bf16 %v3405_v15 }
 0x213   : > { %v2081_v42 = vunpack.i.h.bf16 %v3394_v5  ;;  %v2080_v38 = vunpack.i.l.bf16 %v3394_v5  ;;  %v2055_v5 = vunpack.i.l.bf16 %v3235_v2 }
 0x214   : > { %v3421_v31 = vpop.permute.xlu2 %2128 }
 0x215   : > { %v3403_v54 = vsel %vm1066_vm14, %v2081_v42, %v3912_v49  ;;  %v2130_v49 = vunpack.i.l.bf16 %v3421_v31 }
 0x217   : > { %2293 = vrot.lane.b32.xlu2 %v4043_v1, %s2333_s15 }
 0x218   : > { %2283 = vrot.lane.b32.xlu0 %v2861_v25, %s2333_s15 }
 0x219   : > { %v3426_v25 = vpop.permute.xlu0 %2118 }
 0x21a   : > { %v2094_v44 = vpop.permute.xlu1 %2093  ;;  %v3925_v7 = vunpack.i.l.bf16 %v3426_v25 }
 0x21b   : > { %v2096_v40 = vunpack.i.h.bf16 %v2094_v44  ;;  %v2095_v51 = vunpack.i.l.bf16 %v2094_v44 }
 0x21d   : > { %v3416_v11 = vsel %vm1066_vm14, %v2096_v40, %v2100_v32  ;;  %v3419_v56 = vsel %vm1066_vm14, %v2095_v51, %v2096_v40  ;;  %v3923_v40 = vunpack.i.h.bf16 %v3421_v31 }
 0x21f   : > { %v1124_v28 = vsel %vm1066_vm14, %v2130_v49, %v3923_v40  ;;  %v2091_v40 = vunpack.i.h.bf16 %v3382_v46 }
 0x220   : > { %964 = vrot.lane.b32.xlu0 %v747_v57, %s2333_s15 }
 0x221   : > { %v3431_v1 = vpop.permute.xlu2 %2143  ;;  %v3433_v44 = vpop.permute.xlu0 %2133 }
 0x222   : > { %v3429_v36 = vpop.permute.xlu1 %2108  ;;  %v3924_v33 = vunpack.i.h.bf16 %v3433_v44  ;;  %v2135_v57 = vunpack.i.l.bf16 %v3433_v44  ;;  %v2145_v62 = vunpack.i.l.bf16 %v3431_v1 }
 0x229   : > { %v3453_v0 = vpop.permute.xlu2 %2158 }
 0x22a   : > { %v3435_v32 = vpop.permute.xlu1 %2123 }
 0x22b   : > { %v3920_v58 = vunpack.i.h.bf16 %v3435_v32  ;;  %v2125_v26 = vunpack.i.l.bf16 %v3435_v32 }
 0x22d   : > { %v1128_v37 = vsel %vm1066_vm14, %v2125_v26, %v3920_v58  ;;  %v1120_v58 = vsel %vm1066_vm14, %v2135_v57, %v3924_v33  ;;  %v1112_v33 = vsel %vm1066_vm14, %v2105_v61, %v4046_v8  ;;  %v2090_v8 = vunpack.i.l.bf16 %v3382_v46 }
 0x22e   : > { %1327 = vmatpush.msra.mxu2 %v1128_v37  ;;  %v2076_v46 = vunpack.i.h.bf16 %v3356_v39 }
 0x230   : > { %1328 = vmatpush.msra.mxu2 %v1124_v28  ;;  %v1116_v28 = vsel %vm1066_vm14, %v2116_v52, %v3925_v7 }
 0x232   : > { %v2139_v37 = vpop.permute.xlu1 %2138  ;;  %1329 = vmatpush.msra.mxu2 %v1120_v58  ;;  %v2115_v58 = vunpack.i.l.bf16 %v3398_v16  ;;  %v3479_v16 = vpop.permute.xlu2 %2173 }
 0x233   : > { %v2141_v30 = vunpack.i.h.bf16 %v2139_v37  ;;  %v2140_v19 = vunpack.i.l.bf16 %v2139_v37  ;;  %v2066_v37 = vunpack.i.h.bf16 %v3378_v14 }
 0x234   : > { %1330 = vmatpush.msra.mxu2 %v1116_v28  ;;  %v1108_v28 = vsel %vm1066_vm14, %v2091_v40, %v2095_v51  ;;  %v4048_v51 = vunpack.i.h.bf16 %v3235_v2  ;;  %v1103_v2 = vsel %vm1066_vm14, %v2076_v46, %v2080_v38  ;;  %v4054_v46 = vunpack.i.h.bf16 %v3079_v10 }
 0x235   : > { %v1127_v60 = vsel %vm1066_vm14, %v2140_v19, %v2125_v26  ;;  %v1123_v7 = vsel %vm1066_vm14, %v2141_v30, %v2130_v49  ;;  %v1119_v19 = vsel %vm1066_vm14, %v2145_v62, %v2135_v57  ;;  %v1104_v26 = vsel %vm1066_vm14, %v2080_v38, %v2081_v42 }
 0x236   : > { %1287 = vmatpush.msra.mxu0 %v1127_v60  ;;  %1331 = vmatpush.msra.mxu2 %v1112_v33  ;;  %v2101_v60 = vunpack.i.h.bf16 %v3380_v63  ;;  %v1115_v30 = vsel %vm1066_vm14, %v2115_v58, %v2116_v52  ;;  %v2041_v62 = vunpack.i.h.bf16 %v3206_v21  ;;  %v1096_v63 = vsel %vm1066_vm14, %v2055_v5, %v4048_v51 }
 0x237   : > { %v2065_v52 = vunpack.i.l.bf16 %v3378_v14  ;;  %v4049_v33 = vunpack.i.l.bf16 %v3283_v9  ;;  %v4050_v58 = vunpack.i.h.bf16 %v3233_v27  ;;  %v2040_v14 = vunpack.i.l.bf16 %v3206_v21 }
 0x238   : > { %1288 = vmatpush.msra.mxu0 %v1123_v7  ;;  %1332 = vmatpush.msra.mxu2 %v1108_v28  ;;  %v4047_v7 = vunpack.i.l.bf16 %v3285_v50  ;;  %v1111_v42 = vsel %vm1066_vm14, %v2101_v60, %v2105_v61  ;;  %v1107_v50 = vsel %vm1066_vm14, %v2090_v8, %v2091_v40  ;;  %v2051_v61 = vunpack.i.h.bf16 %v3359_v55 }
 0x239   : > { %v1092_v57 = vsel %vm1066_vm14, %v2041_v62, %v4049_v33  ;;  %v4051_v28 = vunpack.i.l.bf16 %v3233_v27  ;;  %v2146_v9 = vunpack.i.h.bf16 %v3431_v1  ;;  %v1990_v51 = vunpack.i.l.bf16 %v3208_v17 }
 0x23a   : > { %v3475_v47 = vpop.permute.xlu1 %2153  ;;  %1289 = vmatpush.msra.mxu0 %v1119_v19  ;;  %1333 = vmatpush.msra.mxu2 %v1104_v26  ;;  %v1100_v49 = vsel %vm1066_vm14, %v2066_v37, %v4047_v7  ;;  %v1099_v26 = vsel %vm1066_vm14, %v2065_v52, %v2066_v37  ;;  %v3514_v21 = vpop.permute.xlu2 %2188  ;;  %v1095_v60 = vsel %vm1066_vm14, %v2051_v61, %v2055_v5  ;;  %v4052_v37 = vunpack.i.h.bf16 %v3247_v4 }
 0x23b   : > { %v1088_v39 = vsel %vm1066_vm14, %v4051_v28, %v4050_v58  ;;  %v2156_v27 = vunpack.i.h.bf16 %v3475_v47  ;;  %v4053_v7 = vunpack.i.l.bf16 %v3247_v4  ;;  %v1091_v5 = vsel %vm1066_vm14, %v2040_v14, %v2041_v62  ;;  %v4057_v58 = vld [vmem:[#allocation22_spill] sm:$0xff] }
 0x23c   : > { %1290 = vmatpush.msra.mxu0 %v1115_v30  ;;  %1334 = vmatpush.msra.mxu2 %v1100_v49  ;;  %v2160_v30 = vunpack.i.l.bf16 %v3453_v0  ;;  %v2015_v49 = vunpack.i.l.bf16 %v3204_v34  ;;  %v4055_v52 = vunpack.i.l.bf16 %v3079_v10 }
 0x23e   : > { %1291 = vmatpush.msra.mxu0 %v1111_v42  ;;  %1335 = vmatpush.msra.mxu2 %v1096_v63  ;;  %v1168_v42 = vsel %vm1066_vm14, %v2156_v27, %v2160_v30  ;;  %v1072_v62 = vsel %vm1066_vm14, %v4055_v52, %v4054_v46 }
 0x240   : > { %1292 = vmatpush.msra.mxu0 %v1107_v50  ;;  %1336 = vmatpush.msra.mxu2 %v1092_v57 }
 0x242   : > { %v3504_v19 = vpop.permute.xlu0 %2148  ;;  %v3506_v40 = vpop.permute.xlu1 %2168  ;;  %1293 = vmatpush.msra.mxu0 %v1103_v2  ;;  %1337 = vmatpush.msra.mxu2 %v1088_v39 }
 0x243   : > { %v2150_v55 = vunpack.i.l.bf16 %v3504_v19  ;;  %v2171_v38 = vunpack.i.h.bf16 %v3506_v40  ;;  %v2170_v50 = vunpack.i.l.bf16 %v3506_v40  ;;  %v3562_v28 = vpop.permute.xlu2 %2203  ;;  %v2151_v14 = vunpack.i.h.bf16 %v3504_v19 }
 0x244   : > { %1294 = vmatpush.msra.mxu0 %v1099_v26  ;;  %1338 = vmatpush.msra.mxu2 %v3307_v22  ;;  %v1080_v22 = vsel %vm1066_vm14, %v4053_v7, %v4052_v37  ;;  %v2161_v7 = vunpack.i.h.bf16 %v3453_v0 }
 0x245   : > { %v1171_v8 = vsel %vm1066_vm14, %v2171_v38, %v2146_v9  ;;  %v1172_v1 = vsel %vm1066_vm14, %v2146_v9, %v2150_v55  ;;  %v2191_v9 = vunpack.i.h.bf16 %v3514_v21  ;;  %v2190_v38 = vunpack.i.l.bf16 %v3514_v21 }
 0x246   : > { %1295 = vmatpush.msra.mxu0 %v1095_v60  ;;  %1312 = vmatpush.msra.mxu1 %v1171_v8 }
 0x247   : > { %1339 = vmatpush.msra.mxu2 %v1080_v22  ;;  %1352 = vmatpush.msra.mxu3 %v1172_v1  ;;  %v2176_v22 = vunpack.i.h.bf16 %v3479_v16  ;;  %v1156_v52 = vsel %vm1066_vm14, %v2190_v38, %v2191_v9 }
 0x248   : > { %1296 = vmatpush.msra.mxu0 %v1091_v5 }
 0x249   : > { %1340 = vmatpush.msra.mxu2 %v3223_v6  ;;  %1353 = vmatpush.msra.mxu3 %v1168_v42  ;;  %v4056_v6 = vunpack.i.h.bf16 %v3204_v34  ;;  %v1965_v34 = vunpack.i.l.bf16 %v4057_v58 }
 0x24a   : > { %v3534_v63 = vpop.permute.xlu0 %2163  ;;  %v2184_v4 = vpop.permute.xlu1 %2183  ;;  %1297 = vmatpush.msra.mxu0 %v3260_v53  ;;  %v3550_v53 = vld [vmem:[%s3847_s2] sm:$0xff] }
 0x24b   : > { %v2166_v33 = vunpack.i.h.bf16 %v3534_v63  ;;  %v2185_v57 = vunpack.i.l.bf16 %v2184_v4  ;;  %1341 = vmatpush.msra.mxu2 %v1072_v62  ;;  %v1083_v61 = vsel %vm1066_vm14, %v2015_v49, %v4056_v6  ;;  %v2165_v8 = vunpack.i.l.bf16 %v3534_v63 }
 0x24c   : > { %1298 = vmatpush.msra.mxu0 %v1083_v61  ;;  %v2175_v49 = vunpack.i.l.bf16 %v3479_v16  ;;  %v2186_v42 = vunpack.i.h.bf16 %v2184_v4  ;;  %v2121_v62 = vunpack.i.h.bf16 %v3426_v25  ;;  %v3926_v6 = vunpack.i.l.bf16 %v3429_v36  ;;  %v3603_v4 = vpop.permute.xlu2 %2218 }
 0x24d   : > { %1342 = vmatpush.msra.mxu2 %v3161_v20  ;;  %v1167_v10 = vsel %vm1066_vm14, %v2185_v57, %v2156_v27  ;;  %v1164_v2 = vsel %vm1066_vm14, %v2166_v33, %v2170_v50  ;;  %v4058_v20 = vunpack.i.h.bf16 %v3208_v17  ;;  %v2155_v17 = vunpack.i.l.bf16 %v3475_v47 }
 0x24e   : > { %1343 = vmatmul.f32.vlgmr.msra.gmra.mxu2 %v3550_v53  ;;  %1299 = vmatpush.msra.mxu0 %v3267_v3  ;;  %v4059_v3 = vunpack.i.h.bf16 %v4057_v58  ;;  %v1126_v46 = vsel %vm1066_vm14, %v2161_v7, %v2165_v8  ;;  %v2111_v57 = vunpack.i.h.bf16 %v3429_v36  ;;  %v1122_v61 = vsel %vm1066_vm14, %v2175_v49, %v2176_v22 }
 0x24f   : > { %1313 = vmatpush.msra.mxu1 %v1167_v10  ;;  %1354 = vmatpush.msra.mxu3 %v1164_v2  ;;  %v1075_v39 = vsel %vm1066_vm14, %v1990_v51, %v4058_v20  ;;  %v1130_v47 = vsel %vm1066_vm14, %v2151_v14, %v2155_v17  ;;  %v2205_v51 = vunpack.i.l.bf16 %v3562_v28  ;;  %v1118_v20 = vsel %vm1066_vm14, %v2121_v62, %v2186_v42 }
 0x250   : > { %1300 = vmatpush.msra.mxu0 %v1075_v39  ;;  %v1067_v60 = vsel %vm1066_vm14, %v1965_v34, %v4059_v3  ;;  %v2206_v8 = vunpack.i.h.bf16 %v3562_v28  ;;  %v1114_v22 = vsel %vm1066_vm14, %v3926_v6, %v2111_v57  ;;  %v2061_v63 = vunpack.i.h.bf16 %v3320_v45 }
 0x251   : > { %v4066_v28 = vunpack.i.h.bf16 %v3435_v32  ;;  %v4070_v16 = vunpack.i.l.bf16 %v3429_v36  ;;  %v4074_v36 = vld [vmem:[#allocation21_spill] sm:$0xff] }
 0x252   : > { %v3570_v26 = vpop.permute.xlu0 %2178  ;;  %v3572_v27 = vpop.permute.xlu1 %2198  ;;  %1301 = vmatpush.msra.mxu0 %v3196_v23 }
 0x253   : > { %v2181_v1 = vunpack.i.h.bf16 %v3570_v26  ;;  %v2180_v37 = vunpack.i.l.bf16 %v3570_v26  ;;  %v2201_v23 = vunpack.i.h.bf16 %v3572_v27  ;;  %v2200_v2 = vunpack.i.l.bf16 %v3572_v27 }
 0x254   : > { %1302 = vmatpush.msra.mxu0 %v1067_v60  ;;  %v2086_v27 = vunpack.i.h.bf16 %v3354_v41 }
 0x255   : > { %1303 = vmatmul.f32.vlgmr.msra.gmra.mxu0 %v3550_v53  ;;  %v1160_v5 = vsel %vm1066_vm14, %v2180_v37, %v2181_v1  ;;  %v1152_v10 = vsel %vm1066_vm14, %v2201_v23, %v2205_v51 }
 0x256   : > { %1407 = vmatpush.msrb.mxu0 %v1130_v47  ;;  %1355 = vmatpush.msra.mxu3 %v1160_v5  ;;  %v2220_v47 = vunpack.i.l.bf16 %v3603_v4 }
 0x258   : > { %1408 = vmatpush.msrb.mxu0 %v1126_v46  ;;  %1356 = vmatpush.msra.mxu3 %v1156_v52  ;;  %v1159_v52 = vsel %vm1066_vm14, %v2206_v8, %v2180_v37 }
 0x25a   : > { %1409 = vmatpush.msrb.mxu0 %v1122_v61  ;;  %v3612_v58 = vpop.permute.xlu0 %2193  ;;  %v3614_v34 = vpop.permute.xlu1 %2213  ;;  %1357 = vmatpush.msra.mxu3 %v1152_v10  ;;  %v1155_v61 = vsel %vm1066_vm14, %v2220_v47, %v2190_v38  ;;  %v4061_v38 = vunpack.i.l.bf16 %v3320_v45  ;;  %v2011_v47 = vunpack.i.h.bf16 %v3140_v59  ;;  %v2221_v45 = vunpack.i.h.bf16 %v3603_v4 }
 0x25b   : > { %v2196_v39 = vunpack.i.h.bf16 %v3612_v58  ;;  %v2195_v3 = vunpack.i.l.bf16 %v3612_v58  ;;  %v2216_v60 = vunpack.i.h.bf16 %v3614_v34  ;;  %v2215_v17 = vunpack.i.l.bf16 %v3614_v34 }
 0x25c   : > { %1410 = vmatpush.msrb.mxu0 %v1118_v20  ;;  %v3649_v20 = vpop.permute.xlu2 %2233 }
 0x25d   : > { %v1163_v5 = vsel %vm1066_vm14, %v2195_v3, %v2166_v33  ;;  %v1148_v42 = vsel %vm1066_vm14, %v2215_v17, %v2216_v60  ;;  %v1174_v46 = vsel %vm1066_vm14, %v2196_v39, %v2200_v2  ;;  %v4060_v33 = vunpack.i.l.bf16 %v3354_v41 }
 0x25e   : > { %1411 = vmatpush.msrb.mxu0 %v1114_v22  ;;  %1314 = vmatpush.msra.mxu1 %v1163_v5  ;;  %v2036_v41 = vunpack.i.h.bf16 %v3324_v29 }
 0x25f   : > { %1358 = vmatpush.msra.mxu3 %v1148_v42  ;;  %1432 = vmatpush.msrb.mxu2 %v1174_v46  ;;  %v1106_v57 = vsel %vm1066_vm14, %v4060_v33, %v2086_v27  ;;  %v1098_v27 = vsel %vm1066_vm14, %v4061_v38, %v2061_v63 }
 0x260   : > { %1412 = vmatpush.msrb.mxu0 %v3416_v11  ;;  %1315 = vmatpush.msra.mxu1 %v1159_v52 }
 0x262   : > { %1413 = vmatpush.msrb.mxu0 %v1106_v57  ;;  %v3645_v10 = vpop.permute.xlu0 %2208  ;;  %v3647_v2 = vpop.permute.xlu1 %2228  ;;  %1316 = vmatpush.msra.mxu1 %v1155_v61  ;;  %v4063_v57 = vld [vmem:[#allocation13_spill] sm:$0xff]  ;;  %v2236_v61 = vunpack.i.h.bf16 %v3649_v20 }
 0x263   : > { %v2211_v37 = vunpack.i.h.bf16 %v3645_v10  ;;  %v2210_v11 = vunpack.i.l.bf16 %v3645_v10  ;;  %v2231_v3 = vunpack.i.h.bf16 %v3647_v2  ;;  %v2230_v46 = vunpack.i.l.bf16 %v3647_v2 }
 0x264   : > { %1414 = vmatpush.msrb.mxu0 %v3363_v24  ;;  %v4062_v24 = vunpack.i.l.bf16 %v3324_v29  ;;  %v2235_v29 = vunpack.i.l.bf16 %v3649_v20 }
 0x265   : > { %v1151_v8 = vsel %vm1066_vm14, %v2231_v3, %v2201_v23  ;;  %v1170_v22 = vsel %vm1066_vm14, %v2210_v11, %v2211_v37  ;;  %v3677_v37 = vpop.permute.xlu2 %2248  ;;  %v4064_v3 = vunpack.i.l.bf16 %v3140_v59 }
 0x266   : > { %1415 = vmatpush.msrb.mxu0 %v1098_v27  ;;  %1317 = vmatpush.msra.mxu1 %v1151_v8  ;;  %v1090_v5 = vsel %vm1066_vm14, %v4062_v24, %v2036_v41  ;;  %v2250_v59 = vunpack.i.l.bf16 %v3677_v37 }
 0x267   : > { %1433 = vmatpush.msrb.mxu2 %v1170_v22  ;;  %v1082_v41 = vsel %vm1066_vm14, %v4064_v3, %v2011_v47 }
 0x268   : > { %1416 = vmatpush.msrb.mxu0 %v3366_v43  ;;  %v1986_v43 = vunpack.i.h.bf16 %v4063_v57 }
 0x26a   : > { %1417 = vmatpush.msrb.mxu0 %v1090_v5  ;;  %v2224_v42 = vpop.permute.xlu0 %2223  ;;  %v3669_v23 = vpop.permute.xlu1 %2243 }
 0x26b   : > { %v2226_v52 = vunpack.i.h.bf16 %v2224_v42  ;;  %v2225_v63 = vunpack.i.l.bf16 %v2224_v42  ;;  %v2245_v33 = vunpack.i.l.bf16 %v3669_v23  ;;  %v2246_v22 = vunpack.i.h.bf16 %v3669_v23 }
 0x26c   : > { %1418 = vmatpush.msrb.mxu0 %v3310_v13  ;;  %v1162_v13 = vsel %vm1066_vm14, %v2235_v29, %v2236_v61 }
 0x26d   : > { %v1147_v38 = vsel %vm1066_vm14, %v2245_v33, %v2215_v17  ;;  %v1144_v27 = vsel %vm1066_vm14, %v2226_v52, %v2230_v46  ;;  %v1166_v8 = vsel %vm1066_vm14, %v2221_v45, %v2225_v63  ;;  %v4065_v17 = vunpack.i.l.bf16 %v4063_v57  ;;  %v3715_v3 = vpop.permute.xlu2 %2263 }
 0x26e   : > { %1419 = vmatpush.msrb.mxu0 %v1082_v41  ;;  %1318 = vmatpush.msra.mxu1 %v1147_v38  ;;  %v1158_v42 = vsel %vm1066_vm14, %v2246_v22, %v2250_v59  ;;  %v2251_v41 = vunpack.i.h.bf16 %v3677_v37  ;;  %v3731_v37 = vld [vmem:[%s3847_s2 + $0x8] sm:$0xff] }
 0x26f   : > { %1359 = vmatpush.msra.mxu3 %v1144_v27  ;;  %1434 = vmatpush.msrb.mxu2 %v1166_v8  ;;  %v1074_v47 = vsel %vm1066_vm14, %v4065_v17, %v1986_v43  ;;  %v2266_v27 = vunpack.i.h.bf16 %v3715_v3 }
 0x270   : > { %1420 = vmatpush.msrb.mxu0 %v3190_v35 }
 0x271   : > { %1435 = vmatpush.msrb.mxu2 %v1162_v13 }
 0x272   : > { %1421 = vmatpush.msrb.mxu0 %v1074_v47  ;;  %v3698_v24 = vpop.permute.xlu0 %2238  ;;  %v3700_v5 = vpop.permute.xlu1 %2258 }
 0x273   : > { %v2241_v35 = vunpack.i.h.bf16 %v3698_v24  ;;  %v2240_v63 = vunpack.i.l.bf16 %v3698_v24  ;;  %v2261_v33 = vunpack.i.h.bf16 %v3700_v5  ;;  %v2260_v61 = vunpack.i.l.bf16 %v3700_v5  ;;  %1436 = vmatpush.msrb.mxu2 %v1158_v42 }
 0x274   : > { %1422 = vmatpush.msrb.mxu0 %v3199_v18  ;;  %v2265_v18 = vunpack.i.l.bf16 %v3715_v3  ;;  %v4077_v3 = vld [vmem:[#allocation17_spill] sm:$0xff] }
 0x275   : > { %1423 = vmatmul.f32.vlgmr.msrb.gmra.mxu0 %v3550_v53  ;;  %v1140_v57 = vsel %vm1066_vm14, %v2240_v63, %v2241_v35  ;;  %v1154_v43 = vsel %vm1066_vm14, %v2260_v61, %v2261_v33  ;;  %v2279_v42 = vpop.permute.xlu2 %2278 }
 0x276   : > { %1360 = vmatpush.msra.mxu3 %v1140_v57  ;;  %1437 = vmatpush.msrb.mxu2 %v1154_v43  ;;  %v1132_v5 = vsel %vm1066_vm14, %v2265_v18, %v2266_v27  ;;  %v1169_v57 = vsel %vm1066_vm14, %v2160_v30, %v2210_v11  ;;  %v2280_v6 = vunpack.i.l.bf16 %v2279_v42  ;;  %v1161_v30 = vsel %vm1066_vm14, %v2181_v1, %v2235_v29 }
 0x277   : > { %v1153_v29 = vsel %vm1066_vm14, %v2205_v51, %v2260_v61  ;;  %v1129_v51 = vsel %vm1066_vm14, %v4066_v28, %v2151_v14 }
 0x278   : > { %v1145_v34 = vsel %vm1066_vm14, %v2230_v46, %v2280_v6 }
 0x27a   : > { %v3718_v38 = vpop.permute.xlu0 %2253  ;;  %v2274_v47 = vpop.permute.xlu1 %2273 }
 0x27b   : > { %v2256_v8 = vunpack.i.h.bf16 %v3718_v38  ;;  %v2255_v59 = vunpack.i.l.bf16 %v3718_v38  ;;  %v2276_v43 = vunpack.i.h.bf16 %v2274_v47 }
 0x27d   : > { %v1143_v13 = vsel %vm1066_vm14, %v2256_v8, %v2226_v52  ;;  %v1136_v17 = vsel %vm1066_vm14, %v2251_v41, %v2255_v59  ;;  %v1173_v52 = vsel %vm1066_vm14, %v2150_v55, %v2196_v39  ;;  %v2275_v8 = vunpack.i.l.bf16 %v2274_v47  ;;  %v2294_v11 = vpop.permute.xlu2 %2293 }
 0x27e   : > { %1319 = vmatpush.msra.mxu1 %v1143_v13  ;;  %1361 = vmatpush.msra.mxu3 %v1136_v17  ;;  %v1165_v55 = vsel %vm1066_vm14, %v2170_v50, %v2221_v45  ;;  %v1135_v10 = vsel %vm1066_vm14, %v2276_v43, %v2251_v41  ;;  %v1157_v50 = vsel %vm1066_vm14, %v2191_v9, %v2246_v22  ;;  %v2295_v22 = vunpack.i.l.bf16 %v2294_v11 }
 0x27f   : > { %v2296_v61 = vunpack.i.h.bf16 %v2294_v11  ;;  %v4067_v41 = vunpack.i.h.bf16 %v3421_v31 }
 0x280   : > { %1362 = vmatpush.msra.mxu3 %v1132_v5  ;;  %v2281_v5 = vunpack.i.h.bf16 %v2279_v42 }
 0x281   : > { %1547 = vmatmul.msk.f32.vlgmr.msra.gmra.mxu3 %vm1283_vm15, %v3731_v37  ;;  %v1125_v19 = vsel %vm1066_vm14, %v4067_v41, %v2161_v7  ;;  %v4069_v7 = vunpack.i.l.bf16 %v3426_v25  ;;  %v4072_v25 = vld [vmem:[#allocation15_spill] sm:$0xff] }
 0x282   : > { %1392 = vmatpush.msrb.mxu3 %v1173_v52  ;;  %v2269_v33 = vpop.permute.xlu0 %2268  ;;  %v2289_v4 = vpop.permute.xlu1 %2288  ;;  %v1146_v40 = vsel %vm1066_vm14, %v2280_v6, %v2281_v5  ;;  %v4068_v6 = vunpack.i.h.bf16 %v3433_v44  ;;  %v1133_v44 = vsel %vm1066_vm14, %v2266_v27, %v2296_v61 }
 0x283   : > { %v2271_v13 = vunpack.i.h.bf16 %v2269_v33  ;;  %v2270_v17 = vunpack.i.l.bf16 %v2269_v33  ;;  %v2290_v26 = vunpack.i.l.bf16 %v2289_v4  ;;  %v1117_v46 = vsel %vm1066_vm14, %v4069_v7, %v2121_v62  ;;  %v4073_v62 = vld [vmem:[#allocation16_spill] sm:$0xff] }
 0x284   : > { %1393 = vmatpush.msrb.mxu3 %v1169_v57  ;;  %v1121_v2 = vsel %vm1066_vm14, %v4068_v6, %v2175_v49  ;;  %v4071_v49 = vunpack.i.h.bf16 %v3405_v15  ;;  %v4075_v15 = vld [vmem:[#allocation20_spill] sm:$0xff] }
 0x285   : > { %v1139_v58 = vsel %vm1066_vm14, %v2270_v17, %v2240_v63  ;;  %v1150_v39 = vsel %vm1066_vm14, %v2271_v13, %v2275_v8  ;;  %v2291_v63 = vunpack.i.h.bf16 %v2289_v4  ;;  %v1149_v23 = vsel %vm1066_vm14, %v2216_v60, %v2271_v13 }
 0x286   : > { %1394 = vmatpush.msrb.mxu3 %v1165_v55  ;;  %1320 = vmatpush.msra.mxu1 %v1139_v58  ;;  %v1113_v24 = vsel %vm1066_vm14, %v4071_v49, %v4070_v16 }
 0x287   : > { %1438 = vmatpush.msrb.mxu2 %v1150_v39  ;;  %v1138_v60 = vsel %vm1066_vm14, %v2291_v63, %v2295_v22  ;;  %v1137_v0 = vsel %vm1066_vm14, %v2255_v59, %v2291_v63  ;;  %v4081_v59 = vld [vmem:[#allocation12_spill] sm:$0xff] }
 0x288   : > { %1395 = vmatpush.msrb.mxu3 %v1161_v30  ;;  %1321 = vmatpush.msra.mxu1 %v1135_v10 }
 0x289   : > { %1439 = vmatpush.msrb.mxu2 %v1146_v40 }
 0x28a   : > { %1396 = vmatpush.msrb.mxu3 %v1157_v50  ;;  %v2284_v20 = vpop.permute.xlu0 %2283 }
 0x28b   : > { %v2286_v45 = vunpack.i.h.bf16 %v2284_v20  ;;  %v2285_v1 = vunpack.i.l.bf16 %v2284_v20 }
 0x28c   : > { %1397 = vmatpush.msrb.mxu3 %v1153_v29 }
 0x28d   : > { %v1131_v21 = vsel %vm1066_vm14, %v2285_v1, %v2265_v18  ;;  %v1142_v9 = vsel %vm1066_vm14, %v2286_v45, %v2290_v26  ;;  %v1141_v32 = vsel %vm1066_vm14, %v2241_v35, %v2286_v45  ;;  %v4076_v35 = vld [vmem:[#allocation11_spill] sm:$0xff] }
 0x28e   : > { %1398 = vmatpush.msrb.mxu3 %v1149_v23  ;;  %1322 = vmatpush.msra.mxu1 %v1131_v21 }
 0x28f   : > { %1440 = vmatpush.msrb.mxu2 %v1142_v9  ;;  %1546 = vmatmul.msk.f32.vlgmr.msra.gmra.mxu1 %vm1283_vm15, %v3731_v37 }
 0x290   : > { %1367 = vmatpush.msrb.mxu1 %v1129_v51  ;;  %1399 = vmatpush.msrb.mxu3 %v1145_v34 }
 0x291   : > { %1441 = vmatpush.msrb.mxu2 %v1138_v60 }
 0x292   : > { %1368 = vmatpush.msrb.mxu1 %v1125_v19  ;;  %1400 = vmatpush.msrb.mxu3 %v1141_v32  ;;  %v965_v14 = vpop.permute.xlu0 %964 }
 0x293   : > { %v1134_v31 = vsel %vm1066_vm14, %v2296_v61, %v965_v14 }
 0x294   : > { %1369 = vmatpush.msrb.mxu1 %v1121_v2  ;;  %1401 = vmatpush.msrb.mxu3 %v1137_v0 }
 0x295   : > { %1442 = vmatpush.msrb.mxu2 %v1134_v31 }
 0x296   : > { %1370 = vmatpush.msrb.mxu1 %v1117_v46  ;;  %1402 = vmatpush.msrb.mxu3 %v1133_v44 }
 0x297   : > { %1549 = vmatmul.msk.f32.vlgmr.msrb.gmra.mxu2 %vm1283_vm15, %v3731_v37  ;;  %1548 = vmatmul.msk.f32.vlgmr.msrb.gmra.mxu3 %vm1283_vm15, %v3731_v37 }
 0x298   : > { %1371 = vmatpush.msrb.mxu1 %v1113_v24 }
 0x29a   : > { %1372 = vmatpush.msrb.mxu1 %v3419_v56  ;;  %v4078_v56 = vld [vmem:[#allocation14_spill] sm:$0xff] }
 0x29c   : > { %1373 = vmatpush.msrb.mxu1 %v3403_v54 }
 0x29e   : > { %1374 = vmatpush.msrb.mxu1 %v3297_v12  ;;  %v4079_v12 = vld [vmem:[#allocation9_spill] sm:$0xff] }
 0x29f   : > { %v1447_v54 = vrot.slane %v4079_v12, 1 }
 0x2a0   : > { %1375 = vmatpush.msrb.mxu1 %v3333_v48  ;;  %v4080_v48 = vmov 0  }
 0x2a1   : > { %vm1448_vm0 = vcmp.ne.s32.totalorder %v1447_v54, 0 }
 0x2a2   : > { %1376 = vmatpush.msrb.mxu1 %v4072_v25  ;;  %v1449_v38 = vsel %vm1448_vm0, 1, %v4080_v48 }
 0x2a3   : > { %v1451_v18 = vperm.slane %v1449_v38, 1  ;;  %v1450_v57 = vperm.slane %v1449_v38, 0  ;;  %v1453_v5 = vperm.slane %v1449_v38, 3  ;;  %v1452_v10 = vperm.slane %v1449_v38, 2 }
 0x2a4   : > { %1377 = vmatpush.msrb.mxu1 %v4073_v62 }
 0x2a5   : > { %vm1455_vm1 = vcmp.eq.s32.totalorder %v1451_v18, 1  ;;  %vm1454_vm2 = vcmp.eq.s32.totalorder %v1450_v57, 1  ;;  %vm1457_vm3 = vcmp.eq.s32.totalorder %v1453_v5, 1  ;;  %vm1456_vm4 = vcmp.eq.s32.totalorder %v1452_v10, 1 }
 0x2a6   : > { %1378 = vmatpush.msrb.mxu1 %v4074_v36 }
 0x2a8   : > { %1379 = vmatpush.msrb.mxu1 %v4075_v15 }
 0x2aa   : > { %1380 = vmatpush.msrb.mxu1 %v4076_v35 }
 0x2ac   : > { %1381 = vmatpush.msrb.mxu1 %v4077_v3 }
 0x2ae   : > { %1382 = vmatpush.msrb.mxu1 %v4078_v56 }
 0x2af   : > { %1383 = vmatmul.f32.vlgmr.msrb.gmra.mxu1 %v3550_v53 }
 0x2d1   : > { %v1344_v27 = vpop.f32.mrf.mxu2 }
 0x2d2   : > { %v1345_v47 = vadd.f32 %v1344_v27, %v4081_v59  ;;  %v1304_v33 = vpop.f32.mrf.mxu0 }
 0x2d3   : > { %v1305_v53 = vadd.f32 %v1304_v33, %v4081_v59 }
 0x2f2   : > { %v1424_v17 = vpop.f32.mrf.mxu0 }
 0x2f3   : > { %v1425_v55 = vadd.f32 %v1424_v17, %v4081_v59 }
 0x304   : > { %v1364_v37 = vpop.f32.mrf.mxu3 }
 0x305   : > { %v1365_v42 = vadd.f32 %v1364_v37, %v1345_v47 }
 0x307   : > { %v1459_v52 = vsel %vm1455_vm1, %v1365_v42, 0.0 }
 0x308   : > { %1463 = vst [vmem:[%s2383_s10 + $0x8] sm:$0xff] %v1459_v52 }
 0x30c   : > { %v1324_v43 = vpop.f32.mrf.mxu1 }
 0x30d   : > { %v1325_v8 = vadd.f32 %v1324_v43, %v1305_v53 }
 0x30f   : > { %v1458_v13 = vsel %vm1454_vm2, %v1325_v8, 0.0 }
 0x310   : > { %1462 = vst [vmem:[%s2383_s10] sm:$0xff] %v1458_v13 }
 0x31a   : > { %v1444_v58 = vpop.f32.mrf.mxu2  ;;  %v1404_v40 = vpop.f32.mrf.mxu3 }
 0x31b   : > { %v1445_v39 = vadd.f32 %v1444_v58, %v1425_v55 }
 0x31d   : > { %v1461_v30 = vsel %vm1457_vm3, %v1445_v39, 0.0 }
 0x31e   : > { %1465 = vst [vmem:[%s2383_s10 + $0x18] sm:$0xff] %v1461_v30 }
 0x32c   : > { %v1384_v4 = vpop.f32.mrf.mxu1 }
 0x32d   : > { %v1385_v50 = vadd.f32 %v1384_v4, %v4081_v59 }
 0x32f   : > { %v1405_v20 = vadd.f32 %v1404_v40, %v1385_v50 }
 0x331   : > { %v1460_v11 = vsel %vm1456_vm4, %v1405_v20, 0.0 }
 0x332   : > { %1464 = vst [vmem:[%s2383_s10 + $0x10] sm:$0xff] %v1460_v11 }
 0x333 PF: > { %s16_s21 = sadd.s32 1, %s2307_s21  }
 0x334   : > { %p13_p4 = scmp.ge.s32.totalorder %s16_s21, 6  }
 0x336   :  { %15 = sbr.rel (!%p13_p4) target bundleno = 1 (0x1), region = 124 }
 0x33b   :  { %1491 = vsyncmov [#allocation4] }
 0x33e   :  { %s1492_s20 = vpop.sfrf %1491 }
 0x33f   :  { %p1552_p5 = scmp.ne.s32.totalorder %s1492_s20, 0 }
 0x341   :  { %1496 = shalt.err (%p1552_p5)  }
 0x342   :  { %1498 = vsyncmov [#allocation4 + $0x1] }
 0x345   :  { %s1499_s22 = vpop.sfrf %1498 }
 0x346   :  { %p1553_p6 = scmp.ne.s32.totalorder %s1499_s22, 0 }
 0x348   :  { %1503 = shalt.err (%p1553_p6)  }

</bundles_post_ra>
